<compile_context>
chip_gen: v6e
topology: v6e:2x2x1
jax: 0.10.0
libtpu: 0.0.40
codegen_flags: <defaults>
</compile_context>

<pallas_src>
import jax
import jax.numpy as jnp
from jax import lax
from jax.experimental import pallas as pl
from jax.experimental.pallas import tpu as pltpu

HIDDEN_SIZE = 250
NUM_LAYERS = 6
INPUT_SIZE = 2
OUTPUT_SIZE = 1

H_PAD = 256                 # hidden padded to a lane-aligned 2*128 slab
GATE_PAD = 4 * H_PAD        # 1024 gate columns (i | f | g | o, each 256 wide)
O_PAD = 128                 # fc output padded to one full lane group


# ------------------------- Fused 6-layer LSTM + FC kernel ---------------------
def _fused_lstm_kernel(x_ref, w_ref, b_ref, wfc_ref, bfc_ref, out_ref, h_scr, c_scr):
    # x_ref:   (T, B, H_PAD)          layer-0 input, zero-padded to H_PAD lanes
    # w_ref:   (L, 2*H_PAD, GATE_PAD) stacked [W_ih; W_hh] per layer (zero padded)
    # b_ref:   (L, 1, GATE_PAD)       combined bias (b_ih + b_hh), gate-padded
    # wfc_ref: (H_PAD, O_PAD)         fc weight (only rows :250 / column 0 are real)
    # bfc_ref: (1, O_PAD)             fc bias
    # out_ref: (T, B, O_PAD)          fc output per timestep
    # h_scr/c_scr: (L, B, H_PAD)      persistent per-layer LSTM state
    t_steps = x_ref.shape[0]
    num_layers = h_scr.shape[0]

    h_scr[...] = jnp.zeros_like(h_scr)
    c_scr[...] = jnp.zeros_like(c_scr)

    def timestep(t, carry):
        layer_in = x_ref[t]                                    # (B, H_PAD)
        for l in range(num_layers):                            # static unroll
            h_prev = h_scr[l]                                  # (B, H_PAD)
            c_prev = c_scr[l]                                  # (B, H_PAD)

            # One fused matmul per cell: [x_t, h_prev] @ [W_ih; W_hh]
            xh = jnp.concatenate([layer_in, h_prev], axis=-1)  # (B, 2*H_PAD)
            gates = (
                jnp.dot(xh, w_ref[l], preferred_element_type=jnp.float32)
                + b_ref[l]
            )                                                  # (B, GATE_PAD)

            # Lane-aligned (256-wide) gate slices -> free views. Order: i, f, g, o.
            i_g = jax.nn.sigmoid(gates[:, 0 * H_PAD:1 * H_PAD])
            f_g = jax.nn.sigmoid(gates[:, 1 * H_PAD:2 * H_PAD])
            g_g = jnp.tanh(gates[:, 2 * H_PAD:3 * H_PAD])
            o_g = jax.nn.sigmoid(gates[:, 3 * H_PAD:4 * H_PAD])

            c_new = f_g * c_prev + i_g * g_g
            h_new = o_g * jnp.tanh(c_new)

            c_scr[l] = c_new
            h_scr[l] = h_new
            layer_in = h_new

        # Fused final Linear(250 -> 1), padded to 128 output lanes (lane-dense store).
        out_ref[t] = (
            jnp.dot(layer_in, wfc_ref[...], preferred_element_type=jnp.float32)
            + bfc_ref[...]
        )
        return carry

    lax.fori_loop(0, t_steps, timestep, 0)


def _fused_lstm_fc(x_pad, w, b, w_fc, b_fc):
    """x_pad: (T, B, H_PAD) -> (T, B, O_PAD)."""
    T, B, _ = x_pad.shape
    L = w.shape[0]
    return pl.pallas_call(
        _fused_lstm_kernel,
        out_shape=jax.ShapeDtypeStruct((T, B, O_PAD), jnp.float32),
        # No grid: weights, biases, x and out are whole-array VMEM operands
        # (single-buffered, no per-step DMA / pipelining overhead).
        scratch_shapes=[
            pltpu.VMEM((L, B, H_PAD), jnp.float32),   # h state per layer
            pltpu.VMEM((L, B, H_PAD), jnp.float32),   # c state per layer
        ],
        compiler_params=pltpu.CompilerParams(
            vmem_limit_bytes=32 * 1024 * 1024,        # ~14 MB used; safe on v5e/v6e/v7x
        ),
    )(x_pad, w, b, w_fc, b_fc)


# ------------------------- Parameter init (PyTorch layout) --------------------
def init_params(key):
    params = {"lstm": [], "fc": {}}
    k = 1.0 / jnp.sqrt(HIDDEN_SIZE)
    for layer in range(NUM_LAYERS):
        in_dim = INPUT_SIZE if layer == 0 else HIDDEN_SIZE
        key, k1, k2, k3, k4 = jax.random.split(key, 5)
        params["lstm"].append({
            "w_ih": jax.random.uniform(k1, (4 * HIDDEN_SIZE, in_dim), jnp.float32, -k, k),
            "w_hh": jax.random.uniform(k2, (4 * HIDDEN_SIZE, HIDDEN_SIZE), jnp.float32, -k, k),
            "b_ih": jax.random.uniform(k3, (4 * HIDDEN_SIZE,), jnp.float32, -k, k),
            "b_hh": jax.random.uniform(k4, (4 * HIDDEN_SIZE,), jnp.float32, -k, k),
        })
    key, k1, k2 = jax.random.split(key, 3)
    params["fc"] = {
        "w": jax.random.uniform(k1, (OUTPUT_SIZE, HIDDEN_SIZE), jnp.float32, -k, k),
        "b": jax.random.uniform(k2, (OUTPUT_SIZE,), jnp.float32, -k, k),
    }
    return params


# ------------------------- Pack params into kernel layout ---------------------
def _pad_gate_cols(w_t):
    """(in_dim, 4*H) -> (in_dim, GATE_PAD): each 250-wide gate block padded to 256."""
    blocks = jnp.split(w_t, 4, axis=1)
    return jnp.concatenate(
        [jnp.pad(blk, ((0, 0), (0, H_PAD - HIDDEN_SIZE))) for blk in blocks], axis=1)


def _pad_gate_vec(v):
    """(4*H,) -> (GATE_PAD,)."""
    blocks = jnp.split(v, 4)
    return jnp.concatenate(
        [jnp.pad(blk, (0, H_PAD - HIDDEN_SIZE)) for blk in blocks])


def pack_params(params):
    w_list, b_list = [], []
    for lp in params["lstm"]:
        w_ih, w_hh = lp["w_ih"], lp["w_hh"]          # (4H, in_dim), (4H, H)
        in_dim = w_ih.shape[1]
        top = jnp.zeros((H_PAD, GATE_PAD), jnp.float32).at[:in_dim].set(
            _pad_gate_cols(w_ih.T))
        bot = jnp.zeros((H_PAD, GATE_PAD), jnp.float32).at[:HIDDEN_SIZE].set(
            _pad_gate_cols(w_hh.T))
        w_list.append(jnp.concatenate([top, bot], axis=0))          # (2*H_PAD, GATE_PAD)
        b_list.append(
            _pad_gate_vec(lp["b_ih"] + lp["b_hh"]).reshape(1, GATE_PAD))

    w_fc = params["fc"]["w"]                                        # (O, H)
    b_fc = params["fc"]["b"]                                        # (O,)
    wfc = jnp.zeros((H_PAD, O_PAD), jnp.float32).at[:HIDDEN_SIZE, :OUTPUT_SIZE].set(w_fc.T)
    bfc = jnp.zeros((1, O_PAD), jnp.float32).at[0, :OUTPUT_SIZE].set(b_fc)

    return {
        "w": jnp.stack(w_list),      # (L, 2*H_PAD, GATE_PAD)
        "b": jnp.stack(b_list),      # (L, 1, GATE_PAD)
        "w_fc": wfc,                 # (H_PAD, O_PAD)
        "b_fc": bfc,                 # (1, O_PAD)
    }


# ------------------------- Forward (matches PyTorch LSTMModel.forward) --------
@jax.jit
def lstm_model_forward(packed, x_btd):
    """x_btd: (B, T, input_size) -> (B, T, 1)."""
    B, T, D = x_btd.shape
    x_tbd = jnp.transpose(x_btd, (1, 0, 2)).astype(jnp.float32)          # (T, B, D)
    x_pad = jnp.zeros((T, B, H_PAD), jnp.float32).at[:, :, :D].set(x_tbd)
    out_pad = _fused_lstm_fc(x_pad, packed["w"], packed["b"],
                             packed["w_fc"], packed["b_fc"])             # (T, B, O_PAD)
    out = out_pad[:, :, :OUTPUT_SIZE]                                    # (T, B, 1)
    return jnp.transpose(out, (1, 0, 2))                                 # (B, T, 1)


# ------------------------- Pure-JAX reference for verification ----------------
def _reference_forward(params, x_btd):
    h_seq = x_btd.astype(jnp.float32)                                    # (B, T, D)
    B = h_seq.shape[0]
    for lp in params["lstm"]:
        w_ih, w_hh = lp["w_ih"], lp["w_hh"]
        bias = lp["b_ih"] + lp["b_hh"]

        def step(carry, x_t, w_ih=w_ih, w_hh=w_hh, bias=bias):
            h, c = carry
            gates = x_t @ w_ih.T + h @ w_hh.T + bias
            i, f, g, o = jnp.split(gates, 4, axis=-1)
            c = jax.nn.sigmoid(f) * c + jax.nn.sigmoid(i) * jnp.tanh(g)
            h = jax.nn.sigmoid(o) * jnp.tanh(c)
            return (h, c), h

        init = (jnp.zeros((B, HIDDEN_SIZE), jnp.float32),
                jnp.zeros((B, HIDDEN_SIZE), jnp.float32))
        _, ys = lax.scan(step, init, jnp.transpose(h_seq, (1, 0, 2)))
        h_seq = jnp.transpose(ys, (1, 0, 2))
    return h_seq @ params["fc"]["w"].T + params["fc"]["b"]


if __name__ == "__main__":
    key = jax.random.PRNGKey(0)
    key, pkey, xkey = jax.random.split(key, 3)

    B, T = 2, 8
    params = init_params(pkey)
    packed = pack_params(params)
    x = jax.random.normal(xkey, (B, T, INPUT_SIZE), jnp.float32)

    out = jax.block_until_ready(lstm_model_forward(packed, x))
    assert out.shape == (B, T, OUTPUT_SIZE), out.shape

    ref = jax.block_until_ready(_reference_forward(params, x))
    assert jnp.allclose(out, ref, atol=5e-4, rtol=5e-4), (
        float(jnp.max(jnp.abs(out - ref)))
    )

    print("KERNEL_OK")
</pallas_src>

<mosaic_0001>
module attributes {stable_mosaic.version = 11 : i64} {
  func.func @_fused_lstm_kernel(%arg0: memref<8x2x256xf32, #tpu.memory_space<vmem>>, %arg1: memref<6x512x1024xf32, #tpu.memory_space<vmem>>, %arg2: memref<6x1x1024xf32, #tpu.memory_space<vmem>>, %arg3: memref<256x128xf32, #tpu.memory_space<vmem>>, %arg4: memref<1x128xf32, #tpu.memory_space<vmem>>, %arg5: memref<8x2x128xf32, #tpu.memory_space<vmem>>, %arg6: memref<6x2x256xf32, #tpu.memory_space<vmem>>, %arg7: memref<6x2x256xf32, #tpu.memory_space<vmem>>) attributes {dimension_semantics = [], scalar_prefetch = 0 : i64, scratch_operands = 2 : i64, tpu.core_type = #tpu.core_type<tc>} {
    %cst = arith.constant 0.000000e+00 : f32
    %0 = vector.broadcast %cst : f32 to vector<6x2x256xf32>
    %c0 = arith.constant 0 : index
    %c0_0 = arith.constant 0 : index
    %c0_1 = arith.constant 0 : index
    %1 = vector.load %arg6[%c0, %c0_0, %c0_1] : memref<6x2x256xf32, #tpu.memory_space<vmem>>, vector<6x2x256xf32>
    tpu.vector_store %arg6[%c0, %c0_0, %c0_1], %0 {strides = array<i32>} : memref<6x2x256xf32, #tpu.memory_space<vmem>>, vector<6x2x256xf32>,
    %cst_2 = arith.constant 0.000000e+00 : f32
    %2 = vector.broadcast %cst_2 : f32 to vector<6x2x256xf32>
    %c0_3 = arith.constant 0 : index
    %c0_4 = arith.constant 0 : index
    %c0_5 = arith.constant 0 : index
    %3 = vector.load %arg7[%c0_3, %c0_4, %c0_5] : memref<6x2x256xf32, #tpu.memory_space<vmem>>, vector<6x2x256xf32>
    tpu.vector_store %arg7[%c0_3, %c0_4, %c0_5], %2 {strides = array<i32>} : memref<6x2x256xf32, #tpu.memory_space<vmem>>, vector<6x2x256xf32>,
    %c0_i32 = arith.constant 0 : i32
    %c8_i32 = arith.constant 8 : i32
    %4 = arith.addi %c0_i32, %c8_i32 : i32
    %c1_i32 = arith.constant 1 : i32
    scf.for %arg8 = %c0_i32 to %4 step %c1_i32  : i32 {
      %5 = arith.index_cast %arg8 : i32 to index
      %c0_7 = arith.constant 0 : index
      %c0_8 = arith.constant 0 : index
      %6 = vector.load %arg0[%5, %c0_7, %c0_8] : memref<8x2x256xf32, #tpu.memory_space<vmem>>, vector<1x2x256xf32>
      %7 = vector.shape_cast %6 : vector<1x2x256xf32> to vector<2x256xf32>
      %c0_9 = arith.constant 0 : index
      %c0_10 = arith.constant 0 : index
      %c0_11 = arith.constant 0 : index
      %8 = vector.load %arg6[%c0_9, %c0_10, %c0_11] : memref<6x2x256xf32, #tpu.memory_space<vmem>>, vector<1x2x256xf32>
      %9 = vector.shape_cast %8 : vector<1x2x256xf32> to vector<2x256xf32>
      %c0_12 = arith.constant 0 : index
      %c0_13 = arith.constant 0 : index
      %c0_14 = arith.constant 0 : index
      %10 = vector.load %arg7[%c0_12, %c0_13, %c0_14] : memref<6x2x256xf32, #tpu.memory_space<vmem>>, vector<1x2x256xf32>
      %11 = vector.shape_cast %10 : vector<1x2x256xf32> to vector<2x256xf32>
      %12 = tpu.concatenate %7, %9 in 1 : vector<2x256xf32>, vector<2x256xf32> -> vector<2x512xf32>
      %c0_15 = arith.constant 0 : index
      %c0_16 = arith.constant 0 : index
      %c0_17 = arith.constant 0 : index
      %13 = vector.load %arg1[%c0_15, %c0_16, %c0_17] : memref<6x512x1024xf32, #tpu.memory_space<vmem>>, vector<1x512x1024xf32>
      %14 = vector.shape_cast %13 : vector<1x512x1024xf32> to vector<512x1024xf32>
      %cst_18 = arith.constant dense<0.000000e+00> : vector<2x1024xf32>
      %15 = tpu.matmul %12, %14, %cst_18 {dimension_numbers = #tpu.dot_dimension_numbers<[1], [0], [0], [1], [0, 0, 1, 1], [], []>} : vector<2x512xf32>, vector<512x1024xf32>, vector<2x1024xf32> -> vector<2x1024xf32>
      %c0_19 = arith.constant 0 : index
      %c0_20 = arith.constant 0 : index
      %c0_21 = arith.constant 0 : index
      %16 = vector.load %arg2[%c0_19, %c0_20, %c0_21] : memref<6x1x1024xf32, #tpu.memory_space<vmem>>, vector<1x1x1024xf32>
      %17 = vector.shape_cast %16 : vector<1x1x1024xf32> to vector<1x1024xf32>
      %18 = vector.broadcast %17 : vector<1x1024xf32> to vector<2x1024xf32>
      %19 = arith.addf %15, %18 : vector<2x1024xf32>
      %20 = vector.extract_strided_slice %19 {offsets = [0, 0], sizes = [2, 256], strides = [1, 1]} : vector<2x1024xf32> to vector<2x256xf32>
      %21 = arith.negf %20 : vector<2x256xf32>
      %22 = math.exp %21 : vector<2x256xf32>
      %cst_22 = arith.constant 1.000000e+00 : f32
      %23 = vector.broadcast %cst_22 : f32 to vector<2x256xf32>
      %24 = arith.addf %23, %22 : vector<2x256xf32>
      %25 = arith.divf %23, %24 : vector<2x256xf32>
      %26 = vector.extract_strided_slice %19 {offsets = [0, 256], sizes = [2, 256], strides = [1, 1]} : vector<2x1024xf32> to vector<2x256xf32>
      %27 = arith.negf %26 : vector<2x256xf32>
      %28 = math.exp %27 : vector<2x256xf32>
      %cst_23 = arith.constant 1.000000e+00 : f32
      %29 = vector.broadcast %cst_23 : f32 to vector<2x256xf32>
      %30 = arith.addf %29, %28 : vector<2x256xf32>
      %31 = arith.divf %29, %30 : vector<2x256xf32>
      %32 = vector.extract_strided_slice %19 {offsets = [0, 512], sizes = [2, 256], strides = [1, 1]} : vector<2x1024xf32> to vector<2x256xf32>
      %33 = math.tanh %32 : vector<2x256xf32>
      %34 = vector.extract_strided_slice %19 {offsets = [0, 768], sizes = [2, 256], strides = [1, 1]} : vector<2x1024xf32> to vector<2x256xf32>
      %35 = arith.negf %34 : vector<2x256xf32>
      %36 = math.exp %35 : vector<2x256xf32>
      %cst_24 = arith.constant 1.000000e+00 : f32
      %37 = vector.broadcast %cst_24 : f32 to vector<2x256xf32>
      %38 = arith.addf %37, %36 : vector<2x256xf32>
      %39 = arith.divf %37, %38 : vector<2x256xf32>
      %40 = arith.mulf %31, %11 : vector<2x256xf32>
      %41 = arith.mulf %25, %33 : vector<2x256xf32>
      %42 = arith.addf %40, %41 : vector<2x256xf32>
      %43 = math.tanh %42 : vector<2x256xf32>
      %44 = arith.mulf %39, %43 : vector<2x256xf32>
      %c0_25 = arith.constant 0 : index
      %c0_26 = arith.constant 0 : index
      %c0_27 = arith.constant 0 : index
      %45 = vector.load %arg7[%c0_25, %c0_26, %c0_27] : memref<6x2x256xf32, #tpu.memory_space<vmem>>, vector<1x2x256xf32>
      %46 = vector.shape_cast %45 : vector<1x2x256xf32> to vector<2x256xf32>
      %47 = vector.shape_cast %42 : vector<2x256xf32> to vector<1x2x256xf32>
      tpu.vector_store %arg7[%c0_25, %c0_26, %c0_27], %47 {strides = array<i32>} : memref<6x2x256xf32, #tpu.memory_space<vmem>>, vector<1x2x256xf32>,
      %c0_28 = arith.constant 0 : index
      %c0_29 = arith.constant 0 : index
      %c0_30 = arith.constant 0 : index
      %48 = vector.load %arg6[%c0_28, %c0_29, %c0_30] : memref<6x2x256xf32, #tpu.memory_space<vmem>>, vector<1x2x256xf32>
      %49 = vector.shape_cast %48 : vector<1x2x256xf32> to vector<2x256xf32>
      %50 = vector.shape_cast %44 : vector<2x256xf32> to vector<1x2x256xf32>
      tpu.vector_store %arg6[%c0_28, %c0_29, %c0_30], %50 {strides = array<i32>} : memref<6x2x256xf32, #tpu.memory_space<vmem>>, vector<1x2x256xf32>,
      %c1 = arith.constant 1 : index
      %c0_31 = arith.constant 0 : index
      %c0_32 = arith.constant 0 : index
      %51 = vector.load %arg6[%c1, %c0_31, %c0_32] : memref<6x2x256xf32, #tpu.memory_space<vmem>>, vector<1x2x256xf32>
      %52 = vector.shape_cast %51 : vector<1x2x256xf32> to vector<2x256xf32>
      %c1_33 = arith.constant 1 : index
      %c0_34 = arith.constant 0 : index
      %c0_35 = arith.constant 0 : index
      %53 = vector.load %arg7[%c1_33, %c0_34, %c0_35] : memref<6x2x256xf32, #tpu.memory_space<vmem>>, vector<1x2x256xf32>
      %54 = vector.shape_cast %53 : vector<1x2x256xf32> to vector<2x256xf32>
      %55 = tpu.concatenate %44, %52 in 1 : vector<2x256xf32>, vector<2x256xf32> -> vector<2x512xf32>
      %c1_36 = arith.constant 1 : index
      %c0_37 = arith.constant 0 : index
      %c0_38 = arith.constant 0 : index
      %56 = vector.load %arg1[%c1_36, %c0_37, %c0_38] : memref<6x512x1024xf32, #tpu.memory_space<vmem>>, vector<1x512x1024xf32>
      %57 = vector.shape_cast %56 : vector<1x512x1024xf32> to vector<512x1024xf32>
      %cst_39 = arith.constant dense<0.000000e+00> : vector<2x1024xf32>
      %58 = tpu.matmul %55, %57, %cst_39 {dimension_numbers = #tpu.dot_dimension_numbers<[1], [0], [0], [1], [0, 0, 1, 1], [], []>} : vector<2x512xf32>, vector<512x1024xf32>, vector<2x1024xf32> -> vector<2x1024xf32>
      %c1_40 = arith.constant 1 : index
      %c0_41 = arith.constant 0 : index
      %c0_42 = arith.constant 0 : index
      %59 = vector.load %arg2[%c1_40, %c0_41, %c0_42] : memref<6x1x1024xf32, #tpu.memory_space<vmem>>, vector<1x1x1024xf32>
      %60 = vector.shape_cast %59 : vector<1x1x1024xf32> to vector<1x1024xf32>
      %61 = vector.broadcast %60 : vector<1x1024xf32> to vector<2x1024xf32>
      %62 = arith.addf %58, %61 : vector<2x1024xf32>
      %63 = vector.extract_strided_slice %62 {offsets = [0, 0], sizes = [2, 256], strides = [1, 1]} : vector<2x1024xf32> to vector<2x256xf32>
      %64 = arith.negf %63 : vector<2x256xf32>
      %65 = math.exp %64 : vector<2x256xf32>
      %cst_43 = arith.constant 1.000000e+00 : f32
      %66 = vector.broadcast %cst_43 : f32 to vector<2x256xf32>
      %67 = arith.addf %66, %65 : vector<2x256xf32>
      %68 = arith.divf %66, %67 : vector<2x256xf32>
      %69 = vector.extract_strided_slice %62 {offsets = [0, 256], sizes = [2, 256], strides = [1, 1]} : vector<2x1024xf32> to vector<2x256xf32>
      %70 = arith.negf %69 : vector<2x256xf32>
      %71 = math.exp %70 : vector<2x256xf32>
      %cst_44 = arith.constant 1.000000e+00 : f32
      %72 = vector.broadcast %cst_44 : f32 to vector<2x256xf32>
      %73 = arith.addf %72, %71 : vector<2x256xf32>
      %74 = arith.divf %72, %73 : vector<2x256xf32>
      %75 = vector.extract_strided_slice %62 {offsets = [0, 512], sizes = [2, 256], strides = [1, 1]} : vector<2x1024xf32> to vector<2x256xf32>
      %76 = math.tanh %75 : vector<2x256xf32>
      %77 = vector.extract_strided_slice %62 {offsets = [0, 768], sizes = [2, 256], strides = [1, 1]} : vector<2x1024xf32> to vector<2x256xf32>
      %78 = arith.negf %77 : vector<2x256xf32>
      %79 = math.exp %78 : vector<2x256xf32>
      %cst_45 = arith.constant 1.000000e+00 : f32
      %80 = vector.broadcast %cst_45 : f32 to vector<2x256xf32>
      %81 = arith.addf %80, %79 : vector<2x256xf32>
      %82 = arith.divf %80, %81 : vector<2x256xf32>
      %83 = arith.mulf %74, %54 : vector<2x256xf32>
      %84 = arith.mulf %68, %76 : vector<2x256xf32>
      %85 = arith.addf %83, %84 : vector<2x256xf32>
      %86 = math.tanh %85 : vector<2x256xf32>
      %87 = arith.mulf %82, %86 : vector<2x256xf32>
      %c1_46 = arith.constant 1 : index
      %c0_47 = arith.constant 0 : index
      %c0_48 = arith.constant 0 : index
      %88 = vector.load %arg7[%c1_46, %c0_47, %c0_48] : memref<6x2x256xf32, #tpu.memory_space<vmem>>, vector<1x2x256xf32>
      %89 = vector.shape_cast %88 : vector<1x2x256xf32> to vector<2x256xf32>
      %90 = vector.shape_cast %85 : vector<2x256xf32> to vector<1x2x256xf32>
      tpu.vector_store %arg7[%c1_46, %c0_47, %c0_48], %90 {strides = array<i32>} : memref<6x2x256xf32, #tpu.memory_space<vmem>>, vector<1x2x256xf32>,
      %c1_49 = arith.constant 1 : index
      %c0_50 = arith.constant 0 : index
      %c0_51 = arith.constant 0 : index
      %91 = vector.load %arg6[%c1_49, %c0_50, %c0_51] : memref<6x2x256xf32, #tpu.memory_space<vmem>>, vector<1x2x256xf32>
      %92 = vector.shape_cast %91 : vector<1x2x256xf32> to vector<2x256xf32>
      %93 = vector.shape_cast %87 : vector<2x256xf32> to vector<1x2x256xf32>
      tpu.vector_store %arg6[%c1_49, %c0_50, %c0_51], %93 {strides = array<i32>} : memref<6x2x256xf32, #tpu.memory_space<vmem>>, vector<1x2x256xf32>,
      %c2 = arith.constant 2 : index
      %c0_52 = arith.constant 0 : index
      %c0_53 = arith.constant 0 : index
      %94 = vector.load %arg6[%c2, %c0_52, %c0_53] : memref<6x2x256xf32, #tpu.memory_space<vmem>>, vector<1x2x256xf32>
      %95 = vector.shape_cast %94 : vector<1x2x256xf32> to vector<2x256xf32>
      %c2_54 = arith.constant 2 : index
      %c0_55 = arith.constant 0 : index
      %c0_56 = arith.constant 0 : index
      %96 = vector.load %arg7[%c2_54, %c0_55, %c0_56] : memref<6x2x256xf32, #tpu.memory_space<vmem>>, vector<1x2x256xf32>
      %97 = vector.shape_cast %96 : vector<1x2x256xf32> to vector<2x256xf32>
      %98 = tpu.concatenate %87, %95 in 1 : vector<2x256xf32>, vector<2x256xf32> -> vector<2x512xf32>
      %c2_57 = arith.constant 2 : index
      %c0_58 = arith.constant 0 : index
      %c0_59 = arith.constant 0 : index
      %99 = vector.load %arg1[%c2_57, %c0_58, %c0_59] : memref<6x512x1024xf32, #tpu.memory_space<vmem>>, vector<1x512x1024xf32>
      %100 = vector.shape_cast %99 : vector<1x512x1024xf32> to vector<512x1024xf32>
      %cst_60 = arith.constant dense<0.000000e+00> : vector<2x1024xf32>
      %101 = tpu.matmul %98, %100, %cst_60 {dimension_numbers = #tpu.dot_dimension_numbers<[1], [0], [0], [1], [0, 0, 1, 1], [], []>} : vector<2x512xf32>, vector<512x1024xf32>, vector<2x1024xf32> -> vector<2x1024xf32>
      %c2_61 = arith.constant 2 : index
      %c0_62 = arith.constant 0 : index
      %c0_63 = arith.constant 0 : index
      %102 = vector.load %arg2[%c2_61, %c0_62, %c0_63] : memref<6x1x1024xf32, #tpu.memory_space<vmem>>, vector<1x1x1024xf32>
      %103 = vector.shape_cast %102 : vector<1x1x1024xf32> to vector<1x1024xf32>
      %104 = vector.broadcast %103 : vector<1x1024xf32> to vector<2x1024xf32>
      %105 = arith.addf %101, %104 : vector<2x1024xf32>
      %106 = vector.extract_strided_slice %105 {offsets = [0, 0], sizes = [2, 256], strides = [1, 1]} : vector<2x1024xf32> to vector<2x256xf32>
      %107 = arith.negf %106 : vector<2x256xf32>
      %108 = math.exp %107 : vector<2x256xf32>
      %cst_64 = arith.constant 1.000000e+00 : f32
      %109 = vector.broadcast %cst_64 : f32 to vector<2x256xf32>
      %110 = arith.addf %109, %108 : vector<2x256xf32>
      %111 = arith.divf %109, %110 : vector<2x256xf32>
      %112 = vector.extract_strided_slice %105 {offsets = [0, 256], sizes = [2, 256], strides = [1, 1]} : vector<2x1024xf32> to vector<2x256xf32>
      %113 = arith.negf %112 : vector<2x256xf32>
      %114 = math.exp %113 : vector<2x256xf32>
      %cst_65 = arith.constant 1.000000e+00 : f32
      %115 = vector.broadcast %cst_65 : f32 to vector<2x256xf32>
      %116 = arith.addf %115, %114 : vector<2x256xf32>
      %117 = arith.divf %115, %116 : vector<2x256xf32>
      %118 = vector.extract_strided_slice %105 {offsets = [0, 512], sizes = [2, 256], strides = [1, 1]} : vector<2x1024xf32> to vector<2x256xf32>
      %119 = math.tanh %118 : vector<2x256xf32>
      %120 = vector.extract_strided_slice %105 {offsets = [0, 768], sizes = [2, 256], strides = [1, 1]} : vector<2x1024xf32> to vector<2x256xf32>
      %121 = arith.negf %120 : vector<2x256xf32>
      %122 = math.exp %121 : vector<2x256xf32>
      %cst_66 = arith.constant 1.000000e+00 : f32
      %123 = vector.broadcast %cst_66 : f32 to vector<2x256xf32>
      %124 = arith.addf %123, %122 : vector<2x256xf32>
      %125 = arith.divf %123, %124 : vector<2x256xf32>
      %126 = arith.mulf %117, %97 : vector<2x256xf32>
      %127 = arith.mulf %111, %119 : vector<2x256xf32>
      %128 = arith.addf %126, %127 : vector<2x256xf32>
      %129 = math.tanh %128 : vector<2x256xf32>
      %130 = arith.mulf %125, %129 : vector<2x256xf32>
      %c2_67 = arith.constant 2 : index
      %c0_68 = arith.constant 0 : index
      %c0_69 = arith.constant 0 : index
      %131 = vector.load %arg7[%c2_67, %c0_68, %c0_69] : memref<6x2x256xf32, #tpu.memory_space<vmem>>, vector<1x2x256xf32>
      %132 = vector.shape_cast %131 : vector<1x2x256xf32> to vector<2x256xf32>
      %133 = vector.shape_cast %128 : vector<2x256xf32> to vector<1x2x256xf32>
      tpu.vector_store %arg7[%c2_67, %c0_68, %c0_69], %133 {strides = array<i32>} : memref<6x2x256xf32, #tpu.memory_space<vmem>>, vector<1x2x256xf32>,
      %c2_70 = arith.constant 2 : index
      %c0_71 = arith.constant 0 : index
      %c0_72 = arith.constant 0 : index
      %134 = vector.load %arg6[%c2_70, %c0_71, %c0_72] : memref<6x2x256xf32, #tpu.memory_space<vmem>>, vector<1x2x256xf32>
      %135 = vector.shape_cast %134 : vector<1x2x256xf32> to vector<2x256xf32>
      %136 = vector.shape_cast %130 : vector<2x256xf32> to vector<1x2x256xf32>
      tpu.vector_store %arg6[%c2_70, %c0_71, %c0_72], %136 {strides = array<i32>} : memref<6x2x256xf32, #tpu.memory_space<vmem>>, vector<1x2x256xf32>,
      %c3 = arith.constant 3 : index
      %c0_73 = arith.constant 0 : index
      %c0_74 = arith.constant 0 : index
      %137 = vector.load %arg6[%c3, %c0_73, %c0_74] : memref<6x2x256xf32, #tpu.memory_space<vmem>>, vector<1x2x256xf32>
      %138 = vector.shape_cast %137 : vector<1x2x256xf32> to vector<2x256xf32>
      %c3_75 = arith.constant 3 : index
      %c0_76 = arith.constant 0 : index
      %c0_77 = arith.constant 0 : index
      %139 = vector.load %arg7[%c3_75, %c0_76, %c0_77] : memref<6x2x256xf32, #tpu.memory_space<vmem>>, vector<1x2x256xf32>
      %140 = vector.shape_cast %139 : vector<1x2x256xf32> to vector<2x256xf32>
      %141 = tpu.concatenate %130, %138 in 1 : vector<2x256xf32>, vector<2x256xf32> -> vector<2x512xf32>
      %c3_78 = arith.constant 3 : index
      %c0_79 = arith.constant 0 : index
      %c0_80 = arith.constant 0 : index
      %142 = vector.load %arg1[%c3_78, %c0_79, %c0_80] : memref<6x512x1024xf32, #tpu.memory_space<vmem>>, vector<1x512x1024xf32>
      %143 = vector.shape_cast %142 : vector<1x512x1024xf32> to vector<512x1024xf32>
      %cst_81 = arith.constant dense<0.000000e+00> : vector<2x1024xf32>
      %144 = tpu.matmul %141, %143, %cst_81 {dimension_numbers = #tpu.dot_dimension_numbers<[1], [0], [0], [1], [0, 0, 1, 1], [], []>} : vector<2x512xf32>, vector<512x1024xf32>, vector<2x1024xf32> -> vector<2x1024xf32>
      %c3_82 = arith.constant 3 : index
      %c0_83 = arith.constant 0 : index
      %c0_84 = arith.constant 0 : index
      %145 = vector.load %arg2[%c3_82, %c0_83, %c0_84] : memref<6x1x1024xf32, #tpu.memory_space<vmem>>, vector<1x1x1024xf32>
      %146 = vector.shape_cast %145 : vector<1x1x1024xf32> to vector<1x1024xf32>
      %147 = vector.broadcast %146 : vector<1x1024xf32> to vector<2x1024xf32>
      %148 = arith.addf %144, %147 : vector<2x1024xf32>
      %149 = vector.extract_strided_slice %148 {offsets = [0, 0], sizes = [2, 256], strides = [1, 1]} : vector<2x1024xf32> to vector<2x256xf32>
      %150 = arith.negf %149 : vector<2x256xf32>
      %151 = math.exp %150 : vector<2x256xf32>
      %cst_85 = arith.constant 1.000000e+00 : f32
      %152 = vector.broadcast %cst_85 : f32 to vector<2x256xf32>
      %153 = arith.addf %152, %151 : vector<2x256xf32>
      %154 = arith.divf %152, %153 : vector<2x256xf32>
      %155 = vector.extract_strided_slice %148 {offsets = [0, 256], sizes = [2, 256], strides = [1, 1]} : vector<2x1024xf32> to vector<2x256xf32>
      %156 = arith.negf %155 : vector<2x256xf32>
      %157 = math.exp %156 : vector<2x256xf32>
      %cst_86 = arith.constant 1.000000e+00 : f32
      %158 = vector.broadcast %cst_86 : f32 to vector<2x256xf32>
      %159 = arith.addf %158, %157 : vector<2x256xf32>
      %160 = arith.divf %158, %159 : vector<2x256xf32>
      %161 = vector.extract_strided_slice %148 {offsets = [0, 512], sizes = [2, 256], strides = [1, 1]} : vector<2x1024xf32> to vector<2x256xf32>
      %162 = math.tanh %161 : vector<2x256xf32>
      %163 = vector.extract_strided_slice %148 {offsets = [0, 768], sizes = [2, 256], strides = [1, 1]} : vector<2x1024xf32> to vector<2x256xf32>
      %164 = arith.negf %163 : vector<2x256xf32>
      %165 = math.exp %164 : vector<2x256xf32>
      %cst_87 = arith.constant 1.000000e+00 : f32
      %166 = vector.broadcast %cst_87 : f32 to vector<2x256xf32>
      %167 = arith.addf %166, %165 : vector<2x256xf32>
      %168 = arith.divf %166, %167 : vector<2x256xf32>
      %169 = arith.mulf %160, %140 : vector<2x256xf32>
      %170 = arith.mulf %154, %162 : vector<2x256xf32>
      %171 = arith.addf %169, %170 : vector<2x256xf32>
      %172 = math.tanh %171 : vector<2x256xf32>
      %173 = arith.mulf %168, %172 : vector<2x256xf32>
      %c3_88 = arith.constant 3 : index
      %c0_89 = arith.constant 0 : index
      %c0_90 = arith.constant 0 : index
      %174 = vector.load %arg7[%c3_88, %c0_89, %c0_90] : memref<6x2x256xf32, #tpu.memory_space<vmem>>, vector<1x2x256xf32>
      %175 = vector.shape_cast %174 : vector<1x2x256xf32> to vector<2x256xf32>
      %176 = vector.shape_cast %171 : vector<2x256xf32> to vector<1x2x256xf32>
      tpu.vector_store %arg7[%c3_88, %c0_89, %c0_90], %176 {strides = array<i32>} : memref<6x2x256xf32, #tpu.memory_space<vmem>>, vector<1x2x256xf32>,
      %c3_91 = arith.constant 3 : index
      %c0_92 = arith.constant 0 : index
      %c0_93 = arith.constant 0 : index
      %177 = vector.load %arg6[%c3_91, %c0_92, %c0_93] : memref<6x2x256xf32, #tpu.memory_space<vmem>>, vector<1x2x256xf32>
      %178 = vector.shape_cast %177 : vector<1x2x256xf32> to vector<2x256xf32>
      %179 = vector.shape_cast %173 : vector<2x256xf32> to vector<1x2x256xf32>
      tpu.vector_store %arg6[%c3_91, %c0_92, %c0_93], %179 {strides = array<i32>} : memref<6x2x256xf32, #tpu.memory_space<vmem>>, vector<1x2x256xf32>,
      %c4 = arith.constant 4 : index
      %c0_94 = arith.constant 0 : index
      %c0_95 = arith.constant 0 : index
      %180 = vector.load %arg6[%c4, %c0_94, %c0_95] : memref<6x2x256xf32, #tpu.memory_space<vmem>>, vector<1x2x256xf32>
      %181 = vector.shape_cast %180 : vector<1x2x256xf32> to vector<2x256xf32>
      %c4_96 = arith.constant 4 : index
      %c0_97 = arith.constant 0 : index
      %c0_98 = arith.constant 0 : index
      %182 = vector.load %arg7[%c4_96, %c0_97, %c0_98] : memref<6x2x256xf32, #tpu.memory_space<vmem>>, vector<1x2x256xf32>
      %183 = vector.shape_cast %182 : vector<1x2x256xf32> to vector<2x256xf32>
      %184 = tpu.concatenate %173, %181 in 1 : vector<2x256xf32>, vector<2x256xf32> -> vector<2x512xf32>
      %c4_99 = arith.constant 4 : index
      %c0_100 = arith.constant 0 : index
      %c0_101 = arith.constant 0 : index
      %185 = vector.load %arg1[%c4_99, %c0_100, %c0_101] : memref<6x512x1024xf32, #tpu.memory_space<vmem>>, vector<1x512x1024xf32>
      %186 = vector.shape_cast %185 : vector<1x512x1024xf32> to vector<512x1024xf32>
      %cst_102 = arith.constant dense<0.000000e+00> : vector<2x1024xf32>
      %187 = tpu.matmul %184, %186, %cst_102 {dimension_numbers = #tpu.dot_dimension_numbers<[1], [0], [0], [1], [0, 0, 1, 1], [], []>} : vector<2x512xf32>, vector<512x1024xf32>, vector<2x1024xf32> -> vector<2x1024xf32>
      %c4_103 = arith.constant 4 : index
      %c0_104 = arith.constant 0 : index
      %c0_105 = arith.constant 0 : index
      %188 = vector.load %arg2[%c4_103, %c0_104, %c0_105] : memref<6x1x1024xf32, #tpu.memory_space<vmem>>, vector<1x1x1024xf32>
      %189 = vector.shape_cast %188 : vector<1x1x1024xf32> to vector<1x1024xf32>
      %190 = vector.broadcast %189 : vector<1x1024xf32> to vector<2x1024xf32>
      %191 = arith.addf %187, %190 : vector<2x1024xf32>
      %192 = vector.extract_strided_slice %191 {offsets = [0, 0], sizes = [2, 256], strides = [1, 1]} : vector<2x1024xf32> to vector<2x256xf32>
      %193 = arith.negf %192 : vector<2x256xf32>
      %194 = math.exp %193 : vector<2x256xf32>
      %cst_106 = arith.constant 1.000000e+00 : f32
      %195 = vector.broadcast %cst_106 : f32 to vector<2x256xf32>
      %196 = arith.addf %195, %194 : vector<2x256xf32>
      %197 = arith.divf %195, %196 : vector<2x256xf32>
      %198 = vector.extract_strided_slice %191 {offsets = [0, 256], sizes = [2, 256], strides = [1, 1]} : vector<2x1024xf32> to vector<2x256xf32>
      %199 = arith.negf %198 : vector<2x256xf32>
      %200 = math.exp %199 : vector<2x256xf32>
      %cst_107 = arith.constant 1.000000e+00 : f32
      %201 = vector.broadcast %cst_107 : f32 to vector<2x256xf32>
      %202 = arith.addf %201, %200 : vector<2x256xf32>
      %203 = arith.divf %201, %202 : vector<2x256xf32>
      %204 = vector.extract_strided_slice %191 {offsets = [0, 512], sizes = [2, 256], strides = [1, 1]} : vector<2x1024xf32> to vector<2x256xf32>
      %205 = math.tanh %204 : vector<2x256xf32>
      %206 = vector.extract_strided_slice %191 {offsets = [0, 768], sizes = [2, 256], strides = [1, 1]} : vector<2x1024xf32> to vector<2x256xf32>
      %207 = arith.negf %206 : vector<2x256xf32>
      %208 = math.exp %207 : vector<2x256xf32>
      %cst_108 = arith.constant 1.000000e+00 : f32
      %209 = vector.broadcast %cst_108 : f32 to vector<2x256xf32>
      %210 = arith.addf %209, %208 : vector<2x256xf32>
      %211 = arith.divf %209, %210 : vector<2x256xf32>
      %212 = arith.mulf %203, %183 : vector<2x256xf32>
      %213 = arith.mulf %197, %205 : vector<2x256xf32>
      %214 = arith.addf %212, %213 : vector<2x256xf32>
      %215 = math.tanh %214 : vector<2x256xf32>
      %216 = arith.mulf %211, %215 : vector<2x256xf32>
      %c4_109 = arith.constant 4 : index
      %c0_110 = arith.constant 0 : index
      %c0_111 = arith.constant 0 : index
      %217 = vector.load %arg7[%c4_109, %c0_110, %c0_111] : memref<6x2x256xf32, #tpu.memory_space<vmem>>, vector<1x2x256xf32>
      %218 = vector.shape_cast %217 : vector<1x2x256xf32> to vector<2x256xf32>
      %219 = vector.shape_cast %214 : vector<2x256xf32> to vector<1x2x256xf32>
      tpu.vector_store %arg7[%c4_109, %c0_110, %c0_111], %219 {strides = array<i32>} : memref<6x2x256xf32, #tpu.memory_space<vmem>>, vector<1x2x256xf32>,
      %c4_112 = arith.constant 4 : index
      %c0_113 = arith.constant 0 : index
      %c0_114 = arith.constant 0 : index
      %220 = vector.load %arg6[%c4_112, %c0_113, %c0_114] : memref<6x2x256xf32, #tpu.memory_space<vmem>>, vector<1x2x256xf32>
      %221 = vector.shape_cast %220 : vector<1x2x256xf32> to vector<2x256xf32>
      %222 = vector.shape_cast %216 : vector<2x256xf32> to vector<1x2x256xf32>
      tpu.vector_store %arg6[%c4_112, %c0_113, %c0_114], %222 {strides = array<i32>} : memref<6x2x256xf32, #tpu.memory_space<vmem>>, vector<1x2x256xf32>,
      %c5 = arith.constant 5 : index
      %c0_115 = arith.constant 0 : index
      %c0_116 = arith.constant 0 : index
      %223 = vector.load %arg6[%c5, %c0_115, %c0_116] : memref<6x2x256xf32, #tpu.memory_space<vmem>>, vector<1x2x256xf32>
      %224 = vector.shape_cast %223 : vector<1x2x256xf32> to vector<2x256xf32>
      %c5_117 = arith.constant 5 : index
      %c0_118 = arith.constant 0 : index
      %c0_119 = arith.constant 0 : index
      %225 = vector.load %arg7[%c5_117, %c0_118, %c0_119] : memref<6x2x256xf32, #tpu.memory_space<vmem>>, vector<1x2x256xf32>
      %226 = vector.shape_cast %225 : vector<1x2x256xf32> to vector<2x256xf32>
      %227 = tpu.concatenate %216, %224 in 1 : vector<2x256xf32>, vector<2x256xf32> -> vector<2x512xf32>
      %c5_120 = arith.constant 5 : index
      %c0_121 = arith.constant 0 : index
      %c0_122 = arith.constant 0 : index
      %228 = vector.load %arg1[%c5_120, %c0_121, %c0_122] : memref<6x512x1024xf32, #tpu.memory_space<vmem>>, vector<1x512x1024xf32>
      %229 = vector.shape_cast %228 : vector<1x512x1024xf32> to vector<512x1024xf32>
      %cst_123 = arith.constant dense<0.000000e+00> : vector<2x1024xf32>
      %230 = tpu.matmul %227, %229, %cst_123 {dimension_numbers = #tpu.dot_dimension_numbers<[1], [0], [0], [1], [0, 0, 1, 1], [], []>} : vector<2x512xf32>, vector<512x1024xf32>, vector<2x1024xf32> -> vector<2x1024xf32>
      %c5_124 = arith.constant 5 : index
      %c0_125 = arith.constant 0 : index
      %c0_126 = arith.constant 0 : index
      %231 = vector.load %arg2[%c5_124, %c0_125, %c0_126] : memref<6x1x1024xf32, #tpu.memory_space<vmem>>, vector<1x1x1024xf32>
      %232 = vector.shape_cast %231 : vector<1x1x1024xf32> to vector<1x1024xf32>
      %233 = vector.broadcast %232 : vector<1x1024xf32> to vector<2x1024xf32>
      %234 = arith.addf %230, %233 : vector<2x1024xf32>
      %235 = vector.extract_strided_slice %234 {offsets = [0, 0], sizes = [2, 256], strides = [1, 1]} : vector<2x1024xf32> to vector<2x256xf32>
      %236 = arith.negf %235 : vector<2x256xf32>
      %237 = math.exp %236 : vector<2x256xf32>
      %cst_127 = arith.constant 1.000000e+00 : f32
      %238 = vector.broadcast %cst_127 : f32 to vector<2x256xf32>
      %239 = arith.addf %238, %237 : vector<2x256xf32>
      %240 = arith.divf %238, %239 : vector<2x256xf32>
      %241 = vector.extract_strided_slice %234 {offsets = [0, 256], sizes = [2, 256], strides = [1, 1]} : vector<2x1024xf32> to vector<2x256xf32>
      %242 = arith.negf %241 : vector<2x256xf32>
      %243 = math.exp %242 : vector<2x256xf32>
      %cst_128 = arith.constant 1.000000e+00 : f32
      %244 = vector.broadcast %cst_128 : f32 to vector<2x256xf32>
      %245 = arith.addf %244, %243 : vector<2x256xf32>
      %246 = arith.divf %244, %245 : vector<2x256xf32>
      %247 = vector.extract_strided_slice %234 {offsets = [0, 512], sizes = [2, 256], strides = [1, 1]} : vector<2x1024xf32> to vector<2x256xf32>
      %248 = math.tanh %247 : vector<2x256xf32>
      %249 = vector.extract_strided_slice %234 {offsets = [0, 768], sizes = [2, 256], strides = [1, 1]} : vector<2x1024xf32> to vector<2x256xf32>
      %250 = arith.negf %249 : vector<2x256xf32>
      %251 = math.exp %250 : vector<2x256xf32>
      %cst_129 = arith.constant 1.000000e+00 : f32
      %252 = vector.broadcast %cst_129 : f32 to vector<2x256xf32>
      %253 = arith.addf %252, %251 : vector<2x256xf32>
      %254 = arith.divf %252, %253 : vector<2x256xf32>
      %255 = arith.mulf %246, %226 : vector<2x256xf32>
      %256 = arith.mulf %240, %248 : vector<2x256xf32>
      %257 = arith.addf %255, %256 : vector<2x256xf32>
      %258 = math.tanh %257 : vector<2x256xf32>
      %259 = arith.mulf %254, %258 : vector<2x256xf32>
      %c5_130 = arith.constant 5 : index
      %c0_131 = arith.constant 0 : index
      %c0_132 = arith.constant 0 : index
      %260 = vector.load %arg7[%c5_130, %c0_131, %c0_132] : memref<6x2x256xf32, #tpu.memory_space<vmem>>, vector<1x2x256xf32>
      %261 = vector.shape_cast %260 : vector<1x2x256xf32> to vector<2x256xf32>
      %262 = vector.shape_cast %257 : vector<2x256xf32> to vector<1x2x256xf32>
      tpu.vector_store %arg7[%c5_130, %c0_131, %c0_132], %262 {strides = array<i32>} : memref<6x2x256xf32, #tpu.memory_space<vmem>>, vector<1x2x256xf32>,
      %c5_133 = arith.constant 5 : index
      %c0_134 = arith.constant 0 : index
      %c0_135 = arith.constant 0 : index
      %263 = vector.load %arg6[%c5_133, %c0_134, %c0_135] : memref<6x2x256xf32, #tpu.memory_space<vmem>>, vector<1x2x256xf32>
      %264 = vector.shape_cast %263 : vector<1x2x256xf32> to vector<2x256xf32>
      %265 = vector.shape_cast %259 : vector<2x256xf32> to vector<1x2x256xf32>
      tpu.vector_store %arg6[%c5_133, %c0_134, %c0_135], %265 {strides = array<i32>} : memref<6x2x256xf32, #tpu.memory_space<vmem>>, vector<1x2x256xf32>,
      %c0_136 = arith.constant 0 : index
      %c0_137 = arith.constant 0 : index
      %266 = vector.load %arg3[%c0_136, %c0_137] : memref<256x128xf32, #tpu.memory_space<vmem>>, vector<256x128xf32>
      %cst_138 = arith.constant dense<0.000000e+00> : vector<2x128xf32>
      %267 = tpu.matmul %259, %266, %cst_138 {dimension_numbers = #tpu.dot_dimension_numbers<[1], [0], [0], [1], [0, 0, 1, 1], [], []>} : vector<2x256xf32>, vector<256x128xf32>, vector<2x128xf32> -> vector<2x128xf32>
      %c0_139 = arith.constant 0 : index
      %c0_140 = arith.constant 0 : index
      %268 = vector.load %arg4[%c0_139, %c0_140] : memref<1x128xf32, #tpu.memory_space<vmem>>, vector<1x128xf32>
      %269 = vector.broadcast %268 : vector<1x128xf32> to vector<2x128xf32>
      %270 = arith.addf %267, %269 : vector<2x128xf32>
      %271 = arith.index_cast %arg8 : i32 to index
      %c0_141 = arith.constant 0 : index
      %c0_142 = arith.constant 0 : index
      %272 = vector.load %arg5[%271, %c0_141, %c0_142] : memref<8x2x128xf32, #tpu.memory_space<vmem>>, vector<1x2x128xf32>
      %273 = vector.shape_cast %272 : vector<1x2x128xf32> to vector<2x128xf32>
      %274 = vector.shape_cast %270 : vector<2x128xf32> to vector<1x2x128xf32>
      tpu.vector_store %arg5[%271, %c0_141, %c0_142], %274 {strides = array<i32>} : memref<8x2x128xf32, #tpu.memory_space<vmem>>, vector<1x2x128xf32>,
    }
    %c8_i32_6 = arith.constant 8 : i32
    return
  }
}

</mosaic_0001>

<bundles_post_ra>
// kernel: lstm_model_forward.1
= control target key start
LH: loop header
LB: loop body
LE: loop exit
PB: predicated region body
PF: predicated region fallthrough
CT: control target
= control target key end

     0   :  { %10 = vsyncpa [#allocation5], 0  ;;  %s8398_s0 = inlined_call_operand.vmem [shape: f32[8,2,256], index: 0, kind: input, shape index: {}]   ;;  %s8399_s1 = inlined_call_operand.hbm [shape: f32[6,512,1024], index: 1, kind: input, shape index: {}]   ;;  %s8400_s2 = inlined_call_operand.hbm [shape: f32[6,1,1024], index: 2, kind: input, shape index: {}]   ;;  %s8401_s3 = inlined_call_operand.hbm [shape: f32[256,128], index: 3, kind: input, shape index: {}]   ;;  %s8402_s4 = inlined_call_operand.hbm [shape: f32[1,128], index: 4, kind: input, shape index: {}]   ;;  %s8403_s5 = inlined_call_operand.vmem [shape: f32[8,2,128], index: 5, kind: output, shape index: {}]  }
   0x1   :  { %11 = vsyncpa [#allocation7], 0 }
   0x2   :  { %12 = vsyncpa [#allocation10], 0  ;;  %s7971_s18 = smov [#allocation6]  }
   0x3   :  { %s32_s19 = sshll.u32 %s7971_s18, 4  ;;  %s33_s19 = int_to_ptr.vmem [resolvable:$true] %s32_s19 }
   0x4   :  { %s7885_s20 = scalar_lea.vmem %s33_s19, 768  ;;  %p7890_p1 = scmp.lt.s32.totalorder %s33_s19, %s33_s19 }
   0x5   :  { %p7886_p0 = scmp.ne.s32.totalorder %s33_s19, %s7885_s20  ;;  %p7891_p2 = scmp.lt.s32.totalorder %s7885_s20, %s7885_s20 }
   0x7   :  { %p7892_p3 = por %p7891_p2, %p7890_p1 }
   0x9   :  { %p7893_p4 = pnand %p7892_p3, %p7886_p0 }
   0xb   :  { %7896 = shalt.err (!%p7893_p4)
}
   0xc   :  { %s7972_s21 = smov 128   ;;  %s7973_s22 = smov 8  }
   0xd   :  { %38 = dma.hbm_to_vmem [thread:$0]  %s8400_s2, 768, %s33_s19, [#allocation7], %s7972_s21, %s7972_s21, %s7973_s22  }
   0xe   :  { %s7974_s25 = smov [#allocation4]  }
   0xf   :  { %s20_s26 = sshll.u32 %s7974_s25, 4  ;;  %s21_s26 = int_to_ptr.vmem [resolvable:$true] %s20_s26 }
  0x10   :  { %s7905_s27 = scalar_lea.vmem %s21_s26, 393216  ;;  %p7910_p6 = scmp.lt.s32.totalorder %s21_s26, %s21_s26 }
  0x11   :  { %p7906_p5 = scmp.ne.s32.totalorder %s21_s26, %s7905_s27  ;;  %p7911_p7 = scmp.lt.s32.totalorder %s7905_s27, %s7905_s27 }
  0x13   :  { %p7912_p8 = por %p7911_p7, %p7910_p6 }
  0x15   :  { %p7913_p9 = pnand %p7912_p8, %p7906_p5 }
  0x17   :  { %7916 = shalt.err (!%p7913_p9)
}
  0x18   :  { %s7975_s28 = smov 1024   ;;  %s7976_s29 = smov 64  }
  0x19   :  { %26 = dma.hbm_to_vmem [thread:$0]  %s8399_s1, 393216, %s21_s26, [#allocation5], %s7975_s28, %s7975_s28, %s7976_s29  }
  0x1a   :  { %s7977_s7 = smov [#allocation8]   ;;  %s7978_s9 = smov [#allocation9]  }
  0x1b   :  { %s44_s8 = sshll.u32 %s7977_s7, 4  ;;  %s57_s2 = sshll.u32 %s7978_s9, 4  ;;  %s45_s8 = int_to_ptr.vmem [resolvable:$true] %s44_s8  ;;  %s58_s2 = int_to_ptr.vmem [resolvable:$true] %s57_s2 }
  0x1c   :  { %s7925_s10 = scalar_lea.vmem %s45_s8, 4096  ;;  %p7930_p11 = scmp.lt.s32.totalorder %s45_s8, %s45_s8 }
  0x1d   :  { %p7926_p10 = scmp.ne.s32.totalorder %s45_s8, %s7925_s10  ;;  %p7931_p12 = scmp.lt.s32.totalorder %s7925_s10, %s7925_s10 }
  0x1f   :  { %p7932_p13 = por %p7931_p12, %p7930_p11 }
  0x21   :  { %p7933_p0 = pnand %p7932_p13, %p7926_p10 }
  0x23   :  { %7936 = shalt.err (!%p7933_p0)
}
  0x24   :  { %50 = dma.hbm_to_vmem [thread:$0]  %s8401_s3, 4096, %s45_s8, [#allocation7], %s7972_s21, %s7972_s21, %s7973_s22  }
  0x25   :  { %s7945_s1 = scalar_lea.vmem %s58_s2, 16  ;;  %s7949_s13 = scalar_lea.vmem %s58_s2, 32 }
  0x26   :  { %p7946_p1 = scmp.ne.s32.totalorder %s58_s2, %s7945_s1  ;;  %p7950_p2 = scmp.lt.s32.totalorder %s58_s2, %s58_s2 }
  0x27   :  { %p7951_p3 = scmp.lt.s32.totalorder %s7949_s13, %s7945_s1 }
  0x29   :  { %p7952_p4 = por %p7951_p3, %p7950_p2 }
  0x2b   :  { %p7953_p5 = pnand %p7952_p4, %p7946_p1 }
  0x2d   :  { %7956 = shalt.err (!%p7953_p5)
}
  0x2e   :  { %60 = dma.hbm_to_vmem [thread:$0]  %s8402_s4, 16, %s58_s2, [#allocation10]  }
  0x2f   :  { %7961 = dma.done.wait [#allocation5], 393216  }
  0x30   :  { %7962 = vsyncadd [#allocation5], 4294574080 }
  0x31   :  { %7963 = dma.done.wait [#allocation7], 4864  }
  0x32   :  { %7964 = vsyncadd [#allocation7], 4294962432 }
  0x33   :  { %7965 = dma.done.wait [#allocation10], 16  }
  0x34   :  { %7966 = vsyncadd [#allocation10], 4294967280  ;;  %v7979_v0 = vmov 0.0   ;;  %s8028_s3 = smov 0  }
  0x35   :  { %73 = vst [vmem:[#allocation2] sm:$0xf] %v7979_v0  ;;  %74 = vst [vmem:[#allocation2 + $0x4] sm:$0xf] %v7979_v0 }
  0x36   :  { %75 = vst [vmem:[#allocation2 + $0x8] sm:$0xf] %v7979_v0  ;;  %76 = vst [vmem:[#allocation2 + $0xc] sm:$0xf] %v7979_v0 }
  0x37   :  { %77 = vst [vmem:[#allocation2 + $0x10] sm:$0xf] %v7979_v0  ;;  %78 = vst [vmem:[#allocation2 + $0x14] sm:$0xf] %v7979_v0 }
  0x38   :  { %79 = vst [vmem:[#allocation3] sm:$0xf] %v7979_v0  ;;  %80 = vst [vmem:[#allocation3 + $0x4] sm:$0xf] %v7979_v0 }
  0x39   :  { %81 = vst [vmem:[#allocation3 + $0x8] sm:$0xf] %v7979_v0  ;;  %82 = vst [vmem:[#allocation3 + $0xc] sm:$0xf] %v7979_v0 }
  0x3a   :  { %83 = vst [vmem:[#allocation3 + $0x10] sm:$0xf] %v7979_v0  ;;  %84 = vst [vmem:[#allocation3 + $0x14] sm:$0xf] %v7979_v0 }
  0x3b LB: > { %v240_v1 = vld [vmem:[#allocation4 + $0x3c8] sm:$0xff]  ;;  %v239_v3 = vld [vmem:[#allocation4 + $0x3c0] sm:$0xff]  ;;  %s7625_s4 = sshll.u32 %s7969_s3, 2  ;;  %s7561_s19 = sshll.u32 %s7969_s3, 1  ;;  %s7969_s3 = sphi %s8028_s3, %s90_s3  }
  0x3c   : > { %v496_v2 = vld [vmem:[#allocation4 + $0xbc8] sm:$0xff]  ;;  %673 = vmatprep.subr.mxu0 %v240_v1  ;;  %v495_v4 = vld [vmem:[#allocation4 + $0xbc0] sm:$0xff]  ;;  %s8037_s18 = scalar_lea.vmem %s8398_s0, %s7625_s4  ;;  %s7543_s22 = scalar_lea.vmem %s8403_s5, %s7561_s19 }
  0x3d   : > { %744 = vmatprep.subr.mxu1 %v496_v2  ;;  %v232_v5 = vld [vmem:[#allocation4 + $0x388] sm:$0xff]  ;;  %674 = vmatpush1.msra.mxu0 %v239_v3  ;;  %v231_v7 = vld [vmem:[#allocation4 + $0x380] sm:$0xff]  ;;  %s90_s3 = sadd.s32 1, %s7969_s3  }
  0x3e   : > { %v488_v6 = vld [vmem:[#allocation4 + $0xb88] sm:$0xff]  ;;  %745 = vmatpush1.msra.mxu1 %v495_v4  ;;  %v487_v8 = vld [vmem:[#allocation4 + $0xb80] sm:$0xff]  ;;  %675 = vmatprep.subr.mxu0 %v232_v5  ;;  %p87_p6 = scmp.ge.s32.totalorder %s90_s3, 8  }
  0x3f   : > { %v224_v9 = vld [vmem:[#allocation4 + $0x348] sm:$0xff]  ;;  %746 = vmatprep.subr.mxu1 %v488_v6  ;;  %v223_v11 = vld [vmem:[#allocation4 + $0x340] sm:$0xff]  ;;  %676 = vmatpush1.msra.mxu0 %v231_v7 }
  0x40   : > { %v480_v10 = vld [vmem:[#allocation4 + $0xb48] sm:$0xff]  ;;  %v479_v12 = vld [vmem:[#allocation4 + $0xb40] sm:$0xff]  ;;  %747 = vmatpush1.msra.mxu1 %v487_v8  ;;  %677 = vmatprep.subr.mxu0 %v224_v9 }
  0x41   : > { %v216_v13 = vld [vmem:[#allocation4 + $0x308] sm:$0xff]  ;;  %748 = vmatprep.subr.mxu1 %v480_v10  ;;  %v215_v15 = vld [vmem:[#allocation4 + $0x300] sm:$0xff]  ;;  %678 = vmatpush1.msra.mxu0 %v223_v11 }
  0x42   : > { %v472_v14 = vld [vmem:[#allocation4 + $0xb08] sm:$0xff]  ;;  %v471_v16 = vld [vmem:[#allocation4 + $0xb00] sm:$0xff]  ;;  %749 = vmatpush1.msra.mxu1 %v479_v12  ;;  %679 = vmatprep.subr.mxu0 %v216_v13 }
  0x43   : > { %v208_v17 = vld [vmem:[#allocation4 + $0x2c8] sm:$0xff]  ;;  %750 = vmatprep.subr.mxu1 %v472_v14  ;;  %v207_v19 = vld [vmem:[#allocation4 + $0x2c0] sm:$0xff]  ;;  %680 = vmatpush1.msra.mxu0 %v215_v15 }
  0x44   : > { %v464_v18 = vld [vmem:[#allocation4 + $0xac8] sm:$0xff]  ;;  %v463_v20 = vld [vmem:[#allocation4 + $0xac0] sm:$0xff]  ;;  %751 = vmatpush1.msra.mxu1 %v471_v16  ;;  %681 = vmatprep.subr.mxu0 %v208_v17 }
  0x45   : > { %v200_v21 = vld [vmem:[#allocation4 + $0x288] sm:$0xff]  ;;  %752 = vmatprep.subr.mxu1 %v464_v18  ;;  %v199_v23 = vld [vmem:[#allocation4 + $0x280] sm:$0xff]  ;;  %682 = vmatpush1.msra.mxu0 %v207_v19 }
  0x46   : > { %v456_v22 = vld [vmem:[#allocation4 + $0xa88] sm:$0xff]  ;;  %v455_v24 = vld [vmem:[#allocation4 + $0xa80] sm:$0xff]  ;;  %753 = vmatpush1.msra.mxu1 %v463_v20  ;;  %683 = vmatprep.subr.mxu0 %v200_v21 }
  0x47   : > { %v192_v25 = vld [vmem:[#allocation4 + $0x248] sm:$0xff]  ;;  %754 = vmatprep.subr.mxu1 %v456_v22  ;;  %v191_v27 = vld [vmem:[#allocation4 + $0x240] sm:$0xff]  ;;  %684 = vmatpush1.msra.mxu0 %v199_v23 }
  0x48   : > { %v448_v26 = vld [vmem:[#allocation4 + $0xa48] sm:$0xff]  ;;  %v447_v28 = vld [vmem:[#allocation4 + $0xa40] sm:$0xff]  ;;  %755 = vmatpush1.msra.mxu1 %v455_v24  ;;  %685 = vmatprep.subr.mxu0 %v192_v25 }
  0x49   : > { %v184_v29 = vld [vmem:[#allocation4 + $0x208] sm:$0xff]  ;;  %756 = vmatprep.subr.mxu1 %v448_v26  ;;  %v183_v31 = vld [vmem:[#allocation4 + $0x200] sm:$0xff]  ;;  %686 = vmatpush1.msra.mxu0 %v191_v27 }
  0x4a   : > { %v440_v30 = vld [vmem:[#allocation4 + $0xa08] sm:$0xff]  ;;  %v439_v32 = vld [vmem:[#allocation4 + $0xa00] sm:$0xff]  ;;  %757 = vmatpush1.msra.mxu1 %v447_v28  ;;  %687 = vmatprep.subr.mxu0 %v184_v29 }
  0x4b   : > { %v176_v33 = vld [vmem:[#allocation4 + $0x1c8] sm:$0xff]  ;;  %758 = vmatprep.subr.mxu1 %v440_v30  ;;  %v175_v35 = vld [vmem:[#allocation4 + $0x1c0] sm:$0xff]  ;;  %688 = vmatpush1.msra.mxu0 %v183_v31 }
  0x4c   : > { %v432_v34 = vld [vmem:[#allocation4 + $0x9c8] sm:$0xff]  ;;  %v431_v36 = vld [vmem:[#allocation4 + $0x9c0] sm:$0xff]  ;;  %759 = vmatpush1.msra.mxu1 %v439_v32  ;;  %689 = vmatprep.subr.mxu0 %v176_v33 }
  0x4d   : > { %v168_v37 = vld [vmem:[#allocation4 + $0x188] sm:$0xff]  ;;  %760 = vmatprep.subr.mxu1 %v432_v34  ;;  %v167_v39 = vld [vmem:[#allocation4 + $0x180] sm:$0xff]  ;;  %690 = vmatpush1.msra.mxu0 %v175_v35 }
  0x4e   : > { %v424_v38 = vld [vmem:[#allocation4 + $0x988] sm:$0xff]  ;;  %v423_v40 = vld [vmem:[#allocation4 + $0x980] sm:$0xff]  ;;  %761 = vmatpush1.msra.mxu1 %v431_v36  ;;  %691 = vmatprep.subr.mxu0 %v168_v37 }
  0x4f   : > { %v160_v41 = vld [vmem:[#allocation4 + $0x148] sm:$0xff]  ;;  %762 = vmatprep.subr.mxu1 %v424_v38  ;;  %v159_v43 = vld [vmem:[#allocation4 + $0x140] sm:$0xff]  ;;  %692 = vmatpush1.msra.mxu0 %v167_v39 }
  0x50   : > { %v416_v42 = vld [vmem:[#allocation4 + $0x948] sm:$0xff]  ;;  %v415_v44 = vld [vmem:[#allocation4 + $0x940] sm:$0xff]  ;;  %763 = vmatpush1.msra.mxu1 %v423_v40  ;;  %693 = vmatprep.subr.mxu0 %v160_v41 }
  0x51   : > { %v152_v45 = vld [vmem:[#allocation4 + $0x108] sm:$0xff]  ;;  %764 = vmatprep.subr.mxu1 %v416_v42  ;;  %v151_v47 = vld [vmem:[#allocation4 + $0x100] sm:$0xff]  ;;  %694 = vmatpush1.msra.mxu0 %v159_v43 }
  0x52   : > { %v408_v46 = vld [vmem:[#allocation4 + $0x908] sm:$0xff]  ;;  %v407_v48 = vld [vmem:[#allocation4 + $0x900] sm:$0xff]  ;;  %765 = vmatpush1.msra.mxu1 %v415_v44  ;;  %695 = vmatprep.subr.mxu0 %v152_v45 }
  0x53   : > { %v144_v49 = vld [vmem:[#allocation4 + $0xc8] sm:$0xff]  ;;  %766 = vmatprep.subr.mxu1 %v408_v46  ;;  %v143_v51 = vld [vmem:[#allocation4 + $0xc0] sm:$0xff]  ;;  %696 = vmatpush1.msra.mxu0 %v151_v47 }
  0x54   : > { %v400_v50 = vld [vmem:[#allocation4 + $0x8c8] sm:$0xff]  ;;  %v399_v52 = vld [vmem:[#allocation4 + $0x8c0] sm:$0xff]  ;;  %767 = vmatpush1.msra.mxu1 %v407_v48  ;;  %697 = vmatprep.subr.mxu0 %v144_v49 }
  0x55   : > { %v136_v53 = vld [vmem:[#allocation4 + $0x88] sm:$0xff]  ;;  %768 = vmatprep.subr.mxu1 %v400_v50  ;;  %v135_v55 = vld [vmem:[#allocation4 + $0x80] sm:$0xff]  ;;  %698 = vmatpush1.msra.mxu0 %v143_v51 }
  0x56   : > { %v392_v54 = vld [vmem:[#allocation4 + $0x888] sm:$0xff]  ;;  %v391_v56 = vld [vmem:[#allocation4 + $0x880] sm:$0xff]  ;;  %769 = vmatpush1.msra.mxu1 %v399_v52  ;;  %699 = vmatprep.subr.mxu0 %v136_v53 }
  0x57   : > { %v128_v57 = vld [vmem:[#allocation4 + $0x48] sm:$0xff]  ;;  %770 = vmatprep.subr.mxu1 %v392_v54  ;;  %v127_v59 = vld [vmem:[#allocation4 + $0x40] sm:$0xff]  ;;  %700 = vmatpush1.msra.mxu0 %v135_v55 }
  0x58   : > { %v384_v58 = vld [vmem:[#allocation4 + $0x848] sm:$0xff]  ;;  %v383_v60 = vld [vmem:[#allocation4 + $0x840] sm:$0xff]  ;;  %771 = vmatpush1.msra.mxu1 %v391_v56  ;;  %701 = vmatprep.subr.mxu0 %v128_v57  ;;  %v8040_v57 = vld.sshfl [vmem:[%s8037_s18] sm:$0x33 pattern:$0x76325410] }
  0x59   : > { %v120_v61 = vld [vmem:[#allocation4 + $0x8] sm:$0xff]  ;;  %772 = vmatprep.subr.mxu1 %v384_v58  ;;  %v119_v63 = vld [vmem:[#allocation4] sm:$0xff]  ;;  %702 = vmatpush1.msra.mxu0 %v127_v59 }
  0x5a   : > { %v376_v62 = vld [vmem:[#allocation4 + $0x808] sm:$0xff]  ;;  %v375_v0 = vld [vmem:[#allocation4 + $0x800] sm:$0xff]  ;;  %773 = vmatpush1.msra.mxu1 %v383_v60  ;;  %703 = vmatprep.subr.mxu0 %v120_v61 }
  0x5b   : > { %v368_v1 = vld [vmem:[#allocation4 + $0x7c8] sm:$0xff]  ;;  %774 = vmatprep.subr.mxu1 %v376_v62  ;;  %v367_v3 = vld [vmem:[#allocation4 + $0x7c0] sm:$0xff]  ;;  %704 = vmatpush1.msra.mxu0 %v119_v63  ;;  %v8042_v62 = vld.sshfl [vmem:[#allocation2] sm:$0x33 pattern:$0x76325410] }
  0x5c   : > { %v624_v2 = vld [vmem:[#allocation4 + $0xfc8] sm:$0xff]  ;;  %v623_v4 = vld [vmem:[#allocation4 + $0xfc0] sm:$0xff]  ;;  %775 = vmatpush1.msra.mxu1 %v375_v0  ;;  %705 = vmatprep.subr.mxu0 %v368_v1  ;;  %v8046_v1 = vcombine.high %v8040_v57, %v8040_v57 }
  0x5d   : > { %v360_v5 = vld [vmem:[#allocation4 + $0x788] sm:$0xff]  ;;  %776 = vmatprep.subr.mxu1 %v624_v2  ;;  %v359_v7 = vld [vmem:[#allocation4 + $0x780] sm:$0xff]  ;;  %706 = vmatpush2.msra.mxu0 %v367_v3 }
  0x5e   : > { %v616_v6 = vld [vmem:[#allocation4 + $0xf88] sm:$0xff]  ;;  %v615_v8 = vld [vmem:[#allocation4 + $0xf80] sm:$0xff]  ;;  %777 = vmatpush2.msra.mxu1 %v623_v4  ;;  %707 = vmatprep.subr.mxu0 %v360_v5  ;;  %v8050_v4 = vcombine.high %v8042_v62, %v8042_v62  ;;  %v242_v5 = vld [vmem:[#allocation4 + $0x3d8] sm:$0xff] }
  0x5f   : > { %v352_v9 = vld [vmem:[#allocation4 + $0x748] sm:$0xff]  ;;  %778 = vmatprep.subr.mxu1 %v616_v6  ;;  %v351_v11 = vld [vmem:[#allocation4 + $0x740] sm:$0xff]  ;;  %708 = vmatpush2.msra.mxu0 %v359_v7  ;;  %v498_v6 = vld [vmem:[#allocation4 + $0xbd8] sm:$0xff] }
  0x60   : > { %v608_v10 = vld [vmem:[#allocation4 + $0xf48] sm:$0xff]  ;;  %v607_v12 = vld [vmem:[#allocation4 + $0xf40] sm:$0xff]  ;;  %779 = vmatpush2.msra.mxu1 %v615_v8  ;;  %709 = vmatprep.subr.mxu0 %v352_v9  ;;  %v241_v7 = vld [vmem:[#allocation4 + $0x3d0] sm:$0xff] }
  0x61   : > { %v344_v13 = vld [vmem:[#allocation4 + $0x708] sm:$0xff]  ;;  %780 = vmatprep.subr.mxu1 %v608_v10  ;;  %v343_v15 = vld [vmem:[#allocation4 + $0x700] sm:$0xff]  ;;  %710 = vmatpush2.msra.mxu0 %v351_v11  ;;  %v497_v8 = vld [vmem:[#allocation4 + $0xbd0] sm:$0xff] }
  0x62   : > { %v600_v14 = vld [vmem:[#allocation4 + $0xf08] sm:$0xff]  ;;  %v599_v16 = vld [vmem:[#allocation4 + $0xf00] sm:$0xff]  ;;  %781 = vmatpush2.msra.mxu1 %v607_v12  ;;  %711 = vmatprep.subr.mxu0 %v344_v13  ;;  %v234_v9 = vld [vmem:[#allocation4 + $0x398] sm:$0xff] }
  0x63   : > { %v336_v17 = vld [vmem:[#allocation4 + $0x6c8] sm:$0xff]  ;;  %782 = vmatprep.subr.mxu1 %v600_v14  ;;  %v335_v19 = vld [vmem:[#allocation4 + $0x6c0] sm:$0xff]  ;;  %712 = vmatpush2.msra.mxu0 %v343_v15  ;;  %v490_v10 = vld [vmem:[#allocation4 + $0xb98] sm:$0xff] }
  0x64   : > { %v592_v18 = vld [vmem:[#allocation4 + $0xec8] sm:$0xff]  ;;  %v591_v20 = vld [vmem:[#allocation4 + $0xec0] sm:$0xff]  ;;  %783 = vmatpush2.msra.mxu1 %v599_v16  ;;  %713 = vmatprep.subr.mxu0 %v336_v17  ;;  %v233_v11 = vld [vmem:[#allocation4 + $0x390] sm:$0xff] }
  0x65   : > { %v328_v21 = vld [vmem:[#allocation4 + $0x688] sm:$0xff]  ;;  %784 = vmatprep.subr.mxu1 %v592_v18  ;;  %v327_v23 = vld [vmem:[#allocation4 + $0x680] sm:$0xff]  ;;  %714 = vmatpush2.msra.mxu0 %v335_v19  ;;  %v489_v12 = vld [vmem:[#allocation4 + $0xb90] sm:$0xff] }
  0x66   : > { %v584_v22 = vld [vmem:[#allocation4 + $0xe88] sm:$0xff]  ;;  %v583_v24 = vld [vmem:[#allocation4 + $0xe80] sm:$0xff]  ;;  %785 = vmatpush2.msra.mxu1 %v591_v20  ;;  %715 = vmatprep.subr.mxu0 %v328_v21  ;;  %v226_v13 = vld [vmem:[#allocation4 + $0x358] sm:$0xff] }
  0x67   : > { %v320_v25 = vld [vmem:[#allocation4 + $0x648] sm:$0xff]  ;;  %786 = vmatprep.subr.mxu1 %v584_v22  ;;  %v319_v27 = vld [vmem:[#allocation4 + $0x640] sm:$0xff]  ;;  %716 = vmatpush2.msra.mxu0 %v327_v23  ;;  %v482_v14 = vld [vmem:[#allocation4 + $0xb58] sm:$0xff] }
  0x68   : > { %v576_v26 = vld [vmem:[#allocation4 + $0xe48] sm:$0xff]  ;;  %v575_v28 = vld [vmem:[#allocation4 + $0xe40] sm:$0xff]  ;;  %787 = vmatpush2.msra.mxu1 %v583_v24  ;;  %717 = vmatprep.subr.mxu0 %v320_v25  ;;  %v225_v15 = vld [vmem:[#allocation4 + $0x350] sm:$0xff] }
  0x69   : > { %v312_v29 = vld [vmem:[#allocation4 + $0x608] sm:$0xff]  ;;  %788 = vmatprep.subr.mxu1 %v576_v26  ;;  %v311_v31 = vld [vmem:[#allocation4 + $0x600] sm:$0xff]  ;;  %718 = vmatpush2.msra.mxu0 %v319_v27  ;;  %v481_v16 = vld [vmem:[#allocation4 + $0xb50] sm:$0xff] }
  0x6a   : > { %v568_v30 = vld [vmem:[#allocation4 + $0xe08] sm:$0xff]  ;;  %v567_v32 = vld [vmem:[#allocation4 + $0xe00] sm:$0xff]  ;;  %789 = vmatpush2.msra.mxu1 %v575_v28  ;;  %719 = vmatprep.subr.mxu0 %v312_v29  ;;  %v218_v17 = vld [vmem:[#allocation4 + $0x318] sm:$0xff] }
  0x6b   : > { %v304_v33 = vld [vmem:[#allocation4 + $0x5c8] sm:$0xff]  ;;  %790 = vmatprep.subr.mxu1 %v568_v30  ;;  %v303_v35 = vld [vmem:[#allocation4 + $0x5c0] sm:$0xff]  ;;  %720 = vmatpush2.msra.mxu0 %v311_v31  ;;  %v474_v18 = vld [vmem:[#allocation4 + $0xb18] sm:$0xff] }
  0x6c   : > { %v560_v34 = vld [vmem:[#allocation4 + $0xdc8] sm:$0xff]  ;;  %v559_v36 = vld [vmem:[#allocation4 + $0xdc0] sm:$0xff]  ;;  %791 = vmatpush2.msra.mxu1 %v567_v32  ;;  %721 = vmatprep.subr.mxu0 %v304_v33  ;;  %v217_v19 = vld [vmem:[#allocation4 + $0x310] sm:$0xff] }
  0x6d   : > { %v296_v37 = vld [vmem:[#allocation4 + $0x588] sm:$0xff]  ;;  %792 = vmatprep.subr.mxu1 %v560_v34  ;;  %v295_v39 = vld [vmem:[#allocation4 + $0x580] sm:$0xff]  ;;  %722 = vmatpush2.msra.mxu0 %v303_v35  ;;  %v473_v20 = vld [vmem:[#allocation4 + $0xb10] sm:$0xff] }
  0x6e   : > { %v552_v38 = vld [vmem:[#allocation4 + $0xd88] sm:$0xff]  ;;  %v551_v40 = vld [vmem:[#allocation4 + $0xd80] sm:$0xff]  ;;  %793 = vmatpush2.msra.mxu1 %v559_v36  ;;  %723 = vmatprep.subr.mxu0 %v296_v37  ;;  %v210_v21 = vld [vmem:[#allocation4 + $0x2d8] sm:$0xff] }
  0x6f   : > { %v288_v41 = vld [vmem:[#allocation4 + $0x548] sm:$0xff]  ;;  %794 = vmatprep.subr.mxu1 %v552_v38  ;;  %v287_v43 = vld [vmem:[#allocation4 + $0x540] sm:$0xff]  ;;  %724 = vmatpush2.msra.mxu0 %v295_v39  ;;  %v466_v22 = vld [vmem:[#allocation4 + $0xad8] sm:$0xff] }
  0x70   : > { %v544_v42 = vld [vmem:[#allocation4 + $0xd48] sm:$0xff]  ;;  %v543_v44 = vld [vmem:[#allocation4 + $0xd40] sm:$0xff]  ;;  %795 = vmatpush2.msra.mxu1 %v551_v40  ;;  %725 = vmatprep.subr.mxu0 %v288_v41  ;;  %v209_v23 = vld [vmem:[#allocation4 + $0x2d0] sm:$0xff] }
  0x71   : > { %v280_v45 = vld [vmem:[#allocation4 + $0x508] sm:$0xff]  ;;  %796 = vmatprep.subr.mxu1 %v544_v42  ;;  %v279_v47 = vld [vmem:[#allocation4 + $0x500] sm:$0xff]  ;;  %726 = vmatpush2.msra.mxu0 %v287_v43  ;;  %v465_v24 = vld [vmem:[#allocation4 + $0xad0] sm:$0xff] }
  0x72   : > { %v536_v46 = vld [vmem:[#allocation4 + $0xd08] sm:$0xff]  ;;  %v535_v48 = vld [vmem:[#allocation4 + $0xd00] sm:$0xff]  ;;  %797 = vmatpush2.msra.mxu1 %v543_v44  ;;  %727 = vmatprep.subr.mxu0 %v280_v45  ;;  %v202_v25 = vld [vmem:[#allocation4 + $0x298] sm:$0xff] }
  0x73   : > { %v272_v49 = vld [vmem:[#allocation4 + $0x4c8] sm:$0xff]  ;;  %798 = vmatprep.subr.mxu1 %v536_v46  ;;  %v271_v51 = vld [vmem:[#allocation4 + $0x4c0] sm:$0xff]  ;;  %728 = vmatpush2.msra.mxu0 %v279_v47  ;;  %v458_v26 = vld [vmem:[#allocation4 + $0xa98] sm:$0xff] }
  0x74   : > { %v528_v50 = vld [vmem:[#allocation4 + $0xcc8] sm:$0xff]  ;;  %v527_v52 = vld [vmem:[#allocation4 + $0xcc0] sm:$0xff]  ;;  %799 = vmatpush2.msra.mxu1 %v535_v48  ;;  %729 = vmatprep.subr.mxu0 %v272_v49  ;;  %v201_v27 = vld [vmem:[#allocation4 + $0x290] sm:$0xff] }
  0x75   : > { %v264_v53 = vld [vmem:[#allocation4 + $0x488] sm:$0xff]  ;;  %800 = vmatprep.subr.mxu1 %v528_v50  ;;  %v263_v55 = vld [vmem:[#allocation4 + $0x480] sm:$0xff]  ;;  %730 = vmatpush2.msra.mxu0 %v271_v51  ;;  %v457_v28 = vld [vmem:[#allocation4 + $0xa90] sm:$0xff] }
  0x76   : > { %v520_v54 = vld [vmem:[#allocation4 + $0xc88] sm:$0xff]  ;;  %v519_v56 = vld [vmem:[#allocation4 + $0xc80] sm:$0xff]  ;;  %801 = vmatpush2.msra.mxu1 %v527_v52  ;;  %731 = vmatprep.subr.mxu0 %v264_v53  ;;  %v194_v29 = vld [vmem:[#allocation4 + $0x258] sm:$0xff] }
  0x77   : > { %v256_v58 = vld [vmem:[#allocation4 + $0x448] sm:$0xff]  ;;  %802 = vmatprep.subr.mxu1 %v520_v54  ;;  %v255_v60 = vld [vmem:[#allocation4 + $0x440] sm:$0xff]  ;;  %732 = vmatpush2.msra.mxu0 %v263_v55  ;;  %v450_v30 = vld [vmem:[#allocation4 + $0xa58] sm:$0xff] }
  0x78   : > { %v512_v59 = vld [vmem:[#allocation4 + $0xc48] sm:$0xff]  ;;  %v511_v61 = vld [vmem:[#allocation4 + $0xc40] sm:$0xff]  ;;  %803 = vmatpush2.msra.mxu1 %v519_v56  ;;  %733 = vmatprep.subr.mxu0 %v256_v58  ;;  %v193_v31 = vld [vmem:[#allocation4 + $0x250] sm:$0xff] }
  0x79   : > { %v248_v63 = vld [vmem:[#allocation4 + $0x408] sm:$0xff]  ;;  %804 = vmatprep.subr.mxu1 %v512_v59  ;;  %v247_v2 = vld [vmem:[#allocation4 + $0x400] sm:$0xff]  ;;  %734 = vmatpush2.msra.mxu0 %v255_v60  ;;  %v449_v32 = vld [vmem:[#allocation4 + $0xa50] sm:$0xff] }
  0x7a   : > { %v504_v0 = vld [vmem:[#allocation4 + $0xc08] sm:$0xff]  ;;  %805 = vmatpush2.msra.mxu1 %v511_v61  ;;  %v503_v3 = vld [vmem:[#allocation4 + $0xc00] sm:$0xff]  ;;  %735 = vmatprep.subr.mxu0 %v248_v63  ;;  %v186_v33 = vld [vmem:[#allocation4 + $0x218] sm:$0xff] }
  0x7b   : > { %806 = vmatprep.subr.mxu1 %v504_v0  ;;  %736 = vmatpush2.msra.mxu0 %v247_v2  ;;  %v442_v34 = vld [vmem:[#allocation4 + $0xa18] sm:$0xff]  ;;  %v185_v35 = vld [vmem:[#allocation4 + $0x210] sm:$0xff] }
  0x7c   : > { %737 = vmatprep.mubr.f32.mxu0 %v8046_v1  ;;  %807 = vmatpush2.msra.mxu1 %v503_v3  ;;  %v441_v36 = vld [vmem:[#allocation4 + $0xa10] sm:$0xff]  ;;  %v178_v37 = vld [vmem:[#allocation4 + $0x1d8] sm:$0xff] }
  0x7d   : > { %738 = vmatmul.mubr.f32.vlgmr.msra.gmra.mxu0 %v8040_v57  ;;  %808 = vmatprep.mubr.f32.mxu1 %v8050_v4  ;;  %v434_v38 = vld [vmem:[#allocation4 + $0x9d8] sm:$0xff]  ;;  %v177_v39 = vld [vmem:[#allocation4 + $0x1d0] sm:$0xff] }
  0x7e   : > { %815 = vmatprep.subr.mxu0 %v242_v5  ;;  %886 = vmatprep.subr.mxu1 %v498_v6  ;;  %v433_v40 = vld [vmem:[#allocation4 + $0x9d0] sm:$0xff]  ;;  %v170_v41 = vld [vmem:[#allocation4 + $0x198] sm:$0xff] }
  0x7f   : > { %809 = vmatmul.mubr.f32.vlgmr.msra.gmra.mxu1 %v8042_v62  ;;  %816 = vmatpush1.msra.mxu0 %v241_v7  ;;  %v426_v42 = vld [vmem:[#allocation4 + $0x998] sm:$0xff]  ;;  %v169_v43 = vld [vmem:[#allocation4 + $0x190] sm:$0xff] }
  0x80   : > { %887 = vmatpush1.msra.mxu1 %v497_v8  ;;  %817 = vmatprep.subr.mxu0 %v234_v9  ;;  %v425_v44 = vld [vmem:[#allocation4 + $0x990] sm:$0xff]  ;;  %v162_v45 = vld [vmem:[#allocation4 + $0x158] sm:$0xff] }
  0x81   : > { %888 = vmatprep.subr.mxu1 %v490_v10  ;;  %818 = vmatpush1.msra.mxu0 %v233_v11  ;;  %v418_v46 = vld [vmem:[#allocation4 + $0x958] sm:$0xff]  ;;  %v161_v47 = vld [vmem:[#allocation4 + $0x150] sm:$0xff] }
  0x82   : > { %889 = vmatpush1.msra.mxu1 %v489_v12  ;;  %819 = vmatprep.subr.mxu0 %v226_v13  ;;  %v417_v48 = vld [vmem:[#allocation4 + $0x950] sm:$0xff]  ;;  %v154_v49 = vld [vmem:[#allocation4 + $0x118] sm:$0xff] }
  0x83   : > { %890 = vmatprep.subr.mxu1 %v482_v14  ;;  %820 = vmatpush1.msra.mxu0 %v225_v15  ;;  %v410_v50 = vld [vmem:[#allocation4 + $0x918] sm:$0xff]  ;;  %v153_v51 = vld [vmem:[#allocation4 + $0x110] sm:$0xff] }
  0x84   : > { %891 = vmatpush1.msra.mxu1 %v481_v16  ;;  %821 = vmatprep.subr.mxu0 %v218_v17  ;;  %v409_v52 = vld [vmem:[#allocation4 + $0x910] sm:$0xff]  ;;  %v146_v53 = vld [vmem:[#allocation4 + $0xd8] sm:$0xff] }
  0x85   : > { %892 = vmatprep.subr.mxu1 %v474_v18  ;;  %822 = vmatpush1.msra.mxu0 %v217_v19  ;;  %v402_v54 = vld [vmem:[#allocation4 + $0x8d8] sm:$0xff]  ;;  %v145_v55 = vld [vmem:[#allocation4 + $0xd0] sm:$0xff] }
  0x86   : > { %893 = vmatpush1.msra.mxu1 %v473_v20  ;;  %823 = vmatprep.subr.mxu0 %v210_v21  ;;  %v401_v56 = vld [vmem:[#allocation4 + $0x8d0] sm:$0xff]  ;;  %v138_v58 = vld [vmem:[#allocation4 + $0x98] sm:$0xff] }
  0x87   : > { %894 = vmatprep.subr.mxu1 %v466_v22  ;;  %824 = vmatpush1.msra.mxu0 %v209_v23  ;;  %v394_v59 = vld [vmem:[#allocation4 + $0x898] sm:$0xff]  ;;  %v137_v60 = vld [vmem:[#allocation4 + $0x90] sm:$0xff] }
  0x88   : > { %895 = vmatpush1.msra.mxu1 %v465_v24  ;;  %825 = vmatprep.subr.mxu0 %v202_v25  ;;  %v393_v61 = vld [vmem:[#allocation4 + $0x890] sm:$0xff]  ;;  %v130_v63 = vld [vmem:[#allocation4 + $0x58] sm:$0xff] }
  0x89   : > { %896 = vmatprep.subr.mxu1 %v458_v26  ;;  %826 = vmatpush1.msra.mxu0 %v201_v27  ;;  %v386_v0 = vld [vmem:[#allocation4 + $0x858] sm:$0xff]  ;;  %v129_v2 = vld [vmem:[#allocation4 + $0x50] sm:$0xff] }
  0x8a   : > { %897 = vmatpush1.msra.mxu1 %v457_v28  ;;  %827 = vmatprep.subr.mxu0 %v194_v29  ;;  %v385_v3 = vld [vmem:[#allocation4 + $0x850] sm:$0xff]  ;;  %v122_v5 = vld [vmem:[#allocation4 + $0x18] sm:$0xff] }
  0x8b   : > { %898 = vmatprep.subr.mxu1 %v450_v30  ;;  %828 = vmatpush1.msra.mxu0 %v193_v31  ;;  %v378_v6 = vld [vmem:[#allocation4 + $0x818] sm:$0xff]  ;;  %v121_v7 = vld [vmem:[#allocation4 + $0x10] sm:$0xff] }
  0x8c   : > { %899 = vmatpush1.msra.mxu1 %v449_v32  ;;  %829 = vmatprep.subr.mxu0 %v186_v33  ;;  %v377_v8 = vld [vmem:[#allocation4 + $0x810] sm:$0xff]  ;;  %v370_v9 = vld [vmem:[#allocation4 + $0x7d8] sm:$0xff] }
  0x8d   : > { %900 = vmatprep.subr.mxu1 %v442_v34  ;;  %830 = vmatpush1.msra.mxu0 %v185_v35  ;;  %v626_v10 = vld [vmem:[#allocation4 + $0xfd8] sm:$0xff]  ;;  %v369_v11 = vld [vmem:[#allocation4 + $0x7d0] sm:$0xff] }
  0x8e   : > { %901 = vmatpush1.msra.mxu1 %v441_v36  ;;  %831 = vmatprep.subr.mxu0 %v178_v37  ;;  %v625_v12 = vld [vmem:[#allocation4 + $0xfd0] sm:$0xff]  ;;  %v362_v13 = vld [vmem:[#allocation4 + $0x798] sm:$0xff] }
  0x8f   : > { %902 = vmatprep.subr.mxu1 %v434_v38  ;;  %832 = vmatpush1.msra.mxu0 %v177_v39  ;;  %v618_v14 = vld [vmem:[#allocation4 + $0xf98] sm:$0xff]  ;;  %v361_v15 = vld [vmem:[#allocation4 + $0x790] sm:$0xff] }
  0x90   : > { %903 = vmatpush1.msra.mxu1 %v433_v40  ;;  %833 = vmatprep.subr.mxu0 %v170_v41  ;;  %v617_v16 = vld [vmem:[#allocation4 + $0xf90] sm:$0xff]  ;;  %v354_v17 = vld [vmem:[#allocation4 + $0x758] sm:$0xff] }
  0x91   : > { %904 = vmatprep.subr.mxu1 %v426_v42  ;;  %834 = vmatpush1.msra.mxu0 %v169_v43  ;;  %v610_v18 = vld [vmem:[#allocation4 + $0xf58] sm:$0xff]  ;;  %v353_v19 = vld [vmem:[#allocation4 + $0x750] sm:$0xff] }
  0x92   : > { %905 = vmatpush1.msra.mxu1 %v425_v44  ;;  %835 = vmatprep.subr.mxu0 %v162_v45  ;;  %v609_v20 = vld [vmem:[#allocation4 + $0xf50] sm:$0xff]  ;;  %v346_v21 = vld [vmem:[#allocation4 + $0x718] sm:$0xff] }
  0x93   : > { %906 = vmatprep.subr.mxu1 %v418_v46  ;;  %836 = vmatpush1.msra.mxu0 %v161_v47  ;;  %v602_v22 = vld [vmem:[#allocation4 + $0xf18] sm:$0xff]  ;;  %v345_v23 = vld [vmem:[#allocation4 + $0x710] sm:$0xff] }
  0x94   : > { %907 = vmatpush1.msra.mxu1 %v417_v48  ;;  %837 = vmatprep.subr.mxu0 %v154_v49  ;;  %v601_v24 = vld [vmem:[#allocation4 + $0xf10] sm:$0xff]  ;;  %v338_v25 = vld [vmem:[#allocation4 + $0x6d8] sm:$0xff] }
  0x95   : > { %908 = vmatprep.subr.mxu1 %v410_v50  ;;  %838 = vmatpush1.msra.mxu0 %v153_v51  ;;  %v594_v26 = vld [vmem:[#allocation4 + $0xed8] sm:$0xff]  ;;  %v337_v27 = vld [vmem:[#allocation4 + $0x6d0] sm:$0xff] }
  0x96   : > { %909 = vmatpush1.msra.mxu1 %v409_v52  ;;  %839 = vmatprep.subr.mxu0 %v146_v53  ;;  %v593_v28 = vld [vmem:[#allocation4 + $0xed0] sm:$0xff]  ;;  %v330_v29 = vld [vmem:[#allocation4 + $0x698] sm:$0xff] }
  0x97   : > { %910 = vmatprep.subr.mxu1 %v402_v54  ;;  %840 = vmatpush1.msra.mxu0 %v145_v55  ;;  %v586_v30 = vld [vmem:[#allocation4 + $0xe98] sm:$0xff]  ;;  %v329_v31 = vld [vmem:[#allocation4 + $0x690] sm:$0xff] }
  0x98   : > { %911 = vmatpush1.msra.mxu1 %v401_v56  ;;  %841 = vmatprep.subr.mxu0 %v138_v58  ;;  %v585_v32 = vld [vmem:[#allocation4 + $0xe90] sm:$0xff]  ;;  %v322_v33 = vld [vmem:[#allocation4 + $0x658] sm:$0xff] }
  0x99   : > { %912 = vmatprep.subr.mxu1 %v394_v59  ;;  %842 = vmatpush1.msra.mxu0 %v137_v60  ;;  %v578_v34 = vld [vmem:[#allocation4 + $0xe58] sm:$0xff]  ;;  %v321_v35 = vld [vmem:[#allocation4 + $0x650] sm:$0xff] }
  0x9a   : > { %913 = vmatpush1.msra.mxu1 %v393_v61  ;;  %843 = vmatprep.subr.mxu0 %v130_v63  ;;  %v577_v36 = vld [vmem:[#allocation4 + $0xe50] sm:$0xff]  ;;  %v314_v37 = vld [vmem:[#allocation4 + $0x618] sm:$0xff] }
  0x9b   : > { %914 = vmatprep.subr.mxu1 %v386_v0  ;;  %844 = vmatpush1.msra.mxu0 %v129_v2  ;;  %v570_v38 = vld [vmem:[#allocation4 + $0xe18] sm:$0xff]  ;;  %v313_v39 = vld [vmem:[#allocation4 + $0x610] sm:$0xff] }
  0x9c   : > { %915 = vmatpush1.msra.mxu1 %v385_v3  ;;  %845 = vmatprep.subr.mxu0 %v122_v5  ;;  %v569_v40 = vld [vmem:[#allocation4 + $0xe10] sm:$0xff]  ;;  %v306_v41 = vld [vmem:[#allocation4 + $0x5d8] sm:$0xff] }
  0x9d   : > { %916 = vmatprep.subr.mxu1 %v378_v6  ;;  %846 = vmatpush1.msra.mxu0 %v121_v7  ;;  %v562_v42 = vld [vmem:[#allocation4 + $0xdd8] sm:$0xff]  ;;  %v305_v43 = vld [vmem:[#allocation4 + $0x5d0] sm:$0xff] }
  0x9e   : > { %917 = vmatpush1.msra.mxu1 %v377_v8  ;;  %847 = vmatprep.subr.mxu0 %v370_v9  ;;  %v561_v44 = vld [vmem:[#allocation4 + $0xdd0] sm:$0xff]  ;;  %v298_v45 = vld [vmem:[#allocation4 + $0x598] sm:$0xff] }
  0x9f   : > { %918 = vmatprep.subr.mxu1 %v626_v10  ;;  %848 = vmatpush2.msra.mxu0 %v369_v11  ;;  %v554_v46 = vld [vmem:[#allocation4 + $0xd98] sm:$0xff]  ;;  %v297_v47 = vld [vmem:[#allocation4 + $0x590] sm:$0xff] }
  0xa0   : > { %919 = vmatpush2.msra.mxu1 %v625_v12  ;;  %849 = vmatprep.subr.mxu0 %v362_v13  ;;  %v553_v48 = vld [vmem:[#allocation4 + $0xd90] sm:$0xff]  ;;  %v290_v49 = vld [vmem:[#allocation4 + $0x558] sm:$0xff]  ;;  %v244_v13 = vld [vmem:[#allocation4 + $0x3e8] sm:$0xff] }
  0xa1   : > { %920 = vmatprep.subr.mxu1 %v618_v14  ;;  %850 = vmatpush2.msra.mxu0 %v361_v15  ;;  %v546_v50 = vld [vmem:[#allocation4 + $0xd58] sm:$0xff]  ;;  %v289_v51 = vld [vmem:[#allocation4 + $0x550] sm:$0xff]  ;;  %v500_v14 = vld [vmem:[#allocation4 + $0xbe8] sm:$0xff] }
  0xa2   : > { %921 = vmatpush2.msra.mxu1 %v617_v16  ;;  %851 = vmatprep.subr.mxu0 %v354_v17  ;;  %v545_v52 = vld [vmem:[#allocation4 + $0xd50] sm:$0xff]  ;;  %v282_v53 = vld [vmem:[#allocation4 + $0x518] sm:$0xff]  ;;  %v243_v15 = vld [vmem:[#allocation4 + $0x3e0] sm:$0xff] }
  0xa3   : > { %922 = vmatprep.subr.mxu1 %v610_v18  ;;  %852 = vmatpush2.msra.mxu0 %v353_v19  ;;  %v538_v54 = vld [vmem:[#allocation4 + $0xd18] sm:$0xff]  ;;  %v281_v55 = vld [vmem:[#allocation4 + $0x510] sm:$0xff]  ;;  %v499_v16 = vld [vmem:[#allocation4 + $0xbe0] sm:$0xff] }
  0xa4   : > { %923 = vmatpush2.msra.mxu1 %v609_v20  ;;  %853 = vmatprep.subr.mxu0 %v346_v21  ;;  %v537_v56 = vld [vmem:[#allocation4 + $0xd10] sm:$0xff]  ;;  %v274_v58 = vld [vmem:[#allocation4 + $0x4d8] sm:$0xff]  ;;  %v236_v17 = vld [vmem:[#allocation4 + $0x3a8] sm:$0xff] }
  0xa5   : > { %924 = vmatprep.subr.mxu1 %v602_v22  ;;  %854 = vmatpush2.msra.mxu0 %v345_v23  ;;  %v530_v59 = vld [vmem:[#allocation4 + $0xcd8] sm:$0xff]  ;;  %v273_v60 = vld [vmem:[#allocation4 + $0x4d0] sm:$0xff]  ;;  %v492_v18 = vld [vmem:[#allocation4 + $0xba8] sm:$0xff] }
  0xa6   : > { %925 = vmatpush2.msra.mxu1 %v601_v24  ;;  %855 = vmatprep.subr.mxu0 %v338_v25  ;;  %v529_v61 = vld [vmem:[#allocation4 + $0xcd0] sm:$0xff]  ;;  %v266_v63 = vld [vmem:[#allocation4 + $0x498] sm:$0xff]  ;;  %v235_v19 = vld [vmem:[#allocation4 + $0x3a0] sm:$0xff] }
  0xa7   : > { %926 = vmatprep.subr.mxu1 %v594_v26  ;;  %856 = vmatpush2.msra.mxu0 %v337_v27  ;;  %v522_v0 = vld [vmem:[#allocation4 + $0xc98] sm:$0xff]  ;;  %v265_v2 = vld [vmem:[#allocation4 + $0x490] sm:$0xff]  ;;  %v491_v20 = vld [vmem:[#allocation4 + $0xba0] sm:$0xff] }
  0xa8   : > { %927 = vmatpush2.msra.mxu1 %v593_v28  ;;  %857 = vmatprep.subr.mxu0 %v330_v29  ;;  %v521_v3 = vld [vmem:[#allocation4 + $0xc90] sm:$0xff]  ;;  %v258_v5 = vld [vmem:[#allocation4 + $0x458] sm:$0xff]  ;;  %v228_v21 = vld [vmem:[#allocation4 + $0x368] sm:$0xff] }
  0xa9   : > { %928 = vmatprep.subr.mxu1 %v586_v30  ;;  %858 = vmatpush2.msra.mxu0 %v329_v31  ;;  %v514_v6 = vld [vmem:[#allocation4 + $0xc58] sm:$0xff]  ;;  %v257_v7 = vld [vmem:[#allocation4 + $0x450] sm:$0xff]  ;;  %v484_v22 = vld [vmem:[#allocation4 + $0xb68] sm:$0xff] }
  0xaa   : > { %929 = vmatpush2.msra.mxu1 %v585_v32  ;;  %859 = vmatprep.subr.mxu0 %v322_v33  ;;  %v513_v8 = vld [vmem:[#allocation4 + $0xc50] sm:$0xff]  ;;  %v250_v9 = vld [vmem:[#allocation4 + $0x418] sm:$0xff]  ;;  %v227_v23 = vld [vmem:[#allocation4 + $0x360] sm:$0xff] }
  0xab   : > { %930 = vmatprep.subr.mxu1 %v578_v34  ;;  %860 = vmatpush2.msra.mxu0 %v321_v35  ;;  %v506_v10 = vld [vmem:[#allocation4 + $0xc18] sm:$0xff]  ;;  %v249_v11 = vld [vmem:[#allocation4 + $0x410] sm:$0xff]  ;;  %v220_v24 = vld [vmem:[#allocation4 + $0x328] sm:$0xff] }
  0xac   : > { %931 = vmatpush2.msra.mxu1 %v577_v36  ;;  %861 = vmatprep.subr.mxu0 %v314_v37  ;;  %v505_v12 = vld [vmem:[#allocation4 + $0xc10] sm:$0xff]  ;;  %v476_v25 = vld [vmem:[#allocation4 + $0xb28] sm:$0xff]  ;;  %v219_v26 = vld [vmem:[#allocation4 + $0x320] sm:$0xff] }
  0xad   : > { %932 = vmatprep.subr.mxu1 %v570_v38  ;;  %862 = vmatpush2.msra.mxu0 %v313_v39  ;;  %v475_v27 = vld [vmem:[#allocation4 + $0xb20] sm:$0xff]  ;;  %v468_v28 = vld [vmem:[#allocation4 + $0xae8] sm:$0xff] }
  0xae   : > { %933 = vmatpush2.msra.mxu1 %v569_v40  ;;  %863 = vmatprep.subr.mxu0 %v306_v41  ;;  %v211_v29 = vld [vmem:[#allocation4 + $0x2e0] sm:$0xff]  ;;  %v204_v31 = vld [vmem:[#allocation4 + $0x2a8] sm:$0xff] }
  0xaf   : > { %934 = vmatprep.subr.mxu1 %v562_v42  ;;  %864 = vmatpush2.msra.mxu0 %v305_v43  ;;  %v467_v30 = vld [vmem:[#allocation4 + $0xae0] sm:$0xff]  ;;  %v460_v32 = vld [vmem:[#allocation4 + $0xaa8] sm:$0xff] }
  0xb0   : > { %935 = vmatpush2.msra.mxu1 %v561_v44  ;;  %865 = vmatprep.subr.mxu0 %v298_v45  ;;  %v203_v33 = vld [vmem:[#allocation4 + $0x2a0] sm:$0xff]  ;;  %v196_v35 = vld [vmem:[#allocation4 + $0x268] sm:$0xff] }
  0xb1   : > { %936 = vmatprep.subr.mxu1 %v554_v46  ;;  %866 = vmatpush2.msra.mxu0 %v297_v47  ;;  %v459_v34 = vld [vmem:[#allocation4 + $0xaa0] sm:$0xff]  ;;  %v452_v36 = vld [vmem:[#allocation4 + $0xa68] sm:$0xff] }
  0xb2   : > { %937 = vmatpush2.msra.mxu1 %v553_v48  ;;  %867 = vmatprep.subr.mxu0 %v290_v49  ;;  %v195_v37 = vld [vmem:[#allocation4 + $0x260] sm:$0xff]  ;;  %v188_v39 = vld [vmem:[#allocation4 + $0x228] sm:$0xff] }
  0xb3   : > { %938 = vmatprep.subr.mxu1 %v546_v50  ;;  %868 = vmatpush2.msra.mxu0 %v289_v51  ;;  %v451_v38 = vld [vmem:[#allocation4 + $0xa60] sm:$0xff]  ;;  %v444_v40 = vld [vmem:[#allocation4 + $0xa28] sm:$0xff] }
  0xb4   : > { %939 = vmatpush2.msra.mxu1 %v545_v52  ;;  %869 = vmatprep.subr.mxu0 %v282_v53  ;;  %v187_v41 = vld [vmem:[#allocation4 + $0x220] sm:$0xff]  ;;  %v180_v43 = vld [vmem:[#allocation4 + $0x1e8] sm:$0xff] }
  0xb5   : > { %940 = vmatprep.subr.mxu1 %v538_v54  ;;  %870 = vmatpush2.msra.mxu0 %v281_v55  ;;  %v443_v42 = vld [vmem:[#allocation4 + $0xa20] sm:$0xff]  ;;  %v436_v44 = vld [vmem:[#allocation4 + $0x9e8] sm:$0xff] }
  0xb6   : > { %941 = vmatpush2.msra.mxu1 %v537_v56  ;;  %871 = vmatprep.subr.mxu0 %v274_v58  ;;  %v179_v45 = vld [vmem:[#allocation4 + $0x1e0] sm:$0xff]  ;;  %v172_v47 = vld [vmem:[#allocation4 + $0x1a8] sm:$0xff] }
  0xb7   : > { %942 = vmatprep.subr.mxu1 %v530_v59  ;;  %872 = vmatpush2.msra.mxu0 %v273_v60  ;;  %v435_v46 = vld [vmem:[#allocation4 + $0x9e0] sm:$0xff]  ;;  %v428_v48 = vld [vmem:[#allocation4 + $0x9a8] sm:$0xff] }
  0xb8   : > { %943 = vmatpush2.msra.mxu1 %v529_v61  ;;  %873 = vmatprep.subr.mxu0 %v266_v63  ;;  %v171_v49 = vld [vmem:[#allocation4 + $0x1a0] sm:$0xff]  ;;  %v164_v51 = vld [vmem:[#allocation4 + $0x168] sm:$0xff] }
  0xb9   : > { %944 = vmatprep.subr.mxu1 %v522_v0  ;;  %874 = vmatpush2.msra.mxu0 %v265_v2  ;;  %v427_v50 = vld [vmem:[#allocation4 + $0x9a0] sm:$0xff]  ;;  %v420_v52 = vld [vmem:[#allocation4 + $0x968] sm:$0xff] }
  0xba   : > { %945 = vmatpush2.msra.mxu1 %v521_v3  ;;  %875 = vmatprep.subr.mxu0 %v258_v5  ;;  %v163_v53 = vld [vmem:[#allocation4 + $0x160] sm:$0xff]  ;;  %v156_v55 = vld [vmem:[#allocation4 + $0x128] sm:$0xff] }
  0xbb   : > { %946 = vmatprep.subr.mxu1 %v514_v6  ;;  %876 = vmatpush2.msra.mxu0 %v257_v7  ;;  %v419_v54 = vld [vmem:[#allocation4 + $0x960] sm:$0xff]  ;;  %v412_v56 = vld [vmem:[#allocation4 + $0x928] sm:$0xff] }
  0xbc   : > { %947 = vmatpush2.msra.mxu1 %v513_v8  ;;  %877 = vmatprep.subr.mxu0 %v250_v9  ;;  %v155_v58 = vld [vmem:[#allocation4 + $0x120] sm:$0xff]  ;;  %v148_v60 = vld [vmem:[#allocation4 + $0xe8] sm:$0xff] }
  0xbd   : > { %948 = vmatprep.subr.mxu1 %v506_v10  ;;  %878 = vmatpush2.msra.mxu0 %v249_v11  ;;  %v411_v59 = vld [vmem:[#allocation4 + $0x920] sm:$0xff]  ;;  %v404_v61 = vld [vmem:[#allocation4 + $0x8e8] sm:$0xff] }
  0xbe   : > { %879 = vmatprep.mubr.f32.mxu0 %v8046_v1  ;;  %949 = vmatpush2.msra.mxu1 %v505_v12  ;;  %v147_v63 = vld [vmem:[#allocation4 + $0xe0] sm:$0xff]  ;;  %v140_v2 = vld [vmem:[#allocation4 + $0xa8] sm:$0xff] }
  0xbf   : > { %880 = vmatmul.mubr.f32.vlgmr.msra.gmra.mxu0 %v8040_v57  ;;  %950 = vmatprep.mubr.f32.mxu1 %v8050_v4  ;;  %v483_v57 = vld [vmem:[#allocation4 + $0xb60] sm:$0xff]  ;;  %v396_v3 = vld [vmem:[#allocation4 + $0x8a8] sm:$0xff] }
  0xc0   : > { %957 = vmatprep.subr.mxu0 %v244_v13  ;;  %1028 = vmatprep.subr.mxu1 %v500_v14  ;;  %v403_v0 = vld [vmem:[#allocation4 + $0x8e0] sm:$0xff]  ;;  %v132_v7 = vld [vmem:[#allocation4 + $0x68] sm:$0xff] }
  0xc1   : > { %951 = vmatmul.mubr.f32.vlgmr.msra.gmra.mxu1 %v8042_v62  ;;  %958 = vmatpush1.msra.mxu0 %v243_v15  ;;  %v212_v62 = vld [vmem:[#allocation4 + $0x2e8] sm:$0xff]  ;;  %v139_v5 = vld [vmem:[#allocation4 + $0xa0] sm:$0xff] }
  0xc2   : > { %1029 = vmatpush1.msra.mxu1 %v499_v16  ;;  %959 = vmatprep.subr.mxu0 %v236_v17  ;;  %v395_v6 = vld [vmem:[#allocation4 + $0x8a0] sm:$0xff]  ;;  %v388_v8 = vld [vmem:[#allocation4 + $0x868] sm:$0xff] }
  0xc3   : > { %1030 = vmatprep.subr.mxu1 %v492_v18  ;;  %960 = vmatpush1.msra.mxu0 %v235_v19  ;;  %v131_v9 = vld [vmem:[#allocation4 + $0x60] sm:$0xff]  ;;  %v124_v11 = vld [vmem:[#allocation4 + $0x28] sm:$0xff] }
  0xc4   : > { %1031 = vmatpush1.msra.mxu1 %v491_v20  ;;  %961 = vmatprep.subr.mxu0 %v228_v21  ;;  %v387_v10 = vld [vmem:[#allocation4 + $0x860] sm:$0xff]  ;;  %v380_v12 = vld [vmem:[#allocation4 + $0x828] sm:$0xff] }
  0xc5   : > { %1032 = vmatprep.subr.mxu1 %v484_v22  ;;  %962 = vmatpush1.msra.mxu0 %v227_v23  ;;  %v123_v13 = vld [vmem:[#allocation4 + $0x20] sm:$0xff]  ;;  %v372_v15 = vld [vmem:[#allocation4 + $0x7e8] sm:$0xff] }
  0xc6   : > { %1033 = vmatpush1.msra.mxu1 %v483_v57  ;;  %963 = vmatprep.subr.mxu0 %v220_v24  ;;  %v379_v14 = vld [vmem:[#allocation4 + $0x820] sm:$0xff]  ;;  %v628_v16 = vld [vmem:[#allocation4 + $0xfe8] sm:$0xff] }
  0xc7   : > { %1034 = vmatprep.subr.mxu1 %v476_v25  ;;  %964 = vmatpush1.msra.mxu0 %v219_v26  ;;  %v371_v17 = vld [vmem:[#allocation4 + $0x7e0] sm:$0xff]  ;;  %v364_v19 = vld [vmem:[#allocation4 + $0x7a8] sm:$0xff] }
  0xc8   : > { %1035 = vmatpush1.msra.mxu1 %v475_v27  ;;  %965 = vmatprep.subr.mxu0 %v212_v62  ;;  %v627_v18 = vld [vmem:[#allocation4 + $0xfe0] sm:$0xff]  ;;  %v620_v20 = vld [vmem:[#allocation4 + $0xfa8] sm:$0xff] }
  0xc9   : > { %1036 = vmatprep.subr.mxu1 %v468_v28  ;;  %966 = vmatpush1.msra.mxu0 %v211_v29  ;;  %v363_v21 = vld [vmem:[#allocation4 + $0x7a0] sm:$0xff]  ;;  %v356_v23 = vld [vmem:[#allocation4 + $0x768] sm:$0xff] }
  0xca   : > { %1037 = vmatpush1.msra.mxu1 %v467_v30  ;;  %967 = vmatprep.subr.mxu0 %v204_v31  ;;  %v619_v22 = vld [vmem:[#allocation4 + $0xfa0] sm:$0xff]  ;;  %v612_v57 = vld [vmem:[#allocation4 + $0xf68] sm:$0xff] }
  0xcb   : > { %1038 = vmatprep.subr.mxu1 %v460_v32  ;;  %968 = vmatpush1.msra.mxu0 %v203_v33  ;;  %v355_v24 = vld [vmem:[#allocation4 + $0x760] sm:$0xff]  ;;  %v348_v26 = vld [vmem:[#allocation4 + $0x728] sm:$0xff] }
  0xcc   : > { %1039 = vmatpush1.msra.mxu1 %v459_v34  ;;  %969 = vmatprep.subr.mxu0 %v196_v35  ;;  %v611_v25 = vld [vmem:[#allocation4 + $0xf60] sm:$0xff]  ;;  %v604_v27 = vld [vmem:[#allocation4 + $0xf28] sm:$0xff] }
  0xcd   : > { %1040 = vmatprep.subr.mxu1 %v452_v36  ;;  %970 = vmatpush1.msra.mxu0 %v195_v37  ;;  %v347_v62 = vld [vmem:[#allocation4 + $0x720] sm:$0xff]  ;;  %v340_v29 = vld [vmem:[#allocation4 + $0x6e8] sm:$0xff] }
  0xce   : > { %1041 = vmatpush1.msra.mxu1 %v451_v38  ;;  %971 = vmatprep.subr.mxu0 %v188_v39  ;;  %v603_v28 = vld [vmem:[#allocation4 + $0xf20] sm:$0xff]  ;;  %v596_v30 = vld [vmem:[#allocation4 + $0xee8] sm:$0xff] }
  0xcf   : > { %1042 = vmatprep.subr.mxu1 %v444_v40  ;;  %972 = vmatpush1.msra.mxu0 %v187_v41  ;;  %v339_v31 = vld [vmem:[#allocation4 + $0x6e0] sm:$0xff]  ;;  %v332_v33 = vld [vmem:[#allocation4 + $0x6a8] sm:$0xff] }
  0xd0   : > { %1043 = vmatpush1.msra.mxu1 %v443_v42  ;;  %973 = vmatprep.subr.mxu0 %v180_v43  ;;  %v595_v32 = vld [vmem:[#allocation4 + $0xee0] sm:$0xff]  ;;  %v588_v34 = vld [vmem:[#allocation4 + $0xea8] sm:$0xff] }
  0xd1   : > { %1044 = vmatprep.subr.mxu1 %v436_v44  ;;  %974 = vmatpush1.msra.mxu0 %v179_v45  ;;  %v331_v35 = vld [vmem:[#allocation4 + $0x6a0] sm:$0xff]  ;;  %v324_v37 = vld [vmem:[#allocation4 + $0x668] sm:$0xff] }
  0xd2   : > { %1045 = vmatpush1.msra.mxu1 %v435_v46  ;;  %975 = vmatprep.subr.mxu0 %v172_v47  ;;  %v587_v36 = vld [vmem:[#allocation4 + $0xea0] sm:$0xff]  ;;  %v580_v38 = vld [vmem:[#allocation4 + $0xe68] sm:$0xff] }
  0xd3   : > { %1046 = vmatprep.subr.mxu1 %v428_v48  ;;  %976 = vmatpush1.msra.mxu0 %v171_v49  ;;  %v323_v39 = vld [vmem:[#allocation4 + $0x660] sm:$0xff]  ;;  %v316_v41 = vld [vmem:[#allocation4 + $0x628] sm:$0xff] }
  0xd4   : > { %1047 = vmatpush1.msra.mxu1 %v427_v50  ;;  %977 = vmatprep.subr.mxu0 %v164_v51  ;;  %v579_v40 = vld [vmem:[#allocation4 + $0xe60] sm:$0xff]  ;;  %v572_v42 = vld [vmem:[#allocation4 + $0xe28] sm:$0xff] }
  0xd5   : > { %1048 = vmatprep.subr.mxu1 %v420_v52  ;;  %978 = vmatpush1.msra.mxu0 %v163_v53  ;;  %v315_v43 = vld [vmem:[#allocation4 + $0x620] sm:$0xff]  ;;  %v308_v45 = vld [vmem:[#allocation4 + $0x5e8] sm:$0xff] }
  0xd6   : > { %1049 = vmatpush1.msra.mxu1 %v419_v54  ;;  %979 = vmatprep.subr.mxu0 %v156_v55  ;;  %v571_v44 = vld [vmem:[#allocation4 + $0xe20] sm:$0xff]  ;;  %v564_v46 = vld [vmem:[#allocation4 + $0xde8] sm:$0xff] }
  0xd7   : > { %1050 = vmatprep.subr.mxu1 %v412_v56  ;;  %980 = vmatpush1.msra.mxu0 %v155_v58  ;;  %v307_v47 = vld [vmem:[#allocation4 + $0x5e0] sm:$0xff]  ;;  %v300_v49 = vld [vmem:[#allocation4 + $0x5a8] sm:$0xff] }
  0xd8   : > { %1051 = vmatpush1.msra.mxu1 %v411_v59  ;;  %981 = vmatprep.subr.mxu0 %v148_v60  ;;  %v563_v48 = vld [vmem:[#allocation4 + $0xde0] sm:$0xff]  ;;  %v556_v50 = vld [vmem:[#allocation4 + $0xda8] sm:$0xff] }
  0xd9   : > { %1052 = vmatprep.subr.mxu1 %v404_v61  ;;  %982 = vmatpush1.msra.mxu0 %v147_v63  ;;  %v299_v51 = vld [vmem:[#allocation4 + $0x5a0] sm:$0xff]  ;;  %v292_v53 = vld [vmem:[#allocation4 + $0x568] sm:$0xff] }
  0xda   : > { %1053 = vmatpush1.msra.mxu1 %v403_v0  ;;  %983 = vmatprep.subr.mxu0 %v140_v2  ;;  %v555_v52 = vld [vmem:[#allocation4 + $0xda0] sm:$0xff]  ;;  %v548_v54 = vld [vmem:[#allocation4 + $0xd68] sm:$0xff] }
  0xdb   : > { %1054 = vmatprep.subr.mxu1 %v396_v3  ;;  %984 = vmatpush1.msra.mxu0 %v139_v5  ;;  %v291_v55 = vld [vmem:[#allocation4 + $0x560] sm:$0xff]  ;;  %v284_v58 = vld [vmem:[#allocation4 + $0x528] sm:$0xff] }
  0xdc   : > { %1055 = vmatpush1.msra.mxu1 %v395_v6  ;;  %985 = vmatprep.subr.mxu0 %v132_v7  ;;  %v547_v56 = vld [vmem:[#allocation4 + $0xd60] sm:$0xff]  ;;  %v540_v59 = vld [vmem:[#allocation4 + $0xd28] sm:$0xff] }
  0xdd   : > { %1056 = vmatprep.subr.mxu1 %v388_v8  ;;  %986 = vmatpush1.msra.mxu0 %v131_v9  ;;  %v283_v60 = vld [vmem:[#allocation4 + $0x520] sm:$0xff]  ;;  %v276_v63 = vld [vmem:[#allocation4 + $0x4e8] sm:$0xff] }
  0xde   : > { %1057 = vmatpush1.msra.mxu1 %v387_v10  ;;  %987 = vmatprep.subr.mxu0 %v124_v11  ;;  %v539_v61 = vld [vmem:[#allocation4 + $0xd20] sm:$0xff]  ;;  %v532_v0 = vld [vmem:[#allocation4 + $0xce8] sm:$0xff] }
  0xdf   : > { %1058 = vmatprep.subr.mxu1 %v380_v12  ;;  %988 = vmatpush1.msra.mxu0 %v123_v13  ;;  %v275_v2 = vld [vmem:[#allocation4 + $0x4e0] sm:$0xff]  ;;  %v268_v5 = vld [vmem:[#allocation4 + $0x4a8] sm:$0xff] }
  0xe0   : > { %1059 = vmatpush1.msra.mxu1 %v379_v14  ;;  %989 = vmatprep.subr.mxu0 %v372_v15  ;;  %v531_v3 = vld [vmem:[#allocation4 + $0xce0] sm:$0xff]  ;;  %v524_v6 = vld [vmem:[#allocation4 + $0xca8] sm:$0xff] }
  0xe1   : > { %1060 = vmatprep.subr.mxu1 %v628_v16  ;;  %990 = vmatpush2.msra.mxu0 %v371_v17  ;;  %v267_v7 = vld [vmem:[#allocation4 + $0x4a0] sm:$0xff]  ;;  %v260_v9 = vld [vmem:[#allocation4 + $0x468] sm:$0xff]  ;;  %v246_v17 = vld [vmem:[#allocation4 + $0x3f8] sm:$0xff] }
  0xe2   : > { %1061 = vmatpush2.msra.mxu1 %v627_v18  ;;  %991 = vmatprep.subr.mxu0 %v364_v19  ;;  %v523_v8 = vld [vmem:[#allocation4 + $0xca0] sm:$0xff]  ;;  %v516_v10 = vld [vmem:[#allocation4 + $0xc68] sm:$0xff]  ;;  %v502_v18 = vld [vmem:[#allocation4 + $0xbf8] sm:$0xff] }
  0xe3   : > { %1062 = vmatprep.subr.mxu1 %v620_v20  ;;  %992 = vmatpush2.msra.mxu0 %v363_v21  ;;  %v259_v11 = vld [vmem:[#allocation4 + $0x460] sm:$0xff]  ;;  %v252_v13 = vld [vmem:[#allocation4 + $0x428] sm:$0xff]  ;;  %v8062_v19 = vld.sshfl [vmem:[%s8037_s18] sm:$0x33 pattern:$0x76325410] }
  0xe4   : > { %1063 = vmatpush2.msra.mxu1 %v619_v22  ;;  %993 = vmatprep.subr.mxu0 %v356_v23  ;;  %v515_v12 = vld [vmem:[#allocation4 + $0xc60] sm:$0xff]  ;;  %v508_v14 = vld [vmem:[#allocation4 + $0xc28] sm:$0xff]  ;;  %v245_v20 = vld [vmem:[#allocation4 + $0x3f0] sm:$0xff] }
  0xe5   : > { %1064 = vmatprep.subr.mxu1 %v612_v57  ;;  %994 = vmatpush2.msra.mxu0 %v355_v24  ;;  %v251_v15 = vld [vmem:[#allocation4 + $0x420] sm:$0xff]  ;;  %v501_v21 = vld [vmem:[#allocation4 + $0xbf0] sm:$0xff]  ;;  %v238_v22 = vld [vmem:[#allocation4 + $0x3b8] sm:$0xff] }
  0xe6   : > { %1065 = vmatpush2.msra.mxu1 %v611_v25  ;;  %995 = vmatprep.subr.mxu0 %v348_v26  ;;  %v507_v16 = vld [vmem:[#allocation4 + $0xc20] sm:$0xff]  ;;  %v494_v23 = vld [vmem:[#allocation4 + $0xbb8] sm:$0xff]  ;;  %v8066_v57 = vld.sshfl [vmem:[#allocation2] sm:$0x33 pattern:$0x76325410] }
  0xe7   : > { %1066 = vmatprep.subr.mxu1 %v604_v27  ;;  %996 = vmatpush2.msra.mxu0 %v347_v62  ;;  %v237_v24 = vld [vmem:[#allocation4 + $0x3b0] sm:$0xff]  ;;  %v230_v26 = vld [vmem:[#allocation4 + $0x378] sm:$0xff] }
  0xe8   : > { %1067 = vmatpush2.msra.mxu1 %v603_v28  ;;  %997 = vmatprep.subr.mxu0 %v340_v29  ;;  %v493_v25 = vld [vmem:[#allocation4 + $0xbb0] sm:$0xff]  ;;  %v486_v27 = vld [vmem:[#allocation4 + $0xb78] sm:$0xff] }
  0xe9   : > { %1068 = vmatprep.subr.mxu1 %v596_v30  ;;  %998 = vmatpush2.msra.mxu0 %v339_v31  ;;  %v229_v62 = vld [vmem:[#allocation4 + $0x370] sm:$0xff]  ;;  %v222_v29 = vld [vmem:[#allocation4 + $0x338] sm:$0xff] }
  0xea   : > { %1069 = vmatpush2.msra.mxu1 %v595_v32  ;;  %999 = vmatprep.subr.mxu0 %v332_v33  ;;  %v485_v28 = vld [vmem:[#allocation4 + $0xb70] sm:$0xff]  ;;  %v478_v30 = vld [vmem:[#allocation4 + $0xb38] sm:$0xff] }
  0xeb   : > { %1070 = vmatprep.subr.mxu1 %v588_v34  ;;  %1000 = vmatpush2.msra.mxu0 %v331_v35  ;;  %v221_v31 = vld [vmem:[#allocation4 + $0x330] sm:$0xff]  ;;  %v214_v33 = vld [vmem:[#allocation4 + $0x2f8] sm:$0xff] }
  0xec   : > { %1071 = vmatpush2.msra.mxu1 %v587_v36  ;;  %1001 = vmatprep.subr.mxu0 %v324_v37  ;;  %v477_v32 = vld [vmem:[#allocation4 + $0xb30] sm:$0xff]  ;;  %v470_v34 = vld [vmem:[#allocation4 + $0xaf8] sm:$0xff] }
  0xed   : > { %1072 = vmatprep.subr.mxu1 %v580_v38  ;;  %1002 = vmatpush2.msra.mxu0 %v323_v39  ;;  %v213_v35 = vld [vmem:[#allocation4 + $0x2f0] sm:$0xff]  ;;  %v206_v37 = vld [vmem:[#allocation4 + $0x2b8] sm:$0xff] }
  0xee   : > { %1073 = vmatpush2.msra.mxu1 %v579_v40  ;;  %1003 = vmatprep.subr.mxu0 %v316_v41  ;;  %v469_v36 = vld [vmem:[#allocation4 + $0xaf0] sm:$0xff]  ;;  %v462_v38 = vld [vmem:[#allocation4 + $0xab8] sm:$0xff] }
  0xef   : > { %1074 = vmatprep.subr.mxu1 %v572_v42  ;;  %1004 = vmatpush2.msra.mxu0 %v315_v43  ;;  %v205_v39 = vld [vmem:[#allocation4 + $0x2b0] sm:$0xff]  ;;  %v198_v41 = vld [vmem:[#allocation4 + $0x278] sm:$0xff] }
  0xf0   : > { %1075 = vmatpush2.msra.mxu1 %v571_v44  ;;  %1005 = vmatprep.subr.mxu0 %v308_v45  ;;  %v461_v40 = vld [vmem:[#allocation4 + $0xab0] sm:$0xff]  ;;  %v454_v42 = vld [vmem:[#allocation4 + $0xa78] sm:$0xff] }
  0xf1   : > { %1076 = vmatprep.subr.mxu1 %v564_v46  ;;  %1006 = vmatpush2.msra.mxu0 %v307_v47  ;;  %v197_v43 = vld [vmem:[#allocation4 + $0x270] sm:$0xff]  ;;  %v190_v45 = vld [vmem:[#allocation4 + $0x238] sm:$0xff] }
  0xf2   : > { %1077 = vmatpush2.msra.mxu1 %v563_v48  ;;  %1007 = vmatprep.subr.mxu0 %v300_v49  ;;  %v453_v44 = vld [vmem:[#allocation4 + $0xa70] sm:$0xff]  ;;  %v446_v46 = vld [vmem:[#allocation4 + $0xa38] sm:$0xff] }
  0xf3   : > { %1078 = vmatprep.subr.mxu1 %v556_v50  ;;  %1008 = vmatpush2.msra.mxu0 %v299_v51  ;;  %v189_v47 = vld [vmem:[#allocation4 + $0x230] sm:$0xff]  ;;  %v182_v49 = vld [vmem:[#allocation4 + $0x1f8] sm:$0xff] }
  0xf4   : > { %1079 = vmatpush2.msra.mxu1 %v555_v52  ;;  %1009 = vmatprep.subr.mxu0 %v292_v53  ;;  %v445_v48 = vld [vmem:[#allocation4 + $0xa30] sm:$0xff]  ;;  %v438_v50 = vld [vmem:[#allocation4 + $0x9f8] sm:$0xff] }
  0xf5   : > { %1080 = vmatprep.subr.mxu1 %v548_v54  ;;  %1010 = vmatpush2.msra.mxu0 %v291_v55  ;;  %v181_v51 = vld [vmem:[#allocation4 + $0x1f0] sm:$0xff]  ;;  %v174_v53 = vld [vmem:[#allocation4 + $0x1b8] sm:$0xff] }
  0xf6   : > { %1081 = vmatpush2.msra.mxu1 %v547_v56  ;;  %1011 = vmatprep.subr.mxu0 %v284_v58  ;;  %v437_v52 = vld [vmem:[#allocation4 + $0x9f0] sm:$0xff]  ;;  %v430_v54 = vld [vmem:[#allocation4 + $0x9b8] sm:$0xff] }
  0xf7   : > { %1082 = vmatprep.subr.mxu1 %v540_v59  ;;  %1012 = vmatpush2.msra.mxu0 %v283_v60  ;;  %v173_v55 = vld [vmem:[#allocation4 + $0x1b0] sm:$0xff]  ;;  %v166_v58 = vld [vmem:[#allocation4 + $0x178] sm:$0xff] }
  0xf8   : > { %1083 = vmatpush2.msra.mxu1 %v539_v61  ;;  %1013 = vmatprep.subr.mxu0 %v276_v63  ;;  %v429_v56 = vld [vmem:[#allocation4 + $0x9b0] sm:$0xff]  ;;  %v422_v59 = vld [vmem:[#allocation4 + $0x978] sm:$0xff] }
  0xf9   : > { %1084 = vmatprep.subr.mxu1 %v532_v0  ;;  %1014 = vmatpush2.msra.mxu0 %v275_v2  ;;  %v165_v60 = vld [vmem:[#allocation4 + $0x170] sm:$0xff]  ;;  %v158_v63 = vld [vmem:[#allocation4 + $0x138] sm:$0xff] }
  0xfa   : > { %1085 = vmatpush2.msra.mxu1 %v531_v3  ;;  %1015 = vmatprep.subr.mxu0 %v268_v5  ;;  %v421_v61 = vld [vmem:[#allocation4 + $0x970] sm:$0xff]  ;;  %v414_v0 = vld [vmem:[#allocation4 + $0x938] sm:$0xff] }
  0xfb   : > { %1086 = vmatprep.subr.mxu1 %v524_v6  ;;  %1016 = vmatpush2.msra.mxu0 %v267_v7  ;;  %v157_v2 = vld [vmem:[#allocation4 + $0x130] sm:$0xff]  ;;  %v150_v5 = vld [vmem:[#allocation4 + $0xf8] sm:$0xff] }
  0xfc   : > { %1087 = vmatpush2.msra.mxu1 %v523_v8  ;;  %1017 = vmatprep.subr.mxu0 %v260_v9  ;;  %v413_v3 = vld [vmem:[#allocation4 + $0x930] sm:$0xff]  ;;  %v406_v6 = vld [vmem:[#allocation4 + $0x8f8] sm:$0xff] }
  0xfd   : > { %1088 = vmatprep.subr.mxu1 %v516_v10  ;;  %1018 = vmatpush2.msra.mxu0 %v259_v11  ;;  %v149_v7 = vld [vmem:[#allocation4 + $0xf0] sm:$0xff]  ;;  %v142_v9 = vld [vmem:[#allocation4 + $0xb8] sm:$0xff] }
  0xfe   : > { %1089 = vmatpush2.msra.mxu1 %v515_v12  ;;  %1019 = vmatprep.subr.mxu0 %v252_v13  ;;  %v405_v8 = vld [vmem:[#allocation4 + $0x8f0] sm:$0xff]  ;;  %v398_v10 = vld [vmem:[#allocation4 + $0x8b8] sm:$0xff] }
  0xff   : > { %1090 = vmatprep.subr.mxu1 %v508_v14  ;;  %1020 = vmatpush2.msra.mxu0 %v251_v15  ;;  %v141_v11 = vld [vmem:[#allocation4 + $0xb0] sm:$0xff]  ;;  %v134_v13 = vld [vmem:[#allocation4 + $0x78] sm:$0xff] }
 0x100   : > { %1021 = vmatprep.mubr.f32.mxu0 %v8046_v1  ;;  %1091 = vmatpush2.msra.mxu1 %v507_v16  ;;  %v397_v12 = vld [vmem:[#allocation4 + $0x8b0] sm:$0xff]  ;;  %v390_v14 = vld [vmem:[#allocation4 + $0x878] sm:$0xff] }
 0x101   : > { %1022 = vmatmul.mubr.f32.vlgmr.msra.gmra.mxu0 %v8062_v19  ;;  %1092 = vmatprep.mubr.f32.mxu1 %v8050_v4  ;;  %v133_v15 = vld [vmem:[#allocation4 + $0x70] sm:$0xff] }
 0x102   : > { %1099 = vmatprep.subr.mxu0 %v246_v17  ;;  %1170 = vmatprep.subr.mxu1 %v502_v18  ;;  %v389_v16 = vld [vmem:[#allocation4 + $0x870] sm:$0xff]  ;;  %v126_v17 = vld [vmem:[#allocation4 + $0x38] sm:$0xff] }
 0x103   : > { %1093 = vmatmul.mubr.f32.vlgmr.msra.gmra.mxu1 %v8066_v57  ;;  %1100 = vmatpush1.msra.mxu0 %v245_v20  ;;  %v382_v18 = vld [vmem:[#allocation4 + $0x838] sm:$0xff]  ;;  %v125_v20 = vld [vmem:[#allocation4 + $0x30] sm:$0xff] }
 0x104   : > { %1171 = vmatpush1.msra.mxu1 %v501_v21  ;;  %1101 = vmatprep.subr.mxu0 %v238_v22  ;;  %v381_v21 = vld [vmem:[#allocation4 + $0x830] sm:$0xff]  ;;  %v374_v22 = vld [vmem:[#allocation4 + $0x7f8] sm:$0xff] }
 0x105   : > { %1172 = vmatprep.subr.mxu1 %v494_v23  ;;  %1102 = vmatpush1.msra.mxu0 %v237_v24  ;;  %v630_v23 = vld [vmem:[#allocation4 + $0xff8] sm:$0xff]  ;;  %v373_v24 = vld [vmem:[#allocation4 + $0x7f0] sm:$0xff] }
 0x106   : > { %1173 = vmatpush1.msra.mxu1 %v493_v25  ;;  %1103 = vmatprep.subr.mxu0 %v230_v26  ;;  %v629_v25 = vld [vmem:[#allocation4 + $0xff0] sm:$0xff]  ;;  %v366_v26 = vld [vmem:[#allocation4 + $0x7b8] sm:$0xff] }
 0x107   : > { %1174 = vmatprep.subr.mxu1 %v486_v27  ;;  %1104 = vmatpush1.msra.mxu0 %v229_v62  ;;  %v622_v27 = vld [vmem:[#allocation4 + $0xfb8] sm:$0xff]  ;;  %v365_v62 = vld [vmem:[#allocation4 + $0x7b0] sm:$0xff] }
 0x108   : > { %1175 = vmatpush1.msra.mxu1 %v485_v28  ;;  %1105 = vmatprep.subr.mxu0 %v222_v29  ;;  %v621_v28 = vld [vmem:[#allocation4 + $0xfb0] sm:$0xff]  ;;  %v358_v29 = vld [vmem:[#allocation4 + $0x778] sm:$0xff] }
 0x109   : > { %1176 = vmatprep.subr.mxu1 %v478_v30  ;;  %1106 = vmatpush1.msra.mxu0 %v221_v31  ;;  %v614_v30 = vld [vmem:[#allocation4 + $0xf78] sm:$0xff]  ;;  %v357_v31 = vld [vmem:[#allocation4 + $0x770] sm:$0xff] }
 0x10a   : > { %1177 = vmatpush1.msra.mxu1 %v477_v32  ;;  %1107 = vmatprep.subr.mxu0 %v214_v33  ;;  %v613_v32 = vld [vmem:[#allocation4 + $0xf70] sm:$0xff]  ;;  %v350_v33 = vld [vmem:[#allocation4 + $0x738] sm:$0xff] }
 0x10b   : > { %1178 = vmatprep.subr.mxu1 %v470_v34  ;;  %1108 = vmatpush1.msra.mxu0 %v213_v35  ;;  %v606_v34 = vld [vmem:[#allocation4 + $0xf38] sm:$0xff]  ;;  %v349_v35 = vld [vmem:[#allocation4 + $0x730] sm:$0xff] }
 0x10c   : > { %1179 = vmatpush1.msra.mxu1 %v469_v36  ;;  %1109 = vmatprep.subr.mxu0 %v206_v37  ;;  %v605_v36 = vld [vmem:[#allocation4 + $0xf30] sm:$0xff]  ;;  %v342_v37 = vld [vmem:[#allocation4 + $0x6f8] sm:$0xff] }
 0x10d   : > { %1180 = vmatprep.subr.mxu1 %v462_v38  ;;  %1110 = vmatpush1.msra.mxu0 %v205_v39  ;;  %v598_v38 = vld [vmem:[#allocation4 + $0xef8] sm:$0xff]  ;;  %v341_v39 = vld [vmem:[#allocation4 + $0x6f0] sm:$0xff] }
 0x10e   : > { %1181 = vmatpush1.msra.mxu1 %v461_v40  ;;  %1111 = vmatprep.subr.mxu0 %v198_v41  ;;  %v597_v40 = vld [vmem:[#allocation4 + $0xef0] sm:$0xff]  ;;  %v334_v41 = vld [vmem:[#allocation4 + $0x6b8] sm:$0xff] }
 0x10f   : > { %1182 = vmatprep.subr.mxu1 %v454_v42  ;;  %1112 = vmatpush1.msra.mxu0 %v197_v43  ;;  %v590_v42 = vld [vmem:[#allocation4 + $0xeb8] sm:$0xff]  ;;  %v333_v43 = vld [vmem:[#allocation4 + $0x6b0] sm:$0xff] }
 0x110   : > { %1183 = vmatpush1.msra.mxu1 %v453_v44  ;;  %1113 = vmatprep.subr.mxu0 %v190_v45  ;;  %v589_v44 = vld [vmem:[#allocation4 + $0xeb0] sm:$0xff]  ;;  %v326_v45 = vld [vmem:[#allocation4 + $0x678] sm:$0xff] }
 0x111   : > { %1184 = vmatprep.subr.mxu1 %v446_v46  ;;  %1114 = vmatpush1.msra.mxu0 %v189_v47  ;;  %v582_v46 = vld [vmem:[#allocation4 + $0xe78] sm:$0xff]  ;;  %v325_v47 = vld [vmem:[#allocation4 + $0x670] sm:$0xff] }
 0x112   : > { %1185 = vmatpush1.msra.mxu1 %v445_v48  ;;  %1115 = vmatprep.subr.mxu0 %v182_v49  ;;  %v581_v48 = vld [vmem:[#allocation4 + $0xe70] sm:$0xff]  ;;  %v318_v49 = vld [vmem:[#allocation4 + $0x638] sm:$0xff] }
 0x113   : > { %1186 = vmatprep.subr.mxu1 %v438_v50  ;;  %1116 = vmatpush1.msra.mxu0 %v181_v51  ;;  %v574_v50 = vld [vmem:[#allocation4 + $0xe38] sm:$0xff]  ;;  %v317_v51 = vld [vmem:[#allocation4 + $0x630] sm:$0xff] }
 0x114   : > { %1187 = vmatpush1.msra.mxu1 %v437_v52  ;;  %1117 = vmatprep.subr.mxu0 %v174_v53  ;;  %v573_v52 = vld [vmem:[#allocation4 + $0xe30] sm:$0xff]  ;;  %v310_v53 = vld [vmem:[#allocation4 + $0x5f8] sm:$0xff] }
 0x115   : > { %1188 = vmatprep.subr.mxu1 %v430_v54  ;;  %1118 = vmatpush1.msra.mxu0 %v173_v55  ;;  %v566_v54 = vld [vmem:[#allocation4 + $0xdf8] sm:$0xff]  ;;  %v309_v55 = vld [vmem:[#allocation4 + $0x5f0] sm:$0xff] }
 0x116   : > { %1189 = vmatpush1.msra.mxu1 %v429_v56  ;;  %1119 = vmatprep.subr.mxu0 %v166_v58  ;;  %v565_v56 = vld [vmem:[#allocation4 + $0xdf0] sm:$0xff]  ;;  %v302_v58 = vld [vmem:[#allocation4 + $0x5b8] sm:$0xff] }
 0x117   : > { %1190 = vmatprep.subr.mxu1 %v422_v59  ;;  %1120 = vmatpush1.msra.mxu0 %v165_v60  ;;  %v558_v59 = vld [vmem:[#allocation4 + $0xdb8] sm:$0xff]  ;;  %v301_v60 = vld [vmem:[#allocation4 + $0x5b0] sm:$0xff] }
 0x118   : > { %1191 = vmatpush1.msra.mxu1 %v421_v61  ;;  %1121 = vmatprep.subr.mxu0 %v158_v63  ;;  %v557_v61 = vld [vmem:[#allocation4 + $0xdb0] sm:$0xff]  ;;  %v294_v63 = vld [vmem:[#allocation4 + $0x578] sm:$0xff] }
 0x119   : > { %1192 = vmatprep.subr.mxu1 %v414_v0  ;;  %1122 = vmatpush1.msra.mxu0 %v157_v2  ;;  %v550_v0 = vld [vmem:[#allocation4 + $0xd78] sm:$0xff]  ;;  %v293_v2 = vld [vmem:[#allocation4 + $0x570] sm:$0xff] }
 0x11a   : > { %1193 = vmatpush1.msra.mxu1 %v413_v3  ;;  %1123 = vmatprep.subr.mxu0 %v150_v5  ;;  %v549_v3 = vld [vmem:[#allocation4 + $0xd70] sm:$0xff]  ;;  %v286_v5 = vld [vmem:[#allocation4 + $0x538] sm:$0xff] }
 0x11b   : > { %1194 = vmatprep.subr.mxu1 %v406_v6  ;;  %1124 = vmatpush1.msra.mxu0 %v149_v7  ;;  %v542_v6 = vld [vmem:[#allocation4 + $0xd38] sm:$0xff]  ;;  %v285_v7 = vld [vmem:[#allocation4 + $0x530] sm:$0xff] }
 0x11c   : > { %1195 = vmatpush1.msra.mxu1 %v405_v8  ;;  %1125 = vmatprep.subr.mxu0 %v142_v9  ;;  %v541_v8 = vld [vmem:[#allocation4 + $0xd30] sm:$0xff]  ;;  %v278_v9 = vld [vmem:[#allocation4 + $0x4f8] sm:$0xff] }
 0x11d   : > { %1196 = vmatprep.subr.mxu1 %v398_v10  ;;  %1126 = vmatpush1.msra.mxu0 %v141_v11  ;;  %v534_v10 = vld [vmem:[#allocation4 + $0xcf8] sm:$0xff]  ;;  %v277_v11 = vld [vmem:[#allocation4 + $0x4f0] sm:$0xff] }
 0x11e   : > { %1197 = vmatpush1.msra.mxu1 %v397_v12  ;;  %1127 = vmatprep.subr.mxu0 %v134_v13  ;;  %v533_v12 = vld [vmem:[#allocation4 + $0xcf0] sm:$0xff]  ;;  %v270_v13 = vld [vmem:[#allocation4 + $0x4b8] sm:$0xff] }
 0x11f   : > { %1198 = vmatprep.subr.mxu1 %v390_v14  ;;  %1128 = vmatpush1.msra.mxu0 %v133_v15  ;;  %v526_v14 = vld [vmem:[#allocation4 + $0xcb8] sm:$0xff]  ;;  %v269_v15 = vld [vmem:[#allocation4 + $0x4b0] sm:$0xff] }
 0x120   : > { %1199 = vmatpush1.msra.mxu1 %v389_v16  ;;  %1129 = vmatprep.subr.mxu0 %v126_v17  ;;  %v525_v16 = vld [vmem:[#allocation4 + $0xcb0] sm:$0xff]  ;;  %v262_v17 = vld [vmem:[#allocation4 + $0x478] sm:$0xff] }
 0x121   : > { %1200 = vmatprep.subr.mxu1 %v382_v18  ;;  %1130 = vmatpush1.msra.mxu0 %v125_v20  ;;  %v518_v18 = vld [vmem:[#allocation4 + $0xc78] sm:$0xff]  ;;  %v261_v20 = vld [vmem:[#allocation4 + $0x470] sm:$0xff] }
 0x122   : > { %1201 = vmatpush1.msra.mxu1 %v381_v21  ;;  %1131 = vmatprep.subr.mxu0 %v374_v22  ;;  %v517_v21 = vld [vmem:[#allocation4 + $0xc70] sm:$0xff]  ;;  %v254_v22 = vld [vmem:[#allocation4 + $0x438] sm:$0xff] }
 0x123   : > { %1202 = vmatprep.subr.mxu1 %v630_v23  ;;  %1132 = vmatpush2.msra.mxu0 %v373_v24  ;;  %v510_v23 = vld [vmem:[#allocation4 + $0xc38] sm:$0xff]  ;;  %v253_v24 = vld [vmem:[#allocation4 + $0x430] sm:$0xff] }
 0x124   : > { %1203 = vmatpush2.msra.mxu1 %v629_v25  ;;  %1133 = vmatprep.subr.mxu0 %v366_v26  ;;  %v509_v25 = vld [vmem:[#allocation4 + $0xc30] sm:$0xff]  ;;  %v1461_v26 = vld [vmem:[#allocation4 + $0x13c8] sm:$0xff] }
 0x125   : > { %1204 = vmatprep.subr.mxu1 %v622_v27  ;;  %1134 = vmatpush2.msra.mxu0 %v365_v62  ;;  %v1717_v27 = vld [vmem:[#allocation4 + $0x1bc8] sm:$0xff]  ;;  %v1460_v62 = vld [vmem:[#allocation4 + $0x13c0] sm:$0xff] }
 0x126   : > { %1205 = vmatpush2.msra.mxu1 %v621_v28  ;;  %1135 = vmatprep.subr.mxu0 %v358_v29  ;;  %v1716_v28 = vld [vmem:[#allocation4 + $0x1bc0] sm:$0xff]  ;;  %v1453_v29 = vld [vmem:[#allocation4 + $0x1388] sm:$0xff] }
 0x127   : > { %1206 = vmatprep.subr.mxu1 %v614_v30  ;;  %1136 = vmatpush2.msra.mxu0 %v357_v31  ;;  %v1709_v30 = vld [vmem:[#allocation4 + $0x1b88] sm:$0xff]  ;;  %v1452_v31 = vld [vmem:[#allocation4 + $0x1380] sm:$0xff] }
 0x128   : > { %1207 = vmatpush2.msra.mxu1 %v613_v32  ;;  %1137 = vmatprep.subr.mxu0 %v350_v33  ;;  %v1708_v32 = vld [vmem:[#allocation4 + $0x1b80] sm:$0xff] }
 0x129   : > { %1208 = vmatprep.subr.mxu1 %v606_v34  ;;  %1138 = vmatpush2.msra.mxu0 %v349_v35  ;;  %v1444_v33 = vld [vmem:[#allocation4 + $0x1340] sm:$0xff]  ;;  %v1693_v34 = vld [vmem:[#allocation4 + $0x1b08] sm:$0xff] }
 0x12a   : > { %1209 = vmatpush2.msra.mxu1 %v605_v36  ;;  %1139 = vmatprep.subr.mxu0 %v342_v37  ;;  %v1436_v35 = vld [vmem:[#allocation4 + $0x1300] sm:$0xff]  ;;  %v1429_v37 = vld [vmem:[#allocation4 + $0x12c8] sm:$0xff] }
 0x12b   : > { %1210 = vmatprep.subr.mxu1 %v598_v38  ;;  %1140 = vmatpush2.msra.mxu0 %v341_v39  ;;  %v1692_v36 = vld [vmem:[#allocation4 + $0x1b00] sm:$0xff]  ;;  %v1685_v38 = vld [vmem:[#allocation4 + $0x1ac8] sm:$0xff] }
 0x12c   : > { %1211 = vmatpush2.msra.mxu1 %v597_v40  ;;  %1141 = vmatprep.subr.mxu0 %v334_v41  ;;  %v1428_v39 = vld [vmem:[#allocation4 + $0x12c0] sm:$0xff]  ;;  %v1421_v41 = vld [vmem:[#allocation4 + $0x1288] sm:$0xff] }
 0x12d   : > { %1212 = vmatprep.subr.mxu1 %v590_v42  ;;  %1142 = vmatpush2.msra.mxu0 %v333_v43  ;;  %v1684_v40 = vld [vmem:[#allocation4 + $0x1ac0] sm:$0xff]  ;;  %v1677_v42 = vld [vmem:[#allocation4 + $0x1a88] sm:$0xff] }
 0x12e   : > { %1213 = vmatpush2.msra.mxu1 %v589_v44  ;;  %1143 = vmatprep.subr.mxu0 %v326_v45  ;;  %v1420_v43 = vld [vmem:[#allocation4 + $0x1280] sm:$0xff]  ;;  %v1413_v45 = vld [vmem:[#allocation4 + $0x1248] sm:$0xff] }
 0x12f   : > { %1214 = vmatprep.subr.mxu1 %v582_v46  ;;  %1144 = vmatpush2.msra.mxu0 %v325_v47  ;;  %v1676_v44 = vld [vmem:[#allocation4 + $0x1a80] sm:$0xff]  ;;  %v1669_v46 = vld [vmem:[#allocation4 + $0x1a48] sm:$0xff] }
 0x130   : > { %1215 = vmatpush2.msra.mxu1 %v581_v48  ;;  %1145 = vmatprep.subr.mxu0 %v318_v49  ;;  %v1412_v47 = vld [vmem:[#allocation4 + $0x1240] sm:$0xff]  ;;  %v1405_v49 = vld [vmem:[#allocation4 + $0x1208] sm:$0xff] }
 0x131   : > { %1216 = vmatprep.subr.mxu1 %v574_v50  ;;  %1146 = vmatpush2.msra.mxu0 %v317_v51  ;;  %v1668_v48 = vld [vmem:[#allocation4 + $0x1a40] sm:$0xff]  ;;  %v1661_v50 = vld [vmem:[#allocation4 + $0x1a08] sm:$0xff] }
 0x132   : > { %1217 = vmatpush2.msra.mxu1 %v573_v52  ;;  %1147 = vmatprep.subr.mxu0 %v310_v53  ;;  %v1404_v51 = vld [vmem:[#allocation4 + $0x1200] sm:$0xff]  ;;  %v1397_v53 = vld [vmem:[#allocation4 + $0x11c8] sm:$0xff] }
 0x133   : > { %1218 = vmatprep.subr.mxu1 %v566_v54  ;;  %1148 = vmatpush2.msra.mxu0 %v309_v55  ;;  %v1660_v52 = vld [vmem:[#allocation4 + $0x1a00] sm:$0xff]  ;;  %v1653_v54 = vld [vmem:[#allocation4 + $0x19c8] sm:$0xff] }
 0x134   : > { %1219 = vmatpush2.msra.mxu1 %v565_v56  ;;  %1149 = vmatprep.subr.mxu0 %v302_v58  ;;  %v1396_v55 = vld [vmem:[#allocation4 + $0x11c0] sm:$0xff]  ;;  %v1389_v58 = vld [vmem:[#allocation4 + $0x1188] sm:$0xff] }
 0x135   : > { %1220 = vmatprep.subr.mxu1 %v558_v59  ;;  %1150 = vmatpush2.msra.mxu0 %v301_v60  ;;  %v1652_v56 = vld [vmem:[#allocation4 + $0x19c0] sm:$0xff]  ;;  %v1645_v59 = vld [vmem:[#allocation4 + $0x1988] sm:$0xff] }
 0x136   : > { %1221 = vmatpush2.msra.mxu1 %v557_v61  ;;  %1151 = vmatprep.subr.mxu0 %v294_v63  ;;  %v1388_v60 = vld [vmem:[#allocation4 + $0x1180] sm:$0xff]  ;;  %v1381_v63 = vld [vmem:[#allocation4 + $0x1148] sm:$0xff] }
 0x137   : > { %1222 = vmatprep.subr.mxu1 %v550_v0  ;;  %1152 = vmatpush2.msra.mxu0 %v293_v2  ;;  %v1644_v61 = vld [vmem:[#allocation4 + $0x1980] sm:$0xff]  ;;  %v1637_v0 = vld [vmem:[#allocation4 + $0x1948] sm:$0xff] }
 0x138   : > { %1223 = vmatpush2.msra.mxu1 %v549_v3  ;;  %1153 = vmatprep.subr.mxu0 %v286_v5  ;;  %v1380_v2 = vld [vmem:[#allocation4 + $0x1140] sm:$0xff]  ;;  %v1373_v5 = vld [vmem:[#allocation4 + $0x1108] sm:$0xff] }
 0x139   : > { %1224 = vmatprep.subr.mxu1 %v542_v6  ;;  %1154 = vmatpush2.msra.mxu0 %v285_v7  ;;  %v1636_v3 = vld [vmem:[#allocation4 + $0x1940] sm:$0xff]  ;;  %v1629_v6 = vld [vmem:[#allocation4 + $0x1908] sm:$0xff] }
 0x13a   : > { %1225 = vmatpush2.msra.mxu1 %v541_v8  ;;  %1155 = vmatprep.subr.mxu0 %v278_v9  ;;  %v1372_v7 = vld [vmem:[#allocation4 + $0x1100] sm:$0xff]  ;;  %v1365_v9 = vld [vmem:[#allocation4 + $0x10c8] sm:$0xff] }
 0x13b   : > { %1226 = vmatprep.subr.mxu1 %v534_v10  ;;  %1156 = vmatpush2.msra.mxu0 %v277_v11  ;;  %v1628_v8 = vld [vmem:[#allocation4 + $0x1900] sm:$0xff]  ;;  %v1621_v10 = vld [vmem:[#allocation4 + $0x18c8] sm:$0xff] }
 0x13c   : > { %1227 = vmatpush2.msra.mxu1 %v533_v12  ;;  %1157 = vmatprep.subr.mxu0 %v270_v13  ;;  %v1364_v11 = vld [vmem:[#allocation4 + $0x10c0] sm:$0xff]  ;;  %v1357_v13 = vld [vmem:[#allocation4 + $0x1088] sm:$0xff] }
 0x13d   : > { %1228 = vmatprep.subr.mxu1 %v526_v14  ;;  %1158 = vmatpush2.msra.mxu0 %v269_v15  ;;  %v1620_v12 = vld [vmem:[#allocation4 + $0x18c0] sm:$0xff]  ;;  %v1613_v14 = vld [vmem:[#allocation4 + $0x1888] sm:$0xff] }
 0x13e   : > { %1229 = vmatpush2.msra.mxu1 %v525_v16  ;;  %1159 = vmatprep.subr.mxu0 %v262_v17  ;;  %v1356_v15 = vld [vmem:[#allocation4 + $0x1080] sm:$0xff]  ;;  %v1349_v17 = vld [vmem:[#allocation4 + $0x1048] sm:$0xff] }
 0x13f   : > { %1230 = vmatprep.subr.mxu1 %v518_v18  ;;  %1160 = vmatpush2.msra.mxu0 %v261_v20  ;;  %v1612_v16 = vld [vmem:[#allocation4 + $0x1880] sm:$0xff]  ;;  %v1605_v18 = vld [vmem:[#allocation4 + $0x1848] sm:$0xff] }
 0x140   : > { %1231 = vmatpush2.msra.mxu1 %v517_v21  ;;  %1161 = vmatprep.subr.mxu0 %v254_v22  ;;  %v1348_v20 = vld [vmem:[#allocation4 + $0x1040] sm:$0xff]  ;;  %v1341_v22 = vld [vmem:[#allocation4 + $0x1008] sm:$0xff] }
 0x141   : > { %1232 = vmatprep.subr.mxu1 %v510_v23  ;;  %1162 = vmatpush2.msra.mxu0 %v253_v24  ;;  %v1604_v21 = vld [vmem:[#allocation4 + $0x1840] sm:$0xff]  ;;  %v1597_v23 = vld [vmem:[#allocation4 + $0x1808] sm:$0xff] }
 0x142   : > { %1163 = vmatprep.mubr.f32.mxu0 %v8046_v1  ;;  %1233 = vmatpush2.msra.mxu1 %v509_v25  ;;  %v1445_v1 = vld [vmem:[#allocation4 + $0x1348] sm:$0xff]  ;;  %v1340_v24 = vld [vmem:[#allocation4 + $0x1000] sm:$0xff] }
 0x143   : > { %1234 = vmatprep.mubr.f32.mxu1 %v8050_v4  ;;  %1164 = vmatmul.mubr.f32.vlgmr.msra.gmra.mxu0 %v8062_v19  ;;  %v1701_v4 = vld [vmem:[#allocation4 + $0x1b48] sm:$0xff]  ;;  %v1700_v19 = vld [vmem:[#allocation4 + $0x1b40] sm:$0xff] }
 0x144   : > { %1235 = vmatmul.mubr.f32.vlgmr.msra.gmra.mxu1 %v8066_v57  ;;  %1895 = vmatprep.subr.mxu0 %v1461_v26  ;;  %v1437_v57 = vld [vmem:[#allocation4 + $0x1308] sm:$0xff]  ;;  %v1596_v25 = vld [vmem:[#allocation4 + $0x1800] sm:$0xff] }
 0x145   : > { %1966 = vmatprep.subr.mxu1 %v1717_v27  ;;  %1896 = vmatpush1.msra.mxu0 %v1460_v62  ;;  %v1589_v26 = vld [vmem:[#allocation4 + $0x17c8] sm:$0xff]  ;;  %v1588_v62 = vld [vmem:[#allocation4 + $0x17c0] sm:$0xff] }
 0x146   : > { %1967 = vmatpush1.msra.mxu1 %v1716_v28  ;;  %1897 = vmatprep.subr.mxu0 %v1453_v29  ;;  %v1845_v27 = vld [vmem:[#allocation4 + $0x1fc8] sm:$0xff]  ;;  %v1844_v28 = vld [vmem:[#allocation4 + $0x1fc0] sm:$0xff] }
 0x147   : > { %1968 = vmatprep.subr.mxu1 %v1709_v30  ;;  %1898 = vmatpush1.msra.mxu0 %v1452_v31  ;;  %v1581_v29 = vld [vmem:[#allocation4 + $0x1788] sm:$0xff]  ;;  %v1580_v31 = vld [vmem:[#allocation4 + $0x1780] sm:$0xff] }
 0x148   : > { %1969 = vmatpush1.msra.mxu1 %v1708_v32  ;;  %1899 = vmatprep.subr.mxu0 %v1445_v1  ;;  %v1837_v30 = vld [vmem:[#allocation4 + $0x1f88] sm:$0xff]  ;;  %v1836_v32 = vld [vmem:[#allocation4 + $0x1f80] sm:$0xff] }
 0x149   : > { %1970 = vmatprep.subr.mxu1 %v1701_v4  ;;  %1900 = vmatpush1.msra.mxu0 %v1444_v33  ;;  %v1573_v1 = vld [vmem:[#allocation4 + $0x1748] sm:$0xff]  ;;  %v1572_v33 = vld [vmem:[#allocation4 + $0x1740] sm:$0xff] }
 0x14a   : > { %1971 = vmatpush1.msra.mxu1 %v1700_v19  ;;  %1901 = vmatprep.subr.mxu0 %v1437_v57  ;;  %v1829_v4 = vld [vmem:[#allocation4 + $0x1f48] sm:$0xff]  ;;  %v1828_v19 = vld [vmem:[#allocation4 + $0x1f40] sm:$0xff] }
 0x14b   : > { %1972 = vmatprep.subr.mxu1 %v1693_v34  ;;  %1902 = vmatpush1.msra.mxu0 %v1436_v35  ;;  %v1565_v57 = vld [vmem:[#allocation4 + $0x1708] sm:$0xff]  ;;  %v633_v35 = vlaneseq }
 0x14c   : > { %1973 = vmatpush1.msra.mxu1 %v1692_v36  ;;  %1903 = vmatprep.subr.mxu0 %v1429_v37  ;;  %v1821_v34 = vld [vmem:[#allocation4 + $0x1f08] sm:$0xff]  ;;  %v1564_v36 = vld [vmem:[#allocation4 + $0x1700] sm:$0xff] }
 0x14d   : > { %1974 = vmatprep.subr.mxu1 %v1685_v38  ;;  %1904 = vmatpush1.msra.mxu0 %v1428_v39  ;;  %v1820_v37 = vld [vmem:[#allocation4 + $0x1f00] sm:$0xff]  ;;  %v1557_v38 = vld [vmem:[#allocation4 + $0x16c8] sm:$0xff] }
 0x14e   : > { %1975 = vmatpush1.msra.mxu1 %v1684_v40  ;;  %1905 = vmatprep.subr.mxu0 %v1421_v41  ;;  %v1813_v39 = vld [vmem:[#allocation4 + $0x1ec8] sm:$0xff]  ;;  %v1556_v40 = vld [vmem:[#allocation4 + $0x16c0] sm:$0xff] }
 0x14f   : > { %1976 = vmatprep.subr.mxu1 %v1677_v42  ;;  %1906 = vmatpush1.msra.mxu0 %v1420_v43  ;;  %v1812_v41 = vld [vmem:[#allocation4 + $0x1ec0] sm:$0xff]  ;;  %v1549_v42 = vld [vmem:[#allocation4 + $0x1688] sm:$0xff] }
 0x150   : > { %1977 = vmatpush1.msra.mxu1 %v1676_v44  ;;  %1907 = vmatprep.subr.mxu0 %v1413_v45  ;;  %v1805_v43 = vld [vmem:[#allocation4 + $0x1e88] sm:$0xff]  ;;  %v8073_v44 = vshrl.u32 %v633_v35, 7  ;;  %v1548_v45 = vld [vmem:[#allocation4 + $0x1680] sm:$0xff] }
 0x151   : > { %1978 = vmatprep.subr.mxu1 %v1669_v46  ;;  %1908 = vmatpush1.msra.mxu0 %v1412_v47  ;;  %v1804_v46 = vld [vmem:[#allocation4 + $0x1e80] sm:$0xff]  ;;  %v8075_v47 = vpop.f32.mrf.mxu0  ;;  %v1477_v35 = vld [vmem:[#allocation4 + $0x1448] sm:$0xff] }
 0x152   : > { %1979 = vmatpush1.msra.mxu1 %v1668_v48  ;;  %1909 = vmatprep.subr.mxu0 %v1405_v49  ;;  %v1541_v48 = vld [vmem:[#allocation4 + $0x1648] sm:$0xff] }
 0x153   : > { %1980 = vmatprep.subr.mxu1 %v1661_v50  ;;  %1910 = vmatpush1.msra.mxu0 %v1404_v51  ;;  %v1797_v49 = vld [vmem:[#allocation4 + $0x1e48] sm:$0xff]  ;;  %v1540_v50 = vld [vmem:[#allocation4 + $0x1640] sm:$0xff] }
 0x154   : > { %1981 = vmatpush1.msra.mxu1 %v1660_v52  ;;  %1911 = vmatprep.subr.mxu0 %v1397_v53  ;;  %v1796_v51 = vld [vmem:[#allocation4 + $0x1e40] sm:$0xff]  ;;  %v1533_v52 = vld [vmem:[#allocation4 + $0x1608] sm:$0xff] }
 0x155   : > { %1982 = vmatprep.subr.mxu1 %v1653_v54  ;;  %1912 = vmatpush1.msra.mxu0 %v1396_v55  ;;  %v1789_v53 = vld [vmem:[#allocation4 + $0x1e08] sm:$0xff]  ;;  %v8078_v54 = vsub.s32 0, %v8073_v44  ;;  %v1532_v55 = vld [vmem:[#allocation4 + $0x1600] sm:$0xff] }
 0x156   : > { %1983 = vmatpush1.msra.mxu1 %v1652_v56  ;;  %1913 = vmatprep.subr.mxu0 %v1389_v58  ;;  %v1788_v56 = vld [vmem:[#allocation4 + $0x1e00] sm:$0xff] }
 0x157   : > { %1984 = vmatprep.subr.mxu1 %v1645_v59  ;;  %1914 = vmatpush1.msra.mxu0 %v1388_v60  ;;  %v8080_v58 = vld [vmem:[#allocation6] sm:$0xff]  ;;  %v8082_v59 = vpop.f32.mrf.mxu1  ;;  %v8084_v60 = vpop.f32.mrf.mxu0 }
 0x158   : > { %1985 = vmatpush1.msra.mxu1 %v1644_v61  ;;  %1915 = vmatprep.subr.mxu0 %v1381_v63  ;;  %v8087_v61 = vsub.s32 2, %v8073_v44  ;;  %v1525_v63 = vld [vmem:[#allocation4 + $0x15c8] sm:$0xff] }
 0x159   : > { %1986 = vmatprep.subr.mxu1 %v1637_v0  ;;  %1916 = vmatpush1.msra.mxu0 %v1380_v2  ;;  %v1781_v0 = vld [vmem:[#allocation4 + $0x1dc8] sm:$0xff]  ;;  %v8090_v2 = vsub.s32 3, %v8073_v44 }
 0x15a   : > { %1987 = vmatpush1.msra.mxu1 %v1636_v3  ;;  %1917 = vmatprep.subr.mxu0 %v1373_v5  ;;  %v1524_v3 = vld [vmem:[#allocation4 + $0x15c0] sm:$0xff] }
 0x15b   : > { %1988 = vmatprep.subr.mxu1 %v1629_v6  ;;  %1918 = vmatpush1.msra.mxu0 %v1372_v7  ;;  %v1780_v5 = vld [vmem:[#allocation4 + $0x1dc0] sm:$0xff]  ;;  %v1517_v6 = vld [vmem:[#allocation4 + $0x1588] sm:$0xff] }
 0x15c   : > { %1989 = vmatpush1.msra.mxu1 %v1628_v8  ;;  %1919 = vmatprep.subr.mxu0 %v1365_v9  ;;  %v1773_v8 = vld [vmem:[#allocation4 + $0x1d88] sm:$0xff]  ;;  %v1516_v9 = vld [vmem:[#allocation4 + $0x1580] sm:$0xff] }
 0x15d   : > { %1990 = vmatprep.subr.mxu1 %v1621_v10  ;;  %1920 = vmatpush1.msra.mxu0 %v1364_v11  ;;  %v1772_v10 = vld [vmem:[#allocation4 + $0x1d80] sm:$0xff]  ;;  %v636_v11 = vrot.slane %v8080_v58, %v8078_v54 }
 0x15e   : > { %1991 = vmatpush1.msra.mxu1 %v1620_v12  ;;  %1921 = vmatprep.subr.mxu0 %v1357_v13  ;;  %v8095_v12 = vsub.s32 1, %v8073_v44  ;;  %v1509_v13 = vld [vmem:[#allocation4 + $0x1548] sm:$0xff] }
 0x15f   : > { %1992 = vmatprep.subr.mxu1 %v1613_v14  ;;  %1922 = vmatpush1.msra.mxu0 %v1356_v15  ;;  %v1765_v14 = vld [vmem:[#allocation4 + $0x1d48] sm:$0xff]  ;;  %v1508_v15 = vld [vmem:[#allocation4 + $0x1540] sm:$0xff] }
 0x160   : > { %1993 = vmatpush1.msra.mxu1 %v1612_v16  ;;  %1923 = vmatprep.subr.mxu0 %v1349_v17  ;;  %v812_v16 = vpop.f32.mrf.mxu1  ;;  %v644_v17 = vrot.slane %v8080_v58, %v8087_v61 }
 0x161   : > { %1994 = vmatprep.subr.mxu1 %v1605_v18  ;;  %1924 = vmatpush1.msra.mxu0 %v1348_v20  ;;  %v1764_v18 = vld [vmem:[#allocation4 + $0x1d40] sm:$0xff]  ;;  %v1501_v20 = vld [vmem:[#allocation4 + $0x1508] sm:$0xff] }
 0x162   : > { %1995 = vmatpush1.msra.mxu1 %v1604_v21  ;;  %1925 = vmatprep.subr.mxu0 %v1341_v22  ;;  %v1757_v21 = vld [vmem:[#allocation4 + $0x1d08] sm:$0xff]  ;;  %v648_v22 = vrot.slane %v8080_v58, %v8090_v2 }
 0x163   : > { %1996 = vmatprep.subr.mxu1 %v1597_v23  ;;  %1926 = vmatpush1.msra.mxu0 %v1340_v24  ;;  %v1500_v23 = vld [vmem:[#allocation4 + $0x1500] sm:$0xff] }
 0x164   : > { %1997 = vmatpush1.msra.mxu1 %v1596_v25  ;;  %1927 = vmatprep.subr.mxu0 %v1589_v26  ;;  %v1756_v24 = vld [vmem:[#allocation4 + $0x1d00] sm:$0xff] }
 0x165   : > { %1998 = vmatprep.subr.mxu1 %v1845_v27  ;;  %1928 = vmatpush2.msra.mxu0 %v1588_v62  ;;  %v1493_v27 = vld [vmem:[#allocation4 + $0x14c8] sm:$0xff] }
 0x166   : > { %1999 = vmatpush2.msra.mxu1 %v1844_v28  ;;  %1929 = vmatprep.subr.mxu0 %v1581_v29  ;;  %v1749_v62 = vld [vmem:[#allocation4 + $0x1cc8] sm:$0xff]  ;;  %v740_v28 = vadd.f32 %v8075_v47, %v636_v11  ;;  %v640_v29 = vrot.slane %v8080_v58, %v8095_v12  ;;  %v1724_v47 = vld [vmem:[#allocation4 + $0x1c00] sm:$0xff]  ;;  %v1678_v11 = vld [vmem:[#allocation4 + $0x1a90] sm:$0xff] }
 0x167   : > { %2000 = vmatprep.subr.mxu1 %v1837_v30  ;;  %1930 = vmatpush2.msra.mxu0 %v1580_v31  ;;  %v1492_v30 = vld [vmem:[#allocation4 + $0x14c0] sm:$0xff] }
 0x168   : > { %2001 = vmatpush2.msra.mxu1 %v1836_v32  ;;  %1931 = vmatprep.subr.mxu0 %v1573_v1  ;;  %v1748_v31 = vld [vmem:[#allocation4 + $0x1cc0] sm:$0xff]  ;;  %v1485_v1 = vld [vmem:[#allocation4 + $0x1488] sm:$0xff] }
 0x169   : > { %2002 = vmatprep.subr.mxu1 %v1829_v4  ;;  %1932 = vmatpush2.msra.mxu0 %v1572_v33  ;;  %v1741_v4 = vld [vmem:[#allocation4 + $0x1c88] sm:$0xff] }
 0x16a   : > { %2003 = vmatpush2.msra.mxu1 %v1828_v19  ;;  %1933 = vmatprep.subr.mxu0 %v1565_v57  ;;  %v1484_v19 = vld [vmem:[#allocation4 + $0x1480] sm:$0xff] }
 0x16b   : > { %2004 = vmatprep.subr.mxu1 %v1821_v34  ;;  %1934 = vmatpush2.msra.mxu0 %v1564_v36  ;;  %v1740_v57 = vld [vmem:[#allocation4 + $0x1c80] sm:$0xff]  ;;  %v1733_v36 = vld [vmem:[#allocation4 + $0x1c48] sm:$0xff] }
 0x16c   : > { %2005 = vmatpush2.msra.mxu1 %v1820_v37  ;;  %1935 = vmatprep.subr.mxu0 %v1557_v38  ;;  %v811_v37 = vadd.f32 %v8082_v59, %v740_v28  ;;  %v742_v38 = vadd.f32 %v8084_v60, %v640_v29  ;;  %v1718_v59 = vld [vmem:[#allocation4 + $0x1bd0] sm:$0xff] }
 0x16d   : > { %2006 = vmatprep.subr.mxu1 %v1813_v39  ;;  %1936 = vmatpush2.msra.mxu0 %v1556_v40  ;;  %v1476_v39 = vld [vmem:[#allocation4 + $0x1440] sm:$0xff] }
 0x16e   : > { %2007 = vmatpush2.msra.mxu1 %v1812_v41  ;;  %1937 = vmatprep.subr.mxu0 %v1549_v42  ;;  %v1732_v40 = vld [vmem:[#allocation4 + $0x1c40] sm:$0xff]  ;;  %v1469_v42 = vld [vmem:[#allocation4 + $0x1408] sm:$0xff] }
 0x16f   : > { %2008 = vmatprep.subr.mxu1 %v1805_v43  ;;  %1938 = vmatpush2.msra.mxu0 %v1548_v45  ;;  %v1725_v43 = vld [vmem:[#allocation4 + $0x1c08] sm:$0xff] }
 0x170   : > { %2009 = vmatpush2.msra.mxu1 %v1804_v46  ;;  %1939 = vmatprep.subr.mxu0 %v1541_v48  ;;  %v1468_v46 = vld [vmem:[#allocation4 + $0x1400] sm:$0xff]  ;;  %v8106_v48 = vld.sshfl [vmem:[#allocation2 + $0x4] sm:$0x33 pattern:$0x76325410] }
 0x171   : > { %2010 = vmatprep.subr.mxu1 %v1797_v49  ;;  %1940 = vmatpush2.msra.mxu0 %v1540_v50  ;;  %v7565_v49 = vmul.f32 -1.442695, %v811_v37  ;;  %v813_v50 = vadd.f32 %v812_v16, %v742_v38  ;;  %v1663_v16 = vld [vmem:[#allocation4 + $0x1a18] sm:$0xff]  ;;  %v1630_v38 = vld [vmem:[#allocation4 + $0x1910] sm:$0xff] }
 0x172   : > { %2011 = vmatpush2.msra.mxu1 %v1796_v51  ;;  %1941 = vmatprep.subr.mxu0 %v1533_v52  ;;  %v8110_v51 = vcombine.high %v8106_v48, %v8106_v48 }
 0x173   : > { %2012 = vmatprep.subr.mxu1 %v1789_v53  ;;  %1942 = vmatpush2.msra.mxu0 %v1532_v55  ;;  %v1463_v53 = vld [vmem:[#allocation4 + $0x13d8] sm:$0xff]  ;;  %7678 = vpow2.f32 %v7565_v49  ;;  %v7566_v60 = vmul.f32 -1.442695, %v813_v50  ;;  %v1598_v50 = vld [vmem:[#allocation4 + $0x1810] sm:$0xff] }
 0x174   : > { %2013 = vmatpush2.msra.mxu1 %v1788_v56  ;;  %1943 = vmatprep.subr.mxu0 %v1525_v63  ;;  %v1719_v55 = vld [vmem:[#allocation4 + $0x1bd8] sm:$0xff] }
 0x175   : > { %2014 = vmatprep.subr.mxu1 %v1781_v0  ;;  %1944 = vmatpush2.msra.mxu0 %v1524_v3  ;;  %v1711_v63 = vld [vmem:[#allocation4 + $0x1b98] sm:$0xff]  ;;  %v1710_v0 = vld [vmem:[#allocation4 + $0x1b90] sm:$0xff] }
 0x176   : > { %2015 = vmatpush2.msra.mxu1 %v1780_v5  ;;  %1945 = vmatprep.subr.mxu0 %v1517_v6  ;;  %v1703_v3 = vld [vmem:[#allocation4 + $0x1b58] sm:$0xff]  ;;  %v1702_v5 = vld [vmem:[#allocation4 + $0x1b50] sm:$0xff] }
 0x177   : > { %2016 = vmatprep.subr.mxu1 %v1773_v8  ;;  %1946 = vmatpush2.msra.mxu0 %v1516_v9  ;;  %v1695_v6 = vld [vmem:[#allocation4 + $0x1b18] sm:$0xff]  ;;  %v1686_v9 = vld [vmem:[#allocation4 + $0x1ad0] sm:$0xff] }
 0x178   : > { %2017 = vmatpush2.msra.mxu1 %v1772_v10  ;;  %1947 = vmatprep.subr.mxu0 %v1509_v13  ;;  %v1687_v8 = vld [vmem:[#allocation4 + $0x1ad8] sm:$0xff] }
 0x179   : > { %2018 = vmatprep.subr.mxu1 %v1765_v14  ;;  %1948 = vmatpush2.msra.mxu0 %v1508_v15  ;;  %v1679_v10 = vld [vmem:[#allocation4 + $0x1a98] sm:$0xff]  ;;  %v8116_v14 = vsub.s32 4, %v8073_v44  ;;  %v1670_v15 = vld [vmem:[#allocation4 + $0x1a50] sm:$0xff] }
 0x17a   : > { %2019 = vmatpush2.msra.mxu1 %v1764_v18  ;;  %1949 = vmatprep.subr.mxu0 %v1501_v20  ;;  %v1671_v13 = vld [vmem:[#allocation4 + $0x1a58] sm:$0xff]  ;;  %v8119_v18 = vsub.s32 5, %v8073_v44  ;;  %v1662_v20 = vld [vmem:[#allocation4 + $0x1a10] sm:$0xff] }
 0x17b   : > { %2020 = vmatprep.subr.mxu1 %v1757_v21  ;;  %1950 = vmatpush2.msra.mxu0 %v1500_v23  ;;  %v1599_v49 = vld [vmem:[#allocation4 + $0x1818] sm:$0xff] }
 0x17c   : > { %2021 = vmatpush2.msra.mxu1 %v1756_v24  ;;  %1951 = vmatprep.subr.mxu0 %v1493_v27  ;;  %v652_v24 = vrot.slane %v8080_v58, %v8116_v14  ;;  %v1647_v27 = vld [vmem:[#allocation4 + $0x1998] sm:$0xff]  ;;  %v656_v29 = vrot.slane %v8080_v58, %v8119_v18 }
 0x17d   : > { %2022 = vmatprep.subr.mxu1 %v1749_v62  ;;  %1952 = vmatpush2.msra.mxu0 %v1492_v30  ;;  %v1646_v30 = vld [vmem:[#allocation4 + $0x1990] sm:$0xff] }
 0x17e   : > { %2023 = vmatpush2.msra.mxu1 %v1748_v31  ;;  %1953 = vmatprep.subr.mxu0 %v1485_v1  ;;  %v1639_v1 = vld [vmem:[#allocation4 + $0x1958] sm:$0xff] }
 0x17f   : > { %v881_v7 = vpop.f32.mrf.mxu0  ;;  %2024 = vmatprep.subr.mxu1 %v1741_v4  ;;  %1954 = vmatpush2.msra.mxu0 %v1484_v19 }
 0x180   : > { %v882_v32 = vadd.f32 %v881_v7, %v644_v17  ;;  %2025 = vmatpush2.msra.mxu1 %v1740_v57  ;;  %1955 = vmatprep.subr.mxu0 %v1477_v35  ;;  %v1694_v7 = vld [vmem:[#allocation4 + $0x1b10] sm:$0xff]  ;;  %v7679_v17 = vpop.eup %7678  ;;  %v1631_v35 = vld [vmem:[#allocation4 + $0x1918] sm:$0xff] }
 0x181   : > { %v952_v25 = vpop.f32.mrf.mxu1  ;;  %v883_v26 = vpop.f32.mrf.mxu0  ;;  %2026 = vmatprep.subr.mxu1 %v1733_v36  ;;  %1956 = vmatpush2.msra.mxu0 %v1476_v39 }
 0x182   : > { %v884_v33 = vadd.f32 %v883_v26, %v648_v22  ;;  %v953_v41 = vadd.f32 %v952_v25, %v882_v32  ;;  %2027 = vmatpush2.msra.mxu1 %v1732_v40  ;;  %1957 = vmatprep.subr.mxu0 %v1469_v42  ;;  %v1655_v22 = vld [vmem:[#allocation4 + $0x19d8] sm:$0xff]  ;;  %v1654_v25 = vld [vmem:[#allocation4 + $0x19d0] sm:$0xff]  ;;  %v1247_v26 = vadd.f32 1.0, %v7679_v17 }
 0x183   : > { %v954_v34 = vpop.f32.mrf.mxu1  ;;  %2028 = vmatprep.subr.mxu1 %v1725_v43  ;;  %1958 = vmatpush2.msra.mxu0 %v1468_v46  ;;  %v1623_v40 = vld [vmem:[#allocation4 + $0x18d8] sm:$0xff]  ;;  %v1622_v42 = vld [vmem:[#allocation4 + $0x18d0] sm:$0xff] }
 0x184   : > { %v955_v45 = vadd.f32 %v954_v34, %v884_v33  ;;  %v7567_v52 = vmul.f32 -1.442695, %v953_v41  ;;  %2029 = vmatpush2.msra.mxu1 %v1724_v47  ;;  %2030 = vmatprep.mubr.f32.mxu1 %v8110_v51  ;;  %v1638_v33 = vld [vmem:[#allocation4 + $0x1950] sm:$0xff]  ;;  %v1615_v43 = vld [vmem:[#allocation4 + $0x1898] sm:$0xff] }
 0x185   : > { %2037 = vmatprep.subr.mxu0 %v1463_v53  ;;  %2108 = vmatprep.subr.mxu1 %v1719_v55  ;;  %v1607_v46 = vld [vmem:[#allocation4 + $0x1858] sm:$0xff]  ;;  %v1606_v47 = vld [vmem:[#allocation4 + $0x1850] sm:$0xff]  ;;  %v7571_v55 = vld.sshfl [vmem:[#allocation3] sm:$0x33 pattern:$0x76325410] }
 0x186   : > { %v7568_v56 = vmul.f32 -1.442695, %v955_v45  ;;  %2031 = vmatmul.mubr.f32.vlgmr.msra.gmra.mxu1 %v8106_v48  ;;  %7680 = vpow2.f32 %v7567_v52  ;;  %v1614_v45 = vld [vmem:[#allocation4 + $0x1890] sm:$0xff]  ;;  %v1847_v52 = vld [vmem:[#allocation4 + $0x1fd8] sm:$0xff] }
 0x187   : > { %2109 = vmatpush1.msra.mxu1 %v1718_v59  ;;  %2172 = vmatprep.mubr.f32.mxu1 %v8110_v51  ;;  %v1846_v53 = vld [vmem:[#allocation4 + $0x1fd0] sm:$0xff] }
 0x188   : > { %2110 = vmatprep.subr.mxu1 %v1711_v63  ;;  %7682 = vpow2.f32 %v7568_v56  ;;  %v1839_v56 = vld [vmem:[#allocation4 + $0x1f98] sm:$0xff] }
 0x189   : > { %2111 = vmatpush1.msra.mxu1 %v1710_v0  ;;  %7684 = vpow2.f32 %v7566_v60  ;;  %v1838_v60 = vld [vmem:[#allocation4 + $0x1f90] sm:$0xff]  ;;  %v1831_v0 = vld [vmem:[#allocation4 + $0x1f58] sm:$0xff] }
 0x18a   : > { %2112 = vmatprep.subr.mxu1 %v1703_v3  ;;  %7686 = vrcp.f32 %v1247_v26  ;;  %v1799_v26 = vld [vmem:[#allocation4 + $0x1e58] sm:$0xff] }
 0x18b   : > { %2113 = vmatpush1.msra.mxu1 %v1702_v5  ;;  %v1287_v5 = vcombine.high %v7571_v55, %v7571_v55 }
 0x18c   : > { %2114 = vmatprep.subr.mxu1 %v1695_v6  ;;  %v1830_v6 = vld [vmem:[#allocation4 + $0x1f50] sm:$0xff] }
 0x18d   : > { %2115 = vmatpush1.msra.mxu1 %v1694_v7 }
 0x18e   : > { %2116 = vmatprep.subr.mxu1 %v1687_v8  ;;  %v1823_v8 = vld [vmem:[#allocation4 + $0x1f18] sm:$0xff] }
 0x18f   : > { %2117 = vmatpush1.msra.mxu1 %v1686_v9 }
 0x190   : > { %2118 = vmatprep.subr.mxu1 %v1679_v10 }
 0x191   : > { %2119 = vmatpush1.msra.mxu1 %v1678_v11  ;;  %v1822_v11 = vld [vmem:[#allocation4 + $0x1f10] sm:$0xff] }
 0x192   : > { %2120 = vmatprep.subr.mxu1 %v1671_v13 }
 0x193   : > { %2121 = vmatpush1.msra.mxu1 %v1670_v15  ;;  %v7681_v21 = vpop.eup %7680  ;;  %v1815_v15 = vld [vmem:[#allocation4 + $0x1ed8] sm:$0xff] }
 0x194   : > { %2122 = vmatprep.subr.mxu1 %v1663_v16  ;;  %v1259_v28 = vadd.f32 1.0, %v7681_v21  ;;  %v1814_v21 = vld [vmem:[#allocation4 + $0x1ed0] sm:$0xff] }
 0x195   : > { %2123 = vmatpush1.msra.mxu1 %v1662_v20  ;;  %v7683_v23 = vpop.eup %7682 }
 0x196   : > { %2124 = vmatprep.subr.mxu1 %v1655_v22  ;;  %v7685_v62 = vpop.eup %7684  ;;  %v1260_v31 = vadd.f32 1.0, %v7683_v23  ;;  %7688 = vrcp.f32 %v1259_v28  ;;  %v1807_v22 = vld [vmem:[#allocation4 + $0x1e98] sm:$0xff] }
 0x197   : > { %2125 = vmatpush1.msra.mxu1 %v1654_v25  ;;  %v1248_v19 = vadd.f32 1.0, %v7685_v62  ;;  %v7687_v59 = vpop.eup %7686  ;;  %v1806_v25 = vld [vmem:[#allocation4 + $0x1e90] sm:$0xff]  ;;  %v1791_v28 = vld [vmem:[#allocation4 + $0x1e18] sm:$0xff] }
 0x198   : > { %2126 = vmatprep.subr.mxu1 %v1647_v27  ;;  %7690 = vrcp.f32 %v1260_v31  ;;  %v1798_v62 = vld [vmem:[#allocation4 + $0x1e50] sm:$0xff] }
 0x199   : > { %2127 = vmatpush1.msra.mxu1 %v1646_v30  ;;  %v1783_v30 = vld [vmem:[#allocation4 + $0x1dd8] sm:$0xff]  ;;  %v1782_v31 = vld [vmem:[#allocation4 + $0x1dd0] sm:$0xff] }
 0x19a   : > { %2128 = vmatprep.subr.mxu1 %v1639_v1  ;;  %v1774_v1 = vld [vmem:[#allocation4 + $0x1d90] sm:$0xff] }
 0x19b   : > { %2129 = vmatpush1.msra.mxu1 %v1638_v33  ;;  %v1766_v33 = vld [vmem:[#allocation4 + $0x1d50] sm:$0xff] }
 0x19c   : > { %2130 = vmatprep.subr.mxu1 %v1631_v35  ;;  %v1750_v35 = vld [vmem:[#allocation4 + $0x1cd0] sm:$0xff] }
 0x19d   : > { %2131 = vmatpush1.msra.mxu1 %v1630_v38  ;;  %v1735_v38 = vld [vmem:[#allocation4 + $0x1c58] sm:$0xff] }
 0x19e   : > { %2132 = vmatprep.subr.mxu1 %v1623_v40  ;;  %v1727_v40 = vld [vmem:[#allocation4 + $0x1c18] sm:$0xff] }
 0x19f   : > { %2133 = vmatpush1.msra.mxu1 %v1622_v42  ;;  %v1721_v42 = vld [vmem:[#allocation4 + $0x1be8] sm:$0xff] }
 0x1a0   : > { %2134 = vmatprep.subr.mxu1 %v1615_v43  ;;  %v1720_v43 = vld [vmem:[#allocation4 + $0x1be0] sm:$0xff] }
 0x1a1   : > { %2135 = vmatpush1.msra.mxu1 %v1614_v45  ;;  %v1713_v45 = vld [vmem:[#allocation4 + $0x1ba8] sm:$0xff] }
 0x1a2   : > { %2136 = vmatprep.subr.mxu1 %v1607_v46  ;;  %v1712_v46 = vld [vmem:[#allocation4 + $0x1ba0] sm:$0xff] }
 0x1a3   : > { %2137 = vmatpush1.msra.mxu1 %v1606_v47  ;;  %v7689_v63 = vpop.eup %7688  ;;  %v1705_v47 = vld [vmem:[#allocation4 + $0x1b68] sm:$0xff] }
 0x1a4   : > { %2138 = vmatprep.subr.mxu1 %v1599_v49  ;;  %v1290_v16 = vmul.f32 %v7689_v63, %v7571_v55  ;;  %v1704_v49 = vld [vmem:[#allocation4 + $0x1b60] sm:$0xff] }
 0x1a5   : > { %2139 = vmatpush1.msra.mxu1 %v1598_v50  ;;  %v7691_v3 = vpop.eup %7690  ;;  %v1697_v50 = vld [vmem:[#allocation4 + $0x1b28] sm:$0xff]  ;;  %v1688_v55 = vld [vmem:[#allocation4 + $0x1ae0] sm:$0xff] }
 0x1a6   : > { %2140 = vmatprep.subr.mxu1 %v1847_v52  ;;  %v1291_v17 = vmul.f32 %v7691_v3, %v1287_v5  ;;  %v1696_v52 = vld [vmem:[#allocation4 + $0x1b20] sm:$0xff]  ;;  %v8134_v5 = vsub.s32 6, %v8073_v44 }
 0x1a7   : > { %2141 = vmatpush2.msra.mxu1 %v1846_v53  ;;  %v1689_v53 = vld [vmem:[#allocation4 + $0x1ae8] sm:$0xff]  ;;  %v1672_v63 = vld [vmem:[#allocation4 + $0x1a60] sm:$0xff] }
 0x1a8   : > { %2142 = vmatprep.subr.mxu1 %v1839_v56  ;;  %v1681_v56 = vld [vmem:[#allocation4 + $0x1aa8] sm:$0xff]  ;;  %v1664_v3 = vld [vmem:[#allocation4 + $0x1a20] sm:$0xff] }
 0x1a9   : > { %2143 = vmatpush2.msra.mxu1 %v1838_v60  ;;  %v1673_v60 = vld [vmem:[#allocation4 + $0x1a68] sm:$0xff] }
 0x1aa   : > { %2144 = vmatprep.subr.mxu1 %v1831_v0  ;;  %v1665_v0 = vld [vmem:[#allocation4 + $0x1a28] sm:$0xff] }
 0x1ab   : > { %2145 = vmatpush2.msra.mxu1 %v1830_v6  ;;  %v1657_v6 = vld [vmem:[#allocation4 + $0x19e8] sm:$0xff] }
 0x1ac   : > { %2146 = vmatprep.subr.mxu1 %v1823_v8  ;;  %v8137_v8 = vsub.s32 7, %v8073_v44  ;;  %v1632_v44 = vld [vmem:[#allocation4 + $0x1920] sm:$0xff] }
 0x1ad   : > { %2147 = vmatpush2.msra.mxu1 %v1822_v11  ;;  %v660_v11 = vrot.slane %v8080_v58, %v8134_v5 }
 0x1ae   : > { %2148 = vmatprep.subr.mxu1 %v1815_v15  ;;  %v1640_v15 = vld [vmem:[#allocation4 + $0x1960] sm:$0xff] }
 0x1af   : > { %2149 = vmatpush2.msra.mxu1 %v1814_v21 }
 0x1b0   : > { %2150 = vmatprep.subr.mxu1 %v1807_v22 }
 0x1b1   : > { %2151 = vmatpush2.msra.mxu1 %v1806_v25  ;;  %v1625_v25 = vld [vmem:[#allocation4 + $0x18e8] sm:$0xff] }
 0x1b2   : > { %2152 = vmatprep.subr.mxu1 %v1799_v26 }
 0x1b3   : > { %2153 = vmatpush2.msra.mxu1 %v1798_v62 }
 0x1b4   : > { %2154 = vmatprep.subr.mxu1 %v1791_v28 }
 0x1c1   : > { %v1023_v32 = vpop.f32.mrf.mxu0 }
 0x1c2   : > { %v1024_v4 = vadd.f32 %v1023_v32, %v652_v24  ;;  %v1775_v32 = vld [vmem:[#allocation4 + $0x1d98] sm:$0xff] }
 0x1c3   : > { %v1094_v57 = vpop.f32.mrf.mxu1  ;;  %v1025_v34 = vpop.f32.mrf.mxu0 }
 0x1c4   : > { %v1095_v36 = vadd.f32 %v1094_v57, %v1024_v4  ;;  %v1026_v37 = vadd.f32 %v1025_v34, %v656_v29  ;;  %v1790_v29 = vld [vmem:[#allocation4 + $0x1e10] sm:$0xff]  ;;  %v1767_v4 = vld [vmem:[#allocation4 + $0x1d58] sm:$0xff] }
 0x1c5   : > { %v1096_v39 = vpop.f32.mrf.mxu1  ;;  %2155 = vmatpush2.msra.mxu1 %v1790_v29  ;;  %v1758_v57 = vld [vmem:[#allocation4 + $0x1d10] sm:$0xff]  ;;  %v1751_v34 = vld [vmem:[#allocation4 + $0x1cd8] sm:$0xff]  ;;  %v1617_v29 = vld [vmem:[#allocation4 + $0x18a8] sm:$0xff] }
 0x1c6   : > { %7692 = vtanh.f32 %v1095_v36  ;;  %v1097_v41 = vadd.f32 %v1096_v39, %v1026_v37  ;;  %2156 = vmatprep.subr.mxu1 %v1783_v30  ;;  %v1743_v36 = vld [vmem:[#allocation4 + $0x1c98] sm:$0xff]  ;;  %v1742_v37 = vld [vmem:[#allocation4 + $0x1c90] sm:$0xff] }
 0x1c7   : > { %7694 = vrcp.f32 %v1248_v19  ;;  %2157 = vmatpush2.msra.mxu1 %v1782_v31  ;;  %v1759_v19 = vld [vmem:[#allocation4 + $0x1d18] sm:$0xff]  ;;  %v1734_v39 = vld [vmem:[#allocation4 + $0x1c50] sm:$0xff]  ;;  %v1616_v31 = vld [vmem:[#allocation4 + $0x18a0] sm:$0xff] }
 0x1c8   : > { %7696 = vtanh.f32 %v1097_v41  ;;  %2158 = vmatprep.subr.mxu1 %v1775_v32  ;;  %v1726_v41 = vld [vmem:[#allocation4 + $0x1c10] sm:$0xff] }
 0x1c9   : > { %2159 = vmatpush2.msra.mxu1 %v1774_v1  ;;  %v1609_v1 = vld [vmem:[#allocation4 + $0x1868] sm:$0xff] }
 0x1ca   : > { %2160 = vmatprep.subr.mxu1 %v1767_v4  ;;  %v1608_v4 = vld [vmem:[#allocation4 + $0x1860] sm:$0xff] }
 0x1cb   : > { %2161 = vmatpush2.msra.mxu1 %v1766_v33 }
 0x1cc   : > { %2162 = vmatprep.subr.mxu1 %v1759_v19  ;;  %v1601_v19 = vld [vmem:[#allocation4 + $0x1828] sm:$0xff] }
 0x1cd   : > { %2163 = vmatpush2.msra.mxu1 %v1758_v57  ;;  %v1600_v57 = vld [vmem:[#allocation4 + $0x1820] sm:$0xff] }
 0x1ce   : > { %2164 = vmatprep.subr.mxu1 %v1751_v34  ;;  %v1849_v34 = vld [vmem:[#allocation4 + $0x1fe8] sm:$0xff] }
 0x1cf   : > { %2165 = vmatpush2.msra.mxu1 %v1750_v35  ;;  %v1848_v35 = vld [vmem:[#allocation4 + $0x1fe0] sm:$0xff] }
 0x1d0   : > { %2166 = vmatprep.subr.mxu1 %v1743_v36  ;;  %v1841_v36 = vld [vmem:[#allocation4 + $0x1fa8] sm:$0xff] }
 0x1d1   : > { %2167 = vmatpush2.msra.mxu1 %v1742_v37  ;;  %v1840_v37 = vld [vmem:[#allocation4 + $0x1fa0] sm:$0xff] }
 0x1d2   : > { %2168 = vmatprep.subr.mxu1 %v1735_v38  ;;  %v1833_v38 = vld [vmem:[#allocation4 + $0x1f68] sm:$0xff] }
 0x1d3   : > { %v7693_v7 = vpop.eup %7692  ;;  %2169 = vmatpush2.msra.mxu1 %v1734_v39  ;;  %v1832_v39 = vld [vmem:[#allocation4 + $0x1f60] sm:$0xff] }
 0x1d4   : > { %v7695_v9 = vpop.eup %7694  ;;  %v1292_v10 = vmul.f32 %v7693_v7, %v7687_v59  ;;  %2170 = vmatprep.subr.mxu1 %v1727_v40  ;;  %v1680_v59 = vld [vmem:[#allocation4 + $0x1aa0] sm:$0xff]  ;;  %v1825_v40 = vld [vmem:[#allocation4 + $0x1f28] sm:$0xff] }
 0x1d5   : > { %v7697_v13 = vpop.eup %7696  ;;  %2171 = vmatpush2.msra.mxu1 %v1726_v41  ;;  %v1656_v7 = vld [vmem:[#allocation4 + $0x19e0] sm:$0xff] }
 0x1d6   : > { %v1293_v20 = vmul.f32 %v7697_v13, %v7695_v9  ;;  %v8125_v23 = vadd.f32 %v1292_v10, %v1290_v16  ;;  %2250 = vmatprep.subr.mxu1 %v1721_v42  ;;  %2173 = vmatmul.mubr.f32.vlgmr.msra.gmra.mxu1 %v8106_v48  ;;  %v1649_v9 = vld [vmem:[#allocation4 + $0x19a8] sm:$0xff]  ;;  %v1648_v10 = vld [vmem:[#allocation4 + $0x19a0] sm:$0xff]  ;;  %v664_v16 = vrot.slane %v8080_v58, %v8137_v8 }
 0x1d7   : > { %2251 = vmatpush1.msra.mxu1 %v1720_v43  ;;  %2314 = vmatprep.mubr.f32.mxu1 %v8110_v51  ;;  %v1641_v13 = vld [vmem:[#allocation4 + $0x1968] sm:$0xff]  ;;  %v1824_v41 = vld [vmem:[#allocation4 + $0x1f20] sm:$0xff] }
 0x1d8   : > { %v8127_v24 = vadd.f32 %v1293_v20, %v1291_v17  ;;  %2252 = vmatprep.subr.mxu1 %v1713_v45  ;;  %v1633_v17 = vld [vmem:[#allocation4 + $0x1928] sm:$0xff]  ;;  %v1816_v43 = vld [vmem:[#allocation4 + $0x1ee0] sm:$0xff] }
 0x1d9   : > { %2253 = vmatpush1.msra.mxu1 %v1712_v46  ;;  %v1817_v42 = vld [vmem:[#allocation4 + $0x1ee8] sm:$0xff] }
 0x1da   : > { %v1302_v27 = vcombine.low %v8125_v23, %v8127_v24  ;;  %2254 = vmatprep.subr.mxu1 %v1705_v47  ;;  %v1809_v45 = vld [vmem:[#allocation4 + $0x1ea8] sm:$0xff]  ;;  %v1808_v47 = vld [vmem:[#allocation4 + $0x1ea0] sm:$0xff] }
 0x1db   : > { %2255 = vmatpush1.msra.mxu1 %v1704_v49 }
 0x1dc   : > { %7572 = vst.sshfl [vmem:[#allocation3] sm:$0x33 pattern:$0x76325410] %v1302_v27  ;;  %2256 = vmatprep.subr.mxu1 %v1697_v50  ;;  %v1624_v27 = vld [vmem:[#allocation4 + $0x18e0] sm:$0xff]  ;;  %v1801_v50 = vld [vmem:[#allocation4 + $0x1e68] sm:$0xff] }
 0x1dd   : > { %2257 = vmatpush1.msra.mxu1 %v1696_v52 }
 0x1de   : > { %2258 = vmatprep.subr.mxu1 %v1689_v53  ;;  %v1800_v53 = vld [vmem:[#allocation4 + $0x1e60] sm:$0xff] }
 0x1df   : > { %2259 = vmatpush1.msra.mxu1 %v1688_v55 }
 0x1e0   : > { %2260 = vmatprep.subr.mxu1 %v1681_v56  ;;  %v1793_v56 = vld [vmem:[#allocation4 + $0x1e28] sm:$0xff] }
 0x1e1   : > { %2261 = vmatpush1.msra.mxu1 %v1680_v59  ;;  %v1792_v59 = vld [vmem:[#allocation4 + $0x1e20] sm:$0xff] }
 0x1e2   : > { %2262 = vmatprep.subr.mxu1 %v1673_v60  ;;  %v1785_v60 = vld [vmem:[#allocation4 + $0x1de8] sm:$0xff] }
 0x1e3   : > { %2263 = vmatpush1.msra.mxu1 %v1672_v63  ;;  %v1784_v63 = vld [vmem:[#allocation4 + $0x1de0] sm:$0xff] }
 0x1e4   : > { %2264 = vmatprep.subr.mxu1 %v1665_v0  ;;  %v1777_v0 = vld [vmem:[#allocation4 + $0x1da8] sm:$0xff] }
 0x1e5   : > { %2265 = vmatpush1.msra.mxu1 %v1664_v3  ;;  %v1776_v3 = vld [vmem:[#allocation4 + $0x1da0] sm:$0xff] }
 0x1e6   : > { %2266 = vmatprep.subr.mxu1 %v1657_v6  ;;  %v1768_v6 = vld [vmem:[#allocation4 + $0x1d60] sm:$0xff] }
 0x1e7   : > { %2267 = vmatpush1.msra.mxu1 %v1656_v7  ;;  %v1761_v7 = vld [vmem:[#allocation4 + $0x1d28] sm:$0xff] }
 0x1e8   : > { %2268 = vmatprep.subr.mxu1 %v1649_v9  ;;  %v1760_v9 = vld [vmem:[#allocation4 + $0x1d20] sm:$0xff] }
 0x1e9   : > { %2269 = vmatpush1.msra.mxu1 %v1648_v10  ;;  %v1752_v10 = vld [vmem:[#allocation4 + $0x1ce0] sm:$0xff] }
 0x1ea   : > { %2270 = vmatprep.subr.mxu1 %v1641_v13  ;;  %v1745_v13 = vld [vmem:[#allocation4 + $0x1ca8] sm:$0xff] }
 0x1eb   : > { %2271 = vmatpush1.msra.mxu1 %v1640_v15 }
 0x1ec   : > { %2272 = vmatprep.subr.mxu1 %v1633_v17 }
 0x1ed   : > { %2273 = vmatpush1.msra.mxu1 %v1632_v44  ;;  %v1736_v44 = vld [vmem:[#allocation4 + $0x1c60] sm:$0xff] }
 0x1ee   : > { %2274 = vmatprep.subr.mxu1 %v1625_v25 }
 0x1ef   : > { %2275 = vmatpush1.msra.mxu1 %v1624_v27  ;;  %v1462_v27 = vld [vmem:[#allocation4 + $0x13d0] sm:$0xff] }
 0x1f0   : > { %2276 = vmatprep.subr.mxu1 %v1617_v29  ;;  %v1455_v29 = vld [vmem:[#allocation4 + $0x1398] sm:$0xff] }
 0x1f1   : > { %2277 = vmatpush1.msra.mxu1 %v1616_v31  ;;  %v1454_v31 = vld [vmem:[#allocation4 + $0x1390] sm:$0xff] }
 0x1f2   : > { %2278 = vmatprep.subr.mxu1 %v1609_v1  ;;  %v1715_v1 = vld [vmem:[#allocation4 + $0x1bb8] sm:$0xff] }
 0x1f3   : > { %2279 = vmatpush1.msra.mxu1 %v1608_v4  ;;  %v1446_v4 = vld [vmem:[#allocation4 + $0x1350] sm:$0xff] }
 0x1f4   : > { %2280 = vmatprep.subr.mxu1 %v1601_v19  ;;  %v1439_v19 = vld [vmem:[#allocation4 + $0x1318] sm:$0xff] }
 0x1f5   : > { %2281 = vmatpush1.msra.mxu1 %v1600_v57  ;;  %v1707_v57 = vld [vmem:[#allocation4 + $0x1b78] sm:$0xff] }
 0x1f6   : > { %2282 = vmatprep.subr.mxu1 %v1849_v34  ;;  %v1438_v34 = vld [vmem:[#allocation4 + $0x1310] sm:$0xff] }
 0x1f7   : > { %2283 = vmatpush2.msra.mxu1 %v1848_v35  ;;  %v1706_v35 = vld [vmem:[#allocation4 + $0x1b70] sm:$0xff] }
 0x1f8   : > { %2284 = vmatprep.subr.mxu1 %v1841_v36  ;;  %v1431_v36 = vld [vmem:[#allocation4 + $0x12d8] sm:$0xff] }
 0x1f9   : > { %2285 = vmatpush2.msra.mxu1 %v1840_v37  ;;  %v1699_v37 = vld [vmem:[#allocation4 + $0x1b38] sm:$0xff] }
 0x1fa   : > { %2286 = vmatprep.subr.mxu1 %v1833_v38  ;;  %v1430_v38 = vld [vmem:[#allocation4 + $0x12d0] sm:$0xff] }
 0x1fb   : > { %2287 = vmatpush2.msra.mxu1 %v1832_v39  ;;  %v1698_v39 = vld [vmem:[#allocation4 + $0x1b30] sm:$0xff] }
 0x1fc   : > { %2288 = vmatprep.subr.mxu1 %v1825_v40  ;;  %v1423_v40 = vld [vmem:[#allocation4 + $0x1298] sm:$0xff] }
 0x1fd   : > { %2289 = vmatpush2.msra.mxu1 %v1824_v41  ;;  %v1422_v41 = vld [vmem:[#allocation4 + $0x1290] sm:$0xff] }
 0x1fe   : > { %2290 = vmatprep.subr.mxu1 %v1817_v42  ;;  %v1690_v42 = vld [vmem:[#allocation4 + $0x1af0] sm:$0xff] }
 0x1ff   : > { %2291 = vmatpush2.msra.mxu1 %v1816_v43  ;;  %v1415_v43 = vld [vmem:[#allocation4 + $0x1258] sm:$0xff] }
 0x200   : > { %2292 = vmatprep.subr.mxu1 %v1809_v45  ;;  %v1683_v45 = vld [vmem:[#allocation4 + $0x1ab8] sm:$0xff] }
 0x201   : > { %2293 = vmatpush2.msra.mxu1 %v1808_v47  ;;  %v1682_v47 = vld [vmem:[#allocation4 + $0x1ab0] sm:$0xff] }
 0x202   : > { %2294 = vmatprep.subr.mxu1 %v1801_v50  ;;  %v1675_v50 = vld [vmem:[#allocation4 + $0x1a78] sm:$0xff] }
 0x203   : > { %v1165_v20 = vpop.f32.mrf.mxu0  ;;  %2295 = vmatpush2.msra.mxu1 %v1800_v53  ;;  %v1674_v53 = vld [vmem:[#allocation4 + $0x1a70] sm:$0xff] }
 0x204   : > { %v1236_v21 = vpop.f32.mrf.mxu1  ;;  %v1166_v22 = vadd.f32 %v1165_v20, %v660_v11  ;;  %2296 = vmatprep.subr.mxu1 %v1793_v56  ;;  %v1737_v20 = vld [vmem:[#allocation4 + $0x1c68] sm:$0xff]  ;;  %v1667_v56 = vld [vmem:[#allocation4 + $0x1a38] sm:$0xff] }
 0x205   : > { %v1167_v26 = vpop.f32.mrf.mxu0  ;;  %2297 = vmatpush2.msra.mxu1 %v1792_v59  ;;  %v1398_v59 = vld [vmem:[#allocation4 + $0x11d0] sm:$0xff] }
 0x206   : > { %v1237_v62 = vadd.f32 %v1236_v21, %v1166_v22  ;;  %v1168_v28 = vadd.f32 %v1167_v26, %v664_v16  ;;  %v1238_v30 = vpop.f32.mrf.mxu1  ;;  %2298 = vmatprep.subr.mxu1 %v1785_v60  ;;  %v1744_v16 = vld [vmem:[#allocation4 + $0x1ca0] sm:$0xff]  ;;  %v1729_v26 = vld [vmem:[#allocation4 + $0x1c28] sm:$0xff]  ;;  %v1666_v60 = vld [vmem:[#allocation4 + $0x1a30] sm:$0xff] }
 0x207   : > { %2299 = vmatpush2.msra.mxu1 %v1784_v63  ;;  %v1391_v63 = vld [vmem:[#allocation4 + $0x1198] sm:$0xff] }
 0x208   : > { %v7569_v58 = vmul.f32 -1.442695, %v1237_v62  ;;  %v1239_v32 = vadd.f32 %v1238_v30, %v1168_v28  ;;  %2300 = vmatprep.subr.mxu1 %v1777_v0  ;;  %v1728_v62 = vld [vmem:[#allocation4 + $0x1c20] sm:$0xff]  ;;  %v1723_v30 = vld [vmem:[#allocation4 + $0x1bf8] sm:$0xff] }
 0x209   : > { %2301 = vmatpush2.msra.mxu1 %v1776_v3  ;;  %v1659_v0 = vld [vmem:[#allocation4 + $0x19f8] sm:$0xff]  ;;  %v1390_v3 = vld [vmem:[#allocation4 + $0x1190] sm:$0xff] }
 0x20a   : > { %7698 = vpow2.f32 %v7569_v58  ;;  %v7570_v33 = vmul.f32 -1.442695, %v1239_v32  ;;  %v1722_v58 = vld [vmem:[#allocation4 + $0x1bf0] sm:$0xff]  ;;  %v1447_v32 = vld [vmem:[#allocation4 + $0x1358] sm:$0xff] }
 0x20c   : > { %7700 = vpow2.f32 %v7570_v33  ;;  %v1714_v33 = vld [vmem:[#allocation4 + $0x1bb0] sm:$0xff] }
 0x20d   : > { %7702 = vtanh.f32 %v8125_v23  ;;  %v1769_v23 = vld [vmem:[#allocation4 + $0x1d68] sm:$0xff] }
 0x20e   : > { %2302 = vmatprep.subr.mxu1 %v1769_v23  ;;  %v1658_v23 = vld [vmem:[#allocation4 + $0x19f0] sm:$0xff] }
 0x20f   : > { %2303 = vmatpush2.msra.mxu1 %v1768_v6  ;;  %v1383_v6 = vld [vmem:[#allocation4 + $0x1158] sm:$0xff] }
 0x210   : > { %2304 = vmatprep.subr.mxu1 %v1761_v7  ;;  %v1651_v7 = vld [vmem:[#allocation4 + $0x19b8] sm:$0xff] }
 0x211   : > { %2305 = vmatpush2.msra.mxu1 %v1760_v9  ;;  %v1382_v9 = vld [vmem:[#allocation4 + $0x1150] sm:$0xff] }
 0x217   : > { %v7699_v46 = vpop.eup %7698 }
 0x218   : > { %v1273_v49 = vadd.f32 1.0, %v7699_v46  ;;  %v1414_v46 = vld [vmem:[#allocation4 + $0x1250] sm:$0xff] }
 0x219   : > { %v7701_v52 = vpop.eup %7700 }
 0x21a   : > { %7704 = vrcp.f32 %v1273_v49  ;;  %v1274_v55 = vadd.f32 1.0, %v7701_v52  ;;  %v7703_v11 = vpop.eup %7702  ;;  %v1407_v49 = vld [vmem:[#allocation4 + $0x1218] sm:$0xff]  ;;  %v1406_v52 = vld [vmem:[#allocation4 + $0x1210] sm:$0xff] }
 0x21b   : > { %7706 = vtanh.f32 %v8127_v24  ;;  %v1753_v24 = vld [vmem:[#allocation4 + $0x1ce8] sm:$0xff] }
 0x21c   : > { %7708 = vrcp.f32 %v1274_v55  ;;  %2306 = vmatprep.subr.mxu1 %v1753_v24  ;;  %v1399_v55 = vld [vmem:[#allocation4 + $0x11d8] sm:$0xff]  ;;  %v1650_v24 = vld [vmem:[#allocation4 + $0x19b0] sm:$0xff] }
 0x21d   : > { %2307 = vmatpush2.msra.mxu1 %v1752_v10  ;;  %v1375_v10 = vld [vmem:[#allocation4 + $0x1118] sm:$0xff] }
 0x21e   : > { %2308 = vmatprep.subr.mxu1 %v1745_v13  ;;  %v1374_v13 = vld [vmem:[#allocation4 + $0x1110] sm:$0xff] }
 0x21f   : > { %2309 = vmatpush2.msra.mxu1 %v1744_v16  ;;  %v1367_v16 = vld [vmem:[#allocation4 + $0x10d8] sm:$0xff] }
 0x220   : > { %2310 = vmatprep.subr.mxu1 %v1737_v20  ;;  %v1366_v20 = vld [vmem:[#allocation4 + $0x10d0] sm:$0xff] }
 0x221   : > { %2311 = vmatpush2.msra.mxu1 %v1736_v44  ;;  %v1359_v44 = vld [vmem:[#allocation4 + $0x1098] sm:$0xff] }
 0x222   : > { %2312 = vmatprep.subr.mxu1 %v1729_v26  ;;  %v1627_v26 = vld [vmem:[#allocation4 + $0x18f8] sm:$0xff] }
 0x223   : > { %2313 = vmatpush2.msra.mxu1 %v1728_v62  ;;  %v1626_v62 = vld [vmem:[#allocation4 + $0x18f0] sm:$0xff] }
 0x224   : > { %2392 = vmatprep.subr.mxu1 %v1723_v30  ;;  %2315 = vmatmul.mubr.f32.vlgmr.msra.gmra.mxu1 %v8106_v48  ;;  %v1691_v48 = vld [vmem:[#allocation4 + $0x1af8] sm:$0xff]  ;;  %v1350_v30 = vld [vmem:[#allocation4 + $0x1050] sm:$0xff] }
 0x225   : > { %2393 = vmatpush1.msra.mxu1 %v1722_v58  ;;  %v1343_v58 = vld [vmem:[#allocation4 + $0x1018] sm:$0xff]  ;;  %2456 = vmatprep.mubr.f32.mxu1 %v8110_v51  ;;  %v1401_v51 = vld [vmem:[#allocation4 + $0x11e8] sm:$0xff] }
 0x226   : > { %2394 = vmatprep.subr.mxu1 %v1715_v1  ;;  %v1342_v1 = vld [vmem:[#allocation4 + $0x1010] sm:$0xff] }
 0x227   : > { %v7705_v15 = vpop.eup %7704  ;;  %2395 = vmatpush1.msra.mxu1 %v1714_v33  ;;  %v1591_v33 = vld [vmem:[#allocation4 + $0x17d8] sm:$0xff] }
 0x228   : > { %v7707_v17 = vpop.eup %7706  ;;  %v8147_v25 = vmul.f32 %v7705_v15, %v7703_v11  ;;  %2396 = vmatprep.subr.mxu1 %v1707_v57  ;;  %v1643_v11 = vld [vmem:[#allocation4 + $0x1978] sm:$0xff]  ;;  %v1642_v15 = vld [vmem:[#allocation4 + $0x1970] sm:$0xff] }
 0x229   : > { %v7709_v21 = vpop.eup %7708  ;;  %2397 = vmatpush1.msra.mxu1 %v1706_v35  ;;  %v1590_v57 = vld [vmem:[#allocation4 + $0x17d0] sm:$0xff]  ;;  %v1583_v35 = vld [vmem:[#allocation4 + $0x1798] sm:$0xff] }
 0x22a   : > { %v8145_v22 = vmul.f32 %v7709_v21, %v7707_v17  ;;  %2398 = vmatprep.subr.mxu1 %v1699_v37  ;;  %v1635_v17 = vld [vmem:[#allocation4 + $0x1938] sm:$0xff]  ;;  %v1634_v21 = vld [vmem:[#allocation4 + $0x1930] sm:$0xff] }
 0x22b   : > { %2399 = vmatpush1.msra.mxu1 %v1698_v39  ;;  %v1582_v37 = vld [vmem:[#allocation4 + $0x1790] sm:$0xff]  ;;  %v1575_v39 = vld [vmem:[#allocation4 + $0x1758] sm:$0xff] }
 0x22c   : > { %1959 = vmatprep.mubr.f32.mxu0 %v8145_v22  ;;  %v1314_v28 = vcombine.low %v8147_v25, %v8145_v22  ;;  %2400 = vmatprep.subr.mxu1 %v1691_v48  ;;  %v1574_v48 = vld [vmem:[#allocation4 + $0x1750] sm:$0xff] }
 0x22d   : > { %1960 = vmatmul.mubr.f32.vlgmr.msra.gmra.mxu0 %v8147_v25  ;;  %2401 = vmatpush1.msra.mxu1 %v1690_v42  ;;  %v1567_v42 = vld [vmem:[#allocation4 + $0x1718] sm:$0xff] }
 0x22e   : > { %7573 = vst.sshfl [vmem:[#allocation2] sm:$0x33 pattern:$0x76325410] %v1314_v28  ;;  %2038 = vmatpush1.msra.mxu0 %v1462_v27  ;;  %2101 = vmatprep.mubr.f32.mxu0 %v8145_v22  ;;  %v1358_v27 = vld [vmem:[#allocation4 + $0x1090] sm:$0xff]  ;;  %v1351_v28 = vld [vmem:[#allocation4 + $0x1058] sm:$0xff] }
 0x22f   : > { %2039 = vmatprep.subr.mxu0 %v1455_v29  ;;  %2402 = vmatprep.subr.mxu1 %v1683_v45  ;;  %v1619_v29 = vld [vmem:[#allocation4 + $0x18b8] sm:$0xff]  ;;  %v1566_v45 = vld [vmem:[#allocation4 + $0x1710] sm:$0xff] }
 0x230   : > { %2040 = vmatpush1.msra.mxu0 %v1454_v31  ;;  %2403 = vmatpush1.msra.mxu1 %v1682_v47  ;;  %v1618_v31 = vld [vmem:[#allocation4 + $0x18b0] sm:$0xff]  ;;  %v1559_v47 = vld [vmem:[#allocation4 + $0x16d8] sm:$0xff] }
 0x231   : > { %2041 = vmatprep.subr.mxu0 %v1447_v32  ;;  %2404 = vmatprep.subr.mxu1 %v1675_v50  ;;  %v1611_v32 = vld [vmem:[#allocation4 + $0x1878] sm:$0xff]  ;;  %v1558_v50 = vld [vmem:[#allocation4 + $0x16d0] sm:$0xff] }
 0x232   : > { %2042 = vmatpush1.msra.mxu0 %v1446_v4  ;;  %2405 = vmatpush1.msra.mxu1 %v1674_v53  ;;  %v1610_v4 = vld [vmem:[#allocation4 + $0x1870] sm:$0xff]  ;;  %v1551_v53 = vld [vmem:[#allocation4 + $0x1698] sm:$0xff] }
 0x233   : > { %2043 = vmatprep.subr.mxu0 %v1439_v19  ;;  %2406 = vmatprep.subr.mxu1 %v1667_v56  ;;  %v1603_v19 = vld [vmem:[#allocation4 + $0x1838] sm:$0xff]  ;;  %v1550_v56 = vld [vmem:[#allocation4 + $0x1690] sm:$0xff] }
 0x234   : > { %2044 = vmatpush1.msra.mxu0 %v1438_v34  ;;  %2407 = vmatpush1.msra.mxu1 %v1666_v60  ;;  %v1602_v34 = vld [vmem:[#allocation4 + $0x1830] sm:$0xff]  ;;  %v1543_v60 = vld [vmem:[#allocation4 + $0x1658] sm:$0xff] }
 0x235   : > { %2045 = vmatprep.subr.mxu0 %v1431_v36  ;;  %2408 = vmatprep.subr.mxu1 %v1659_v0  ;;  %v1851_v36 = vld [vmem:[#allocation4 + $0x1ff8] sm:$0xff]  ;;  %v1542_v0 = vld [vmem:[#allocation4 + $0x1650] sm:$0xff] }
 0x236   : > { %2046 = vmatpush1.msra.mxu0 %v1430_v38  ;;  %2409 = vmatpush1.msra.mxu1 %v1658_v23  ;;  %v1850_v38 = vld [vmem:[#allocation4 + $0x1ff0] sm:$0xff]  ;;  %v1535_v23 = vld [vmem:[#allocation4 + $0x1618] sm:$0xff] }
 0x237   : > { %2047 = vmatprep.subr.mxu0 %v1423_v40  ;;  %2410 = vmatprep.subr.mxu1 %v1651_v7  ;;  %v1843_v40 = vld [vmem:[#allocation4 + $0x1fb8] sm:$0xff]  ;;  %v1534_v7 = vld [vmem:[#allocation4 + $0x1610] sm:$0xff] }
 0x238   : > { %2048 = vmatpush1.msra.mxu0 %v1422_v41  ;;  %2411 = vmatpush1.msra.mxu1 %v1650_v24  ;;  %v1842_v41 = vld [vmem:[#allocation4 + $0x1fb0] sm:$0xff]  ;;  %v1527_v24 = vld [vmem:[#allocation4 + $0x15d8] sm:$0xff] }
 0x239   : > { %2049 = vmatprep.subr.mxu0 %v1415_v43  ;;  %2412 = vmatprep.subr.mxu1 %v1643_v11  ;;  %v1835_v43 = vld [vmem:[#allocation4 + $0x1f78] sm:$0xff]  ;;  %v1526_v11 = vld [vmem:[#allocation4 + $0x15d0] sm:$0xff] }
 0x23a   : > { %2050 = vmatpush1.msra.mxu0 %v1414_v46  ;;  %2413 = vmatpush1.msra.mxu1 %v1642_v15  ;;  %v1834_v46 = vld [vmem:[#allocation4 + $0x1f70] sm:$0xff]  ;;  %v1519_v15 = vld [vmem:[#allocation4 + $0x1598] sm:$0xff] }
 0x23b   : > { %2051 = vmatprep.subr.mxu0 %v1407_v49  ;;  %2414 = vmatprep.subr.mxu1 %v1635_v17  ;;  %v1827_v49 = vld [vmem:[#allocation4 + $0x1f38] sm:$0xff]  ;;  %v1518_v17 = vld [vmem:[#allocation4 + $0x1590] sm:$0xff] }
 0x23c   : > { %2052 = vmatpush1.msra.mxu0 %v1406_v52  ;;  %2415 = vmatpush1.msra.mxu1 %v1634_v21  ;;  %v1826_v52 = vld [vmem:[#allocation4 + $0x1f30] sm:$0xff]  ;;  %v1511_v21 = vld [vmem:[#allocation4 + $0x1558] sm:$0xff] }
 0x23d   : > { %2053 = vmatprep.subr.mxu0 %v1399_v55  ;;  %2416 = vmatprep.subr.mxu1 %v1627_v26  ;;  %v1819_v55 = vld [vmem:[#allocation4 + $0x1ef8] sm:$0xff]  ;;  %v1510_v26 = vld [vmem:[#allocation4 + $0x1550] sm:$0xff] }
 0x23e   : > { %2054 = vmatpush1.msra.mxu0 %v1398_v59  ;;  %2417 = vmatpush1.msra.mxu1 %v1626_v62  ;;  %v1818_v59 = vld [vmem:[#allocation4 + $0x1ef0] sm:$0xff]  ;;  %v1503_v62 = vld [vmem:[#allocation4 + $0x1518] sm:$0xff] }
 0x23f   : > { %2055 = vmatprep.subr.mxu0 %v1391_v63  ;;  %2418 = vmatprep.subr.mxu1 %v1619_v29  ;;  %v1811_v63 = vld [vmem:[#allocation4 + $0x1eb8] sm:$0xff]  ;;  %v1502_v29 = vld [vmem:[#allocation4 + $0x1510] sm:$0xff] }
 0x240   : > { %2056 = vmatpush1.msra.mxu0 %v1390_v3  ;;  %2419 = vmatpush1.msra.mxu1 %v1618_v31  ;;  %v1810_v3 = vld [vmem:[#allocation4 + $0x1eb0] sm:$0xff]  ;;  %v1495_v31 = vld [vmem:[#allocation4 + $0x14d8] sm:$0xff] }
 0x241   : > { %2057 = vmatprep.subr.mxu0 %v1383_v6  ;;  %2420 = vmatprep.subr.mxu1 %v1611_v32  ;;  %v1803_v6 = vld [vmem:[#allocation4 + $0x1e78] sm:$0xff]  ;;  %v1494_v32 = vld [vmem:[#allocation4 + $0x14d0] sm:$0xff] }
 0x242   : > { %2058 = vmatpush1.msra.mxu0 %v1382_v9  ;;  %2421 = vmatpush1.msra.mxu1 %v1610_v4  ;;  %v1802_v9 = vld [vmem:[#allocation4 + $0x1e70] sm:$0xff]  ;;  %v1487_v4 = vld [vmem:[#allocation4 + $0x1498] sm:$0xff] }
 0x243   : > { %2059 = vmatprep.subr.mxu0 %v1375_v10  ;;  %2422 = vmatprep.subr.mxu1 %v1603_v19  ;;  %v1795_v10 = vld [vmem:[#allocation4 + $0x1e38] sm:$0xff]  ;;  %v1486_v19 = vld [vmem:[#allocation4 + $0x1490] sm:$0xff] }
 0x244   : > { %2060 = vmatpush1.msra.mxu0 %v1374_v13  ;;  %2423 = vmatpush1.msra.mxu1 %v1602_v34  ;;  %v1794_v13 = vld [vmem:[#allocation4 + $0x1e30] sm:$0xff]  ;;  %v1479_v34 = vld [vmem:[#allocation4 + $0x1458] sm:$0xff] }
 0x245   : > { %2061 = vmatprep.subr.mxu0 %v1367_v16  ;;  %2424 = vmatprep.subr.mxu1 %v1851_v36  ;;  %v1787_v16 = vld [vmem:[#allocation4 + $0x1df8] sm:$0xff]  ;;  %v1478_v36 = vld [vmem:[#allocation4 + $0x1450] sm:$0xff] }
 0x246   : > { %2062 = vmatpush1.msra.mxu0 %v1366_v20  ;;  %2425 = vmatpush2.msra.mxu1 %v1850_v38  ;;  %v1786_v20 = vld [vmem:[#allocation4 + $0x1df0] sm:$0xff]  ;;  %v1471_v38 = vld [vmem:[#allocation4 + $0x1418] sm:$0xff] }
 0x247   : > { %2063 = vmatprep.subr.mxu0 %v1359_v44  ;;  %2426 = vmatprep.subr.mxu1 %v1843_v40  ;;  %v1779_v44 = vld [vmem:[#allocation4 + $0x1db8] sm:$0xff]  ;;  %v1470_v40 = vld [vmem:[#allocation4 + $0x1410] sm:$0xff] }
 0x248   : > { %2064 = vmatpush1.msra.mxu0 %v1358_v27  ;;  %2427 = vmatpush2.msra.mxu1 %v1842_v41  ;;  %v1778_v27 = vld [vmem:[#allocation4 + $0x1db0] sm:$0xff]  ;;  %v1465_v41 = vld [vmem:[#allocation4 + $0x13e8] sm:$0xff] }
 0x249   : > { %2065 = vmatprep.subr.mxu0 %v1351_v28  ;;  %2428 = vmatprep.subr.mxu1 %v1835_v43  ;;  %v1771_v28 = vld [vmem:[#allocation4 + $0x1d78] sm:$0xff]  ;;  %v1457_v43 = vld [vmem:[#allocation4 + $0x13a8] sm:$0xff] }
 0x24a   : > { %2066 = vmatpush1.msra.mxu0 %v1350_v30  ;;  %2429 = vmatpush2.msra.mxu1 %v1834_v46  ;;  %v1770_v30 = vld [vmem:[#allocation4 + $0x1d70] sm:$0xff]  ;;  %v1456_v46 = vld [vmem:[#allocation4 + $0x13a0] sm:$0xff] }
 0x24b   : > { %2067 = vmatprep.subr.mxu0 %v1343_v58  ;;  %2430 = vmatprep.subr.mxu1 %v1827_v49  ;;  %v1763_v58 = vld [vmem:[#allocation4 + $0x1d38] sm:$0xff]  ;;  %v1449_v49 = vld [vmem:[#allocation4 + $0x1368] sm:$0xff] }
 0x24c   : > { %2068 = vmatpush1.msra.mxu0 %v1342_v1  ;;  %2431 = vmatpush2.msra.mxu1 %v1826_v52  ;;  %v1762_v1 = vld [vmem:[#allocation4 + $0x1d30] sm:$0xff]  ;;  %v1441_v52 = vld [vmem:[#allocation4 + $0x1328] sm:$0xff] }
 0x24d   : > { %2069 = vmatprep.subr.mxu0 %v1591_v33  ;;  %2432 = vmatprep.subr.mxu1 %v1819_v55  ;;  %v1755_v33 = vld [vmem:[#allocation4 + $0x1cf8] sm:$0xff]  ;;  %v1433_v55 = vld [vmem:[#allocation4 + $0x12e8] sm:$0xff] }
 0x24e   : > { %2070 = vmatpush2.msra.mxu0 %v1590_v57  ;;  %2433 = vmatpush2.msra.mxu1 %v1818_v59  ;;  %v1754_v57 = vld [vmem:[#allocation4 + $0x1cf0] sm:$0xff]  ;;  %v1432_v59 = vld [vmem:[#allocation4 + $0x12e0] sm:$0xff] }
 0x24f   : > { %2071 = vmatprep.subr.mxu0 %v1583_v35  ;;  %2434 = vmatprep.subr.mxu1 %v1811_v63  ;;  %v1747_v35 = vld [vmem:[#allocation4 + $0x1cb8] sm:$0xff]  ;;  %v1424_v63 = vld [vmem:[#allocation4 + $0x12a0] sm:$0xff] }
 0x250   : > { %2072 = vmatpush2.msra.mxu0 %v1582_v37  ;;  %2435 = vmatpush2.msra.mxu1 %v1810_v3  ;;  %v1746_v37 = vld [vmem:[#allocation4 + $0x1cb0] sm:$0xff]  ;;  %v1416_v3 = vld [vmem:[#allocation4 + $0x1260] sm:$0xff] }
 0x251   : > { %2073 = vmatprep.subr.mxu0 %v1575_v39  ;;  %2436 = vmatprep.subr.mxu1 %v1803_v6  ;;  %v1739_v39 = vld [vmem:[#allocation4 + $0x1c78] sm:$0xff]  ;;  %v1408_v6 = vld [vmem:[#allocation4 + $0x1220] sm:$0xff] }
 0x252   : > { %2074 = vmatpush2.msra.mxu0 %v1574_v48  ;;  %2437 = vmatpush2.msra.mxu1 %v1802_v9  ;;  %v1738_v48 = vld [vmem:[#allocation4 + $0x1c70] sm:$0xff]  ;;  %v1393_v9 = vld [vmem:[#allocation4 + $0x11a8] sm:$0xff] }
 0x253   : > { %2075 = vmatprep.subr.mxu0 %v1567_v42  ;;  %2438 = vmatprep.subr.mxu1 %v1795_v10  ;;  %v1464_v42 = vld [vmem:[#allocation4 + $0x13e0] sm:$0xff]  ;;  %v1385_v10 = vld [vmem:[#allocation4 + $0x1168] sm:$0xff] }
 0x254   : > { %2076 = vmatpush2.msra.mxu0 %v1566_v45  ;;  %2439 = vmatpush2.msra.mxu1 %v1794_v13  ;;  %v1731_v45 = vld [vmem:[#allocation4 + $0x1c38] sm:$0xff]  ;;  %v1377_v13 = vld [vmem:[#allocation4 + $0x1128] sm:$0xff] }
 0x255   : > { %2077 = vmatprep.subr.mxu0 %v1559_v47  ;;  %2440 = vmatprep.subr.mxu1 %v1787_v16  ;;  %v1730_v47 = vld [vmem:[#allocation4 + $0x1c30] sm:$0xff]  ;;  %v1369_v16 = vld [vmem:[#allocation4 + $0x10e8] sm:$0xff] }
 0x256   : > { %2078 = vmatpush2.msra.mxu0 %v1558_v50  ;;  %2441 = vmatpush2.msra.mxu1 %v1786_v20  ;;  %v1448_v50 = vld [vmem:[#allocation4 + $0x1360] sm:$0xff]  ;;  %v1361_v20 = vld [vmem:[#allocation4 + $0x10a8] sm:$0xff] }
 0x257   : > { %2079 = vmatprep.subr.mxu0 %v1551_v53  ;;  %2442 = vmatprep.subr.mxu1 %v1779_v44  ;;  %v1440_v53 = vld [vmem:[#allocation4 + $0x1320] sm:$0xff]  ;;  %v1353_v44 = vld [vmem:[#allocation4 + $0x1068] sm:$0xff] }
 0x258   : > { %2080 = vmatpush2.msra.mxu0 %v1550_v56  ;;  %2443 = vmatpush2.msra.mxu1 %v1778_v27  ;;  %v7872_v56 = vld.sshfl [vmem:[#allocation2 + $0x4] sm:$0x33 pattern:$0x76325410]  ;;  %v1345_v27 = vld [vmem:[#allocation4 + $0x1028] sm:$0xff] }
 0x259   : > { %2081 = vmatprep.subr.mxu0 %v1543_v60  ;;  %2444 = vmatprep.subr.mxu1 %v1771_v28  ;;  %v1425_v60 = vld [vmem:[#allocation4 + $0x12a8] sm:$0xff] }
 0x25a   : > { %2082 = vmatpush2.msra.mxu0 %v1542_v0  ;;  %2445 = vmatpush2.msra.mxu1 %v1770_v30  ;;  %v1417_v0 = vld [vmem:[#allocation4 + $0x1268] sm:$0xff] }
 0x25b   : > { %2083 = vmatprep.subr.mxu0 %v1535_v23  ;;  %2446 = vmatprep.subr.mxu1 %v1763_v58  ;;  %v1409_v23 = vld [vmem:[#allocation4 + $0x1228] sm:$0xff] }
 0x25c   : > { %2084 = vmatpush2.msra.mxu0 %v1534_v7  ;;  %2447 = vmatpush2.msra.mxu1 %v1762_v1  ;;  %v1400_v7 = vld [vmem:[#allocation4 + $0x11e0] sm:$0xff]  ;;  %v1593_v28 = vld [vmem:[#allocation4 + $0x17e8] sm:$0xff] }
 0x25d   : > { %2085 = vmatprep.subr.mxu0 %v1527_v24  ;;  %2448 = vmatprep.subr.mxu1 %v1755_v33  ;;  %v1392_v24 = vld [vmem:[#allocation4 + $0x11a0] sm:$0xff]  ;;  %v1585_v30 = vld [vmem:[#allocation4 + $0x17a8] sm:$0xff] }
 0x25e   : > { %2086 = vmatpush2.msra.mxu0 %v1526_v11  ;;  %2449 = vmatpush2.msra.mxu1 %v1754_v57  ;;  %v1384_v11 = vld [vmem:[#allocation4 + $0x1160] sm:$0xff]  ;;  %v1577_v58 = vld [vmem:[#allocation4 + $0x1768] sm:$0xff] }
 0x25f   : > { %2087 = vmatprep.subr.mxu0 %v1519_v15  ;;  %2450 = vmatprep.subr.mxu1 %v1747_v35  ;;  %v1376_v15 = vld [vmem:[#allocation4 + $0x1120] sm:$0xff]  ;;  %v1569_v1 = vld [vmem:[#allocation4 + $0x1728] sm:$0xff] }
 0x260   : > { %2088 = vmatpush2.msra.mxu0 %v1518_v17  ;;  %2451 = vmatpush2.msra.mxu1 %v1746_v37  ;;  %v1368_v17 = vld [vmem:[#allocation4 + $0x10e0] sm:$0xff]  ;;  %v1561_v33 = vld [vmem:[#allocation4 + $0x16e8] sm:$0xff] }
 0x261   : > { %2089 = vmatprep.subr.mxu0 %v1511_v21  ;;  %2452 = vmatprep.subr.mxu1 %v1739_v39  ;;  %v1360_v21 = vld [vmem:[#allocation4 + $0x10a0] sm:$0xff]  ;;  %v1553_v57 = vld [vmem:[#allocation4 + $0x16a8] sm:$0xff] }
 0x262   : > { %2090 = vmatpush2.msra.mxu0 %v1510_v26  ;;  %2453 = vmatpush2.msra.mxu1 %v1738_v48  ;;  %v1352_v26 = vld [vmem:[#allocation4 + $0x1060] sm:$0xff]  ;;  %v1545_v35 = vld [vmem:[#allocation4 + $0x1668] sm:$0xff] }
 0x263   : > { %2091 = vmatprep.subr.mxu0 %v1503_v62  ;;  %2454 = vmatprep.subr.mxu1 %v1731_v45  ;;  %v1344_v62 = vld [vmem:[#allocation4 + $0x1020] sm:$0xff]  ;;  %v1537_v37 = vld [vmem:[#allocation4 + $0x1628] sm:$0xff] }
 0x264   : > { %2092 = vmatpush2.msra.mxu0 %v1502_v29  ;;  %2455 = vmatpush2.msra.mxu1 %v1730_v47  ;;  %v1592_v29 = vld [vmem:[#allocation4 + $0x17e0] sm:$0xff]  ;;  %v1529_v39 = vld [vmem:[#allocation4 + $0x15e8] sm:$0xff] }
 0x265   : > { %2093 = vmatprep.subr.mxu0 %v1495_v31  ;;  %2457 = vmatmul.mubr.f32.vlgmr.msra.gmra.mxu1 %v7872_v56  ;;  %v1584_v31 = vld [vmem:[#allocation4 + $0x17a0] sm:$0xff]  ;;  %v1521_v48 = vld [vmem:[#allocation4 + $0x15a8] sm:$0xff] }
 0x266   : > { %2094 = vmatpush2.msra.mxu0 %v1494_v32  ;;  %v1576_v32 = vld [vmem:[#allocation4 + $0x1760] sm:$0xff]  ;;  %v1505_v45 = vld [vmem:[#allocation4 + $0x1528] sm:$0xff] }
 0x267   : > { %2095 = vmatprep.subr.mxu0 %v1487_v4  ;;  %v1568_v4 = vld [vmem:[#allocation4 + $0x1720] sm:$0xff]  ;;  %v1497_v47 = vld [vmem:[#allocation4 + $0x14e8] sm:$0xff] }
 0x268   : > { %2096 = vmatpush2.msra.mxu0 %v1486_v19  ;;  %v1560_v19 = vld [vmem:[#allocation4 + $0x16e0] sm:$0xff]  ;;  %v1473_v56 = vld [vmem:[#allocation4 + $0x1428] sm:$0xff] }
 0x269   : > { %2097 = vmatprep.subr.mxu0 %v1479_v34  ;;  %v1552_v34 = vld [vmem:[#allocation4 + $0x16a0] sm:$0xff] }
 0x26a   : > { %2098 = vmatpush2.msra.mxu0 %v1478_v36  ;;  %v1544_v36 = vld [vmem:[#allocation4 + $0x1660] sm:$0xff] }
 0x26b   : > { %2099 = vmatprep.subr.mxu0 %v1471_v38  ;;  %v1536_v38 = vld [vmem:[#allocation4 + $0x1620] sm:$0xff] }
 0x26c   : > { %2100 = vmatpush2.msra.mxu0 %v1470_v40  ;;  %v1528_v40 = vld [vmem:[#allocation4 + $0x15e0] sm:$0xff] }
 0x26d   : > { %2102 = vmatmul.mubr.f32.vlgmr.msra.gmra.mxu0 %v8147_v25  ;;  %2179 = vmatprep.subr.mxu0 %v1465_v41  ;;  %v1520_v41 = vld [vmem:[#allocation4 + $0x15a0] sm:$0xff] }
 0x26e   : > { %2180 = vmatpush1.msra.mxu0 %v1464_v42  ;;  %2243 = vmatprep.mubr.f32.mxu0 %v8145_v22  ;;  %v1513_v42 = vld [vmem:[#allocation4 + $0x1568] sm:$0xff] }
 0x26f   : > { %2181 = vmatprep.subr.mxu0 %v1457_v43  ;;  %v1512_v43 = vld [vmem:[#allocation4 + $0x1560] sm:$0xff] }
 0x270   : > { %2182 = vmatpush1.msra.mxu0 %v1456_v46  ;;  %v1504_v46 = vld [vmem:[#allocation4 + $0x1520] sm:$0xff] }
 0x271   : > { %2183 = vmatprep.subr.mxu0 %v1449_v49  ;;  %v1496_v49 = vld [vmem:[#allocation4 + $0x14e0] sm:$0xff] }
 0x272   : > { %2184 = vmatpush1.msra.mxu0 %v1448_v50  ;;  %v1489_v50 = vld [vmem:[#allocation4 + $0x14a8] sm:$0xff] }
 0x273   : > { %2185 = vmatprep.subr.mxu0 %v1441_v52  ;;  %v1488_v52 = vld [vmem:[#allocation4 + $0x14a0] sm:$0xff] }
 0x274   : > { %2186 = vmatpush1.msra.mxu0 %v1440_v53  ;;  %v1481_v53 = vld [vmem:[#allocation4 + $0x1468] sm:$0xff] }
 0x275   : > { %2187 = vmatprep.subr.mxu0 %v1433_v55  ;;  %v1480_v55 = vld [vmem:[#allocation4 + $0x1460] sm:$0xff] }
 0x276   : > { %2188 = vmatpush1.msra.mxu0 %v1432_v59  ;;  %v1472_v59 = vld [vmem:[#allocation4 + $0x1420] sm:$0xff] }
 0x277   : > { %2189 = vmatprep.subr.mxu0 %v1425_v60  ;;  %v1467_v60 = vld [vmem:[#allocation4 + $0x13f8] sm:$0xff] }
 0x278   : > { %2190 = vmatpush1.msra.mxu0 %v1424_v63  ;;  %v1466_v63 = vld [vmem:[#allocation4 + $0x13f0] sm:$0xff] }
 0x279   : > { %2191 = vmatprep.subr.mxu0 %v1417_v0  ;;  %v1459_v0 = vld [vmem:[#allocation4 + $0x13b8] sm:$0xff] }
 0x27a   : > { %2192 = vmatpush1.msra.mxu0 %v1416_v3  ;;  %v1458_v3 = vld [vmem:[#allocation4 + $0x13b0] sm:$0xff] }
 0x27b   : > { %2193 = vmatprep.subr.mxu0 %v1409_v23  ;;  %v1451_v23 = vld [vmem:[#allocation4 + $0x1378] sm:$0xff] }
 0x27c   : > { %2194 = vmatpush1.msra.mxu0 %v1408_v6  ;;  %v1450_v6 = vld [vmem:[#allocation4 + $0x1370] sm:$0xff] }
 0x27d   : > { %2195 = vmatprep.subr.mxu0 %v1401_v51  ;;  %v1443_v51 = vld [vmem:[#allocation4 + $0x1338] sm:$0xff] }
 0x27e   : > { %2196 = vmatpush1.msra.mxu0 %v1400_v7  ;;  %v1442_v7 = vld [vmem:[#allocation4 + $0x1330] sm:$0xff] }
 0x27f   : > { %2197 = vmatprep.subr.mxu0 %v1393_v9  ;;  %v1435_v9 = vld [vmem:[#allocation4 + $0x12f8] sm:$0xff] }
 0x280   : > { %2198 = vmatpush1.msra.mxu0 %v1392_v24  ;;  %v1434_v24 = vld [vmem:[#allocation4 + $0x12f0] sm:$0xff] }
 0x281   : > { %2199 = vmatprep.subr.mxu0 %v1385_v10  ;;  %v1427_v10 = vld [vmem:[#allocation4 + $0x12b8] sm:$0xff] }
 0x282   : > { %2200 = vmatpush1.msra.mxu0 %v1384_v11  ;;  %v1426_v11 = vld [vmem:[#allocation4 + $0x12b0] sm:$0xff] }
 0x283   : > { %2201 = vmatprep.subr.mxu0 %v1377_v13  ;;  %v1419_v13 = vld [vmem:[#allocation4 + $0x1278] sm:$0xff] }
 0x284   : > { %2202 = vmatpush1.msra.mxu0 %v1376_v15  ;;  %v1418_v15 = vld [vmem:[#allocation4 + $0x1270] sm:$0xff] }
 0x285   : > { %2203 = vmatprep.subr.mxu0 %v1369_v16  ;;  %v1410_v16 = vld [vmem:[#allocation4 + $0x1230] sm:$0xff] }
 0x286   : > { %2204 = vmatpush1.msra.mxu0 %v1368_v17  ;;  %v1403_v17 = vld [vmem:[#allocation4 + $0x11f8] sm:$0xff] }
 0x287   : > { %2205 = vmatprep.subr.mxu0 %v1361_v20  ;;  %v1402_v20 = vld [vmem:[#allocation4 + $0x11f0] sm:$0xff] }
 0x288   : > { %2206 = vmatpush1.msra.mxu0 %v1360_v21  ;;  %v1395_v21 = vld [vmem:[#allocation4 + $0x11b8] sm:$0xff] }
 0x289   : > { %2207 = vmatprep.subr.mxu0 %v1353_v44  ;;  %v1394_v44 = vld [vmem:[#allocation4 + $0x11b0] sm:$0xff] }
 0x28a   : > { %2208 = vmatpush1.msra.mxu0 %v1352_v26  ;;  %v1387_v26 = vld [vmem:[#allocation4 + $0x1178] sm:$0xff] }
 0x28b   : > { %2209 = vmatprep.subr.mxu0 %v1345_v27  ;;  %v1386_v27 = vld [vmem:[#allocation4 + $0x1170] sm:$0xff] }
 0x28c   : > { %2210 = vmatpush1.msra.mxu0 %v1344_v62  ;;  %v1379_v62 = vld [vmem:[#allocation4 + $0x1138] sm:$0xff] }
 0x28d   : > { %2211 = vmatprep.subr.mxu0 %v1593_v28  ;;  %v1378_v28 = vld [vmem:[#allocation4 + $0x1130] sm:$0xff] }
 0x28e   : > { %2212 = vmatpush2.msra.mxu0 %v1592_v29  ;;  %v1371_v29 = vld [vmem:[#allocation4 + $0x10f8] sm:$0xff] }
 0x28f   : > { %2213 = vmatprep.subr.mxu0 %v1585_v30  ;;  %v1370_v30 = vld [vmem:[#allocation4 + $0x10f0] sm:$0xff] }
 0x290   : > { %2214 = vmatpush2.msra.mxu0 %v1584_v31  ;;  %v1363_v31 = vld [vmem:[#allocation4 + $0x10b8] sm:$0xff] }
 0x291   : > { %2215 = vmatprep.subr.mxu0 %v1577_v58  ;;  %v1362_v58 = vld [vmem:[#allocation4 + $0x10b0] sm:$0xff] }
 0x292   : > { %2216 = vmatpush2.msra.mxu0 %v1576_v32  ;;  %v1355_v32 = vld [vmem:[#allocation4 + $0x1078] sm:$0xff] }
 0x293   : > { %2217 = vmatprep.subr.mxu0 %v1569_v1  ;;  %v1354_v1 = vld [vmem:[#allocation4 + $0x1070] sm:$0xff] }
 0x294   : > { %2218 = vmatpush2.msra.mxu0 %v1568_v4  ;;  %v1347_v4 = vld [vmem:[#allocation4 + $0x1038] sm:$0xff] }
 0x295   : > { %2219 = vmatprep.subr.mxu0 %v1561_v33  ;;  %v1346_v33 = vld [vmem:[#allocation4 + $0x1030] sm:$0xff] }
 0x296   : > { %2220 = vmatpush2.msra.mxu0 %v1560_v19  ;;  %v1595_v19 = vld [vmem:[#allocation4 + $0x17f8] sm:$0xff] }
 0x297   : > { %2221 = vmatprep.subr.mxu0 %v1553_v57  ;;  %v1594_v57 = vld [vmem:[#allocation4 + $0x17f0] sm:$0xff] }
 0x298   : > { %2222 = vmatpush2.msra.mxu0 %v1552_v34  ;;  %v1587_v34 = vld [vmem:[#allocation4 + $0x17b8] sm:$0xff] }
 0x299   : > { %2223 = vmatprep.subr.mxu0 %v1545_v35  ;;  %v1586_v35 = vld [vmem:[#allocation4 + $0x17b0] sm:$0xff] }
 0x29a   : > { %2224 = vmatpush2.msra.mxu0 %v1544_v36  ;;  %v1579_v36 = vld [vmem:[#allocation4 + $0x1778] sm:$0xff] }
 0x29b   : > { %2225 = vmatprep.subr.mxu0 %v1537_v37  ;;  %v1578_v37 = vld [vmem:[#allocation4 + $0x1770] sm:$0xff] }
 0x29c   : > { %2226 = vmatpush2.msra.mxu0 %v1536_v38  ;;  %v1571_v38 = vld [vmem:[#allocation4 + $0x1738] sm:$0xff] }
 0x29d   : > { %2227 = vmatprep.subr.mxu0 %v1529_v39  ;;  %v1570_v39 = vld [vmem:[#allocation4 + $0x1730] sm:$0xff] }
 0x29e   : > { %2228 = vmatpush2.msra.mxu0 %v1528_v40  ;;  %v1563_v40 = vld [vmem:[#allocation4 + $0x16f8] sm:$0xff] }
 0x29f   : > { %2229 = vmatprep.subr.mxu0 %v1521_v48  ;;  %v1562_v48 = vld [vmem:[#allocation4 + $0x16f0] sm:$0xff] }
 0x2a0   : > { %2230 = vmatpush2.msra.mxu0 %v1520_v41  ;;  %v1555_v41 = vld [vmem:[#allocation4 + $0x16b8] sm:$0xff] }
 0x2a1   : > { %2231 = vmatprep.subr.mxu0 %v1513_v42  ;;  %v1554_v42 = vld [vmem:[#allocation4 + $0x16b0] sm:$0xff] }
 0x2a2   : > { %2232 = vmatpush2.msra.mxu0 %v1512_v43  ;;  %v1547_v43 = vld [vmem:[#allocation4 + $0x1678] sm:$0xff] }
 0x2a3   : > { %2233 = vmatprep.subr.mxu0 %v1505_v45  ;;  %v1546_v45 = vld [vmem:[#allocation4 + $0x1670] sm:$0xff] }
 0x2a4   : > { %2234 = vmatpush2.msra.mxu0 %v1504_v46  ;;  %v1539_v46 = vld [vmem:[#allocation4 + $0x1638] sm:$0xff] }
 0x2a5   : > { %2235 = vmatprep.subr.mxu0 %v1497_v47  ;;  %v1538_v47 = vld [vmem:[#allocation4 + $0x1630] sm:$0xff] }
 0x2a6   : > { %2236 = vmatpush2.msra.mxu0 %v1496_v49  ;;  %v1531_v49 = vld [vmem:[#allocation4 + $0x15f8] sm:$0xff] }
 0x2a7   : > { %2237 = vmatprep.subr.mxu0 %v1489_v50  ;;  %v1530_v50 = vld [vmem:[#allocation4 + $0x15f0] sm:$0xff] }
 0x2a8   : > { %2238 = vmatpush2.msra.mxu0 %v1488_v52  ;;  %v1523_v52 = vld [vmem:[#allocation4 + $0x15b8] sm:$0xff] }
 0x2a9   : > { %2239 = vmatprep.subr.mxu0 %v1481_v53  ;;  %v1522_v53 = vld [vmem:[#allocation4 + $0x15b0] sm:$0xff] }
 0x2aa   : > { %2240 = vmatpush2.msra.mxu0 %v1480_v55  ;;  %v1515_v55 = vld [vmem:[#allocation4 + $0x1578] sm:$0xff] }
 0x2ab   : > { %2241 = vmatprep.subr.mxu0 %v1473_v56  ;;  %v1514_v56 = vld [vmem:[#allocation4 + $0x1570] sm:$0xff] }
 0x2ac   : > { %2242 = vmatpush2.msra.mxu0 %v1472_v59  ;;  %v1507_v59 = vld [vmem:[#allocation4 + $0x1538] sm:$0xff] }
 0x2ad   : > { %2244 = vmatmul.mubr.f32.vlgmr.msra.gmra.mxu0 %v8147_v25  ;;  %2321 = vmatprep.subr.mxu0 %v1467_v60  ;;  %v1506_v60 = vld [vmem:[#allocation4 + $0x1530] sm:$0xff] }
 0x2ae   : > { %2322 = vmatpush1.msra.mxu0 %v1466_v63  ;;  %2385 = vmatprep.mubr.f32.mxu0 %v8145_v22  ;;  %v1411_v22 = vld [vmem:[#allocation4 + $0x1238] sm:$0xff] }
 0x2af   : > { %2323 = vmatprep.subr.mxu0 %v1459_v0  ;;  %v1499_v63 = vld [vmem:[#allocation4 + $0x14f8] sm:$0xff]  ;;  %v1498_v0 = vld [vmem:[#allocation4 + $0x14f0] sm:$0xff] }
 0x2b0   : > { %2324 = vmatpush1.msra.mxu0 %v1458_v3  ;;  %v1491_v3 = vld [vmem:[#allocation4 + $0x14b8] sm:$0xff] }
 0x2b1   : > { %2325 = vmatprep.subr.mxu0 %v1451_v23  ;;  %v1490_v23 = vld [vmem:[#allocation4 + $0x14b0] sm:$0xff] }
 0x2b2   : > { %2326 = vmatpush1.msra.mxu0 %v1450_v6  ;;  %v1483_v6 = vld [vmem:[#allocation4 + $0x1478] sm:$0xff] }
 0x2b3   : > { %2327 = vmatprep.subr.mxu0 %v1443_v51  ;;  %v1482_v51 = vld [vmem:[#allocation4 + $0x1470] sm:$0xff] }
 0x2b4   : > { %2328 = vmatpush1.msra.mxu0 %v1442_v7  ;;  %v1475_v7 = vld [vmem:[#allocation4 + $0x1438] sm:$0xff] }
 0x2b5   : > { %2329 = vmatprep.subr.mxu0 %v1435_v9  ;;  %v1474_v9 = vld [vmem:[#allocation4 + $0x1430] sm:$0xff] }
 0x2b6   : > { %2330 = vmatpush1.msra.mxu0 %v1434_v24  ;;  %v2683_v24 = vld [vmem:[#allocation4 + $0x23c8] sm:$0xff] }
 0x2b7   : > { %2331 = vmatprep.subr.mxu0 %v1427_v10  ;;  %v2939_v10 = vld [vmem:[#allocation4 + $0x2bc8] sm:$0xff] }
 0x2b8   : > { %2332 = vmatpush1.msra.mxu0 %v1426_v11  ;;  %v2682_v11 = vld [vmem:[#allocation4 + $0x23c0] sm:$0xff]  ;;  %3188 = vmatprep.subr.mxu1 %v2939_v10  ;;  %v2827_v10 = vld [vmem:[#allocation4 + $0x2848] sm:$0xff] }
 0x2b9   : > { %2333 = vmatprep.subr.mxu0 %v1419_v13  ;;  %v2938_v13 = vld [vmem:[#allocation4 + $0x2bc0] sm:$0xff] }
 0x2ba   : > { %2334 = vmatpush1.msra.mxu0 %v1418_v15  ;;  %v2675_v15 = vld [vmem:[#allocation4 + $0x2388] sm:$0xff]  ;;  %3189 = vmatpush1.msra.mxu1 %v2938_v13  ;;  %v2826_v13 = vld [vmem:[#allocation4 + $0x2840] sm:$0xff] }
 0x2bb   : > { %2335 = vmatprep.subr.mxu0 %v1411_v22  ;;  %v2931_v22 = vld [vmem:[#allocation4 + $0x2b88] sm:$0xff] }
 0x2bc   : > { %2336 = vmatpush1.msra.mxu0 %v1410_v16  ;;  %v2674_v16 = vld [vmem:[#allocation4 + $0x2380] sm:$0xff]  ;;  %3190 = vmatprep.subr.mxu1 %v2931_v22  ;;  %v2819_v22 = vld [vmem:[#allocation4 + $0x2808] sm:$0xff] }
 0x2bd   : > { %2337 = vmatprep.subr.mxu0 %v1403_v17  ;;  %v2930_v17 = vld [vmem:[#allocation4 + $0x2b80] sm:$0xff] }
 0x2be   : > { %2338 = vmatpush1.msra.mxu0 %v1402_v20  ;;  %v2667_v20 = vld [vmem:[#allocation4 + $0x2348] sm:$0xff]  ;;  %3191 = vmatpush1.msra.mxu1 %v2930_v17  ;;  %v2818_v17 = vld [vmem:[#allocation4 + $0x2800] sm:$0xff] }
 0x2bf   : > { %2339 = vmatprep.subr.mxu0 %v1395_v21  ;;  %v2923_v21 = vld [vmem:[#allocation4 + $0x2b48] sm:$0xff] }
 0x2c0   : > { %2340 = vmatpush1.msra.mxu0 %v1394_v44  ;;  %v2666_v44 = vld [vmem:[#allocation4 + $0x2340] sm:$0xff]  ;;  %3192 = vmatprep.subr.mxu1 %v2923_v21  ;;  %v3067_v21 = vld [vmem:[#allocation4 + $0x2fc8] sm:$0xff] }
 0x2c1   : > { %2341 = vmatprep.subr.mxu0 %v1387_v26  ;;  %v2922_v26 = vld [vmem:[#allocation4 + $0x2b40] sm:$0xff] }
 0x2c2   : > { %2342 = vmatpush1.msra.mxu0 %v1386_v27  ;;  %v2915_v27 = vld [vmem:[#allocation4 + $0x2b08] sm:$0xff]  ;;  %3193 = vmatpush1.msra.mxu1 %v2922_v26  ;;  %v3066_v26 = vld [vmem:[#allocation4 + $0x2fc0] sm:$0xff] }
 0x2c3   : > { %2343 = vmatprep.subr.mxu0 %v1379_v62  ;;  %v2658_v62 = vld [vmem:[#allocation4 + $0x2300] sm:$0xff]  ;;  %3194 = vmatprep.subr.mxu1 %v2915_v27  ;;  %v3059_v27 = vld [vmem:[#allocation4 + $0x2f88] sm:$0xff] }
 0x2c4   : > { %2344 = vmatpush1.msra.mxu0 %v1378_v28  ;;  %v2914_v28 = vld [vmem:[#allocation4 + $0x2b00] sm:$0xff] }
 0x2c5   : > { %2345 = vmatprep.subr.mxu0 %v1371_v29  ;;  %v2651_v29 = vld [vmem:[#allocation4 + $0x22c8] sm:$0xff]  ;;  %3195 = vmatpush1.msra.mxu1 %v2914_v28  ;;  %v3058_v28 = vld [vmem:[#allocation4 + $0x2f80] sm:$0xff] }
 0x2c6   : > { %2346 = vmatpush1.msra.mxu0 %v1370_v30  ;;  %v2907_v30 = vld [vmem:[#allocation4 + $0x2ac8] sm:$0xff] }
 0x2c7   : > { %2347 = vmatprep.subr.mxu0 %v1363_v31  ;;  %v2650_v31 = vld [vmem:[#allocation4 + $0x22c0] sm:$0xff]  ;;  %3196 = vmatprep.subr.mxu1 %v2907_v30  ;;  %v3051_v30 = vld [vmem:[#allocation4 + $0x2f48] sm:$0xff] }
 0x2c8   : > { %2348 = vmatpush1.msra.mxu0 %v1362_v58  ;;  %v2906_v58 = vld [vmem:[#allocation4 + $0x2ac0] sm:$0xff] }
 0x2c9   : > { %2349 = vmatprep.subr.mxu0 %v1355_v32  ;;  %v2643_v32 = vld [vmem:[#allocation4 + $0x2288] sm:$0xff]  ;;  %3197 = vmatpush1.msra.mxu1 %v2906_v58  ;;  %v3050_v58 = vld [vmem:[#allocation4 + $0x2f40] sm:$0xff] }
 0x2ca   : > { %2350 = vmatpush1.msra.mxu0 %v1354_v1  ;;  %v2899_v1 = vld [vmem:[#allocation4 + $0x2a88] sm:$0xff] }
 0x2cb   : > { %2351 = vmatprep.subr.mxu0 %v1347_v4  ;;  %v2642_v4 = vld [vmem:[#allocation4 + $0x2280] sm:$0xff]  ;;  %3198 = vmatprep.subr.mxu1 %v2899_v1  ;;  %v3043_v1 = vld [vmem:[#allocation4 + $0x2f08] sm:$0xff] }
 0x2cc   : > { %2352 = vmatpush1.msra.mxu0 %v1346_v33  ;;  %v2898_v33 = vld [vmem:[#allocation4 + $0x2a80] sm:$0xff] }
 0x2cd   : > { %2353 = vmatprep.subr.mxu0 %v1595_v19  ;;  %v2635_v19 = vld [vmem:[#allocation4 + $0x2248] sm:$0xff]  ;;  %3199 = vmatpush1.msra.mxu1 %v2898_v33  ;;  %v3042_v33 = vld [vmem:[#allocation4 + $0x2f00] sm:$0xff] }
 0x2ce   : > { %2354 = vmatpush2.msra.mxu0 %v1594_v57  ;;  %v2891_v57 = vld [vmem:[#allocation4 + $0x2a48] sm:$0xff] }
 0x2cf   : > { %2355 = vmatprep.subr.mxu0 %v1587_v34  ;;  %v2634_v34 = vld [vmem:[#allocation4 + $0x2240] sm:$0xff]  ;;  %3200 = vmatprep.subr.mxu1 %v2891_v57  ;;  %v3035_v57 = vld [vmem:[#allocation4 + $0x2ec8] sm:$0xff] }
 0x2d0   : > { %2356 = vmatpush2.msra.mxu0 %v1586_v35  ;;  %v2890_v35 = vld [vmem:[#allocation4 + $0x2a40] sm:$0xff] }
 0x2d1   : > { %2357 = vmatprep.subr.mxu0 %v1579_v36  ;;  %v2627_v36 = vld [vmem:[#allocation4 + $0x2208] sm:$0xff]  ;;  %3201 = vmatpush1.msra.mxu1 %v2890_v35  ;;  %v3034_v35 = vld [vmem:[#allocation4 + $0x2ec0] sm:$0xff] }
 0x2d2   : > { %2358 = vmatpush2.msra.mxu0 %v1578_v37  ;;  %v2883_v37 = vld [vmem:[#allocation4 + $0x2a08] sm:$0xff] }
 0x2d3   : > { %2359 = vmatprep.subr.mxu0 %v1571_v38  ;;  %v2626_v38 = vld [vmem:[#allocation4 + $0x2200] sm:$0xff]  ;;  %3202 = vmatprep.subr.mxu1 %v2883_v37  ;;  %v3027_v37 = vld [vmem:[#allocation4 + $0x2e88] sm:$0xff] }
 0x2d4   : > { %2360 = vmatpush2.msra.mxu0 %v1570_v39  ;;  %v2882_v39 = vld [vmem:[#allocation4 + $0x2a00] sm:$0xff] }
 0x2d5   : > { %2361 = vmatprep.subr.mxu0 %v1563_v40  ;;  %v2619_v40 = vld [vmem:[#allocation4 + $0x21c8] sm:$0xff]  ;;  %3203 = vmatpush1.msra.mxu1 %v2882_v39  ;;  %v3026_v39 = vld [vmem:[#allocation4 + $0x2e80] sm:$0xff] }
 0x2d6   : > { %2362 = vmatpush2.msra.mxu0 %v1562_v48  ;;  %v2875_v48 = vld [vmem:[#allocation4 + $0x29c8] sm:$0xff] }
 0x2d7   : > { %2363 = vmatprep.subr.mxu0 %v1555_v41  ;;  %v2618_v41 = vld [vmem:[#allocation4 + $0x21c0] sm:$0xff]  ;;  %3204 = vmatprep.subr.mxu1 %v2875_v48  ;;  %v3019_v48 = vld [vmem:[#allocation4 + $0x2e48] sm:$0xff] }
 0x2d8   : > { %2364 = vmatpush2.msra.mxu0 %v1554_v42  ;;  %v2874_v42 = vld [vmem:[#allocation4 + $0x29c0] sm:$0xff] }
 0x2d9   : > { %2365 = vmatprep.subr.mxu0 %v1547_v43  ;;  %v2611_v43 = vld [vmem:[#allocation4 + $0x2188] sm:$0xff]  ;;  %3205 = vmatpush1.msra.mxu1 %v2874_v42  ;;  %v3018_v42 = vld [vmem:[#allocation4 + $0x2e40] sm:$0xff] }
 0x2da   : > { %2366 = vmatpush2.msra.mxu0 %v1546_v45  ;;  %v2867_v45 = vld [vmem:[#allocation4 + $0x2988] sm:$0xff] }
 0x2db   : > { %2367 = vmatprep.subr.mxu0 %v1539_v46  ;;  %v2610_v46 = vld [vmem:[#allocation4 + $0x2180] sm:$0xff]  ;;  %3206 = vmatprep.subr.mxu1 %v2867_v45  ;;  %v3011_v45 = vld [vmem:[#allocation4 + $0x2e08] sm:$0xff] }
 0x2dc   : > { %2368 = vmatpush2.msra.mxu0 %v1538_v47  ;;  %v2866_v47 = vld [vmem:[#allocation4 + $0x2980] sm:$0xff] }
 0x2dd   : > { %2369 = vmatprep.subr.mxu0 %v1531_v49  ;;  %v2603_v49 = vld [vmem:[#allocation4 + $0x2148] sm:$0xff]  ;;  %3207 = vmatpush1.msra.mxu1 %v2866_v47  ;;  %v2754_v47 = vld [vmem:[#allocation4 + $0x2600] sm:$0xff] }
 0x2de   : > { %2370 = vmatpush2.msra.mxu0 %v1530_v50  ;;  %v2859_v50 = vld [vmem:[#allocation4 + $0x2948] sm:$0xff] }
 0x2df   : > { %2371 = vmatprep.subr.mxu0 %v1523_v52  ;;  %v2602_v52 = vld [vmem:[#allocation4 + $0x2140] sm:$0xff]  ;;  %3208 = vmatprep.subr.mxu1 %v2859_v50  ;;  %v2747_v50 = vld [vmem:[#allocation4 + $0x25c8] sm:$0xff] }
 0x2e0   : > { %2372 = vmatpush2.msra.mxu0 %v1522_v53  ;;  %v2858_v53 = vld [vmem:[#allocation4 + $0x2940] sm:$0xff] }
 0x2e1   : > { %2373 = vmatprep.subr.mxu0 %v1515_v55  ;;  %v2595_v55 = vld [vmem:[#allocation4 + $0x2108] sm:$0xff]  ;;  %3209 = vmatpush1.msra.mxu1 %v2858_v53 }
 0x2e2   : > { %2374 = vmatpush2.msra.mxu0 %v1514_v56  ;;  %v2851_v56 = vld [vmem:[#allocation4 + $0x2908] sm:$0xff] }
 0x2e3   : > { %2375 = vmatprep.subr.mxu0 %v1507_v59  ;;  %3210 = vmatprep.subr.mxu1 %v2851_v56  ;;  %v2594_v59 = vld [vmem:[#allocation4 + $0x2100] sm:$0xff]  ;;  %v8161_v53 = vld [vmem:[#allocation6 + $0x8] sm:$0xff] }
 0x2e4   : > { %2376 = vmatpush2.msra.mxu0 %v1506_v60  ;;  %v2850_v60 = vld [vmem:[#allocation4 + $0x2900] sm:$0xff] }
 0x2e5   : > { %2377 = vmatprep.subr.mxu0 %v1499_v63  ;;  %3211 = vmatpush1.msra.mxu1 %v2850_v60  ;;  %v2587_v63 = vld [vmem:[#allocation4 + $0x20c8] sm:$0xff]  ;;  %v3002_v56 = vld [vmem:[#allocation4 + $0x2dc0] sm:$0xff] }
 0x2e6   : > { %2378 = vmatpush2.msra.mxu0 %v1498_v0  ;;  %v2843_v0 = vld [vmem:[#allocation4 + $0x28c8] sm:$0xff] }
 0x2e7   : > { %2379 = vmatprep.subr.mxu0 %v1491_v3  ;;  %3212 = vmatprep.subr.mxu1 %v2843_v0  ;;  %v2586_v3 = vld [vmem:[#allocation4 + $0x20c0] sm:$0xff]  ;;  %v2995_v60 = vld [vmem:[#allocation4 + $0x2d88] sm:$0xff] }
 0x2e8   : > { %2380 = vmatpush2.msra.mxu0 %v1490_v23  ;;  %v2842_v23 = vld [vmem:[#allocation4 + $0x28c0] sm:$0xff] }
 0x2e9   : > { %2381 = vmatprep.subr.mxu0 %v1483_v6  ;;  %3213 = vmatpush1.msra.mxu1 %v2842_v23  ;;  %v2579_v6 = vld [vmem:[#allocation4 + $0x2088] sm:$0xff]  ;;  %v2994_v0 = vld [vmem:[#allocation4 + $0x2d80] sm:$0xff] }
 0x2ea   : > { %2382 = vmatpush2.msra.mxu0 %v1482_v51  ;;  %v2835_v51 = vld [vmem:[#allocation4 + $0x2888] sm:$0xff] }
 0x2eb   : > { %2383 = vmatprep.subr.mxu0 %v1475_v7  ;;  %3214 = vmatprep.subr.mxu1 %v2835_v51  ;;  %v2578_v7 = vld [vmem:[#allocation4 + $0x2080] sm:$0xff]  ;;  %v2987_v51 = vld [vmem:[#allocation4 + $0x2d48] sm:$0xff] }
 0x2ec   : > { %2384 = vmatpush2.msra.mxu0 %v1474_v9  ;;  %v2834_v9 = vld [vmem:[#allocation4 + $0x2880] sm:$0xff] }
 0x2ed   : > { %2386 = vmatmul.mubr.f32.vlgmr.msra.gmra.mxu0 %v8147_v25  ;;  %3117 = vmatprep.subr.mxu0 %v2683_v24  ;;  %v2659_v25 = vld [vmem:[#allocation4 + $0x2308] sm:$0xff] }
 0x2ee   : > { %3118 = vmatpush1.msra.mxu0 %v2682_v11  ;;  %3215 = vmatpush1.msra.mxu1 %v2834_v9  ;;  %v2571_v24 = vld [vmem:[#allocation4 + $0x2048] sm:$0xff]  ;;  %v2570_v11 = vld [vmem:[#allocation4 + $0x2040] sm:$0xff] }
 0x2ef   : > { %3119 = vmatprep.subr.mxu0 %v2675_v15  ;;  %3216 = vmatprep.subr.mxu1 %v2827_v10  ;;  %v2563_v15 = vld [vmem:[#allocation4 + $0x2008] sm:$0xff]  ;;  %v2986_v9 = vld [vmem:[#allocation4 + $0x2d40] sm:$0xff] }
 0x2f0   : > { %3120 = vmatpush1.msra.mxu0 %v2674_v16  ;;  %3217 = vmatpush1.msra.mxu1 %v2826_v13  ;;  %v2562_v16 = vld [vmem:[#allocation4 + $0x2000] sm:$0xff]  ;;  %v2979_v10 = vld [vmem:[#allocation4 + $0x2d08] sm:$0xff] }
 0x2f1   : > { %3121 = vmatprep.subr.mxu0 %v2667_v20  ;;  %3218 = vmatprep.subr.mxu1 %v2819_v22  ;;  %v2811_v20 = vld [vmem:[#allocation4 + $0x27c8] sm:$0xff]  ;;  %v2722_v13 = vld [vmem:[#allocation4 + $0x2500] sm:$0xff]  ;;  %v1858_v22 = vrot.slane %v8161_v53, %v8078_v54 }
 0x2f2   : > { %3122 = vmatpush1.msra.mxu0 %v2666_v44  ;;  %3219 = vmatpush1.msra.mxu1 %v2818_v17  ;;  %v2810_v44 = vld [vmem:[#allocation4 + $0x27c0] sm:$0xff]  ;;  %v2971_v17 = vld [vmem:[#allocation4 + $0x2cc8] sm:$0xff] }
 0x2f3   : > { %3123 = vmatprep.subr.mxu0 %v2659_v25  ;;  %3220 = vmatprep.subr.mxu1 %v3067_v21  ;;  %v2803_v25 = vld [vmem:[#allocation4 + $0x2788] sm:$0xff]  ;;  %v1866_v21 = vrot.slane %v8161_v53, %v8087_v61 }
 0x2f4   : > { %3124 = vmatpush1.msra.mxu0 %v2658_v62  ;;  %3221 = vmatpush2.msra.mxu1 %v3066_v26  ;;  %v2802_v62 = vld [vmem:[#allocation4 + $0x2780] sm:$0xff] }
 0x2f5   : > { %3125 = vmatprep.subr.mxu0 %v2651_v29  ;;  %3222 = vmatprep.subr.mxu1 %v3059_v27  ;;  %v2795_v29 = vld [vmem:[#allocation4 + $0x2748] sm:$0xff]  ;;  %v2970_v26 = vld [vmem:[#allocation4 + $0x2cc0] sm:$0xff] }
 0x2f6   : > { %3126 = vmatpush1.msra.mxu0 %v2650_v31  ;;  %3223 = vmatpush2.msra.mxu1 %v3058_v28  ;;  %v2794_v31 = vld [vmem:[#allocation4 + $0x2740] sm:$0xff]  ;;  %v2707_v27 = vld [vmem:[#allocation4 + $0x2488] sm:$0xff] }
 0x2f7   : > { %3127 = vmatprep.subr.mxu0 %v2643_v32  ;;  %3224 = vmatprep.subr.mxu1 %v3051_v30  ;;  %v2787_v32 = vld [vmem:[#allocation4 + $0x2708] sm:$0xff]  ;;  %v2706_v30 = vld [vmem:[#allocation4 + $0x2480] sm:$0xff] }
 0x2f8   : > { %3128 = vmatpush1.msra.mxu0 %v2642_v4  ;;  %3225 = vmatpush2.msra.mxu1 %v3050_v58  ;;  %v2786_v4 = vld [vmem:[#allocation4 + $0x2700] sm:$0xff] }
 0x2f9   : > { %3129 = vmatprep.subr.mxu0 %v2635_v19  ;;  %3226 = vmatprep.subr.mxu1 %v3043_v1  ;;  %v2779_v19 = vld [vmem:[#allocation4 + $0x26c8] sm:$0xff] }
 0x2fa   : > { %3130 = vmatpush1.msra.mxu0 %v2634_v34  ;;  %3227 = vmatpush2.msra.mxu1 %v3042_v33  ;;  %v2778_v34 = vld [vmem:[#allocation4 + $0x26c0] sm:$0xff]  ;;  %v2699_v1 = vld [vmem:[#allocation4 + $0x2448] sm:$0xff] }
 0x2fb   : > { %3131 = vmatprep.subr.mxu0 %v2627_v36  ;;  %3228 = vmatprep.subr.mxu1 %v3035_v57  ;;  %v2771_v36 = vld [vmem:[#allocation4 + $0x2688] sm:$0xff]  ;;  %v2954_v57 = vld [vmem:[#allocation4 + $0x2c40] sm:$0xff] }
 0x2fc   : > { %3132 = vmatpush1.msra.mxu0 %v2626_v38  ;;  %3229 = vmatpush2.msra.mxu1 %v3034_v35  ;;  %v2770_v38 = vld [vmem:[#allocation4 + $0x2680] sm:$0xff]  ;;  %v2691_v35 = vld [vmem:[#allocation4 + $0x2408] sm:$0xff] }
 0x2fd   : > { %3133 = vmatprep.subr.mxu0 %v2619_v40  ;;  %3230 = vmatprep.subr.mxu1 %v3027_v37  ;;  %v2763_v40 = vld [vmem:[#allocation4 + $0x2648] sm:$0xff] }
 0x2fe   : > { %3134 = vmatpush1.msra.mxu0 %v2618_v41  ;;  %3231 = vmatpush2.msra.mxu1 %v3026_v39  ;;  %v2762_v41 = vld [vmem:[#allocation4 + $0x2640] sm:$0xff] }
 0x2ff   : > { %3135 = vmatprep.subr.mxu0 %v2611_v43  ;;  %3232 = vmatprep.subr.mxu1 %v3019_v48  ;;  %v2755_v43 = vld [vmem:[#allocation4 + $0x2608] sm:$0xff]  ;;  %v2946_v39 = vld [vmem:[#allocation4 + $0x2c00] sm:$0xff] }
 0x300   : > { %3136 = vmatpush1.msra.mxu0 %v2610_v46  ;;  %3233 = vmatpush2.msra.mxu1 %v3018_v42  ;;  %v1961_v46 = vpop.f32.mrf.mxu0 }
 0x301   : > { %3137 = vmatprep.subr.mxu0 %v2603_v49  ;;  %3234 = vmatprep.subr.mxu1 %v3011_v45  ;;  %v3010_v49 = vld [vmem:[#allocation4 + $0x2e00] sm:$0xff]  ;;  %v1962_v58 = vadd.f32 %v1961_v46, %v1858_v22  ;;  %v2685_v46 = vld [vmem:[#allocation4 + $0x23d8] sm:$0xff] }
 0x302   : > { %3138 = vmatpush1.msra.mxu0 %v2602_v52  ;;  %3235 = vmatpush2.msra.mxu1 %v3010_v49  ;;  %v3003_v52 = vld [vmem:[#allocation4 + $0x2dc8] sm:$0xff]  ;;  %v1963_v23 = vpop.f32.mrf.mxu0  ;;  %v2877_v22 = vld [vmem:[#allocation4 + $0x29d8] sm:$0xff] }
 0x303   : > { %3139 = vmatprep.subr.mxu0 %v2595_v55  ;;  %3236 = vmatprep.subr.mxu1 %v3003_v52  ;;  %v2746_v55 = vld [vmem:[#allocation4 + $0x25c0] sm:$0xff]  ;;  %v2940_v52 = vld [vmem:[#allocation4 + $0x2bd0] sm:$0xff] }
 0x304   : > { %3140 = vmatpush1.msra.mxu0 %v2594_v59  ;;  %v2739_v59 = vld [vmem:[#allocation4 + $0x2588] sm:$0xff]  ;;  %3237 = vmatpush2.msra.mxu1 %v3002_v56  ;;  %v2933_v56 = vld [vmem:[#allocation4 + $0x2b98] sm:$0xff] }
 0x305   : > { %3141 = vmatprep.subr.mxu0 %v2587_v63  ;;  %v2738_v63 = vld [vmem:[#allocation4 + $0x2580] sm:$0xff]  ;;  %3238 = vmatprep.subr.mxu1 %v2995_v60  ;;  %v2932_v60 = vld [vmem:[#allocation4 + $0x2b90] sm:$0xff] }
 0x306   : > { %3142 = vmatpush1.msra.mxu0 %v2586_v3  ;;  %v2032_v3 = vpop.f32.mrf.mxu1  ;;  %3239 = vmatpush2.msra.mxu1 %v2994_v0 }
 0x307   : > { %3143 = vmatprep.subr.mxu0 %v2579_v6  ;;  %v2731_v6 = vld [vmem:[#allocation4 + $0x2548] sm:$0xff]  ;;  %3240 = vmatprep.subr.mxu1 %v2987_v51  ;;  %v2909_v51 = vld [vmem:[#allocation4 + $0x2ad8] sm:$0xff] }
 0x308   : > { %3144 = vmatpush1.msra.mxu0 %v2578_v7  ;;  %v2730_v7 = vld [vmem:[#allocation4 + $0x2540] sm:$0xff]  ;;  %3241 = vmatpush2.msra.mxu1 %v2986_v9  ;;  %v2901_v9 = vld [vmem:[#allocation4 + $0x2a98] sm:$0xff] }
 0x309   : > { %3145 = vmatprep.subr.mxu0 %v2571_v24  ;;  %v2723_v24 = vld [vmem:[#allocation4 + $0x2508] sm:$0xff]  ;;  %3242 = vmatprep.subr.mxu1 %v2979_v10  ;;  %v2893_v10 = vld [vmem:[#allocation4 + $0x2a58] sm:$0xff] }
 0x30a   : > { %3146 = vmatpush1.msra.mxu0 %v2570_v11 }
 0x30b   : > { %3147 = vmatprep.subr.mxu0 %v2563_v15  ;;  %v2978_v15 = vld [vmem:[#allocation4 + $0x2d00] sm:$0xff] }
 0x30c   : > { %3148 = vmatpush1.msra.mxu0 %v2562_v16  ;;  %v2715_v16 = vld [vmem:[#allocation4 + $0x24c8] sm:$0xff]  ;;  %3243 = vmatpush2.msra.mxu1 %v2978_v15  ;;  %v2884_v15 = vld [vmem:[#allocation4 + $0x2a10] sm:$0xff] }
 0x30d   : > { %3149 = vmatprep.subr.mxu0 %v2811_v20  ;;  %v2034_v20 = vpop.f32.mrf.mxu1  ;;  %3244 = vmatprep.subr.mxu1 %v2971_v17 }
 0x30e   : > { %3150 = vmatpush2.msra.mxu0 %v2810_v44  ;;  %v2714_v44 = vld [vmem:[#allocation4 + $0x24c0] sm:$0xff]  ;;  %3245 = vmatpush2.msra.mxu1 %v2970_v26 }
 0x30f   : > { %3151 = vmatprep.subr.mxu0 %v2803_v25  ;;  %v1870_v25 = vrot.slane %v8161_v53, %v8090_v2  ;;  %v2174_v28 = vpop.f32.mrf.mxu1 }
 0x310   : > { %3152 = vmatpush2.msra.mxu0 %v2802_v62  ;;  %v2963_v62 = vld [vmem:[#allocation4 + $0x2c88] sm:$0xff] }
 0x311   : > { %3153 = vmatprep.subr.mxu0 %v2795_v29  ;;  %3246 = vmatprep.subr.mxu1 %v2963_v62  ;;  %v2176_v37 = vpop.f32.mrf.mxu1 }
 0x312   : > { %3154 = vmatpush2.msra.mxu0 %v2794_v31  ;;  %v2962_v31 = vld [vmem:[#allocation4 + $0x2c80] sm:$0xff] }
 0x313   : > { %3155 = vmatprep.subr.mxu0 %v2787_v32  ;;  %v1862_v32 = vrot.slane %v8161_v53, %v8095_v12  ;;  %3247 = vmatpush2.msra.mxu1 %v2962_v31 }
 0x314   : > { %3156 = vmatpush2.msra.mxu0 %v2786_v4  ;;  %v2955_v4 = vld [vmem:[#allocation4 + $0x2c48] sm:$0xff] }
 0x315   : > { %3157 = vmatprep.subr.mxu0 %v2779_v19  ;;  %v2698_v19 = vld [vmem:[#allocation4 + $0x2440] sm:$0xff]  ;;  %3248 = vmatprep.subr.mxu1 %v2955_v4  ;;  %v1964_v48 = vadd.f32 %v1963_v23, %v1862_v32  ;;  %v2917_v23 = vld [vmem:[#allocation4 + $0x2b18] sm:$0xff] }
 0x316   : > { %3158 = vmatpush2.msra.mxu0 %v2778_v34  ;;  %3249 = vmatpush2.msra.mxu1 %v2954_v57  ;;  %v2853_v32 = vld [vmem:[#allocation4 + $0x2918] sm:$0xff] }
 0x317   : > { %3159 = vmatprep.subr.mxu0 %v2771_v36  ;;  %v2947_v36 = vld [vmem:[#allocation4 + $0x2c08] sm:$0xff]  ;;  %v2845_v57 = vld [vmem:[#allocation4 + $0x28d8] sm:$0xff] }
 0x318   : > { %3160 = vmatpush2.msra.mxu0 %v2770_v38  ;;  %v2690_v38 = vld [vmem:[#allocation4 + $0x2400] sm:$0xff]  ;;  %3250 = vmatprep.subr.mxu1 %v2947_v36 }
 0x319   : > { %3161 = vmatprep.subr.mxu0 %v2763_v40  ;;  %v2033_v40 = vadd.f32 %v2032_v3, %v1962_v58  ;;  %3251 = vmatpush2.msra.mxu1 %v2946_v39  ;;  %v2924_v3 = vld [vmem:[#allocation4 + $0x2b50] sm:$0xff]  ;;  %v1878_v58 = vrot.slane %v8161_v53, %v8119_v18 }
 0x31a   : > { %3162 = vmatpush2.msra.mxu0 %v2762_v41  ;;  %v8171_v41 = vld.sshfl [vmem:[#allocation2 + $0x8] sm:$0x33 pattern:$0x76325410] }
 0x31b   : > { %3163 = vmatprep.subr.mxu0 %v2755_v43  ;;  %v8175_v43 = vcombine.high %v8171_v41, %v8171_v41  ;;  %v7575_v49 = vmul.f32 -1.442695, %v2033_v40  ;;  %v2837_v40 = vld [vmem:[#allocation4 + $0x2898] sm:$0xff] }
 0x31c   : > { %3164 = vmatpush2.msra.mxu0 %v2754_v47  ;;  %v2941_v47 = vld [vmem:[#allocation4 + $0x2bd8] sm:$0xff] }
 0x31d   : > { %3165 = vmatprep.subr.mxu0 %v2747_v50  ;;  %3252 = vmatprep.mubr.f32.mxu1 %v8175_v43  ;;  %v2035_v50 = vadd.f32 %v2034_v20, %v1964_v48  ;;  %7710 = vpow2.f32 %v7575_v49  ;;  %v2869_v20 = vld [vmem:[#allocation4 + $0x2998] sm:$0xff]  ;;  %v2836_v48 = vld [vmem:[#allocation4 + $0x2890] sm:$0xff] }
 0x31e   : > { %3166 = vmatpush2.msra.mxu0 %v2746_v55  ;;  %3330 = vmatprep.subr.mxu1 %v2941_v47  ;;  %v2821_v47 = vld [vmem:[#allocation4 + $0x2818] sm:$0xff]  ;;  %v2820_v49 = vld [vmem:[#allocation4 + $0x2810] sm:$0xff] }
 0x31f   : > { %3167 = vmatprep.subr.mxu0 %v2739_v59  ;;  %3253 = vmatmul.mubr.f32.vlgmr.msra.gmra.mxu1 %v8171_v41  ;;  %v7576_v0 = vmul.f32 -1.442695, %v2035_v50  ;;  %v3069_v50 = vld [vmem:[#allocation4 + $0x2fd8] sm:$0xff] }
 0x320   : > { %3168 = vmatpush2.msra.mxu0 %v2738_v63  ;;  %3331 = vmatpush1.msra.mxu1 %v2940_v52  ;;  %v2925_v63 = vld [vmem:[#allocation4 + $0x2b58] sm:$0xff]  ;;  %v3068_v52 = vld [vmem:[#allocation4 + $0x2fd0] sm:$0xff] }
 0x321   : > { %3169 = vmatprep.subr.mxu0 %v2731_v6  ;;  %3394 = vmatprep.mubr.f32.mxu1 %v8175_v43  ;;  %v2916_v6 = vld [vmem:[#allocation4 + $0x2b10] sm:$0xff] }
 0x322   : > { %3170 = vmatpush2.msra.mxu0 %v2730_v7  ;;  %3332 = vmatprep.subr.mxu1 %v2933_v56  ;;  %v2908_v7 = vld [vmem:[#allocation4 + $0x2ad0] sm:$0xff] }
 0x323   : > { %3171 = vmatprep.subr.mxu0 %v2723_v24  ;;  %3333 = vmatpush1.msra.mxu1 %v2932_v60  ;;  %v2900_v24 = vld [vmem:[#allocation4 + $0x2a90] sm:$0xff]  ;;  %v7581_v60 = vld.sshfl [vmem:[#allocation3 + $0x4] sm:$0x33 pattern:$0x76325410] }
 0x324   : > { %3172 = vmatpush2.msra.mxu0 %v2722_v13  ;;  %3334 = vmatprep.subr.mxu1 %v2925_v63  ;;  %v2885_v13 = vld [vmem:[#allocation4 + $0x2a18] sm:$0xff]  ;;  %v3060_v56 = vld [vmem:[#allocation4 + $0x2f90] sm:$0xff] }
 0x325   : > { %3173 = vmatprep.subr.mxu0 %v2715_v16  ;;  %3335 = vmatpush1.msra.mxu1 %v2924_v3  ;;  %v2876_v16 = vld [vmem:[#allocation4 + $0x29d0] sm:$0xff]  ;;  %v3045_v3 = vld [vmem:[#allocation4 + $0x2f18] sm:$0xff] }
 0x326   : > { %3174 = vmatpush2.msra.mxu0 %v2714_v44  ;;  %3336 = vmatprep.subr.mxu1 %v2917_v23  ;;  %v2868_v44 = vld [vmem:[#allocation4 + $0x2990] sm:$0xff] }
 0x327   : > { %3175 = vmatprep.subr.mxu0 %v2707_v27  ;;  %3337 = vmatpush1.msra.mxu1 %v2916_v6  ;;  %v2861_v27 = vld [vmem:[#allocation4 + $0x2958] sm:$0xff]  ;;  %v3052_v63 = vld [vmem:[#allocation4 + $0x2f50] sm:$0xff] }
 0x328   : > { %3176 = vmatpush2.msra.mxu0 %v2706_v30  ;;  %3338 = vmatprep.subr.mxu1 %v2909_v51  ;;  %v3044_v6 = vld [vmem:[#allocation4 + $0x2f10] sm:$0xff] }
 0x329   : > { %3177 = vmatprep.subr.mxu0 %v2699_v1  ;;  %3339 = vmatpush1.msra.mxu1 %v2908_v7  ;;  %v2509_v7 = vcombine.high %v7581_v60, %v7581_v60 }
 0x32a   : > { %3178 = vmatpush2.msra.mxu0 %v2698_v19  ;;  %3340 = vmatprep.subr.mxu1 %v2901_v9  ;;  %v7711_v17 = vpop.eup %7710  ;;  %v3037_v9 = vld [vmem:[#allocation4 + $0x2ed8] sm:$0xff] }
 0x32b   : > { %3179 = vmatprep.subr.mxu0 %v2691_v35  ;;  %3341 = vmatpush1.msra.mxu1 %v2900_v24  ;;  %v2469_v62 = vadd.f32 1.0, %v7711_v17 }
 0x32c   : > { %3180 = vmatpush2.msra.mxu0 %v2690_v38  ;;  %3342 = vmatprep.subr.mxu1 %v2893_v10  ;;  %v3036_v10 = vld [vmem:[#allocation4 + $0x2ed0] sm:$0xff] }
 0x32d   : > { %v2103_v11 = vpop.f32.mrf.mxu0  ;;  %3259 = vmatprep.subr.mxu0 %v2685_v46  ;;  %v2828_v46 = vld [vmem:[#allocation4 + $0x2850] sm:$0xff] }
 0x32e   : > { %v2104_v33 = vadd.f32 %v2103_v11, %v1866_v21  ;;  %v2892_v11 = vld [vmem:[#allocation4 + $0x2a50] sm:$0xff] }
 0x32f   : > { %v2105_v29 = vpop.f32.mrf.mxu0  ;;  %3343 = vmatpush1.msra.mxu1 %v2892_v11 }
 0x330   : > { %v2106_v34 = vadd.f32 %v2105_v29, %v1870_v25  ;;  %v2175_v42 = vadd.f32 %v2174_v28, %v2104_v33  ;;  %3344 = vmatprep.subr.mxu1 %v2885_v13  ;;  %v1874_v25 = vrot.slane %v8161_v53, %v8116_v14  ;;  %v2316_v28 = vpop.f32.mrf.mxu1  ;;  %v2860_v29 = vld [vmem:[#allocation4 + $0x2950] sm:$0xff] }
 0x331   : > { %3345 = vmatpush1.msra.mxu1 %v2884_v15  ;;  %v2852_v33 = vld [vmem:[#allocation4 + $0x2910] sm:$0xff]  ;;  %v3029_v15 = vld [vmem:[#allocation4 + $0x2e98] sm:$0xff] }
 0x332   : > { %v2177_v45 = vadd.f32 %v2176_v37, %v2106_v34  ;;  %v7577_v55 = vmul.f32 -1.442695, %v2175_v42  ;;  %3346 = vmatprep.subr.mxu1 %v2877_v22  ;;  %v2318_v36 = vpop.f32.mrf.mxu1  ;;  %v2844_v37 = vld [vmem:[#allocation4 + $0x28d0] sm:$0xff] }
 0x333   : > { %3347 = vmatpush1.msra.mxu1 %v2876_v16  ;;  %v3028_v16 = vld [vmem:[#allocation4 + $0x2e90] sm:$0xff] }
 0x334   : > { %v7578_v59 = vmul.f32 -1.442695, %v2177_v45  ;;  %7712 = vpow2.f32 %v7577_v55  ;;  %3348 = vmatprep.subr.mxu1 %v2869_v20  ;;  %v2829_v45 = vld [vmem:[#allocation4 + $0x2858] sm:$0xff] }
 0x335   : > { %3349 = vmatpush1.msra.mxu1 %v2868_v44  ;;  %v3061_v55 = vld [vmem:[#allocation4 + $0x2f98] sm:$0xff] }
 0x336   : > { %7714 = vpow2.f32 %v7578_v59  ;;  %3350 = vmatprep.subr.mxu1 %v2861_v27  ;;  %v3053_v59 = vld [vmem:[#allocation4 + $0x2f58] sm:$0xff] }
 0x337   : > { %7716 = vpow2.f32 %v7576_v0  ;;  %3351 = vmatpush1.msra.mxu1 %v2860_v29  ;;  %v3021_v44 = vld [vmem:[#allocation4 + $0x2e58] sm:$0xff] }
 0x338   : > { %3352 = vmatprep.subr.mxu1 %v2853_v32  ;;  %7718 = vrcp.f32 %v2469_v62  ;;  %v3013_v62 = vld [vmem:[#allocation4 + $0x2e18] sm:$0xff]  ;;  %v2996_v32 = vld [vmem:[#allocation4 + $0x2d90] sm:$0xff] }
 0x339   : > { %3353 = vmatpush1.msra.mxu1 %v2852_v33  ;;  %v2981_v33 = vld [vmem:[#allocation4 + $0x2d18] sm:$0xff] }
 0x33a   : > { %3354 = vmatprep.subr.mxu1 %v2845_v57  ;;  %v2973_v57 = vld [vmem:[#allocation4 + $0x2cd8] sm:$0xff] }
 0x33b   : > { %3355 = vmatpush1.msra.mxu1 %v2844_v37  ;;  %v2957_v37 = vld [vmem:[#allocation4 + $0x2c58] sm:$0xff] }
 0x33c   : > { %3356 = vmatprep.subr.mxu1 %v2837_v40  ;;  %v2948_v40 = vld [vmem:[#allocation4 + $0x2c10] sm:$0xff] }
 0x33d   : > { %3357 = vmatpush1.msra.mxu1 %v2836_v48  ;;  %v2943_v48 = vld [vmem:[#allocation4 + $0x2be8] sm:$0xff] }
 0x33e   : > { %3358 = vmatprep.subr.mxu1 %v2829_v45  ;;  %v2935_v45 = vld [vmem:[#allocation4 + $0x2ba8] sm:$0xff] }
 0x33f   : > { %3359 = vmatpush1.msra.mxu1 %v2828_v46  ;;  %v2934_v46 = vld [vmem:[#allocation4 + $0x2ba0] sm:$0xff] }
 0x340   : > { %3360 = vmatprep.subr.mxu1 %v2821_v47  ;;  %v2927_v47 = vld [vmem:[#allocation4 + $0x2b68] sm:$0xff] }
 0x341   : > { %v7713_v21 = vpop.eup %7712  ;;  %3361 = vmatpush1.msra.mxu1 %v2820_v49  ;;  %v2926_v49 = vld [vmem:[#allocation4 + $0x2b60] sm:$0xff] }
 0x342   : > { %v2481_v31 = vadd.f32 1.0, %v7713_v21  ;;  %3362 = vmatprep.subr.mxu1 %v3069_v50  ;;  %v2919_v50 = vld [vmem:[#allocation4 + $0x2b28] sm:$0xff] }
 0x343   : > { %v7715_v26 = vpop.eup %7714  ;;  %3363 = vmatpush2.msra.mxu1 %v3068_v52  ;;  %v2918_v52 = vld [vmem:[#allocation4 + $0x2b20] sm:$0xff] }
 0x344   : > { %v7717_v30 = vpop.eup %7716  ;;  %v2482_v1 = vadd.f32 1.0, %v7715_v26  ;;  %7720 = vrcp.f32 %v2481_v31  ;;  %3364 = vmatprep.subr.mxu1 %v3061_v55  ;;  %v3020_v26 = vld [vmem:[#allocation4 + $0x2e50] sm:$0xff]  ;;  %v2911_v55 = vld [vmem:[#allocation4 + $0x2ae8] sm:$0xff] }
 0x345   : > { %v2470_v34 = vadd.f32 1.0, %v7717_v30  ;;  %3365 = vmatpush2.msra.mxu1 %v3060_v56  ;;  %v7719_v0 = vpop.eup %7718  ;;  %v3005_v30 = vld [vmem:[#allocation4 + $0x2dd8] sm:$0xff]  ;;  %v3004_v31 = vld [vmem:[#allocation4 + $0x2dd0] sm:$0xff]  ;;  %v2910_v56 = vld [vmem:[#allocation4 + $0x2ae0] sm:$0xff] }
 0x346   : > { %7722 = vrcp.f32 %v2482_v1  ;;  %3366 = vmatprep.subr.mxu1 %v3053_v59  ;;  %v2989_v1 = vld [vmem:[#allocation4 + $0x2d58] sm:$0xff]  ;;  %v2903_v59 = vld [vmem:[#allocation4 + $0x2aa8] sm:$0xff] }
 0x347   : > { %3367 = vmatpush2.msra.mxu1 %v3052_v63  ;;  %v2895_v63 = vld [vmem:[#allocation4 + $0x2a68] sm:$0xff] }
 0x348   : > { %3368 = vmatprep.subr.mxu1 %v3045_v3  ;;  %v2887_v3 = vld [vmem:[#allocation4 + $0x2a28] sm:$0xff] }
 0x349   : > { %3369 = vmatpush2.msra.mxu1 %v3044_v6  ;;  %v2879_v6 = vld [vmem:[#allocation4 + $0x29e8] sm:$0xff] }
 0x34a   : > { %3370 = vmatprep.subr.mxu1 %v3037_v9  ;;  %v2870_v9 = vld [vmem:[#allocation4 + $0x29a0] sm:$0xff] }
 0x34b   : > { %3371 = vmatpush2.msra.mxu1 %v3036_v10  ;;  %v2863_v10 = vld [vmem:[#allocation4 + $0x2968] sm:$0xff] }
 0x34c   : > { %3372 = vmatprep.subr.mxu1 %v3029_v15  ;;  %v2855_v15 = vld [vmem:[#allocation4 + $0x2928] sm:$0xff] }
 0x34d   : > { %3373 = vmatpush2.msra.mxu1 %v3028_v16  ;;  %v2458_v16 = vpop.f32.mrf.mxu1 }
 0x34e   : > { %3374 = vmatprep.subr.mxu1 %v3021_v44 }
 0x34f   : > { %3375 = vmatpush2.msra.mxu1 %v3020_v26  ;;  %v2846_v26 = vld [vmem:[#allocation4 + $0x28e0] sm:$0xff] }
 0x350   : > { %3376 = vmatprep.subr.mxu1 %v3013_v62 }
 0x351   : > { %v7721_v23 = vpop.eup %7720 }
 0x352   : > { %v2512_v17 = vmul.f32 %v7721_v23, %v7581_v60  ;;  %v2902_v60 = vld [vmem:[#allocation4 + $0x2aa0] sm:$0xff] }
 0x353   : > { %v7723_v51 = vpop.eup %7722  ;;  %v2886_v23 = vld [vmem:[#allocation4 + $0x2a20] sm:$0xff] }
 0x354   : > { %v2513_v20 = vmul.f32 %v7723_v51, %v2509_v7  ;;  %v2878_v51 = vld [vmem:[#allocation4 + $0x29e0] sm:$0xff]  ;;  %v2871_v7 = vld [vmem:[#allocation4 + $0x29a8] sm:$0xff] }
 0x36d   : > { %v2245_v4 = vpop.f32.mrf.mxu0 }
 0x36e   : > { %v2246_v19 = vadd.f32 %v2245_v4, %v1874_v25  ;;  %v2988_v4 = vld [vmem:[#allocation4 + $0x2d50] sm:$0xff] }
 0x36f   : > { %v2247_v35 = vpop.f32.mrf.mxu0 }
 0x370   : > { %v2317_v38 = vadd.f32 %v2316_v28, %v2246_v19  ;;  %v2248_v39 = vadd.f32 %v2247_v35, %v1878_v58  ;;  %v3012_v28 = vld [vmem:[#allocation4 + $0x2e10] sm:$0xff]  ;;  %v2997_v58 = vld [vmem:[#allocation4 + $0x2d98] sm:$0xff] }
 0x371   : > { %3377 = vmatpush2.msra.mxu1 %v3012_v28  ;;  %v2980_v19 = vld [vmem:[#allocation4 + $0x2d10] sm:$0xff]  ;;  %v2965_v35 = vld [vmem:[#allocation4 + $0x2c98] sm:$0xff] }
 0x372   : > { %7724 = vtanh.f32 %v2317_v38  ;;  %v2319_v42 = vadd.f32 %v2318_v36, %v2248_v39  ;;  %3378 = vmatprep.subr.mxu1 %v3005_v30  ;;  %v2964_v36 = vld [vmem:[#allocation4 + $0x2c90] sm:$0xff]  ;;  %v2949_v39 = vld [vmem:[#allocation4 + $0x2c18] sm:$0xff]  ;;  %v2460_v30 = vpop.f32.mrf.mxu1 }
 0x373   : > { %7726 = vrcp.f32 %v2470_v34  ;;  %3379 = vmatpush2.msra.mxu1 %v3004_v31  ;;  %v2972_v34 = vld [vmem:[#allocation4 + $0x2cd0] sm:$0xff]  ;;  %v2838_v31 = vld [vmem:[#allocation4 + $0x28a0] sm:$0xff] }
 0x374   : > { %7728 = vtanh.f32 %v2319_v42  ;;  %3380 = vmatprep.subr.mxu1 %v2997_v58  ;;  %v2956_v38 = vld [vmem:[#allocation4 + $0x2c50] sm:$0xff]  ;;  %v2942_v42 = vld [vmem:[#allocation4 + $0x2be0] sm:$0xff] }
 0x375   : > { %3381 = vmatpush2.msra.mxu1 %v2996_v32  ;;  %v2831_v32 = vld [vmem:[#allocation4 + $0x2868] sm:$0xff] }
 0x376   : > { %3382 = vmatprep.subr.mxu1 %v2989_v1  ;;  %v2830_v1 = vld [vmem:[#allocation4 + $0x2860] sm:$0xff] }
 0x377   : > { %3383 = vmatpush2.msra.mxu1 %v2988_v4 }
 0x378   : > { %3384 = vmatprep.subr.mxu1 %v2981_v33  ;;  %v2823_v33 = vld [vmem:[#allocation4 + $0x2828] sm:$0xff] }
 0x379   : > { %3385 = vmatpush2.msra.mxu1 %v2980_v19  ;;  %v2822_v19 = vld [vmem:[#allocation4 + $0x2820] sm:$0xff] }
 0x37a   : > { %3386 = vmatprep.subr.mxu1 %v2973_v57  ;;  %v3071_v57 = vld [vmem:[#allocation4 + $0x2fe8] sm:$0xff] }
 0x37b   : > { %3387 = vmatpush2.msra.mxu1 %v2972_v34  ;;  %v3070_v34 = vld [vmem:[#allocation4 + $0x2fe0] sm:$0xff] }
 0x37c   : > { %3388 = vmatprep.subr.mxu1 %v2965_v35  ;;  %v3063_v35 = vld [vmem:[#allocation4 + $0x2fa8] sm:$0xff] }
 0x37d   : > { %3389 = vmatpush2.msra.mxu1 %v2964_v36  ;;  %v3062_v36 = vld [vmem:[#allocation4 + $0x2fa0] sm:$0xff] }
 0x37e   : > { %3390 = vmatprep.subr.mxu1 %v2957_v37  ;;  %v3055_v37 = vld [vmem:[#allocation4 + $0x2f68] sm:$0xff] }
 0x37f   : > { %v7725_v24 = vpop.eup %7724  ;;  %3391 = vmatpush2.msra.mxu1 %v2956_v38  ;;  %v3054_v38 = vld [vmem:[#allocation4 + $0x2f60] sm:$0xff] }
 0x380   : > { %v7727_v11 = vpop.eup %7726  ;;  %v2514_v13 = vmul.f32 %v7725_v24, %v7719_v0  ;;  %3392 = vmatprep.subr.mxu1 %v2949_v39  ;;  %v2894_v0 = vld [vmem:[#allocation4 + $0x2a60] sm:$0xff]  ;;  %v1882_v24 = vrot.slane %v8161_v53, %v8134_v5  ;;  %v3047_v39 = vld [vmem:[#allocation4 + $0x2f28] sm:$0xff] }
 0x381   : > { %v7729_v22 = vpop.eup %7728  ;;  %3393 = vmatpush2.msra.mxu1 %v2948_v40  ;;  %v3046_v40 = vld [vmem:[#allocation4 + $0x2f20] sm:$0xff] }
 0x382   : > { %v2515_v21 = vmul.f32 %v7729_v22, %v7727_v11  ;;  %v8184_v25 = vadd.f32 %v2514_v13, %v2512_v17  ;;  %3472 = vmatprep.subr.mxu1 %v2943_v48  ;;  %3395 = vmatmul.mubr.f32.vlgmr.msra.gmra.mxu1 %v8171_v41  ;;  %v2862_v11 = vld [vmem:[#allocation4 + $0x2960] sm:$0xff]  ;;  %v1886_v13 = vrot.slane %v8161_v53, %v8137_v8  ;;  %v3039_v48 = vld [vmem:[#allocation4 + $0x2ee8] sm:$0xff] }
 0x383   : > { %3473 = vmatpush1.msra.mxu1 %v2942_v42  ;;  %3536 = vmatprep.mubr.f32.mxu1 %v8175_v43  ;;  %v2854_v17 = vld [vmem:[#allocation4 + $0x2920] sm:$0xff] }
 0x384   : > { %v8186_v27 = vadd.f32 %v2515_v21, %v2513_v20  ;;  %3474 = vmatprep.subr.mxu1 %v2935_v45  ;;  %v2847_v21 = vld [vmem:[#allocation4 + $0x28e8] sm:$0xff]  ;;  %v3038_v42 = vld [vmem:[#allocation4 + $0x2ee0] sm:$0xff] }
 0x385   : > { %3475 = vmatpush1.msra.mxu1 %v2934_v46  ;;  %v3031_v45 = vld [vmem:[#allocation4 + $0x2ea8] sm:$0xff] }
 0x386   : > { %v2524_v29 = vcombine.low %v8184_v25, %v8186_v27  ;;  %3476 = vmatprep.subr.mxu1 %v2927_v47  ;;  %v3030_v47 = vld [vmem:[#allocation4 + $0x2ea0] sm:$0xff] }
 0x387   : > { %3477 = vmatpush1.msra.mxu1 %v2926_v49 }
 0x388   : > { %7582 = vst.sshfl [vmem:[#allocation3 + $0x4] sm:$0x33 pattern:$0x76325410] %v2524_v29  ;;  %3478 = vmatprep.subr.mxu1 %v2919_v50  ;;  %v2839_v29 = vld [vmem:[#allocation4 + $0x28a8] sm:$0xff] }
 0x389   : > { %3479 = vmatpush1.msra.mxu1 %v2918_v52  ;;  %v3023_v50 = vld [vmem:[#allocation4 + $0x2e68] sm:$0xff] }
 0x38a   : > { %3480 = vmatprep.subr.mxu1 %v2911_v55  ;;  %v3022_v55 = vld [vmem:[#allocation4 + $0x2e60] sm:$0xff] }
 0x38b   : > { %3481 = vmatpush1.msra.mxu1 %v2910_v56 }
 0x38c   : > { %3482 = vmatprep.subr.mxu1 %v2903_v59  ;;  %v3015_v59 = vld [vmem:[#allocation4 + $0x2e28] sm:$0xff] }
 0x38d   : > { %3483 = vmatpush1.msra.mxu1 %v2902_v60  ;;  %v3014_v60 = vld [vmem:[#allocation4 + $0x2e20] sm:$0xff] }
 0x38e   : > { %3484 = vmatprep.subr.mxu1 %v2895_v63  ;;  %v3007_v63 = vld [vmem:[#allocation4 + $0x2de8] sm:$0xff] }
 0x38f   : > { %3485 = vmatpush1.msra.mxu1 %v2894_v0  ;;  %v3006_v0 = vld [vmem:[#allocation4 + $0x2de0] sm:$0xff] }
 0x390   : > { %3486 = vmatprep.subr.mxu1 %v2887_v3  ;;  %v2999_v3 = vld [vmem:[#allocation4 + $0x2da8] sm:$0xff] }
 0x391   : > { %3487 = vmatpush1.msra.mxu1 %v2886_v23  ;;  %v2998_v23 = vld [vmem:[#allocation4 + $0x2da0] sm:$0xff] }
 0x392   : > { %3488 = vmatprep.subr.mxu1 %v2879_v6  ;;  %v2990_v6 = vld [vmem:[#allocation4 + $0x2d60] sm:$0xff] }
 0x393   : > { %3489 = vmatpush1.msra.mxu1 %v2878_v51  ;;  %v2983_v51 = vld [vmem:[#allocation4 + $0x2d28] sm:$0xff] }
 0x394   : > { %3490 = vmatprep.subr.mxu1 %v2871_v7  ;;  %v2982_v7 = vld [vmem:[#allocation4 + $0x2d20] sm:$0xff] }
 0x395   : > { %3491 = vmatpush1.msra.mxu1 %v2870_v9  ;;  %v2974_v9 = vld [vmem:[#allocation4 + $0x2ce0] sm:$0xff] }
 0x396   : > { %3492 = vmatprep.subr.mxu1 %v2863_v10  ;;  %v2967_v10 = vld [vmem:[#allocation4 + $0x2ca8] sm:$0xff] }
 0x397   : > { %3493 = vmatpush1.msra.mxu1 %v2862_v11 }
 0x398   : > { %3494 = vmatprep.subr.mxu1 %v2855_v15 }
 0x399   : > { %3495 = vmatpush1.msra.mxu1 %v2854_v17  ;;  %v2958_v17 = vld [vmem:[#allocation4 + $0x2c60] sm:$0xff] }
 0x39a   : > { %3496 = vmatprep.subr.mxu1 %v2847_v21 }
 0x39b   : > { %3497 = vmatpush1.msra.mxu1 %v2846_v26  ;;  %v2684_v26 = vld [vmem:[#allocation4 + $0x23d0] sm:$0xff] }
 0x39c   : > { %3498 = vmatprep.subr.mxu1 %v2839_v29  ;;  %v2677_v29 = vld [vmem:[#allocation4 + $0x2398] sm:$0xff] }
 0x39d   : > { %3499 = vmatpush1.msra.mxu1 %v2838_v31  ;;  %v2676_v31 = vld [vmem:[#allocation4 + $0x2390] sm:$0xff] }
 0x39e   : > { %3500 = vmatprep.subr.mxu1 %v2831_v32  ;;  %v2937_v32 = vld [vmem:[#allocation4 + $0x2bb8] sm:$0xff] }
 0x39f   : > { %3501 = vmatpush1.msra.mxu1 %v2830_v1  ;;  %v2668_v1 = vld [vmem:[#allocation4 + $0x2350] sm:$0xff] }
 0x3a0   : > { %3502 = vmatprep.subr.mxu1 %v2823_v33  ;;  %v2661_v33 = vld [vmem:[#allocation4 + $0x2318] sm:$0xff] }
 0x3a1   : > { %3503 = vmatpush1.msra.mxu1 %v2822_v19  ;;  %v2929_v19 = vld [vmem:[#allocation4 + $0x2b78] sm:$0xff] }
 0x3a2   : > { %3504 = vmatprep.subr.mxu1 %v3071_v57  ;;  %v2660_v57 = vld [vmem:[#allocation4 + $0x2310] sm:$0xff] }
 0x3a3   : > { %3505 = vmatpush2.msra.mxu1 %v3070_v34  ;;  %v2928_v34 = vld [vmem:[#allocation4 + $0x2b70] sm:$0xff] }
 0x3a4   : > { %3506 = vmatprep.subr.mxu1 %v3063_v35  ;;  %v2653_v35 = vld [vmem:[#allocation4 + $0x22d8] sm:$0xff] }
 0x3a5   : > { %3507 = vmatpush2.msra.mxu1 %v3062_v36  ;;  %v2921_v36 = vld [vmem:[#allocation4 + $0x2b38] sm:$0xff] }
 0x3a6   : > { %3508 = vmatprep.subr.mxu1 %v3055_v37  ;;  %v2652_v37 = vld [vmem:[#allocation4 + $0x22d0] sm:$0xff] }
 0x3a7   : > { %3509 = vmatpush2.msra.mxu1 %v3054_v38  ;;  %v2920_v38 = vld [vmem:[#allocation4 + $0x2b30] sm:$0xff] }
 0x3a8   : > { %3510 = vmatprep.subr.mxu1 %v3047_v39  ;;  %v2645_v39 = vld [vmem:[#allocation4 + $0x2298] sm:$0xff] }
 0x3a9   : > { %3511 = vmatpush2.msra.mxu1 %v3046_v40  ;;  %v2644_v40 = vld [vmem:[#allocation4 + $0x2290] sm:$0xff] }
 0x3aa   : > { %3512 = vmatprep.subr.mxu1 %v3039_v48  ;;  %v2912_v48 = vld [vmem:[#allocation4 + $0x2af0] sm:$0xff] }
 0x3ab   : > { %3513 = vmatpush2.msra.mxu1 %v3038_v42  ;;  %v2637_v42 = vld [vmem:[#allocation4 + $0x2258] sm:$0xff] }
 0x3ac   : > { %3514 = vmatprep.subr.mxu1 %v3031_v45  ;;  %v2905_v45 = vld [vmem:[#allocation4 + $0x2ab8] sm:$0xff] }
 0x3ad   : > { %v2387_v22 = vpop.f32.mrf.mxu0  ;;  %3515 = vmatpush2.msra.mxu1 %v3030_v47  ;;  %v2904_v47 = vld [vmem:[#allocation4 + $0x2ab0] sm:$0xff] }
 0x3ae   : > { %v2388_v20 = vadd.f32 %v2387_v22, %v1882_v24  ;;  %3516 = vmatprep.subr.mxu1 %v3023_v50  ;;  %v2959_v22 = vld [vmem:[#allocation4 + $0x2c68] sm:$0xff]  ;;  %v2897_v50 = vld [vmem:[#allocation4 + $0x2a78] sm:$0xff] }
 0x3af   : > { %v2389_v44 = vpop.f32.mrf.mxu0  ;;  %3517 = vmatpush2.msra.mxu1 %v3022_v55  ;;  %v2896_v55 = vld [vmem:[#allocation4 + $0x2a70] sm:$0xff] }
 0x3b0   : > { %v2459_v62 = vadd.f32 %v2458_v16, %v2388_v20  ;;  %v2390_v28 = vadd.f32 %v2389_v44, %v1886_v13  ;;  %3518 = vmatprep.subr.mxu1 %v3015_v59  ;;  %v2966_v13 = vld [vmem:[#allocation4 + $0x2ca0] sm:$0xff]  ;;  %v2951_v44 = vld [vmem:[#allocation4 + $0x2c28] sm:$0xff]  ;;  %v2889_v59 = vld [vmem:[#allocation4 + $0x2a38] sm:$0xff] }
 0x3b1   : > { %3519 = vmatpush2.msra.mxu1 %v3014_v60  ;;  %v2620_v60 = vld [vmem:[#allocation4 + $0x21d0] sm:$0xff] }
 0x3b2   : > { %v7579_v53 = vmul.f32 -1.442695, %v2459_v62  ;;  %v2461_v58 = vadd.f32 %v2460_v30, %v2390_v28  ;;  %3520 = vmatprep.subr.mxu1 %v3007_v63  ;;  %v2950_v62 = vld [vmem:[#allocation4 + $0x2c20] sm:$0xff]  ;;  %v2945_v30 = vld [vmem:[#allocation4 + $0x2bf8] sm:$0xff]  ;;  %v2888_v63 = vld [vmem:[#allocation4 + $0x2a30] sm:$0xff] }
 0x3b3   : > { %3521 = vmatpush2.msra.mxu1 %v3006_v0  ;;  %v2613_v0 = vld [vmem:[#allocation4 + $0x2198] sm:$0xff] }
 0x3b4   : > { %7730 = vpow2.f32 %v7579_v53  ;;  %v7580_v4 = vmul.f32 -1.442695, %v2461_v58  ;;  %3522 = vmatprep.subr.mxu1 %v2999_v3  ;;  %v2944_v53 = vld [vmem:[#allocation4 + $0x2bf0] sm:$0xff]  ;;  %v2669_v58 = vld [vmem:[#allocation4 + $0x2358] sm:$0xff] }
 0x3b5   : > { %3523 = vmatpush2.msra.mxu1 %v2998_v23  ;;  %v2881_v3 = vld [vmem:[#allocation4 + $0x29f8] sm:$0xff]  ;;  %v2612_v23 = vld [vmem:[#allocation4 + $0x2190] sm:$0xff] }
 0x3b6   : > { %7732 = vpow2.f32 %v7580_v4  ;;  %v2936_v4 = vld [vmem:[#allocation4 + $0x2bb0] sm:$0xff] }
 0x3b7   : > { %7734 = vtanh.f32 %v8184_v25  ;;  %v2991_v25 = vld [vmem:[#allocation4 + $0x2d68] sm:$0xff] }
 0x3b8   : > { %3524 = vmatprep.subr.mxu1 %v2991_v25  ;;  %v2880_v25 = vld [vmem:[#allocation4 + $0x29f0] sm:$0xff] }
 0x3b9   : > { %3525 = vmatpush2.msra.mxu1 %v2990_v6  ;;  %v2605_v6 = vld [vmem:[#allocation4 + $0x2158] sm:$0xff] }
 0x3ba   : > { %3526 = vmatprep.subr.mxu1 %v2983_v51  ;;  %v2873_v51 = vld [vmem:[#allocation4 + $0x29b8] sm:$0xff] }
 0x3bb   : > { %3527 = vmatpush2.msra.mxu1 %v2982_v7  ;;  %v2604_v7 = vld [vmem:[#allocation4 + $0x2150] sm:$0xff] }
 0x3c1   : > { %v7731_v46 = vpop.eup %7730 }
 0x3c2   : > { %v2495_v49 = vadd.f32 1.0, %v7731_v46  ;;  %v2636_v46 = vld [vmem:[#allocation4 + $0x2250] sm:$0xff] }
 0x3c3   : > { %v7733_v52 = vpop.eup %7732 }
 0x3c4   : > { %7736 = vrcp.f32 %v2495_v49  ;;  %v2496_v56 = vadd.f32 1.0, %v7733_v52  ;;  %v7735_v24 = vpop.eup %7734  ;;  %v2629_v49 = vld [vmem:[#allocation4 + $0x2218] sm:$0xff]  ;;  %v2628_v52 = vld [vmem:[#allocation4 + $0x2210] sm:$0xff] }
 0x3c5   : > { %7738 = vtanh.f32 %v8186_v27  ;;  %v2975_v27 = vld [vmem:[#allocation4 + $0x2ce8] sm:$0xff] }
 0x3c6   : > { %7740 = vrcp.f32 %v2496_v56  ;;  %3528 = vmatprep.subr.mxu1 %v2975_v27  ;;  %v2621_v56 = vld [vmem:[#allocation4 + $0x21d8] sm:$0xff]  ;;  %v2872_v27 = vld [vmem:[#allocation4 + $0x29b0] sm:$0xff] }
 0x3c7   : > { %3529 = vmatpush2.msra.mxu1 %v2974_v9  ;;  %v2597_v9 = vld [vmem:[#allocation4 + $0x2118] sm:$0xff] }
 0x3c8   : > { %3530 = vmatprep.subr.mxu1 %v2967_v10  ;;  %v2596_v10 = vld [vmem:[#allocation4 + $0x2110] sm:$0xff] }
 0x3c9   : > { %3531 = vmatpush2.msra.mxu1 %v2966_v13  ;;  %v2589_v13 = vld [vmem:[#allocation4 + $0x20d8] sm:$0xff] }
 0x3ca   : > { %3532 = vmatprep.subr.mxu1 %v2959_v22  ;;  %v2588_v22 = vld [vmem:[#allocation4 + $0x20d0] sm:$0xff] }
 0x3cb   : > { %3533 = vmatpush2.msra.mxu1 %v2958_v17  ;;  %v2581_v17 = vld [vmem:[#allocation4 + $0x2098] sm:$0xff] }
 0x3cc   : > { %3534 = vmatprep.subr.mxu1 %v2951_v44  ;;  %v2849_v44 = vld [vmem:[#allocation4 + $0x28f8] sm:$0xff] }
 0x3cd   : > { %3535 = vmatpush2.msra.mxu1 %v2950_v62  ;;  %v2848_v62 = vld [vmem:[#allocation4 + $0x28f0] sm:$0xff] }
 0x3ce   : > { %3614 = vmatprep.subr.mxu1 %v2945_v30  ;;  %3537 = vmatmul.mubr.f32.vlgmr.msra.gmra.mxu1 %v8171_v41  ;;  %v2913_v41 = vld [vmem:[#allocation4 + $0x2af8] sm:$0xff]  ;;  %v2572_v30 = vld [vmem:[#allocation4 + $0x2050] sm:$0xff] }
 0x3cf   : > { %3615 = vmatpush1.msra.mxu1 %v2944_v53  ;;  %v2565_v53 = vld [vmem:[#allocation4 + $0x2018] sm:$0xff]  ;;  %3678 = vmatprep.mubr.f32.mxu1 %v8175_v43  ;;  %v2623_v43 = vld [vmem:[#allocation4 + $0x21e8] sm:$0xff] }
 0x3d0   : > { %3616 = vmatprep.subr.mxu1 %v2937_v32  ;;  %v2564_v32 = vld [vmem:[#allocation4 + $0x2010] sm:$0xff] }
 0x3d1   : > { %v7737_v11 = vpop.eup %7736  ;;  %3617 = vmatpush1.msra.mxu1 %v2936_v4  ;;  %v2813_v4 = vld [vmem:[#allocation4 + $0x27d8] sm:$0xff] }
 0x3d2   : > { %v7739_v15 = vpop.eup %7738  ;;  %v8200_v21 = vmul.f32 %v7737_v11, %v7735_v24  ;;  %3618 = vmatprep.subr.mxu1 %v2929_v19  ;;  %v2865_v24 = vld [vmem:[#allocation4 + $0x2978] sm:$0xff]  ;;  %v2864_v11 = vld [vmem:[#allocation4 + $0x2970] sm:$0xff] }
 0x3d3   : > { %v7741_v16 = vpop.eup %7740  ;;  %3619 = vmatpush1.msra.mxu1 %v2928_v34  ;;  %v2812_v19 = vld [vmem:[#allocation4 + $0x27d0] sm:$0xff]  ;;  %v2805_v34 = vld [vmem:[#allocation4 + $0x2798] sm:$0xff] }
 0x3d4   : > { %v8198_v20 = vmul.f32 %v7741_v16, %v7739_v15  ;;  %3620 = vmatprep.subr.mxu1 %v2921_v36  ;;  %v2857_v15 = vld [vmem:[#allocation4 + $0x2938] sm:$0xff]  ;;  %v2856_v16 = vld [vmem:[#allocation4 + $0x2930] sm:$0xff] }
 0x3d5   : > { %3621 = vmatpush1.msra.mxu1 %v2920_v38  ;;  %v2804_v36 = vld [vmem:[#allocation4 + $0x2790] sm:$0xff]  ;;  %v2797_v38 = vld [vmem:[#allocation4 + $0x2758] sm:$0xff] }
 0x3d6   : > { %3181 = vmatprep.mubr.f32.mxu0 %v8198_v20  ;;  %v2536_v28 = vcombine.low %v8200_v21, %v8198_v20  ;;  %3622 = vmatprep.subr.mxu1 %v2913_v41  ;;  %v2796_v41 = vld [vmem:[#allocation4 + $0x2750] sm:$0xff] }
 0x3d7   : > { %3182 = vmatmul.mubr.f32.vlgmr.msra.gmra.mxu0 %v8200_v21  ;;  %3623 = vmatpush1.msra.mxu1 %v2912_v48  ;;  %v2789_v48 = vld [vmem:[#allocation4 + $0x2718] sm:$0xff] }
 0x3d8   : > { %7583 = vst.sshfl [vmem:[#allocation2 + $0x4] sm:$0x33 pattern:$0x76325410] %v2536_v28  ;;  %3260 = vmatpush1.msra.mxu0 %v2684_v26  ;;  %3323 = vmatprep.mubr.f32.mxu0 %v8198_v20  ;;  %v2580_v26 = vld [vmem:[#allocation4 + $0x2090] sm:$0xff]  ;;  %v2573_v28 = vld [vmem:[#allocation4 + $0x2058] sm:$0xff] }
 0x3d9   : > { %3261 = vmatprep.subr.mxu0 %v2677_v29  ;;  %3624 = vmatprep.subr.mxu1 %v2905_v45  ;;  %v2841_v29 = vld [vmem:[#allocation4 + $0x28b8] sm:$0xff]  ;;  %v2788_v45 = vld [vmem:[#allocation4 + $0x2710] sm:$0xff] }
 0x3da   : > { %3262 = vmatpush1.msra.mxu0 %v2676_v31  ;;  %3625 = vmatpush1.msra.mxu1 %v2904_v47  ;;  %v2840_v31 = vld [vmem:[#allocation4 + $0x28b0] sm:$0xff]  ;;  %v2781_v47 = vld [vmem:[#allocation4 + $0x26d8] sm:$0xff] }
 0x3db   : > { %3263 = vmatprep.subr.mxu0 %v2669_v58  ;;  %3626 = vmatprep.subr.mxu1 %v2897_v50  ;;  %v2833_v58 = vld [vmem:[#allocation4 + $0x2878] sm:$0xff]  ;;  %v2780_v50 = vld [vmem:[#allocation4 + $0x26d0] sm:$0xff] }
 0x3dc   : > { %3264 = vmatpush1.msra.mxu0 %v2668_v1  ;;  %3627 = vmatpush1.msra.mxu1 %v2896_v55  ;;  %v2832_v1 = vld [vmem:[#allocation4 + $0x2870] sm:$0xff]  ;;  %v2773_v55 = vld [vmem:[#allocation4 + $0x2698] sm:$0xff] }
 0x3dd   : > { %3265 = vmatprep.subr.mxu0 %v2661_v33  ;;  %3628 = vmatprep.subr.mxu1 %v2889_v59  ;;  %v2825_v33 = vld [vmem:[#allocation4 + $0x2838] sm:$0xff]  ;;  %v2772_v59 = vld [vmem:[#allocation4 + $0x2690] sm:$0xff] }
 0x3de   : > { %3266 = vmatpush1.msra.mxu0 %v2660_v57  ;;  %3629 = vmatpush1.msra.mxu1 %v2888_v63  ;;  %v2824_v57 = vld [vmem:[#allocation4 + $0x2830] sm:$0xff]  ;;  %v2765_v63 = vld [vmem:[#allocation4 + $0x2658] sm:$0xff] }
 0x3df   : > { %3267 = vmatprep.subr.mxu0 %v2653_v35  ;;  %3630 = vmatprep.subr.mxu1 %v2881_v3  ;;  %v3073_v35 = vld [vmem:[#allocation4 + $0x2ff8] sm:$0xff]  ;;  %v2764_v3 = vld [vmem:[#allocation4 + $0x2650] sm:$0xff] }
 0x3e0   : > { %3268 = vmatpush1.msra.mxu0 %v2652_v37  ;;  %3631 = vmatpush1.msra.mxu1 %v2880_v25  ;;  %v3072_v37 = vld [vmem:[#allocation4 + $0x2ff0] sm:$0xff]  ;;  %v2757_v25 = vld [vmem:[#allocation4 + $0x2618] sm:$0xff] }
 0x3e1   : > { %3269 = vmatprep.subr.mxu0 %v2645_v39  ;;  %3632 = vmatprep.subr.mxu1 %v2873_v51  ;;  %v3065_v39 = vld [vmem:[#allocation4 + $0x2fb8] sm:$0xff]  ;;  %v2756_v51 = vld [vmem:[#allocation4 + $0x2610] sm:$0xff] }
 0x3e2   : > { %3270 = vmatpush1.msra.mxu0 %v2644_v40  ;;  %3633 = vmatpush1.msra.mxu1 %v2872_v27  ;;  %v3064_v40 = vld [vmem:[#allocation4 + $0x2fb0] sm:$0xff]  ;;  %v2749_v27 = vld [vmem:[#allocation4 + $0x25d8] sm:$0xff] }
 0x3e3   : > { %3271 = vmatprep.subr.mxu0 %v2637_v42  ;;  %3634 = vmatprep.subr.mxu1 %v2865_v24  ;;  %v3057_v42 = vld [vmem:[#allocation4 + $0x2f78] sm:$0xff]  ;;  %v2748_v24 = vld [vmem:[#allocation4 + $0x25d0] sm:$0xff] }
 0x3e4   : > { %3272 = vmatpush1.msra.mxu0 %v2636_v46  ;;  %3635 = vmatpush1.msra.mxu1 %v2864_v11  ;;  %v3056_v46 = vld [vmem:[#allocation4 + $0x2f70] sm:$0xff]  ;;  %v2741_v11 = vld [vmem:[#allocation4 + $0x2598] sm:$0xff] }
 0x3e5   : > { %3273 = vmatprep.subr.mxu0 %v2629_v49  ;;  %3636 = vmatprep.subr.mxu1 %v2857_v15  ;;  %v3049_v49 = vld [vmem:[#allocation4 + $0x2f38] sm:$0xff]  ;;  %v2740_v15 = vld [vmem:[#allocation4 + $0x2590] sm:$0xff] }
 0x3e6   : > { %3274 = vmatpush1.msra.mxu0 %v2628_v52  ;;  %3637 = vmatpush1.msra.mxu1 %v2856_v16  ;;  %v3048_v52 = vld [vmem:[#allocation4 + $0x2f30] sm:$0xff]  ;;  %v2733_v16 = vld [vmem:[#allocation4 + $0x2558] sm:$0xff] }
 0x3e7   : > { %3275 = vmatprep.subr.mxu0 %v2621_v56  ;;  %3638 = vmatprep.subr.mxu1 %v2849_v44  ;;  %v3041_v56 = vld [vmem:[#allocation4 + $0x2ef8] sm:$0xff]  ;;  %v2732_v44 = vld [vmem:[#allocation4 + $0x2550] sm:$0xff] }
 0x3e8   : > { %3276 = vmatpush1.msra.mxu0 %v2620_v60  ;;  %3639 = vmatpush1.msra.mxu1 %v2848_v62  ;;  %v3040_v60 = vld [vmem:[#allocation4 + $0x2ef0] sm:$0xff]  ;;  %v2725_v62 = vld [vmem:[#allocation4 + $0x2518] sm:$0xff] }
 0x3e9   : > { %3277 = vmatprep.subr.mxu0 %v2613_v0  ;;  %3640 = vmatprep.subr.mxu1 %v2841_v29  ;;  %v3033_v0 = vld [vmem:[#allocation4 + $0x2eb8] sm:$0xff]  ;;  %v2724_v29 = vld [vmem:[#allocation4 + $0x2510] sm:$0xff] }
 0x3ea   : > { %3278 = vmatpush1.msra.mxu0 %v2612_v23  ;;  %3641 = vmatpush1.msra.mxu1 %v2840_v31  ;;  %v3032_v23 = vld [vmem:[#allocation4 + $0x2eb0] sm:$0xff]  ;;  %v2717_v31 = vld [vmem:[#allocation4 + $0x24d8] sm:$0xff] }
 0x3eb   : > { %3279 = vmatprep.subr.mxu0 %v2605_v6  ;;  %3642 = vmatprep.subr.mxu1 %v2833_v58  ;;  %v3025_v6 = vld [vmem:[#allocation4 + $0x2e78] sm:$0xff]  ;;  %v2716_v58 = vld [vmem:[#allocation4 + $0x24d0] sm:$0xff] }
 0x3ec   : > { %3280 = vmatpush1.msra.mxu0 %v2604_v7  ;;  %3643 = vmatpush1.msra.mxu1 %v2832_v1  ;;  %v3024_v7 = vld [vmem:[#allocation4 + $0x2e70] sm:$0xff]  ;;  %v2709_v1 = vld [vmem:[#allocation4 + $0x2498] sm:$0xff] }
 0x3ed   : > { %3281 = vmatprep.subr.mxu0 %v2597_v9  ;;  %3644 = vmatprep.subr.mxu1 %v2825_v33  ;;  %v3017_v9 = vld [vmem:[#allocation4 + $0x2e38] sm:$0xff]  ;;  %v2708_v33 = vld [vmem:[#allocation4 + $0x2490] sm:$0xff] }
 0x3ee   : > { %3282 = vmatpush1.msra.mxu0 %v2596_v10  ;;  %3645 = vmatpush1.msra.mxu1 %v2824_v57  ;;  %v3016_v10 = vld [vmem:[#allocation4 + $0x2e30] sm:$0xff]  ;;  %v2701_v57 = vld [vmem:[#allocation4 + $0x2458] sm:$0xff] }
 0x3ef   : > { %3283 = vmatprep.subr.mxu0 %v2589_v13  ;;  %3646 = vmatprep.subr.mxu1 %v3073_v35  ;;  %v3009_v13 = vld [vmem:[#allocation4 + $0x2df8] sm:$0xff]  ;;  %v2700_v35 = vld [vmem:[#allocation4 + $0x2450] sm:$0xff] }
 0x3f0   : > { %3284 = vmatpush1.msra.mxu0 %v2588_v22  ;;  %3647 = vmatpush2.msra.mxu1 %v3072_v37  ;;  %v3008_v22 = vld [vmem:[#allocation4 + $0x2df0] sm:$0xff]  ;;  %v2693_v37 = vld [vmem:[#allocation4 + $0x2418] sm:$0xff] }
 0x3f1   : > { %3285 = vmatprep.subr.mxu0 %v2581_v17  ;;  %3648 = vmatprep.subr.mxu1 %v3065_v39  ;;  %v3001_v17 = vld [vmem:[#allocation4 + $0x2db8] sm:$0xff]  ;;  %v2692_v39 = vld [vmem:[#allocation4 + $0x2410] sm:$0xff] }
 0x3f2   : > { %3286 = vmatpush1.msra.mxu0 %v2580_v26  ;;  %3649 = vmatpush2.msra.mxu1 %v3064_v40  ;;  %v3000_v26 = vld [vmem:[#allocation4 + $0x2db0] sm:$0xff]  ;;  %v2687_v40 = vld [vmem:[#allocation4 + $0x23e8] sm:$0xff] }
 0x3f3   : > { %3287 = vmatprep.subr.mxu0 %v2573_v28  ;;  %3650 = vmatprep.subr.mxu1 %v3057_v42  ;;  %v2993_v28 = vld [vmem:[#allocation4 + $0x2d78] sm:$0xff]  ;;  %v2679_v42 = vld [vmem:[#allocation4 + $0x23a8] sm:$0xff] }
 0x3f4   : > { %3288 = vmatpush1.msra.mxu0 %v2572_v30  ;;  %3651 = vmatpush2.msra.mxu1 %v3056_v46  ;;  %v2992_v30 = vld [vmem:[#allocation4 + $0x2d70] sm:$0xff]  ;;  %v2678_v46 = vld [vmem:[#allocation4 + $0x23a0] sm:$0xff] }
 0x3f5   : > { %3289 = vmatprep.subr.mxu0 %v2565_v53  ;;  %3652 = vmatprep.subr.mxu1 %v3049_v49  ;;  %v2985_v53 = vld [vmem:[#allocation4 + $0x2d38] sm:$0xff]  ;;  %v2671_v49 = vld [vmem:[#allocation4 + $0x2368] sm:$0xff] }
 0x3f6   : > { %3290 = vmatpush1.msra.mxu0 %v2564_v32  ;;  %3653 = vmatpush2.msra.mxu1 %v3048_v52  ;;  %v2984_v32 = vld [vmem:[#allocation4 + $0x2d30] sm:$0xff]  ;;  %v2663_v52 = vld [vmem:[#allocation4 + $0x2328] sm:$0xff] }
 0x3f7   : > { %3291 = vmatprep.subr.mxu0 %v2813_v4  ;;  %3654 = vmatprep.subr.mxu1 %v3041_v56  ;;  %v2977_v4 = vld [vmem:[#allocation4 + $0x2cf8] sm:$0xff]  ;;  %v2655_v56 = vld [vmem:[#allocation4 + $0x22e8] sm:$0xff] }
 0x3f8   : > { %3292 = vmatpush2.msra.mxu0 %v2812_v19  ;;  %3655 = vmatpush2.msra.mxu1 %v3040_v60  ;;  %v2976_v19 = vld [vmem:[#allocation4 + $0x2cf0] sm:$0xff]  ;;  %v2654_v60 = vld [vmem:[#allocation4 + $0x22e0] sm:$0xff] }
 0x3f9   : > { %3293 = vmatprep.subr.mxu0 %v2805_v34  ;;  %3656 = vmatprep.subr.mxu1 %v3033_v0  ;;  %v2969_v34 = vld [vmem:[#allocation4 + $0x2cb8] sm:$0xff]  ;;  %v2646_v0 = vld [vmem:[#allocation4 + $0x22a0] sm:$0xff] }
 0x3fa   : > { %3294 = vmatpush2.msra.mxu0 %v2804_v36  ;;  %3657 = vmatpush2.msra.mxu1 %v3032_v23  ;;  %v2968_v36 = vld [vmem:[#allocation4 + $0x2cb0] sm:$0xff]  ;;  %v2638_v23 = vld [vmem:[#allocation4 + $0x2260] sm:$0xff] }
 0x3fb   : > { %3295 = vmatprep.subr.mxu0 %v2797_v38  ;;  %3658 = vmatprep.subr.mxu1 %v3025_v6  ;;  %v2961_v38 = vld [vmem:[#allocation4 + $0x2c78] sm:$0xff]  ;;  %v2630_v6 = vld [vmem:[#allocation4 + $0x2220] sm:$0xff] }
 0x3fc   : > { %3296 = vmatpush2.msra.mxu0 %v2796_v41  ;;  %3659 = vmatpush2.msra.mxu1 %v3024_v7  ;;  %v2960_v41 = vld [vmem:[#allocation4 + $0x2c70] sm:$0xff]  ;;  %v2615_v7 = vld [vmem:[#allocation4 + $0x21a8] sm:$0xff] }
 0x3fd   : > { %3297 = vmatprep.subr.mxu0 %v2789_v48  ;;  %3660 = vmatprep.subr.mxu1 %v3017_v9  ;;  %v2686_v48 = vld [vmem:[#allocation4 + $0x23e0] sm:$0xff]  ;;  %v2607_v9 = vld [vmem:[#allocation4 + $0x2168] sm:$0xff] }
 0x3fe   : > { %3298 = vmatpush2.msra.mxu0 %v2788_v45  ;;  %3661 = vmatpush2.msra.mxu1 %v3016_v10  ;;  %v2953_v45 = vld [vmem:[#allocation4 + $0x2c38] sm:$0xff]  ;;  %v2599_v10 = vld [vmem:[#allocation4 + $0x2128] sm:$0xff] }
 0x3ff   : > { %3299 = vmatprep.subr.mxu0 %v2781_v47  ;;  %3662 = vmatprep.subr.mxu1 %v3009_v13  ;;  %v2952_v47 = vld [vmem:[#allocation4 + $0x2c30] sm:$0xff]  ;;  %v2591_v13 = vld [vmem:[#allocation4 + $0x20e8] sm:$0xff] }
 0x400   : > { %3300 = vmatpush2.msra.mxu0 %v2780_v50  ;;  %3663 = vmatpush2.msra.mxu1 %v3008_v22  ;;  %v2670_v50 = vld [vmem:[#allocation4 + $0x2360] sm:$0xff]  ;;  %v2583_v22 = vld [vmem:[#allocation4 + $0x20a8] sm:$0xff] }
 0x401   : > { %3301 = vmatprep.subr.mxu0 %v2773_v55  ;;  %3664 = vmatprep.subr.mxu1 %v3001_v17  ;;  %v2662_v55 = vld [vmem:[#allocation4 + $0x2320] sm:$0xff]  ;;  %v2575_v17 = vld [vmem:[#allocation4 + $0x2068] sm:$0xff] }
 0x402   : > { %3302 = vmatpush2.msra.mxu0 %v2772_v59  ;;  %3665 = vmatpush2.msra.mxu1 %v3000_v26  ;;  %v7873_v59 = vld.sshfl [vmem:[#allocation2 + $0x8] sm:$0x33 pattern:$0x76325410]  ;;  %v2567_v26 = vld [vmem:[#allocation4 + $0x2028] sm:$0xff] }
 0x403   : > { %3303 = vmatprep.subr.mxu0 %v2765_v63  ;;  %3666 = vmatprep.subr.mxu1 %v2993_v28  ;;  %v2647_v63 = vld [vmem:[#allocation4 + $0x22a8] sm:$0xff] }
 0x404   : > { %3304 = vmatpush2.msra.mxu0 %v2764_v3  ;;  %3667 = vmatpush2.msra.mxu1 %v2992_v30  ;;  %v2639_v3 = vld [vmem:[#allocation4 + $0x2268] sm:$0xff] }
 0x405   : > { %3305 = vmatprep.subr.mxu0 %v2757_v25  ;;  %3668 = vmatprep.subr.mxu1 %v2985_v53  ;;  %v2631_v25 = vld [vmem:[#allocation4 + $0x2228] sm:$0xff] }
 0x406   : > { %3306 = vmatpush2.msra.mxu0 %v2756_v51  ;;  %3669 = vmatpush2.msra.mxu1 %v2984_v32  ;;  %v2622_v51 = vld [vmem:[#allocation4 + $0x21e0] sm:$0xff]  ;;  %v2815_v28 = vld [vmem:[#allocation4 + $0x27e8] sm:$0xff] }
 0x407   : > { %3307 = vmatprep.subr.mxu0 %v2749_v27  ;;  %3670 = vmatprep.subr.mxu1 %v2977_v4  ;;  %v2614_v27 = vld [vmem:[#allocation4 + $0x21a0] sm:$0xff]  ;;  %v2807_v30 = vld [vmem:[#allocation4 + $0x27a8] sm:$0xff] }
 0x408   : > { %3308 = vmatpush2.msra.mxu0 %v2748_v24  ;;  %3671 = vmatpush2.msra.mxu1 %v2976_v19  ;;  %v2606_v24 = vld [vmem:[#allocation4 + $0x2160] sm:$0xff]  ;;  %v2799_v53 = vld [vmem:[#allocation4 + $0x2768] sm:$0xff] }
 0x409   : > { %3309 = vmatprep.subr.mxu0 %v2741_v11  ;;  %3672 = vmatprep.subr.mxu1 %v2969_v34  ;;  %v2598_v11 = vld [vmem:[#allocation4 + $0x2120] sm:$0xff]  ;;  %v2791_v32 = vld [vmem:[#allocation4 + $0x2728] sm:$0xff] }
 0x40a   : > { %3310 = vmatpush2.msra.mxu0 %v2740_v15  ;;  %3673 = vmatpush2.msra.mxu1 %v2968_v36  ;;  %v2590_v15 = vld [vmem:[#allocation4 + $0x20e0] sm:$0xff]  ;;  %v2783_v4 = vld [vmem:[#allocation4 + $0x26e8] sm:$0xff] }
 0x40b   : > { %3311 = vmatprep.subr.mxu0 %v2733_v16  ;;  %3674 = vmatprep.subr.mxu1 %v2961_v38  ;;  %v2582_v16 = vld [vmem:[#allocation4 + $0x20a0] sm:$0xff]  ;;  %v2775_v19 = vld [vmem:[#allocation4 + $0x26a8] sm:$0xff] }
 0x40c   : > { %3312 = vmatpush2.msra.mxu0 %v2732_v44  ;;  %3675 = vmatpush2.msra.mxu1 %v2960_v41  ;;  %v2574_v44 = vld [vmem:[#allocation4 + $0x2060] sm:$0xff]  ;;  %v2767_v34 = vld [vmem:[#allocation4 + $0x2668] sm:$0xff] }
 0x40d   : > { %3313 = vmatprep.subr.mxu0 %v2725_v62  ;;  %3676 = vmatprep.subr.mxu1 %v2953_v45  ;;  %v2566_v62 = vld [vmem:[#allocation4 + $0x2020] sm:$0xff]  ;;  %v2759_v36 = vld [vmem:[#allocation4 + $0x2628] sm:$0xff] }
 0x40e   : > { %3314 = vmatpush2.msra.mxu0 %v2724_v29  ;;  %3677 = vmatpush2.msra.mxu1 %v2952_v47  ;;  %v2814_v29 = vld [vmem:[#allocation4 + $0x27e0] sm:$0xff]  ;;  %v2751_v38 = vld [vmem:[#allocation4 + $0x25e8] sm:$0xff] }
 0x40f   : > { %3315 = vmatprep.subr.mxu0 %v2717_v31  ;;  %3679 = vmatmul.mubr.f32.vlgmr.msra.gmra.mxu1 %v7873_v59  ;;  %v2806_v31 = vld [vmem:[#allocation4 + $0x27a0] sm:$0xff]  ;;  %v2743_v41 = vld [vmem:[#allocation4 + $0x25a8] sm:$0xff] }
 0x410   : > { %3316 = vmatpush2.msra.mxu0 %v2716_v58  ;;  %v2798_v58 = vld [vmem:[#allocation4 + $0x2760] sm:$0xff]  ;;  %v2727_v45 = vld [vmem:[#allocation4 + $0x2528] sm:$0xff] }
 0x411   : > { %3317 = vmatprep.subr.mxu0 %v2709_v1  ;;  %v2790_v1 = vld [vmem:[#allocation4 + $0x2720] sm:$0xff]  ;;  %v2719_v47 = vld [vmem:[#allocation4 + $0x24e8] sm:$0xff] }
 0x412   : > { %3318 = vmatpush2.msra.mxu0 %v2708_v33  ;;  %v2782_v33 = vld [vmem:[#allocation4 + $0x26e0] sm:$0xff]  ;;  %v2695_v59 = vld [vmem:[#allocation4 + $0x2428] sm:$0xff] }
 0x413   : > { %3319 = vmatprep.subr.mxu0 %v2701_v57  ;;  %v2774_v57 = vld [vmem:[#allocation4 + $0x26a0] sm:$0xff] }
 0x414   : > { %3320 = vmatpush2.msra.mxu0 %v2700_v35  ;;  %v2766_v35 = vld [vmem:[#allocation4 + $0x2660] sm:$0xff] }
 0x415   : > { %3321 = vmatprep.subr.mxu0 %v2693_v37  ;;  %v2758_v37 = vld [vmem:[#allocation4 + $0x2620] sm:$0xff] }
 0x416   : > { %3322 = vmatpush2.msra.mxu0 %v2692_v39  ;;  %v2750_v39 = vld [vmem:[#allocation4 + $0x25e0] sm:$0xff] }
 0x417   : > { %3324 = vmatmul.mubr.f32.vlgmr.msra.gmra.mxu0 %v8200_v21  ;;  %3401 = vmatprep.subr.mxu0 %v2687_v40  ;;  %v2742_v40 = vld [vmem:[#allocation4 + $0x25a0] sm:$0xff] }
 0x418   : > { %3402 = vmatpush1.msra.mxu0 %v2686_v48  ;;  %3465 = vmatprep.mubr.f32.mxu0 %v8198_v20  ;;  %v2735_v48 = vld [vmem:[#allocation4 + $0x2568] sm:$0xff] }
 0x419   : > { %3403 = vmatprep.subr.mxu0 %v2679_v42  ;;  %v2734_v42 = vld [vmem:[#allocation4 + $0x2560] sm:$0xff] }
 0x41a   : > { %3404 = vmatpush1.msra.mxu0 %v2678_v46  ;;  %v2726_v46 = vld [vmem:[#allocation4 + $0x2520] sm:$0xff] }
 0x41b   : > { %3405 = vmatprep.subr.mxu0 %v2671_v49  ;;  %v2718_v49 = vld [vmem:[#allocation4 + $0x24e0] sm:$0xff] }
 0x41c   : > { %3406 = vmatpush1.msra.mxu0 %v2670_v50  ;;  %v2711_v50 = vld [vmem:[#allocation4 + $0x24a8] sm:$0xff] }
 0x41d   : > { %3407 = vmatprep.subr.mxu0 %v2663_v52  ;;  %v2710_v52 = vld [vmem:[#allocation4 + $0x24a0] sm:$0xff] }
 0x41e   : > { %3408 = vmatpush1.msra.mxu0 %v2662_v55  ;;  %v2703_v55 = vld [vmem:[#allocation4 + $0x2468] sm:$0xff] }
 0x41f   : > { %3409 = vmatprep.subr.mxu0 %v2655_v56  ;;  %v2702_v56 = vld [vmem:[#allocation4 + $0x2460] sm:$0xff] }
 0x420   : > { %3410 = vmatpush1.msra.mxu0 %v2654_v60  ;;  %v2694_v60 = vld [vmem:[#allocation4 + $0x2420] sm:$0xff] }
 0x421   : > { %3411 = vmatprep.subr.mxu0 %v2647_v63  ;;  %v2689_v63 = vld [vmem:[#allocation4 + $0x23f8] sm:$0xff] }
 0x422   : > { %3412 = vmatpush1.msra.mxu0 %v2646_v0  ;;  %v2688_v0 = vld [vmem:[#allocation4 + $0x23f0] sm:$0xff] }
 0x423   : > { %3413 = vmatprep.subr.mxu0 %v2639_v3  ;;  %v2681_v3 = vld [vmem:[#allocation4 + $0x23b8] sm:$0xff] }
 0x424   : > { %3414 = vmatpush1.msra.mxu0 %v2638_v23  ;;  %v2680_v23 = vld [vmem:[#allocation4 + $0x23b0] sm:$0xff] }
 0x425   : > { %3415 = vmatprep.subr.mxu0 %v2631_v25  ;;  %v2673_v25 = vld [vmem:[#allocation4 + $0x2378] sm:$0xff] }
 0x426   : > { %3416 = vmatpush1.msra.mxu0 %v2630_v6  ;;  %v2672_v6 = vld [vmem:[#allocation4 + $0x2370] sm:$0xff] }
 0x427   : > { %3417 = vmatprep.subr.mxu0 %v2623_v43  ;;  %v2665_v43 = vld [vmem:[#allocation4 + $0x2338] sm:$0xff] }
 0x428   : > { %3418 = vmatpush1.msra.mxu0 %v2622_v51  ;;  %v2664_v51 = vld [vmem:[#allocation4 + $0x2330] sm:$0xff] }
 0x429   : > { %3419 = vmatprep.subr.mxu0 %v2615_v7  ;;  %v2657_v7 = vld [vmem:[#allocation4 + $0x22f8] sm:$0xff] }
 0x42a   : > { %3420 = vmatpush1.msra.mxu0 %v2614_v27  ;;  %v2656_v27 = vld [vmem:[#allocation4 + $0x22f0] sm:$0xff] }
 0x42b   : > { %3421 = vmatprep.subr.mxu0 %v2607_v9  ;;  %v2649_v9 = vld [vmem:[#allocation4 + $0x22b8] sm:$0xff] }
 0x42c   : > { %3422 = vmatpush1.msra.mxu0 %v2606_v24  ;;  %v2648_v24 = vld [vmem:[#allocation4 + $0x22b0] sm:$0xff] }
 0x42d   : > { %3423 = vmatprep.subr.mxu0 %v2599_v10  ;;  %v2641_v10 = vld [vmem:[#allocation4 + $0x2278] sm:$0xff] }
 0x42e   : > { %3424 = vmatpush1.msra.mxu0 %v2598_v11  ;;  %v2640_v11 = vld [vmem:[#allocation4 + $0x2270] sm:$0xff] }
 0x42f   : > { %3425 = vmatprep.subr.mxu0 %v2591_v13  ;;  %v2632_v13 = vld [vmem:[#allocation4 + $0x2230] sm:$0xff] }
 0x430   : > { %3426 = vmatpush1.msra.mxu0 %v2590_v15  ;;  %v2625_v15 = vld [vmem:[#allocation4 + $0x21f8] sm:$0xff] }
 0x431   : > { %3427 = vmatprep.subr.mxu0 %v2583_v22  ;;  %v2624_v22 = vld [vmem:[#allocation4 + $0x21f0] sm:$0xff] }
 0x432   : > { %3428 = vmatpush1.msra.mxu0 %v2582_v16  ;;  %v2617_v16 = vld [vmem:[#allocation4 + $0x21b8] sm:$0xff] }
 0x433   : > { %3429 = vmatprep.subr.mxu0 %v2575_v17  ;;  %v2616_v17 = vld [vmem:[#allocation4 + $0x21b0] sm:$0xff] }
 0x434   : > { %3430 = vmatpush1.msra.mxu0 %v2574_v44  ;;  %v2609_v44 = vld [vmem:[#allocation4 + $0x2178] sm:$0xff] }
 0x435   : > { %3431 = vmatprep.subr.mxu0 %v2567_v26  ;;  %v2608_v26 = vld [vmem:[#allocation4 + $0x2170] sm:$0xff] }
 0x436   : > { %3432 = vmatpush1.msra.mxu0 %v2566_v62  ;;  %v2601_v62 = vld [vmem:[#allocation4 + $0x2138] sm:$0xff] }
 0x437   : > { %3433 = vmatprep.subr.mxu0 %v2815_v28  ;;  %v2600_v28 = vld [vmem:[#allocation4 + $0x2130] sm:$0xff] }
 0x438   : > { %3434 = vmatpush2.msra.mxu0 %v2814_v29  ;;  %v2593_v29 = vld [vmem:[#allocation4 + $0x20f8] sm:$0xff] }
 0x439   : > { %3435 = vmatprep.subr.mxu0 %v2807_v30  ;;  %v2592_v30 = vld [vmem:[#allocation4 + $0x20f0] sm:$0xff] }
 0x43a   : > { %3436 = vmatpush2.msra.mxu0 %v2806_v31  ;;  %v2585_v31 = vld [vmem:[#allocation4 + $0x20b8] sm:$0xff] }
 0x43b   : > { %3437 = vmatprep.subr.mxu0 %v2799_v53  ;;  %v2584_v53 = vld [vmem:[#allocation4 + $0x20b0] sm:$0xff] }
 0x43c   : > { %3438 = vmatpush2.msra.mxu0 %v2798_v58  ;;  %v2577_v58 = vld [vmem:[#allocation4 + $0x2078] sm:$0xff] }
 0x43d   : > { %3439 = vmatprep.subr.mxu0 %v2791_v32  ;;  %v2576_v32 = vld [vmem:[#allocation4 + $0x2070] sm:$0xff] }
 0x43e   : > { %3440 = vmatpush2.msra.mxu0 %v2790_v1  ;;  %v2569_v1 = vld [vmem:[#allocation4 + $0x2038] sm:$0xff] }
 0x43f   : > { %3441 = vmatprep.subr.mxu0 %v2783_v4  ;;  %v2568_v4 = vld [vmem:[#allocation4 + $0x2030] sm:$0xff] }
 0x440   : > { %3442 = vmatpush2.msra.mxu0 %v2782_v33  ;;  %v2817_v33 = vld [vmem:[#allocation4 + $0x27f8] sm:$0xff] }
 0x441   : > { %3443 = vmatprep.subr.mxu0 %v2775_v19  ;;  %v2816_v19 = vld [vmem:[#allocation4 + $0x27f0] sm:$0xff] }
 0x442   : > { %3444 = vmatpush2.msra.mxu0 %v2774_v57  ;;  %v2809_v57 = vld [vmem:[#allocation4 + $0x27b8] sm:$0xff] }
 0x443   : > { %3445 = vmatprep.subr.mxu0 %v2767_v34  ;;  %v2808_v34 = vld [vmem:[#allocation4 + $0x27b0] sm:$0xff] }
 0x444   : > { %3446 = vmatpush2.msra.mxu0 %v2766_v35  ;;  %v2801_v35 = vld [vmem:[#allocation4 + $0x2778] sm:$0xff] }
 0x445   : > { %3447 = vmatprep.subr.mxu0 %v2759_v36  ;;  %v2800_v36 = vld [vmem:[#allocation4 + $0x2770] sm:$0xff] }
 0x446   : > { %3448 = vmatpush2.msra.mxu0 %v2758_v37  ;;  %v2793_v37 = vld [vmem:[#allocation4 + $0x2738] sm:$0xff] }
 0x447   : > { %3449 = vmatprep.subr.mxu0 %v2751_v38  ;;  %v2792_v38 = vld [vmem:[#allocation4 + $0x2730] sm:$0xff] }
 0x448   : > { %3450 = vmatpush2.msra.mxu0 %v2750_v39  ;;  %v2785_v39 = vld [vmem:[#allocation4 + $0x26f8] sm:$0xff] }
 0x449   : > { %3451 = vmatprep.subr.mxu0 %v2743_v41  ;;  %v2784_v41 = vld [vmem:[#allocation4 + $0x26f0] sm:$0xff] }
 0x44a   : > { %3452 = vmatpush2.msra.mxu0 %v2742_v40  ;;  %v2777_v40 = vld [vmem:[#allocation4 + $0x26b8] sm:$0xff] }
 0x44b   : > { %3453 = vmatprep.subr.mxu0 %v2735_v48  ;;  %v2776_v48 = vld [vmem:[#allocation4 + $0x26b0] sm:$0xff] }
 0x44c   : > { %3454 = vmatpush2.msra.mxu0 %v2734_v42  ;;  %v2769_v42 = vld [vmem:[#allocation4 + $0x2678] sm:$0xff] }
 0x44d   : > { %3455 = vmatprep.subr.mxu0 %v2727_v45  ;;  %v2768_v45 = vld [vmem:[#allocation4 + $0x2670] sm:$0xff] }
 0x44e   : > { %3456 = vmatpush2.msra.mxu0 %v2726_v46  ;;  %v2761_v46 = vld [vmem:[#allocation4 + $0x2638] sm:$0xff] }
 0x44f   : > { %3457 = vmatprep.subr.mxu0 %v2719_v47  ;;  %v2760_v47 = vld [vmem:[#allocation4 + $0x2630] sm:$0xff] }
 0x450   : > { %3458 = vmatpush2.msra.mxu0 %v2718_v49  ;;  %v2753_v49 = vld [vmem:[#allocation4 + $0x25f8] sm:$0xff] }
 0x451   : > { %3459 = vmatprep.subr.mxu0 %v2711_v50  ;;  %v2752_v50 = vld [vmem:[#allocation4 + $0x25f0] sm:$0xff] }
 0x452   : > { %3460 = vmatpush2.msra.mxu0 %v2710_v52  ;;  %v2745_v52 = vld [vmem:[#allocation4 + $0x25b8] sm:$0xff] }
 0x453   : > { %3461 = vmatprep.subr.mxu0 %v2703_v55  ;;  %v2744_v55 = vld [vmem:[#allocation4 + $0x25b0] sm:$0xff] }
 0x454   : > { %3462 = vmatpush2.msra.mxu0 %v2702_v56  ;;  %v2737_v56 = vld [vmem:[#allocation4 + $0x2578] sm:$0xff] }
 0x455   : > { %3463 = vmatprep.subr.mxu0 %v2695_v59  ;;  %v2736_v59 = vld [vmem:[#allocation4 + $0x2570] sm:$0xff] }
 0x456   : > { %3464 = vmatpush2.msra.mxu0 %v2694_v60  ;;  %v2729_v60 = vld [vmem:[#allocation4 + $0x2538] sm:$0xff] }
 0x457   : > { %3466 = vmatmul.mubr.f32.vlgmr.msra.gmra.mxu0 %v8200_v21  ;;  %3543 = vmatprep.subr.mxu0 %v2689_v63  ;;  %v2728_v63 = vld [vmem:[#allocation4 + $0x2530] sm:$0xff] }
 0x458   : > { %3544 = vmatpush1.msra.mxu0 %v2688_v0  ;;  %3607 = vmatprep.mubr.f32.mxu0 %v8198_v20  ;;  %v2633_v20 = vld [vmem:[#allocation4 + $0x2238] sm:$0xff] }
 0x459   : > { %3545 = vmatprep.subr.mxu0 %v2681_v3  ;;  %v2721_v0 = vld [vmem:[#allocation4 + $0x24f8] sm:$0xff]  ;;  %v2720_v3 = vld [vmem:[#allocation4 + $0x24f0] sm:$0xff] }
 0x45a   : > { %3546 = vmatpush1.msra.mxu0 %v2680_v23  ;;  %v2713_v23 = vld [vmem:[#allocation4 + $0x24b8] sm:$0xff] }
 0x45b   : > { %3547 = vmatprep.subr.mxu0 %v2673_v25  ;;  %v2712_v25 = vld [vmem:[#allocation4 + $0x24b0] sm:$0xff] }
 0x45c   : > { %3548 = vmatpush1.msra.mxu0 %v2672_v6  ;;  %v2705_v6 = vld [vmem:[#allocation4 + $0x2478] sm:$0xff] }
 0x45d   : > { %3549 = vmatprep.subr.mxu0 %v2665_v43  ;;  %v2704_v43 = vld [vmem:[#allocation4 + $0x2470] sm:$0xff] }
 0x45e   : > { %3550 = vmatpush1.msra.mxu0 %v2664_v51  ;;  %v2697_v51 = vld [vmem:[#allocation4 + $0x2438] sm:$0xff] }
 0x45f   : > { %3551 = vmatprep.subr.mxu0 %v2657_v7  ;;  %v2696_v7 = vld [vmem:[#allocation4 + $0x2430] sm:$0xff] }
 0x460   : > { %3552 = vmatpush1.msra.mxu0 %v2656_v27  ;;  %v3905_v27 = vld [vmem:[#allocation4 + $0x33c8] sm:$0xff] }
 0x461   : > { %3553 = vmatprep.subr.mxu0 %v2649_v9  ;;  %v4161_v9 = vld [vmem:[#allocation4 + $0x3bc8] sm:$0xff] }
 0x462   : > { %3554 = vmatpush1.msra.mxu0 %v2648_v24  ;;  %v3904_v24 = vld [vmem:[#allocation4 + $0x33c0] sm:$0xff]  ;;  %4410 = vmatprep.subr.mxu1 %v4161_v9  ;;  %v4049_v9 = vld [vmem:[#allocation4 + $0x3848] sm:$0xff] }
 0x463   : > { %3555 = vmatprep.subr.mxu0 %v2641_v10  ;;  %v4160_v10 = vld [vmem:[#allocation4 + $0x3bc0] sm:$0xff] }
 0x464   : > { %3556 = vmatpush1.msra.mxu0 %v2640_v11  ;;  %v3897_v11 = vld [vmem:[#allocation4 + $0x3388] sm:$0xff]  ;;  %4411 = vmatpush1.msra.mxu1 %v4160_v10  ;;  %v4048_v10 = vld [vmem:[#allocation4 + $0x3840] sm:$0xff] }
 0x465   : > { %3557 = vmatprep.subr.mxu0 %v2633_v20  ;;  %v4153_v20 = vld [vmem:[#allocation4 + $0x3b88] sm:$0xff] }
 0x466   : > { %3558 = vmatpush1.msra.mxu0 %v2632_v13  ;;  %v3896_v13 = vld [vmem:[#allocation4 + $0x3380] sm:$0xff]  ;;  %4412 = vmatprep.subr.mxu1 %v4153_v20  ;;  %v4041_v20 = vld [vmem:[#allocation4 + $0x3808] sm:$0xff] }
 0x467   : > { %3559 = vmatprep.subr.mxu0 %v2625_v15  ;;  %v4152_v15 = vld [vmem:[#allocation4 + $0x3b80] sm:$0xff] }
 0x468   : > { %3560 = vmatpush1.msra.mxu0 %v2624_v22  ;;  %v3889_v22 = vld [vmem:[#allocation4 + $0x3348] sm:$0xff]  ;;  %4413 = vmatpush1.msra.mxu1 %v4152_v15  ;;  %v4040_v15 = vld [vmem:[#allocation4 + $0x3800] sm:$0xff] }
 0x469   : > { %3561 = vmatprep.subr.mxu0 %v2617_v16  ;;  %v4145_v16 = vld [vmem:[#allocation4 + $0x3b48] sm:$0xff] }
 0x46a   : > { %3562 = vmatpush1.msra.mxu0 %v2616_v17  ;;  %v3888_v17 = vld [vmem:[#allocation4 + $0x3340] sm:$0xff]  ;;  %4414 = vmatprep.subr.mxu1 %v4145_v16  ;;  %v4289_v16 = vld [vmem:[#allocation4 + $0x3fc8] sm:$0xff] }
 0x46b   : > { %3563 = vmatprep.subr.mxu0 %v2609_v44  ;;  %v4144_v44 = vld [vmem:[#allocation4 + $0x3b40] sm:$0xff] }
 0x46c   : > { %3564 = vmatpush1.msra.mxu0 %v2608_v26  ;;  %v4137_v26 = vld [vmem:[#allocation4 + $0x3b08] sm:$0xff]  ;;  %4415 = vmatpush1.msra.mxu1 %v4144_v44  ;;  %v4288_v44 = vld [vmem:[#allocation4 + $0x3fc0] sm:$0xff] }
 0x46d   : > { %3565 = vmatprep.subr.mxu0 %v2601_v62  ;;  %v3880_v62 = vld [vmem:[#allocation4 + $0x3300] sm:$0xff]  ;;  %4416 = vmatprep.subr.mxu1 %v4137_v26  ;;  %v4281_v26 = vld [vmem:[#allocation4 + $0x3f88] sm:$0xff] }
 0x46e   : > { %3566 = vmatpush1.msra.mxu0 %v2600_v28  ;;  %v4136_v28 = vld [vmem:[#allocation4 + $0x3b00] sm:$0xff] }
 0x46f   : > { %3567 = vmatprep.subr.mxu0 %v2593_v29  ;;  %v3873_v29 = vld [vmem:[#allocation4 + $0x32c8] sm:$0xff]  ;;  %4417 = vmatpush1.msra.mxu1 %v4136_v28  ;;  %v4280_v28 = vld [vmem:[#allocation4 + $0x3f80] sm:$0xff] }
 0x470   : > { %3568 = vmatpush1.msra.mxu0 %v2592_v30  ;;  %v4129_v30 = vld [vmem:[#allocation4 + $0x3ac8] sm:$0xff] }
 0x471   : > { %3569 = vmatprep.subr.mxu0 %v2585_v31  ;;  %v3872_v31 = vld [vmem:[#allocation4 + $0x32c0] sm:$0xff]  ;;  %4418 = vmatprep.subr.mxu1 %v4129_v30  ;;  %v4273_v30 = vld [vmem:[#allocation4 + $0x3f48] sm:$0xff] }
 0x472   : > { %3570 = vmatpush1.msra.mxu0 %v2584_v53  ;;  %v4128_v53 = vld [vmem:[#allocation4 + $0x3ac0] sm:$0xff] }
 0x473   : > { %3571 = vmatprep.subr.mxu0 %v2577_v58  ;;  %v3865_v58 = vld [vmem:[#allocation4 + $0x3288] sm:$0xff]  ;;  %4419 = vmatpush1.msra.mxu1 %v4128_v53  ;;  %v4272_v53 = vld [vmem:[#allocation4 + $0x3f40] sm:$0xff] }
 0x474   : > { %3572 = vmatpush1.msra.mxu0 %v2576_v32  ;;  %v4121_v32 = vld [vmem:[#allocation4 + $0x3a88] sm:$0xff] }
 0x475   : > { %3573 = vmatprep.subr.mxu0 %v2569_v1  ;;  %v3864_v1 = vld [vmem:[#allocation4 + $0x3280] sm:$0xff]  ;;  %4420 = vmatprep.subr.mxu1 %v4121_v32  ;;  %v4265_v32 = vld [vmem:[#allocation4 + $0x3f08] sm:$0xff] }
 0x476   : > { %3574 = vmatpush1.msra.mxu0 %v2568_v4  ;;  %v4120_v4 = vld [vmem:[#allocation4 + $0x3a80] sm:$0xff] }
 0x477   : > { %3575 = vmatprep.subr.mxu0 %v2817_v33  ;;  %v3857_v33 = vld [vmem:[#allocation4 + $0x3248] sm:$0xff]  ;;  %4421 = vmatpush1.msra.mxu1 %v4120_v4  ;;  %v4264_v4 = vld [vmem:[#allocation4 + $0x3f00] sm:$0xff] }
 0x478   : > { %3576 = vmatpush2.msra.mxu0 %v2816_v19  ;;  %v4113_v19 = vld [vmem:[#allocation4 + $0x3a48] sm:$0xff] }
 0x479   : > { %3577 = vmatprep.subr.mxu0 %v2809_v57  ;;  %v3856_v57 = vld [vmem:[#allocation4 + $0x3240] sm:$0xff]  ;;  %4422 = vmatprep.subr.mxu1 %v4113_v19  ;;  %v4257_v19 = vld [vmem:[#allocation4 + $0x3ec8] sm:$0xff] }
 0x47a   : > { %3578 = vmatpush2.msra.mxu0 %v2808_v34  ;;  %v4112_v34 = vld [vmem:[#allocation4 + $0x3a40] sm:$0xff] }
 0x47b   : > { %3579 = vmatprep.subr.mxu0 %v2801_v35  ;;  %v3849_v35 = vld [vmem:[#allocation4 + $0x3208] sm:$0xff]  ;;  %4423 = vmatpush1.msra.mxu1 %v4112_v34  ;;  %v4256_v34 = vld [vmem:[#allocation4 + $0x3ec0] sm:$0xff] }
 0x47c   : > { %3580 = vmatpush2.msra.mxu0 %v2800_v36  ;;  %v4105_v36 = vld [vmem:[#allocation4 + $0x3a08] sm:$0xff] }
 0x47d   : > { %3581 = vmatprep.subr.mxu0 %v2793_v37  ;;  %v3848_v37 = vld [vmem:[#allocation4 + $0x3200] sm:$0xff]  ;;  %4424 = vmatprep.subr.mxu1 %v4105_v36  ;;  %v4249_v36 = vld [vmem:[#allocation4 + $0x3e88] sm:$0xff] }
 0x47e   : > { %3582 = vmatpush2.msra.mxu0 %v2792_v38  ;;  %v4104_v38 = vld [vmem:[#allocation4 + $0x3a00] sm:$0xff] }
 0x47f   : > { %3583 = vmatprep.subr.mxu0 %v2785_v39  ;;  %v3841_v39 = vld [vmem:[#allocation4 + $0x31c8] sm:$0xff]  ;;  %4425 = vmatpush1.msra.mxu1 %v4104_v38  ;;  %v4248_v38 = vld [vmem:[#allocation4 + $0x3e80] sm:$0xff] }
 0x480   : > { %3584 = vmatpush2.msra.mxu0 %v2784_v41  ;;  %v4097_v41 = vld [vmem:[#allocation4 + $0x39c8] sm:$0xff] }
 0x481   : > { %3585 = vmatprep.subr.mxu0 %v2777_v40  ;;  %v3840_v40 = vld [vmem:[#allocation4 + $0x31c0] sm:$0xff]  ;;  %4426 = vmatprep.subr.mxu1 %v4097_v41  ;;  %v4241_v41 = vld [vmem:[#allocation4 + $0x3e48] sm:$0xff] }
 0x482   : > { %3586 = vmatpush2.msra.mxu0 %v2776_v48  ;;  %v4096_v48 = vld [vmem:[#allocation4 + $0x39c0] sm:$0xff] }
 0x483   : > { %3587 = vmatprep.subr.mxu0 %v2769_v42  ;;  %v3833_v42 = vld [vmem:[#allocation4 + $0x3188] sm:$0xff]  ;;  %4427 = vmatpush1.msra.mxu1 %v4096_v48  ;;  %v4240_v48 = vld [vmem:[#allocation4 + $0x3e40] sm:$0xff] }
 0x484   : > { %3588 = vmatpush2.msra.mxu0 %v2768_v45  ;;  %v4089_v45 = vld [vmem:[#allocation4 + $0x3988] sm:$0xff] }
 0x485   : > { %3589 = vmatprep.subr.mxu0 %v2761_v46  ;;  %v3832_v46 = vld [vmem:[#allocation4 + $0x3180] sm:$0xff]  ;;  %4428 = vmatprep.subr.mxu1 %v4089_v45  ;;  %v4233_v45 = vld [vmem:[#allocation4 + $0x3e08] sm:$0xff] }
 0x486   : > { %3590 = vmatpush2.msra.mxu0 %v2760_v47  ;;  %v4088_v47 = vld [vmem:[#allocation4 + $0x3980] sm:$0xff] }
 0x487   : > { %3591 = vmatprep.subr.mxu0 %v2753_v49  ;;  %v3825_v49 = vld [vmem:[#allocation4 + $0x3148] sm:$0xff]  ;;  %4429 = vmatpush1.msra.mxu1 %v4088_v47  ;;  %v3976_v47 = vld [vmem:[#allocation4 + $0x3600] sm:$0xff] }
 0x488   : > { %3592 = vmatpush2.msra.mxu0 %v2752_v50  ;;  %v4081_v50 = vld [vmem:[#allocation4 + $0x3948] sm:$0xff] }
 0x489   : > { %3593 = vmatprep.subr.mxu0 %v2745_v52  ;;  %v3824_v52 = vld [vmem:[#allocation4 + $0x3140] sm:$0xff]  ;;  %4430 = vmatprep.subr.mxu1 %v4081_v50  ;;  %v3969_v50 = vld [vmem:[#allocation4 + $0x35c8] sm:$0xff] }
 0x48a   : > { %3594 = vmatpush2.msra.mxu0 %v2744_v55  ;;  %v4080_v55 = vld [vmem:[#allocation4 + $0x3940] sm:$0xff] }
 0x48b   : > { %3595 = vmatprep.subr.mxu0 %v2737_v56  ;;  %v3817_v56 = vld [vmem:[#allocation4 + $0x3108] sm:$0xff]  ;;  %4431 = vmatpush1.msra.mxu1 %v4080_v55  ;;  %v8214_v55 = vld [vmem:[#allocation6 + $0x10] sm:$0xff] }
 0x48c   : > { %3596 = vmatpush2.msra.mxu0 %v2736_v59  ;;  %v4073_v59 = vld [vmem:[#allocation4 + $0x3908] sm:$0xff] }
 0x48d   : > { %3597 = vmatprep.subr.mxu0 %v2729_v60  ;;  %4432 = vmatprep.subr.mxu1 %v4073_v59  ;;  %v3816_v60 = vld [vmem:[#allocation4 + $0x3100] sm:$0xff] }
 0x48e   : > { %3598 = vmatpush2.msra.mxu0 %v2728_v63  ;;  %v4072_v63 = vld [vmem:[#allocation4 + $0x3900] sm:$0xff] }
 0x48f   : > { %3599 = vmatprep.subr.mxu0 %v2721_v0  ;;  %4433 = vmatpush1.msra.mxu1 %v4072_v63  ;;  %v3809_v0 = vld [vmem:[#allocation4 + $0x30c8] sm:$0xff]  ;;  %v4224_v59 = vld [vmem:[#allocation4 + $0x3dc0] sm:$0xff] }
 0x490   : > { %3600 = vmatpush2.msra.mxu0 %v2720_v3  ;;  %v4065_v3 = vld [vmem:[#allocation4 + $0x38c8] sm:$0xff] }
 0x491   : > { %3601 = vmatprep.subr.mxu0 %v2713_v23  ;;  %4434 = vmatprep.subr.mxu1 %v4065_v3  ;;  %v3808_v23 = vld [vmem:[#allocation4 + $0x30c0] sm:$0xff]  ;;  %v4217_v63 = vld [vmem:[#allocation4 + $0x3d88] sm:$0xff] }
 0x492   : > { %3602 = vmatpush2.msra.mxu0 %v2712_v25  ;;  %v4064_v25 = vld [vmem:[#allocation4 + $0x38c0] sm:$0xff] }
 0x493   : > { %3603 = vmatprep.subr.mxu0 %v2705_v6  ;;  %4435 = vmatpush1.msra.mxu1 %v4064_v25  ;;  %v3801_v6 = vld [vmem:[#allocation4 + $0x3088] sm:$0xff]  ;;  %v4216_v3 = vld [vmem:[#allocation4 + $0x3d80] sm:$0xff] }
 0x494   : > { %3604 = vmatpush2.msra.mxu0 %v2704_v43  ;;  %v4057_v43 = vld [vmem:[#allocation4 + $0x3888] sm:$0xff] }
 0x495   : > { %3605 = vmatprep.subr.mxu0 %v2697_v51  ;;  %4436 = vmatprep.subr.mxu1 %v4057_v43  ;;  %v3800_v51 = vld [vmem:[#allocation4 + $0x3080] sm:$0xff]  ;;  %v4209_v43 = vld [vmem:[#allocation4 + $0x3d48] sm:$0xff] }
 0x496   : > { %3606 = vmatpush2.msra.mxu0 %v2696_v7  ;;  %v4056_v7 = vld [vmem:[#allocation4 + $0x3880] sm:$0xff] }
 0x497   : > { %3608 = vmatmul.mubr.f32.vlgmr.msra.gmra.mxu0 %v8200_v21  ;;  %4339 = vmatprep.subr.mxu0 %v3905_v27  ;;  %v3881_v21 = vld [vmem:[#allocation4 + $0x3308] sm:$0xff] }
 0x498   : > { %4340 = vmatpush1.msra.mxu0 %v3904_v24  ;;  %4437 = vmatpush1.msra.mxu1 %v4056_v7  ;;  %v3793_v27 = vld [vmem:[#allocation4 + $0x3048] sm:$0xff]  ;;  %v3792_v24 = vld [vmem:[#allocation4 + $0x3040] sm:$0xff] }
 0x499   : > { %4341 = vmatprep.subr.mxu0 %v3897_v11  ;;  %4438 = vmatprep.subr.mxu1 %v4049_v9  ;;  %v3785_v11 = vld [vmem:[#allocation4 + $0x3008] sm:$0xff]  ;;  %v4208_v7 = vld [vmem:[#allocation4 + $0x3d40] sm:$0xff] }
 0x49a   : > { %4342 = vmatpush1.msra.mxu0 %v3896_v13  ;;  %4439 = vmatpush1.msra.mxu1 %v4048_v10  ;;  %v3784_v13 = vld [vmem:[#allocation4 + $0x3000] sm:$0xff]  ;;  %v4201_v9 = vld [vmem:[#allocation4 + $0x3d08] sm:$0xff] }
 0x49b   : > { %4343 = vmatprep.subr.mxu0 %v3889_v22  ;;  %4440 = vmatprep.subr.mxu1 %v4041_v20  ;;  %v4033_v22 = vld [vmem:[#allocation4 + $0x37c8] sm:$0xff]  ;;  %v3944_v10 = vld [vmem:[#allocation4 + $0x3500] sm:$0xff]  ;;  %v3080_v20 = vrot.slane %v8214_v55, %v8078_v54 }
 0x49c   : > { %4344 = vmatpush1.msra.mxu0 %v3888_v17  ;;  %4441 = vmatpush1.msra.mxu1 %v4040_v15  ;;  %v4032_v17 = vld [vmem:[#allocation4 + $0x37c0] sm:$0xff]  ;;  %v4193_v15 = vld [vmem:[#allocation4 + $0x3cc8] sm:$0xff] }
 0x49d   : > { %4345 = vmatprep.subr.mxu0 %v3881_v21  ;;  %4442 = vmatprep.subr.mxu1 %v4289_v16  ;;  %v4025_v21 = vld [vmem:[#allocation4 + $0x3788] sm:$0xff]  ;;  %v3088_v16 = vrot.slane %v8214_v55, %v8087_v61 }
 0x49e   : > { %4346 = vmatpush1.msra.mxu0 %v3880_v62  ;;  %4443 = vmatpush2.msra.mxu1 %v4288_v44  ;;  %v4024_v62 = vld [vmem:[#allocation4 + $0x3780] sm:$0xff] }
 0x49f   : > { %4347 = vmatprep.subr.mxu0 %v3873_v29  ;;  %4444 = vmatprep.subr.mxu1 %v4281_v26  ;;  %v4017_v29 = vld [vmem:[#allocation4 + $0x3748] sm:$0xff]  ;;  %v4192_v44 = vld [vmem:[#allocation4 + $0x3cc0] sm:$0xff] }
 0x4a0   : > { %4348 = vmatpush1.msra.mxu0 %v3872_v31  ;;  %4445 = vmatpush2.msra.mxu1 %v4280_v28  ;;  %v4016_v31 = vld [vmem:[#allocation4 + $0x3740] sm:$0xff]  ;;  %v3929_v26 = vld [vmem:[#allocation4 + $0x3488] sm:$0xff] }
 0x4a1   : > { %4349 = vmatprep.subr.mxu0 %v3865_v58  ;;  %4446 = vmatprep.subr.mxu1 %v4273_v30  ;;  %v4009_v58 = vld [vmem:[#allocation4 + $0x3708] sm:$0xff]  ;;  %v3928_v30 = vld [vmem:[#allocation4 + $0x3480] sm:$0xff] }
 0x4a2   : > { %4350 = vmatpush1.msra.mxu0 %v3864_v1  ;;  %4447 = vmatpush2.msra.mxu1 %v4272_v53  ;;  %v4008_v1 = vld [vmem:[#allocation4 + $0x3700] sm:$0xff] }
 0x4a3   : > { %4351 = vmatprep.subr.mxu0 %v3857_v33  ;;  %4448 = vmatprep.subr.mxu1 %v4265_v32  ;;  %v4001_v33 = vld [vmem:[#allocation4 + $0x36c8] sm:$0xff] }
 0x4a4   : > { %4352 = vmatpush1.msra.mxu0 %v3856_v57  ;;  %4449 = vmatpush2.msra.mxu1 %v4264_v4  ;;  %v4000_v57 = vld [vmem:[#allocation4 + $0x36c0] sm:$0xff]  ;;  %v3921_v32 = vld [vmem:[#allocation4 + $0x3448] sm:$0xff] }
 0x4a5   : > { %4353 = vmatprep.subr.mxu0 %v3849_v35  ;;  %4450 = vmatprep.subr.mxu1 %v4257_v19  ;;  %v3993_v35 = vld [vmem:[#allocation4 + $0x3688] sm:$0xff]  ;;  %v4176_v19 = vld [vmem:[#allocation4 + $0x3c40] sm:$0xff] }
 0x4a6   : > { %4354 = vmatpush1.msra.mxu0 %v3848_v37  ;;  %4451 = vmatpush2.msra.mxu1 %v4256_v34  ;;  %v3992_v37 = vld [vmem:[#allocation4 + $0x3680] sm:$0xff]  ;;  %v3913_v34 = vld [vmem:[#allocation4 + $0x3408] sm:$0xff] }
 0x4a7   : > { %4355 = vmatprep.subr.mxu0 %v3841_v39  ;;  %4452 = vmatprep.subr.mxu1 %v4249_v36  ;;  %v3985_v39 = vld [vmem:[#allocation4 + $0x3648] sm:$0xff] }
 0x4a8   : > { %4356 = vmatpush1.msra.mxu0 %v3840_v40  ;;  %4453 = vmatpush2.msra.mxu1 %v4248_v38  ;;  %v3984_v40 = vld [vmem:[#allocation4 + $0x3640] sm:$0xff] }
 0x4a9   : > { %4357 = vmatprep.subr.mxu0 %v3833_v42  ;;  %4454 = vmatprep.subr.mxu1 %v4241_v41  ;;  %v3977_v42 = vld [vmem:[#allocation4 + $0x3608] sm:$0xff]  ;;  %v4168_v38 = vld [vmem:[#allocation4 + $0x3c00] sm:$0xff] }
 0x4aa   : > { %4358 = vmatpush1.msra.mxu0 %v3832_v46  ;;  %4455 = vmatpush2.msra.mxu1 %v4240_v48  ;;  %v3183_v46 = vpop.f32.mrf.mxu0 }
 0x4ab   : > { %4359 = vmatprep.subr.mxu0 %v3825_v49  ;;  %4456 = vmatprep.subr.mxu1 %v4233_v45  ;;  %v4232_v49 = vld [vmem:[#allocation4 + $0x3e00] sm:$0xff]  ;;  %v3184_v53 = vadd.f32 %v3183_v46, %v3080_v20  ;;  %v3907_v46 = vld [vmem:[#allocation4 + $0x33d8] sm:$0xff] }
 0x4ac   : > { %4360 = vmatpush1.msra.mxu0 %v3824_v52  ;;  %4457 = vmatpush2.msra.mxu1 %v4232_v49  ;;  %v4225_v52 = vld [vmem:[#allocation4 + $0x3dc8] sm:$0xff]  ;;  %v3185_v25 = vpop.f32.mrf.mxu0  ;;  %v4099_v20 = vld [vmem:[#allocation4 + $0x39d8] sm:$0xff] }
 0x4ad   : > { %4361 = vmatprep.subr.mxu0 %v3817_v56  ;;  %4458 = vmatprep.subr.mxu1 %v4225_v52  ;;  %v3968_v56 = vld [vmem:[#allocation4 + $0x35c0] sm:$0xff]  ;;  %v4162_v52 = vld [vmem:[#allocation4 + $0x3bd0] sm:$0xff] }
 0x4ae   : > { %4362 = vmatpush1.msra.mxu0 %v3816_v60  ;;  %v3961_v60 = vld [vmem:[#allocation4 + $0x3588] sm:$0xff]  ;;  %4459 = vmatpush2.msra.mxu1 %v4224_v59  ;;  %v4155_v59 = vld [vmem:[#allocation4 + $0x3b98] sm:$0xff] }
 0x4af   : > { %4363 = vmatprep.subr.mxu0 %v3809_v0  ;;  %v3960_v0 = vld [vmem:[#allocation4 + $0x3580] sm:$0xff]  ;;  %4460 = vmatprep.subr.mxu1 %v4217_v63  ;;  %v4154_v63 = vld [vmem:[#allocation4 + $0x3b90] sm:$0xff] }
 0x4b0   : > { %4364 = vmatpush1.msra.mxu0 %v3808_v23  ;;  %v3254_v23 = vpop.f32.mrf.mxu1  ;;  %4461 = vmatpush2.msra.mxu1 %v4216_v3 }
 0x4b1   : > { %4365 = vmatprep.subr.mxu0 %v3801_v6  ;;  %v3953_v6 = vld [vmem:[#allocation4 + $0x3548] sm:$0xff]  ;;  %4462 = vmatprep.subr.mxu1 %v4209_v43  ;;  %v4131_v43 = vld [vmem:[#allocation4 + $0x3ad8] sm:$0xff] }
 0x4b2   : > { %4366 = vmatpush1.msra.mxu0 %v3800_v51  ;;  %v3952_v51 = vld [vmem:[#allocation4 + $0x3540] sm:$0xff]  ;;  %4463 = vmatpush2.msra.mxu1 %v4208_v7  ;;  %v4123_v7 = vld [vmem:[#allocation4 + $0x3a98] sm:$0xff] }
 0x4b3   : > { %4367 = vmatprep.subr.mxu0 %v3793_v27  ;;  %v3945_v27 = vld [vmem:[#allocation4 + $0x3508] sm:$0xff]  ;;  %4464 = vmatprep.subr.mxu1 %v4201_v9  ;;  %v4115_v9 = vld [vmem:[#allocation4 + $0x3a58] sm:$0xff] }
 0x4b4   : > { %4368 = vmatpush1.msra.mxu0 %v3792_v24 }
 0x4b5   : > { %4369 = vmatprep.subr.mxu0 %v3785_v11  ;;  %v4200_v11 = vld [vmem:[#allocation4 + $0x3d00] sm:$0xff] }
 0x4b6   : > { %4370 = vmatpush1.msra.mxu0 %v3784_v13  ;;  %v3937_v13 = vld [vmem:[#allocation4 + $0x34c8] sm:$0xff]  ;;  %4465 = vmatpush2.msra.mxu1 %v4200_v11  ;;  %v4106_v11 = vld [vmem:[#allocation4 + $0x3a10] sm:$0xff] }
 0x4b7   : > { %4371 = vmatprep.subr.mxu0 %v4033_v22  ;;  %v3256_v22 = vpop.f32.mrf.mxu1  ;;  %4466 = vmatprep.subr.mxu1 %v4193_v15 }
 0x4b8   : > { %4372 = vmatpush2.msra.mxu0 %v4032_v17  ;;  %v3936_v17 = vld [vmem:[#allocation4 + $0x34c0] sm:$0xff]  ;;  %4467 = vmatpush2.msra.mxu1 %v4192_v44 }
 0x4b9   : > { %4373 = vmatprep.subr.mxu0 %v4025_v21  ;;  %v3092_v21 = vrot.slane %v8214_v55, %v8090_v2  ;;  %v3396_v28 = vpop.f32.mrf.mxu1 }
 0x4ba   : > { %4374 = vmatpush2.msra.mxu0 %v4024_v62  ;;  %v4185_v62 = vld [vmem:[#allocation4 + $0x3c88] sm:$0xff] }
 0x4bb   : > { %4375 = vmatprep.subr.mxu0 %v4017_v29  ;;  %4468 = vmatprep.subr.mxu1 %v4185_v62  ;;  %v3398_v36 = vpop.f32.mrf.mxu1 }
 0x4bc   : > { %4376 = vmatpush2.msra.mxu0 %v4016_v31  ;;  %v4184_v31 = vld [vmem:[#allocation4 + $0x3c80] sm:$0xff] }
 0x4bd   : > { %4377 = vmatprep.subr.mxu0 %v4009_v58  ;;  %v3084_v58 = vrot.slane %v8214_v55, %v8095_v12  ;;  %4469 = vmatpush2.msra.mxu1 %v4184_v31 }
 0x4be   : > { %4378 = vmatpush2.msra.mxu0 %v4008_v1  ;;  %v4177_v1 = vld [vmem:[#allocation4 + $0x3c48] sm:$0xff] }
 0x4bf   : > { %4379 = vmatprep.subr.mxu0 %v4001_v33  ;;  %v3920_v33 = vld [vmem:[#allocation4 + $0x3440] sm:$0xff]  ;;  %4470 = vmatprep.subr.mxu1 %v4177_v1  ;;  %v3186_v41 = vadd.f32 %v3185_v25, %v3084_v58  ;;  %v4139_v25 = vld [vmem:[#allocation4 + $0x3b18] sm:$0xff] }
 0x4c0   : > { %4380 = vmatpush2.msra.mxu0 %v4000_v57  ;;  %4471 = vmatpush2.msra.mxu1 %v4176_v19  ;;  %v4075_v58 = vld [vmem:[#allocation4 + $0x3918] sm:$0xff] }
 0x4c1   : > { %4381 = vmatprep.subr.mxu0 %v3993_v35  ;;  %v4169_v35 = vld [vmem:[#allocation4 + $0x3c08] sm:$0xff]  ;;  %v4067_v19 = vld [vmem:[#allocation4 + $0x38d8] sm:$0xff] }
 0x4c2   : > { %4382 = vmatpush2.msra.mxu0 %v3992_v37  ;;  %v3912_v37 = vld [vmem:[#allocation4 + $0x3400] sm:$0xff]  ;;  %4472 = vmatprep.subr.mxu1 %v4169_v35 }
 0x4c3   : > { %4383 = vmatprep.subr.mxu0 %v3985_v39  ;;  %v3255_v39 = vadd.f32 %v3254_v23, %v3184_v53  ;;  %4473 = vmatpush2.msra.mxu1 %v4168_v38  ;;  %v4146_v23 = vld [vmem:[#allocation4 + $0x3b50] sm:$0xff]  ;;  %v3100_v53 = vrot.slane %v8214_v55, %v8119_v18 }
 0x4c4   : > { %4384 = vmatpush2.msra.mxu0 %v3984_v40  ;;  %v8224_v40 = vld.sshfl [vmem:[#allocation2 + $0xc] sm:$0x33 pattern:$0x76325410] }
 0x4c5   : > { %4385 = vmatprep.subr.mxu0 %v3977_v42  ;;  %v8228_v42 = vcombine.high %v8224_v40, %v8224_v40  ;;  %v7585_v49 = vmul.f32 -1.442695, %v3255_v39  ;;  %v4059_v39 = vld [vmem:[#allocation4 + $0x3898] sm:$0xff] }
 0x4c6   : > { %4386 = vmatpush2.msra.mxu0 %v3976_v47  ;;  %v4163_v47 = vld [vmem:[#allocation4 + $0x3bd8] sm:$0xff] }
 0x4c7   : > { %4387 = vmatprep.subr.mxu0 %v3969_v50  ;;  %4474 = vmatprep.mubr.f32.mxu1 %v8228_v42  ;;  %v3257_v50 = vadd.f32 %v3256_v22, %v3186_v41  ;;  %7742 = vpow2.f32 %v7585_v49  ;;  %v4091_v22 = vld [vmem:[#allocation4 + $0x3998] sm:$0xff]  ;;  %v4058_v41 = vld [vmem:[#allocation4 + $0x3890] sm:$0xff] }
 0x4c8   : > { %4388 = vmatpush2.msra.mxu0 %v3968_v56  ;;  %4552 = vmatprep.subr.mxu1 %v4163_v47  ;;  %v4043_v47 = vld [vmem:[#allocation4 + $0x3818] sm:$0xff]  ;;  %v4042_v49 = vld [vmem:[#allocation4 + $0x3810] sm:$0xff] }
 0x4c9   : > { %4389 = vmatprep.subr.mxu0 %v3961_v60  ;;  %4475 = vmatmul.mubr.f32.vlgmr.msra.gmra.mxu1 %v8224_v40  ;;  %v7586_v3 = vmul.f32 -1.442695, %v3257_v50  ;;  %v4291_v50 = vld [vmem:[#allocation4 + $0x3fd8] sm:$0xff] }
 0x4ca   : > { %4390 = vmatpush2.msra.mxu0 %v3960_v0  ;;  %4553 = vmatpush1.msra.mxu1 %v4162_v52  ;;  %v4147_v0 = vld [vmem:[#allocation4 + $0x3b58] sm:$0xff]  ;;  %v4290_v52 = vld [vmem:[#allocation4 + $0x3fd0] sm:$0xff] }
 0x4cb   : > { %4391 = vmatprep.subr.mxu0 %v3953_v6  ;;  %4616 = vmatprep.mubr.f32.mxu1 %v8228_v42  ;;  %v4138_v6 = vld [vmem:[#allocation4 + $0x3b10] sm:$0xff] }
 0x4cc   : > { %4392 = vmatpush2.msra.mxu0 %v3952_v51  ;;  %4554 = vmatprep.subr.mxu1 %v4155_v59  ;;  %v4130_v51 = vld [vmem:[#allocation4 + $0x3ad0] sm:$0xff] }
 0x4cd   : > { %4393 = vmatprep.subr.mxu0 %v3945_v27  ;;  %4555 = vmatpush1.msra.mxu1 %v4154_v63  ;;  %v4122_v27 = vld [vmem:[#allocation4 + $0x3a90] sm:$0xff] }
 0x4ce   : > { %4394 = vmatpush2.msra.mxu0 %v3944_v10  ;;  %4556 = vmatprep.subr.mxu1 %v4147_v0  ;;  %v4107_v10 = vld [vmem:[#allocation4 + $0x3a18] sm:$0xff]  ;;  %v4282_v59 = vld [vmem:[#allocation4 + $0x3f90] sm:$0xff] }
 0x4cf   : > { %4395 = vmatprep.subr.mxu0 %v3937_v13  ;;  %4557 = vmatpush1.msra.mxu1 %v4146_v23  ;;  %v4098_v13 = vld [vmem:[#allocation4 + $0x39d0] sm:$0xff]  ;;  %v4267_v23 = vld [vmem:[#allocation4 + $0x3f18] sm:$0xff] }
 0x4d0   : > { %4396 = vmatpush2.msra.mxu0 %v3936_v17  ;;  %4558 = vmatprep.subr.mxu1 %v4139_v25  ;;  %v4090_v17 = vld [vmem:[#allocation4 + $0x3990] sm:$0xff] }
 0x4d1   : > { %4397 = vmatprep.subr.mxu0 %v3929_v26  ;;  %4559 = vmatpush1.msra.mxu1 %v4138_v6  ;;  %v4083_v26 = vld [vmem:[#allocation4 + $0x3958] sm:$0xff]  ;;  %v7591_v63 = vld.sshfl [vmem:[#allocation3 + $0x8] sm:$0x33 pattern:$0x76325410] }
 0x4d2   : > { %4398 = vmatpush2.msra.mxu0 %v3928_v30  ;;  %4560 = vmatprep.subr.mxu1 %v4131_v43  ;;  %v4274_v0 = vld [vmem:[#allocation4 + $0x3f50] sm:$0xff] }
 0x4d3   : > { %4399 = vmatprep.subr.mxu0 %v3921_v32  ;;  %4561 = vmatpush1.msra.mxu1 %v4130_v51  ;;  %v4266_v6 = vld [vmem:[#allocation4 + $0x3f10] sm:$0xff]  ;;  %v3731_v51 = vcombine.high %v7591_v63, %v7591_v63 }
 0x4d4   : > { %4400 = vmatpush2.msra.mxu0 %v3920_v33  ;;  %4562 = vmatprep.subr.mxu1 %v4123_v7  ;;  %v7743_v15 = vpop.eup %7742  ;;  %v4259_v7 = vld [vmem:[#allocation4 + $0x3ed8] sm:$0xff] }
 0x4d5   : > { %4401 = vmatprep.subr.mxu0 %v3913_v34  ;;  %4563 = vmatpush1.msra.mxu1 %v4122_v27  ;;  %v3691_v62 = vadd.f32 1.0, %v7743_v15 }
 0x4d6   : > { %4402 = vmatpush2.msra.mxu0 %v3912_v37  ;;  %4564 = vmatprep.subr.mxu1 %v4115_v9  ;;  %v4258_v9 = vld [vmem:[#allocation4 + $0x3ed0] sm:$0xff] }
 0x4d7   : > { %v3325_v24 = vpop.f32.mrf.mxu0  ;;  %4481 = vmatprep.subr.mxu0 %v3907_v46  ;;  %v4050_v46 = vld [vmem:[#allocation4 + $0x3850] sm:$0xff] }
 0x4d8   : > { %v3326_v4 = vadd.f32 %v3325_v24, %v3088_v16  ;;  %v4114_v24 = vld [vmem:[#allocation4 + $0x3a50] sm:$0xff] }
 0x4d9   : > { %v3327_v29 = vpop.f32.mrf.mxu0  ;;  %4565 = vmatpush1.msra.mxu1 %v4114_v24 }
 0x4da   : > { %v3328_v57 = vadd.f32 %v3327_v29, %v3092_v21  ;;  %v3397_v48 = vadd.f32 %v3396_v28, %v3326_v4  ;;  %4566 = vmatprep.subr.mxu1 %v4107_v10  ;;  %v3096_v21 = vrot.slane %v8214_v55, %v8116_v14  ;;  %v3538_v28 = vpop.f32.mrf.mxu1  ;;  %v4082_v29 = vld [vmem:[#allocation4 + $0x3950] sm:$0xff] }
 0x4db   : > { %4567 = vmatpush1.msra.mxu1 %v4106_v11  ;;  %v4074_v4 = vld [vmem:[#allocation4 + $0x3910] sm:$0xff]  ;;  %v4251_v11 = vld [vmem:[#allocation4 + $0x3e98] sm:$0xff] }
 0x4dc   : > { %v3399_v45 = vadd.f32 %v3398_v36, %v3328_v57  ;;  %v7587_v56 = vmul.f32 -1.442695, %v3397_v48  ;;  %4568 = vmatprep.subr.mxu1 %v4099_v20  ;;  %v3540_v35 = vpop.f32.mrf.mxu1  ;;  %v4066_v36 = vld [vmem:[#allocation4 + $0x38d0] sm:$0xff] }
 0x4dd   : > { %4569 = vmatpush1.msra.mxu1 %v4098_v13  ;;  %v4250_v13 = vld [vmem:[#allocation4 + $0x3e90] sm:$0xff] }
 0x4de   : > { %v7588_v60 = vmul.f32 -1.442695, %v3399_v45  ;;  %7744 = vpow2.f32 %v7587_v56  ;;  %4570 = vmatprep.subr.mxu1 %v4091_v22  ;;  %v4051_v45 = vld [vmem:[#allocation4 + $0x3858] sm:$0xff] }
 0x4df   : > { %4571 = vmatpush1.msra.mxu1 %v4090_v17  ;;  %v4283_v56 = vld [vmem:[#allocation4 + $0x3f98] sm:$0xff] }
 0x4e0   : > { %7746 = vpow2.f32 %v7588_v60  ;;  %4572 = vmatprep.subr.mxu1 %v4083_v26  ;;  %v4275_v60 = vld [vmem:[#allocation4 + $0x3f58] sm:$0xff] }
 0x4e1   : > { %7748 = vpow2.f32 %v7586_v3  ;;  %4573 = vmatpush1.msra.mxu1 %v4082_v29  ;;  %v4243_v17 = vld [vmem:[#allocation4 + $0x3e58] sm:$0xff] }
 0x4e2   : > { %4574 = vmatprep.subr.mxu1 %v4075_v58  ;;  %7750 = vrcp.f32 %v3691_v62  ;;  %v4235_v62 = vld [vmem:[#allocation4 + $0x3e18] sm:$0xff]  ;;  %v4218_v58 = vld [vmem:[#allocation4 + $0x3d90] sm:$0xff] }
 0x4e3   : > { %4575 = vmatpush1.msra.mxu1 %v4074_v4  ;;  %v4203_v4 = vld [vmem:[#allocation4 + $0x3d18] sm:$0xff] }
 0x4e4   : > { %4576 = vmatprep.subr.mxu1 %v4067_v19  ;;  %v4195_v19 = vld [vmem:[#allocation4 + $0x3cd8] sm:$0xff] }
 0x4e5   : > { %4577 = vmatpush1.msra.mxu1 %v4066_v36  ;;  %v4179_v36 = vld [vmem:[#allocation4 + $0x3c58] sm:$0xff] }
 0x4e6   : > { %4578 = vmatprep.subr.mxu1 %v4059_v39  ;;  %v4170_v39 = vld [vmem:[#allocation4 + $0x3c10] sm:$0xff] }
 0x4e7   : > { %4579 = vmatpush1.msra.mxu1 %v4058_v41  ;;  %v4165_v41 = vld [vmem:[#allocation4 + $0x3be8] sm:$0xff] }
 0x4e8   : > { %4580 = vmatprep.subr.mxu1 %v4051_v45  ;;  %v4157_v45 = vld [vmem:[#allocation4 + $0x3ba8] sm:$0xff] }
 0x4e9   : > { %4581 = vmatpush1.msra.mxu1 %v4050_v46  ;;  %v4156_v46 = vld [vmem:[#allocation4 + $0x3ba0] sm:$0xff] }
 0x4ea   : > { %4582 = vmatprep.subr.mxu1 %v4043_v47  ;;  %v4149_v47 = vld [vmem:[#allocation4 + $0x3b68] sm:$0xff] }
 0x4eb   : > { %v7745_v16 = vpop.eup %7744  ;;  %4583 = vmatpush1.msra.mxu1 %v4042_v49  ;;  %v4148_v49 = vld [vmem:[#allocation4 + $0x3b60] sm:$0xff] }
 0x4ec   : > { %v3703_v31 = vadd.f32 1.0, %v7745_v16  ;;  %4584 = vmatprep.subr.mxu1 %v4291_v50  ;;  %v4141_v50 = vld [vmem:[#allocation4 + $0x3b28] sm:$0xff] }
 0x4ed   : > { %v7747_v44 = vpop.eup %7746  ;;  %4585 = vmatpush2.msra.mxu1 %v4290_v52  ;;  %v4140_v52 = vld [vmem:[#allocation4 + $0x3b20] sm:$0xff] }
 0x4ee   : > { %v7749_v30 = vpop.eup %7748  ;;  %v3704_v32 = vadd.f32 1.0, %v7747_v44  ;;  %7752 = vrcp.f32 %v3703_v31  ;;  %4586 = vmatprep.subr.mxu1 %v4283_v56  ;;  %v4242_v44 = vld [vmem:[#allocation4 + $0x3e50] sm:$0xff]  ;;  %v4133_v56 = vld [vmem:[#allocation4 + $0x3ae8] sm:$0xff] }
 0x4ef   : > { %v3692_v57 = vadd.f32 1.0, %v7749_v30  ;;  %4587 = vmatpush2.msra.mxu1 %v4282_v59  ;;  %v7751_v3 = vpop.eup %7750  ;;  %v4227_v30 = vld [vmem:[#allocation4 + $0x3dd8] sm:$0xff]  ;;  %v4226_v31 = vld [vmem:[#allocation4 + $0x3dd0] sm:$0xff]  ;;  %v4132_v59 = vld [vmem:[#allocation4 + $0x3ae0] sm:$0xff] }
 0x4f0   : > { %7754 = vrcp.f32 %v3704_v32  ;;  %4588 = vmatprep.subr.mxu1 %v4275_v60  ;;  %v4211_v32 = vld [vmem:[#allocation4 + $0x3d58] sm:$0xff]  ;;  %v4125_v60 = vld [vmem:[#allocation4 + $0x3aa8] sm:$0xff] }
 0x4f1   : > { %4589 = vmatpush2.msra.mxu1 %v4274_v0  ;;  %v4117_v0 = vld [vmem:[#allocation4 + $0x3a68] sm:$0xff] }
 0x4f2   : > { %4590 = vmatprep.subr.mxu1 %v4267_v23  ;;  %v4109_v23 = vld [vmem:[#allocation4 + $0x3a28] sm:$0xff] }
 0x4f3   : > { %4591 = vmatpush2.msra.mxu1 %v4266_v6  ;;  %v4101_v6 = vld [vmem:[#allocation4 + $0x39e8] sm:$0xff] }
 0x4f4   : > { %4592 = vmatprep.subr.mxu1 %v4259_v7  ;;  %v4092_v7 = vld [vmem:[#allocation4 + $0x39a0] sm:$0xff] }
 0x4f5   : > { %4593 = vmatpush2.msra.mxu1 %v4258_v9  ;;  %v4085_v9 = vld [vmem:[#allocation4 + $0x3968] sm:$0xff] }
 0x4f6   : > { %4594 = vmatprep.subr.mxu1 %v4251_v11  ;;  %v4077_v11 = vld [vmem:[#allocation4 + $0x3928] sm:$0xff] }
 0x4f7   : > { %4595 = vmatpush2.msra.mxu1 %v4250_v13  ;;  %v3680_v13 = vpop.f32.mrf.mxu1 }
 0x4f8   : > { %4596 = vmatprep.subr.mxu1 %v4243_v17 }
 0x4f9   : > { %4597 = vmatpush2.msra.mxu1 %v4242_v44  ;;  %v4068_v44 = vld [vmem:[#allocation4 + $0x38e0] sm:$0xff] }
 0x4fa   : > { %4598 = vmatprep.subr.mxu1 %v4235_v62 }
 0x4fb   : > { %v7753_v25 = vpop.eup %7752 }
 0x4fc   : > { %v3734_v15 = vmul.f32 %v7753_v25, %v7591_v63  ;;  %v4124_v63 = vld [vmem:[#allocation4 + $0x3aa0] sm:$0xff] }
 0x4fd   : > { %v7755_v43 = vpop.eup %7754  ;;  %v4108_v25 = vld [vmem:[#allocation4 + $0x3a20] sm:$0xff] }
 0x4fe   : > { %v3735_v22 = vmul.f32 %v7755_v43, %v3731_v51  ;;  %v4100_v43 = vld [vmem:[#allocation4 + $0x39e0] sm:$0xff]  ;;  %v4093_v51 = vld [vmem:[#allocation4 + $0x39a8] sm:$0xff] }
 0x517   : > { %v3467_v1 = vpop.f32.mrf.mxu0 }
 0x518   : > { %v3468_v33 = vadd.f32 %v3467_v1, %v3096_v21  ;;  %v4210_v1 = vld [vmem:[#allocation4 + $0x3d50] sm:$0xff] }
 0x519   : > { %v3469_v34 = vpop.f32.mrf.mxu0 }
 0x51a   : > { %v3539_v37 = vadd.f32 %v3538_v28, %v3468_v33  ;;  %v3470_v38 = vadd.f32 %v3469_v34, %v3100_v53  ;;  %v4234_v28 = vld [vmem:[#allocation4 + $0x3e10] sm:$0xff]  ;;  %v4219_v53 = vld [vmem:[#allocation4 + $0x3d98] sm:$0xff] }
 0x51b   : > { %4599 = vmatpush2.msra.mxu1 %v4234_v28  ;;  %v4202_v33 = vld [vmem:[#allocation4 + $0x3d10] sm:$0xff]  ;;  %v4187_v34 = vld [vmem:[#allocation4 + $0x3c98] sm:$0xff] }
 0x51c   : > { %7756 = vtanh.f32 %v3539_v37  ;;  %v3541_v48 = vadd.f32 %v3540_v35, %v3470_v38  ;;  %4600 = vmatprep.subr.mxu1 %v4227_v30  ;;  %v4186_v35 = vld [vmem:[#allocation4 + $0x3c90] sm:$0xff]  ;;  %v4171_v38 = vld [vmem:[#allocation4 + $0x3c18] sm:$0xff]  ;;  %v3682_v30 = vpop.f32.mrf.mxu1 }
 0x51d   : > { %7758 = vrcp.f32 %v3692_v57  ;;  %4601 = vmatpush2.msra.mxu1 %v4226_v31  ;;  %v4194_v57 = vld [vmem:[#allocation4 + $0x3cd0] sm:$0xff]  ;;  %v4060_v31 = vld [vmem:[#allocation4 + $0x38a0] sm:$0xff] }
 0x51e   : > { %7760 = vtanh.f32 %v3541_v48  ;;  %4602 = vmatprep.subr.mxu1 %v4219_v53  ;;  %v4178_v37 = vld [vmem:[#allocation4 + $0x3c50] sm:$0xff]  ;;  %v4164_v48 = vld [vmem:[#allocation4 + $0x3be0] sm:$0xff] }
 0x51f   : > { %4603 = vmatpush2.msra.mxu1 %v4218_v58  ;;  %v4053_v58 = vld [vmem:[#allocation4 + $0x3868] sm:$0xff] }
 0x520   : > { %4604 = vmatprep.subr.mxu1 %v4211_v32  ;;  %v4052_v32 = vld [vmem:[#allocation4 + $0x3860] sm:$0xff] }
 0x521   : > { %4605 = vmatpush2.msra.mxu1 %v4210_v1 }
 0x522   : > { %4606 = vmatprep.subr.mxu1 %v4203_v4  ;;  %v4045_v4 = vld [vmem:[#allocation4 + $0x3828] sm:$0xff] }
 0x523   : > { %4607 = vmatpush2.msra.mxu1 %v4202_v33  ;;  %v4044_v33 = vld [vmem:[#allocation4 + $0x3820] sm:$0xff] }
 0x524   : > { %4608 = vmatprep.subr.mxu1 %v4195_v19  ;;  %v4293_v19 = vld [vmem:[#allocation4 + $0x3fe8] sm:$0xff] }
 0x525   : > { %4609 = vmatpush2.msra.mxu1 %v4194_v57  ;;  %v4292_v57 = vld [vmem:[#allocation4 + $0x3fe0] sm:$0xff] }
 0x526   : > { %4610 = vmatprep.subr.mxu1 %v4187_v34  ;;  %v4285_v34 = vld [vmem:[#allocation4 + $0x3fa8] sm:$0xff] }
 0x527   : > { %4611 = vmatpush2.msra.mxu1 %v4186_v35  ;;  %v4284_v35 = vld [vmem:[#allocation4 + $0x3fa0] sm:$0xff] }
 0x528   : > { %4612 = vmatprep.subr.mxu1 %v4179_v36  ;;  %v4277_v36 = vld [vmem:[#allocation4 + $0x3f68] sm:$0xff] }
 0x529   : > { %v7757_v27 = vpop.eup %7756  ;;  %4613 = vmatpush2.msra.mxu1 %v4178_v37  ;;  %v4276_v37 = vld [vmem:[#allocation4 + $0x3f60] sm:$0xff] }
 0x52a   : > { %v7759_v24 = vpop.eup %7758  ;;  %v3736_v10 = vmul.f32 %v7757_v27, %v7751_v3  ;;  %4614 = vmatprep.subr.mxu1 %v4171_v38  ;;  %v4116_v3 = vld [vmem:[#allocation4 + $0x3a60] sm:$0xff]  ;;  %v3104_v27 = vrot.slane %v8214_v55, %v8134_v5  ;;  %v4269_v38 = vld [vmem:[#allocation4 + $0x3f28] sm:$0xff] }
 0x52b   : > { %v7761_v20 = vpop.eup %7760  ;;  %4615 = vmatpush2.msra.mxu1 %v4170_v39  ;;  %v4268_v39 = vld [vmem:[#allocation4 + $0x3f20] sm:$0xff] }
 0x52c   : > { %v3737_v16 = vmul.f32 %v7761_v20, %v7759_v24  ;;  %v8237_v21 = vadd.f32 %v3736_v10, %v3734_v15  ;;  %4694 = vmatprep.subr.mxu1 %v4165_v41  ;;  %4617 = vmatmul.mubr.f32.vlgmr.msra.gmra.mxu1 %v8224_v40  ;;  %v4084_v24 = vld [vmem:[#allocation4 + $0x3960] sm:$0xff]  ;;  %v3108_v10 = vrot.slane %v8214_v55, %v8137_v8  ;;  %v4261_v41 = vld [vmem:[#allocation4 + $0x3ee8] sm:$0xff] }
 0x52d   : > { %4695 = vmatpush1.msra.mxu1 %v4164_v48  ;;  %4758 = vmatprep.mubr.f32.mxu1 %v8228_v42  ;;  %v4076_v15 = vld [vmem:[#allocation4 + $0x3920] sm:$0xff] }
 0x52e   : > { %v8239_v26 = vadd.f32 %v3737_v16, %v3735_v22  ;;  %4696 = vmatprep.subr.mxu1 %v4157_v45  ;;  %v4069_v16 = vld [vmem:[#allocation4 + $0x38e8] sm:$0xff]  ;;  %v4260_v48 = vld [vmem:[#allocation4 + $0x3ee0] sm:$0xff] }
 0x52f   : > { %4697 = vmatpush1.msra.mxu1 %v4156_v46  ;;  %v4253_v45 = vld [vmem:[#allocation4 + $0x3ea8] sm:$0xff] }
 0x530   : > { %v3746_v29 = vcombine.low %v8237_v21, %v8239_v26  ;;  %4698 = vmatprep.subr.mxu1 %v4149_v47  ;;  %v4252_v47 = vld [vmem:[#allocation4 + $0x3ea0] sm:$0xff] }
 0x531   : > { %4699 = vmatpush1.msra.mxu1 %v4148_v49 }
 0x532   : > { %7592 = vst.sshfl [vmem:[#allocation3 + $0x8] sm:$0x33 pattern:$0x76325410] %v3746_v29  ;;  %4700 = vmatprep.subr.mxu1 %v4141_v50  ;;  %v4061_v29 = vld [vmem:[#allocation4 + $0x38a8] sm:$0xff] }
 0x533   : > { %4701 = vmatpush1.msra.mxu1 %v4140_v52  ;;  %v4245_v50 = vld [vmem:[#allocation4 + $0x3e68] sm:$0xff] }
 0x534   : > { %4702 = vmatprep.subr.mxu1 %v4133_v56  ;;  %v4244_v56 = vld [vmem:[#allocation4 + $0x3e60] sm:$0xff] }
 0x535   : > { %4703 = vmatpush1.msra.mxu1 %v4132_v59 }
 0x536   : > { %4704 = vmatprep.subr.mxu1 %v4125_v60  ;;  %v4237_v60 = vld [vmem:[#allocation4 + $0x3e28] sm:$0xff] }
 0x537   : > { %4705 = vmatpush1.msra.mxu1 %v4124_v63  ;;  %v4236_v63 = vld [vmem:[#allocation4 + $0x3e20] sm:$0xff] }
 0x538   : > { %4706 = vmatprep.subr.mxu1 %v4117_v0  ;;  %v4229_v0 = vld [vmem:[#allocation4 + $0x3de8] sm:$0xff] }
 0x539   : > { %4707 = vmatpush1.msra.mxu1 %v4116_v3  ;;  %v4228_v3 = vld [vmem:[#allocation4 + $0x3de0] sm:$0xff] }
 0x53a   : > { %4708 = vmatprep.subr.mxu1 %v4109_v23  ;;  %v4221_v23 = vld [vmem:[#allocation4 + $0x3da8] sm:$0xff] }
 0x53b   : > { %4709 = vmatpush1.msra.mxu1 %v4108_v25  ;;  %v4220_v25 = vld [vmem:[#allocation4 + $0x3da0] sm:$0xff] }
 0x53c   : > { %4710 = vmatprep.subr.mxu1 %v4101_v6  ;;  %v4212_v6 = vld [vmem:[#allocation4 + $0x3d60] sm:$0xff] }
 0x53d   : > { %4711 = vmatpush1.msra.mxu1 %v4100_v43  ;;  %v4205_v43 = vld [vmem:[#allocation4 + $0x3d28] sm:$0xff] }
 0x53e   : > { %4712 = vmatprep.subr.mxu1 %v4093_v51  ;;  %v4204_v51 = vld [vmem:[#allocation4 + $0x3d20] sm:$0xff] }
 0x53f   : > { %4713 = vmatpush1.msra.mxu1 %v4092_v7  ;;  %v4196_v7 = vld [vmem:[#allocation4 + $0x3ce0] sm:$0xff] }
 0x540   : > { %4714 = vmatprep.subr.mxu1 %v4085_v9  ;;  %v4189_v9 = vld [vmem:[#allocation4 + $0x3ca8] sm:$0xff] }
 0x541   : > { %4715 = vmatpush1.msra.mxu1 %v4084_v24 }
 0x542   : > { %4716 = vmatprep.subr.mxu1 %v4077_v11 }
 0x543   : > { %4717 = vmatpush1.msra.mxu1 %v4076_v15  ;;  %v4180_v15 = vld [vmem:[#allocation4 + $0x3c60] sm:$0xff] }
 0x544   : > { %4718 = vmatprep.subr.mxu1 %v4069_v16 }
 0x545   : > { %4719 = vmatpush1.msra.mxu1 %v4068_v44  ;;  %v3906_v44 = vld [vmem:[#allocation4 + $0x33d0] sm:$0xff] }
 0x546   : > { %4720 = vmatprep.subr.mxu1 %v4061_v29  ;;  %v3899_v29 = vld [vmem:[#allocation4 + $0x3398] sm:$0xff] }
 0x547   : > { %4721 = vmatpush1.msra.mxu1 %v4060_v31  ;;  %v3898_v31 = vld [vmem:[#allocation4 + $0x3390] sm:$0xff] }
 0x548   : > { %4722 = vmatprep.subr.mxu1 %v4053_v58  ;;  %v4159_v58 = vld [vmem:[#allocation4 + $0x3bb8] sm:$0xff] }
 0x549   : > { %4723 = vmatpush1.msra.mxu1 %v4052_v32  ;;  %v3890_v32 = vld [vmem:[#allocation4 + $0x3350] sm:$0xff] }
 0x54a   : > { %4724 = vmatprep.subr.mxu1 %v4045_v4  ;;  %v3883_v4 = vld [vmem:[#allocation4 + $0x3318] sm:$0xff] }
 0x54b   : > { %4725 = vmatpush1.msra.mxu1 %v4044_v33  ;;  %v4151_v33 = vld [vmem:[#allocation4 + $0x3b78] sm:$0xff] }
 0x54c   : > { %4726 = vmatprep.subr.mxu1 %v4293_v19  ;;  %v3882_v19 = vld [vmem:[#allocation4 + $0x3310] sm:$0xff] }
 0x54d   : > { %4727 = vmatpush2.msra.mxu1 %v4292_v57  ;;  %v4150_v57 = vld [vmem:[#allocation4 + $0x3b70] sm:$0xff] }
 0x54e   : > { %4728 = vmatprep.subr.mxu1 %v4285_v34  ;;  %v3875_v34 = vld [vmem:[#allocation4 + $0x32d8] sm:$0xff] }
 0x54f   : > { %4729 = vmatpush2.msra.mxu1 %v4284_v35  ;;  %v4143_v35 = vld [vmem:[#allocation4 + $0x3b38] sm:$0xff] }
 0x550   : > { %4730 = vmatprep.subr.mxu1 %v4277_v36  ;;  %v3874_v36 = vld [vmem:[#allocation4 + $0x32d0] sm:$0xff] }
 0x551   : > { %4731 = vmatpush2.msra.mxu1 %v4276_v37  ;;  %v4142_v37 = vld [vmem:[#allocation4 + $0x3b30] sm:$0xff] }
 0x552   : > { %4732 = vmatprep.subr.mxu1 %v4269_v38  ;;  %v3867_v38 = vld [vmem:[#allocation4 + $0x3298] sm:$0xff] }
 0x553   : > { %4733 = vmatpush2.msra.mxu1 %v4268_v39  ;;  %v3866_v39 = vld [vmem:[#allocation4 + $0x3290] sm:$0xff] }
 0x554   : > { %4734 = vmatprep.subr.mxu1 %v4261_v41  ;;  %v4134_v41 = vld [vmem:[#allocation4 + $0x3af0] sm:$0xff] }
 0x555   : > { %4735 = vmatpush2.msra.mxu1 %v4260_v48  ;;  %v3859_v48 = vld [vmem:[#allocation4 + $0x3258] sm:$0xff] }
 0x556   : > { %4736 = vmatprep.subr.mxu1 %v4253_v45  ;;  %v4127_v45 = vld [vmem:[#allocation4 + $0x3ab8] sm:$0xff] }
 0x557   : > { %v3609_v20 = vpop.f32.mrf.mxu0  ;;  %4737 = vmatpush2.msra.mxu1 %v4252_v47  ;;  %v4126_v47 = vld [vmem:[#allocation4 + $0x3ab0] sm:$0xff] }
 0x558   : > { %v3610_v22 = vadd.f32 %v3609_v20, %v3104_v27  ;;  %4738 = vmatprep.subr.mxu1 %v4245_v50  ;;  %v4181_v20 = vld [vmem:[#allocation4 + $0x3c68] sm:$0xff]  ;;  %v4119_v50 = vld [vmem:[#allocation4 + $0x3a78] sm:$0xff] }
 0x559   : > { %v3611_v17 = vpop.f32.mrf.mxu0  ;;  %4739 = vmatpush2.msra.mxu1 %v4244_v56  ;;  %v4118_v56 = vld [vmem:[#allocation4 + $0x3a70] sm:$0xff] }
 0x55a   : > { %v3681_v62 = vadd.f32 %v3680_v13, %v3610_v22  ;;  %v3612_v28 = vadd.f32 %v3611_v17, %v3108_v10  ;;  %4740 = vmatprep.subr.mxu1 %v4237_v60  ;;  %v4188_v10 = vld [vmem:[#allocation4 + $0x3ca0] sm:$0xff]  ;;  %v4173_v17 = vld [vmem:[#allocation4 + $0x3c28] sm:$0xff]  ;;  %v4111_v60 = vld [vmem:[#allocation4 + $0x3a38] sm:$0xff] }
 0x55b   : > { %4741 = vmatpush2.msra.mxu1 %v4236_v63  ;;  %v3842_v63 = vld [vmem:[#allocation4 + $0x31d0] sm:$0xff] }
 0x55c   : > { %v7589_v55 = vmul.f32 -1.442695, %v3681_v62  ;;  %v3683_v53 = vadd.f32 %v3682_v30, %v3612_v28  ;;  %4742 = vmatprep.subr.mxu1 %v4229_v0  ;;  %v4172_v62 = vld [vmem:[#allocation4 + $0x3c20] sm:$0xff]  ;;  %v4167_v30 = vld [vmem:[#allocation4 + $0x3bf8] sm:$0xff]  ;;  %v4110_v0 = vld [vmem:[#allocation4 + $0x3a30] sm:$0xff] }
 0x55d   : > { %4743 = vmatpush2.msra.mxu1 %v4228_v3  ;;  %v3835_v3 = vld [vmem:[#allocation4 + $0x3198] sm:$0xff] }
 0x55e   : > { %7762 = vpow2.f32 %v7589_v55  ;;  %v7590_v1 = vmul.f32 -1.442695, %v3683_v53  ;;  %4744 = vmatprep.subr.mxu1 %v4221_v23  ;;  %v4166_v55 = vld [vmem:[#allocation4 + $0x3bf0] sm:$0xff]  ;;  %v3891_v53 = vld [vmem:[#allocation4 + $0x3358] sm:$0xff] }
 0x55f   : > { %4745 = vmatpush2.msra.mxu1 %v4220_v25  ;;  %v4103_v23 = vld [vmem:[#allocation4 + $0x39f8] sm:$0xff]  ;;  %v3834_v25 = vld [vmem:[#allocation4 + $0x3190] sm:$0xff] }
 0x560   : > { %7764 = vpow2.f32 %v7590_v1  ;;  %v4158_v1 = vld [vmem:[#allocation4 + $0x3bb0] sm:$0xff] }
 0x561   : > { %7766 = vtanh.f32 %v8237_v21  ;;  %v4213_v21 = vld [vmem:[#allocation4 + $0x3d68] sm:$0xff] }
 0x562   : > { %4746 = vmatprep.subr.mxu1 %v4213_v21  ;;  %v4102_v21 = vld [vmem:[#allocation4 + $0x39f0] sm:$0xff] }
 0x563   : > { %4747 = vmatpush2.msra.mxu1 %v4212_v6  ;;  %v3827_v6 = vld [vmem:[#allocation4 + $0x3158] sm:$0xff] }
 0x564   : > { %4748 = vmatprep.subr.mxu1 %v4205_v43  ;;  %v4095_v43 = vld [vmem:[#allocation4 + $0x39b8] sm:$0xff] }
 0x565   : > { %4749 = vmatpush2.msra.mxu1 %v4204_v51  ;;  %v3826_v51 = vld [vmem:[#allocation4 + $0x3150] sm:$0xff] }
 0x56b   : > { %v7763_v46 = vpop.eup %7762 }
 0x56c   : > { %v3717_v49 = vadd.f32 1.0, %v7763_v46  ;;  %v3858_v46 = vld [vmem:[#allocation4 + $0x3250] sm:$0xff] }
 0x56d   : > { %v7765_v52 = vpop.eup %7764 }
 0x56e   : > { %7768 = vrcp.f32 %v3717_v49  ;;  %v3718_v59 = vadd.f32 1.0, %v7765_v52  ;;  %v7767_v27 = vpop.eup %7766  ;;  %v3851_v49 = vld [vmem:[#allocation4 + $0x3218] sm:$0xff]  ;;  %v3850_v52 = vld [vmem:[#allocation4 + $0x3210] sm:$0xff] }
 0x56f   : > { %7770 = vtanh.f32 %v8239_v26  ;;  %v4197_v26 = vld [vmem:[#allocation4 + $0x3ce8] sm:$0xff] }
 0x570   : > { %7772 = vrcp.f32 %v3718_v59  ;;  %4750 = vmatprep.subr.mxu1 %v4197_v26  ;;  %v3843_v59 = vld [vmem:[#allocation4 + $0x31d8] sm:$0xff]  ;;  %v4094_v26 = vld [vmem:[#allocation4 + $0x39b0] sm:$0xff] }
 0x571   : > { %4751 = vmatpush2.msra.mxu1 %v4196_v7  ;;  %v3819_v7 = vld [vmem:[#allocation4 + $0x3118] sm:$0xff] }
 0x572   : > { %4752 = vmatprep.subr.mxu1 %v4189_v9  ;;  %v3818_v9 = vld [vmem:[#allocation4 + $0x3110] sm:$0xff] }
 0x573   : > { %4753 = vmatpush2.msra.mxu1 %v4188_v10  ;;  %v3811_v10 = vld [vmem:[#allocation4 + $0x30d8] sm:$0xff] }
 0x574   : > { %4754 = vmatprep.subr.mxu1 %v4181_v20  ;;  %v3810_v20 = vld [vmem:[#allocation4 + $0x30d0] sm:$0xff] }
 0x575   : > { %4755 = vmatpush2.msra.mxu1 %v4180_v15  ;;  %v3803_v15 = vld [vmem:[#allocation4 + $0x3098] sm:$0xff] }
 0x576   : > { %4756 = vmatprep.subr.mxu1 %v4173_v17  ;;  %v4071_v17 = vld [vmem:[#allocation4 + $0x38f8] sm:$0xff] }
 0x577   : > { %4757 = vmatpush2.msra.mxu1 %v4172_v62  ;;  %v4070_v62 = vld [vmem:[#allocation4 + $0x38f0] sm:$0xff] }
 0x578   : > { %4836 = vmatprep.subr.mxu1 %v4167_v30  ;;  %4759 = vmatmul.mubr.f32.vlgmr.msra.gmra.mxu1 %v8224_v40  ;;  %v4135_v40 = vld [vmem:[#allocation4 + $0x3af8] sm:$0xff]  ;;  %v3794_v30 = vld [vmem:[#allocation4 + $0x3050] sm:$0xff] }
 0x579   : > { %4837 = vmatpush1.msra.mxu1 %v4166_v55  ;;  %v3787_v55 = vld [vmem:[#allocation4 + $0x3018] sm:$0xff]  ;;  %4900 = vmatprep.mubr.f32.mxu1 %v8228_v42  ;;  %v3845_v42 = vld [vmem:[#allocation4 + $0x31e8] sm:$0xff] }
 0x57a   : > { %4838 = vmatprep.subr.mxu1 %v4159_v58  ;;  %v3786_v58 = vld [vmem:[#allocation4 + $0x3010] sm:$0xff] }
 0x57b   : > { %v7769_v24 = vpop.eup %7768  ;;  %4839 = vmatpush1.msra.mxu1 %v4158_v1  ;;  %v4035_v1 = vld [vmem:[#allocation4 + $0x37d8] sm:$0xff] }
 0x57c   : > { %v7771_v11 = vpop.eup %7770  ;;  %v8253_v16 = vmul.f32 %v7769_v24, %v7767_v27  ;;  %4840 = vmatprep.subr.mxu1 %v4151_v33  ;;  %v4087_v27 = vld [vmem:[#allocation4 + $0x3978] sm:$0xff]  ;;  %v4086_v24 = vld [vmem:[#allocation4 + $0x3970] sm:$0xff] }
 0x57d   : > { %v7773_v13 = vpop.eup %7772  ;;  %4841 = vmatpush1.msra.mxu1 %v4150_v57  ;;  %v4034_v33 = vld [vmem:[#allocation4 + $0x37d0] sm:$0xff]  ;;  %v4027_v57 = vld [vmem:[#allocation4 + $0x3798] sm:$0xff] }
 0x57e   : > { %v8251_v22 = vmul.f32 %v7773_v13, %v7771_v11  ;;  %4842 = vmatprep.subr.mxu1 %v4143_v35  ;;  %v4079_v11 = vld [vmem:[#allocation4 + $0x3938] sm:$0xff]  ;;  %v4078_v13 = vld [vmem:[#allocation4 + $0x3930] sm:$0xff] }
 0x57f   : > { %4843 = vmatpush1.msra.mxu1 %v4142_v37  ;;  %v4026_v35 = vld [vmem:[#allocation4 + $0x3790] sm:$0xff]  ;;  %v4019_v37 = vld [vmem:[#allocation4 + $0x3758] sm:$0xff] }
 0x580   : > { %4403 = vmatprep.mubr.f32.mxu0 %v8251_v22  ;;  %v3758_v28 = vcombine.low %v8253_v16, %v8251_v22  ;;  %4844 = vmatprep.subr.mxu1 %v4135_v40  ;;  %v4018_v40 = vld [vmem:[#allocation4 + $0x3750] sm:$0xff] }
 0x581   : > { %4404 = vmatmul.mubr.f32.vlgmr.msra.gmra.mxu0 %v8253_v16  ;;  %4845 = vmatpush1.msra.mxu1 %v4134_v41  ;;  %v4011_v41 = vld [vmem:[#allocation4 + $0x3718] sm:$0xff] }
 0x582   : > { %7593 = vst.sshfl [vmem:[#allocation2 + $0x8] sm:$0x33 pattern:$0x76325410] %v3758_v28  ;;  %4482 = vmatpush1.msra.mxu0 %v3906_v44  ;;  %4545 = vmatprep.mubr.f32.mxu0 %v8251_v22  ;;  %v3802_v44 = vld [vmem:[#allocation4 + $0x3090] sm:$0xff]  ;;  %v3795_v28 = vld [vmem:[#allocation4 + $0x3058] sm:$0xff] }
 0x583   : > { %4483 = vmatprep.subr.mxu0 %v3899_v29  ;;  %4846 = vmatprep.subr.mxu1 %v4127_v45  ;;  %v4063_v29 = vld [vmem:[#allocation4 + $0x38b8] sm:$0xff]  ;;  %v4010_v45 = vld [vmem:[#allocation4 + $0x3710] sm:$0xff] }
 0x584   : > { %4484 = vmatpush1.msra.mxu0 %v3898_v31  ;;  %4847 = vmatpush1.msra.mxu1 %v4126_v47  ;;  %v4062_v31 = vld [vmem:[#allocation4 + $0x38b0] sm:$0xff]  ;;  %v4003_v47 = vld [vmem:[#allocation4 + $0x36d8] sm:$0xff] }
 0x585   : > { %4485 = vmatprep.subr.mxu0 %v3891_v53  ;;  %4848 = vmatprep.subr.mxu1 %v4119_v50  ;;  %v4055_v53 = vld [vmem:[#allocation4 + $0x3878] sm:$0xff]  ;;  %v4002_v50 = vld [vmem:[#allocation4 + $0x36d0] sm:$0xff] }
 0x586   : > { %4486 = vmatpush1.msra.mxu0 %v3890_v32  ;;  %4849 = vmatpush1.msra.mxu1 %v4118_v56  ;;  %v4054_v32 = vld [vmem:[#allocation4 + $0x3870] sm:$0xff]  ;;  %v3995_v56 = vld [vmem:[#allocation4 + $0x3698] sm:$0xff] }
 0x587   : > { %4487 = vmatprep.subr.mxu0 %v3883_v4  ;;  %4850 = vmatprep.subr.mxu1 %v4111_v60  ;;  %v4047_v4 = vld [vmem:[#allocation4 + $0x3838] sm:$0xff]  ;;  %v3994_v60 = vld [vmem:[#allocation4 + $0x3690] sm:$0xff] }
 0x588   : > { %4488 = vmatpush1.msra.mxu0 %v3882_v19  ;;  %4851 = vmatpush1.msra.mxu1 %v4110_v0  ;;  %v4046_v19 = vld [vmem:[#allocation4 + $0x3830] sm:$0xff]  ;;  %v3987_v0 = vld [vmem:[#allocation4 + $0x3658] sm:$0xff] }
 0x589   : > { %4489 = vmatprep.subr.mxu0 %v3875_v34  ;;  %4852 = vmatprep.subr.mxu1 %v4103_v23  ;;  %v4295_v34 = vld [vmem:[#allocation4 + $0x3ff8] sm:$0xff]  ;;  %v3986_v23 = vld [vmem:[#allocation4 + $0x3650] sm:$0xff] }
 0x58a   : > { %4490 = vmatpush1.msra.mxu0 %v3874_v36  ;;  %4853 = vmatpush1.msra.mxu1 %v4102_v21  ;;  %v4294_v36 = vld [vmem:[#allocation4 + $0x3ff0] sm:$0xff]  ;;  %v3979_v21 = vld [vmem:[#allocation4 + $0x3618] sm:$0xff] }
 0x58b   : > { %4491 = vmatprep.subr.mxu0 %v3867_v38  ;;  %4854 = vmatprep.subr.mxu1 %v4095_v43  ;;  %v4287_v38 = vld [vmem:[#allocation4 + $0x3fb8] sm:$0xff]  ;;  %v3978_v43 = vld [vmem:[#allocation4 + $0x3610] sm:$0xff] }
 0x58c   : > { %4492 = vmatpush1.msra.mxu0 %v3866_v39  ;;  %4855 = vmatpush1.msra.mxu1 %v4094_v26  ;;  %v4286_v39 = vld [vmem:[#allocation4 + $0x3fb0] sm:$0xff]  ;;  %v3971_v26 = vld [vmem:[#allocation4 + $0x35d8] sm:$0xff] }
 0x58d   : > { %4493 = vmatprep.subr.mxu0 %v3859_v48  ;;  %4856 = vmatprep.subr.mxu1 %v4087_v27  ;;  %v4279_v48 = vld [vmem:[#allocation4 + $0x3f78] sm:$0xff]  ;;  %v3970_v27 = vld [vmem:[#allocation4 + $0x35d0] sm:$0xff] }
 0x58e   : > { %4494 = vmatpush1.msra.mxu0 %v3858_v46  ;;  %4857 = vmatpush1.msra.mxu1 %v4086_v24  ;;  %v4278_v46 = vld [vmem:[#allocation4 + $0x3f70] sm:$0xff]  ;;  %v3963_v24 = vld [vmem:[#allocation4 + $0x3598] sm:$0xff] }
 0x58f   : > { %4495 = vmatprep.subr.mxu0 %v3851_v49  ;;  %4858 = vmatprep.subr.mxu1 %v4079_v11  ;;  %v4271_v49 = vld [vmem:[#allocation4 + $0x3f38] sm:$0xff]  ;;  %v3962_v11 = vld [vmem:[#allocation4 + $0x3590] sm:$0xff] }
 0x590   : > { %4496 = vmatpush1.msra.mxu0 %v3850_v52  ;;  %4859 = vmatpush1.msra.mxu1 %v4078_v13  ;;  %v4270_v52 = vld [vmem:[#allocation4 + $0x3f30] sm:$0xff]  ;;  %v3955_v13 = vld [vmem:[#allocation4 + $0x3558] sm:$0xff] }
 0x591   : > { %4497 = vmatprep.subr.mxu0 %v3843_v59  ;;  %4860 = vmatprep.subr.mxu1 %v4071_v17  ;;  %v4263_v59 = vld [vmem:[#allocation4 + $0x3ef8] sm:$0xff]  ;;  %v3954_v17 = vld [vmem:[#allocation4 + $0x3550] sm:$0xff] }
 0x592   : > { %4498 = vmatpush1.msra.mxu0 %v3842_v63  ;;  %4861 = vmatpush1.msra.mxu1 %v4070_v62  ;;  %v4262_v63 = vld [vmem:[#allocation4 + $0x3ef0] sm:$0xff]  ;;  %v3947_v62 = vld [vmem:[#allocation4 + $0x3518] sm:$0xff] }
 0x593   : > { %4499 = vmatprep.subr.mxu0 %v3835_v3  ;;  %4862 = vmatprep.subr.mxu1 %v4063_v29  ;;  %v4255_v3 = vld [vmem:[#allocation4 + $0x3eb8] sm:$0xff]  ;;  %v3946_v29 = vld [vmem:[#allocation4 + $0x3510] sm:$0xff] }
 0x594   : > { %4500 = vmatpush1.msra.mxu0 %v3834_v25  ;;  %4863 = vmatpush1.msra.mxu1 %v4062_v31  ;;  %v4254_v25 = vld [vmem:[#allocation4 + $0x3eb0] sm:$0xff]  ;;  %v3939_v31 = vld [vmem:[#allocation4 + $0x34d8] sm:$0xff] }
 0x595   : > { %4501 = vmatprep.subr.mxu0 %v3827_v6  ;;  %4864 = vmatprep.subr.mxu1 %v4055_v53  ;;  %v4247_v6 = vld [vmem:[#allocation4 + $0x3e78] sm:$0xff]  ;;  %v3938_v53 = vld [vmem:[#allocation4 + $0x34d0] sm:$0xff] }
 0x596   : > { %4502 = vmatpush1.msra.mxu0 %v3826_v51  ;;  %4865 = vmatpush1.msra.mxu1 %v4054_v32  ;;  %v4246_v51 = vld [vmem:[#allocation4 + $0x3e70] sm:$0xff]  ;;  %v3931_v32 = vld [vmem:[#allocation4 + $0x3498] sm:$0xff] }
 0x597   : > { %4503 = vmatprep.subr.mxu0 %v3819_v7  ;;  %4866 = vmatprep.subr.mxu1 %v4047_v4  ;;  %v4239_v7 = vld [vmem:[#allocation4 + $0x3e38] sm:$0xff]  ;;  %v3930_v4 = vld [vmem:[#allocation4 + $0x3490] sm:$0xff] }
 0x598   : > { %4504 = vmatpush1.msra.mxu0 %v3818_v9  ;;  %4867 = vmatpush1.msra.mxu1 %v4046_v19  ;;  %v4238_v9 = vld [vmem:[#allocation4 + $0x3e30] sm:$0xff]  ;;  %v3923_v19 = vld [vmem:[#allocation4 + $0x3458] sm:$0xff] }
 0x599   : > { %4505 = vmatprep.subr.mxu0 %v3811_v10  ;;  %4868 = vmatprep.subr.mxu1 %v4295_v34  ;;  %v4231_v10 = vld [vmem:[#allocation4 + $0x3df8] sm:$0xff]  ;;  %v3922_v34 = vld [vmem:[#allocation4 + $0x3450] sm:$0xff] }
 0x59a   : > { %4506 = vmatpush1.msra.mxu0 %v3810_v20  ;;  %4869 = vmatpush2.msra.mxu1 %v4294_v36  ;;  %v4230_v20 = vld [vmem:[#allocation4 + $0x3df0] sm:$0xff]  ;;  %v3915_v36 = vld [vmem:[#allocation4 + $0x3418] sm:$0xff] }
 0x59b   : > { %4507 = vmatprep.subr.mxu0 %v3803_v15  ;;  %4870 = vmatprep.subr.mxu1 %v4287_v38  ;;  %v4223_v15 = vld [vmem:[#allocation4 + $0x3db8] sm:$0xff]  ;;  %v3914_v38 = vld [vmem:[#allocation4 + $0x3410] sm:$0xff] }
 0x59c   : > { %4508 = vmatpush1.msra.mxu0 %v3802_v44  ;;  %4871 = vmatpush2.msra.mxu1 %v4286_v39  ;;  %v4222_v44 = vld [vmem:[#allocation4 + $0x3db0] sm:$0xff]  ;;  %v3909_v39 = vld [vmem:[#allocation4 + $0x33e8] sm:$0xff] }
 0x59d   : > { %4509 = vmatprep.subr.mxu0 %v3795_v28  ;;  %4872 = vmatprep.subr.mxu1 %v4279_v48  ;;  %v4215_v28 = vld [vmem:[#allocation4 + $0x3d78] sm:$0xff]  ;;  %v3901_v48 = vld [vmem:[#allocation4 + $0x33a8] sm:$0xff] }
 0x59e   : > { %4510 = vmatpush1.msra.mxu0 %v3794_v30  ;;  %4873 = vmatpush2.msra.mxu1 %v4278_v46  ;;  %v4214_v30 = vld [vmem:[#allocation4 + $0x3d70] sm:$0xff]  ;;  %v3900_v46 = vld [vmem:[#allocation4 + $0x33a0] sm:$0xff] }
 0x59f   : > { %4511 = vmatprep.subr.mxu0 %v3787_v55  ;;  %4874 = vmatprep.subr.mxu1 %v4271_v49  ;;  %v4207_v55 = vld [vmem:[#allocation4 + $0x3d38] sm:$0xff]  ;;  %v3893_v49 = vld [vmem:[#allocation4 + $0x3368] sm:$0xff] }
 0x5a0   : > { %4512 = vmatpush1.msra.mxu0 %v3786_v58  ;;  %4875 = vmatpush2.msra.mxu1 %v4270_v52  ;;  %v4206_v58 = vld [vmem:[#allocation4 + $0x3d30] sm:$0xff]  ;;  %v3885_v52 = vld [vmem:[#allocation4 + $0x3328] sm:$0xff] }
 0x5a1   : > { %4513 = vmatprep.subr.mxu0 %v4035_v1  ;;  %4876 = vmatprep.subr.mxu1 %v4263_v59  ;;  %v4199_v1 = vld [vmem:[#allocation4 + $0x3cf8] sm:$0xff]  ;;  %v3877_v59 = vld [vmem:[#allocation4 + $0x32e8] sm:$0xff] }
 0x5a2   : > { %4514 = vmatpush2.msra.mxu0 %v4034_v33  ;;  %4877 = vmatpush2.msra.mxu1 %v4262_v63  ;;  %v4198_v33 = vld [vmem:[#allocation4 + $0x3cf0] sm:$0xff]  ;;  %v3876_v63 = vld [vmem:[#allocation4 + $0x32e0] sm:$0xff] }
 0x5a3   : > { %4515 = vmatprep.subr.mxu0 %v4027_v57  ;;  %4878 = vmatprep.subr.mxu1 %v4255_v3  ;;  %v4191_v57 = vld [vmem:[#allocation4 + $0x3cb8] sm:$0xff]  ;;  %v3868_v3 = vld [vmem:[#allocation4 + $0x32a0] sm:$0xff] }
 0x5a4   : > { %4516 = vmatpush2.msra.mxu0 %v4026_v35  ;;  %4879 = vmatpush2.msra.mxu1 %v4254_v25  ;;  %v4190_v35 = vld [vmem:[#allocation4 + $0x3cb0] sm:$0xff]  ;;  %v3860_v25 = vld [vmem:[#allocation4 + $0x3260] sm:$0xff] }
 0x5a5   : > { %4517 = vmatprep.subr.mxu0 %v4019_v37  ;;  %4880 = vmatprep.subr.mxu1 %v4247_v6  ;;  %v4183_v37 = vld [vmem:[#allocation4 + $0x3c78] sm:$0xff]  ;;  %v3852_v6 = vld [vmem:[#allocation4 + $0x3220] sm:$0xff] }
 0x5a6   : > { %4518 = vmatpush2.msra.mxu0 %v4018_v40  ;;  %4881 = vmatpush2.msra.mxu1 %v4246_v51  ;;  %v4182_v40 = vld [vmem:[#allocation4 + $0x3c70] sm:$0xff]  ;;  %v3837_v51 = vld [vmem:[#allocation4 + $0x31a8] sm:$0xff] }
 0x5a7   : > { %4519 = vmatprep.subr.mxu0 %v4011_v41  ;;  %4882 = vmatprep.subr.mxu1 %v4239_v7  ;;  %v3908_v41 = vld [vmem:[#allocation4 + $0x33e0] sm:$0xff]  ;;  %v3829_v7 = vld [vmem:[#allocation4 + $0x3168] sm:$0xff] }
 0x5a8   : > { %4520 = vmatpush2.msra.mxu0 %v4010_v45  ;;  %4883 = vmatpush2.msra.mxu1 %v4238_v9  ;;  %v4175_v45 = vld [vmem:[#allocation4 + $0x3c38] sm:$0xff]  ;;  %v3821_v9 = vld [vmem:[#allocation4 + $0x3128] sm:$0xff] }
 0x5a9   : > { %4521 = vmatprep.subr.mxu0 %v4003_v47  ;;  %4884 = vmatprep.subr.mxu1 %v4231_v10  ;;  %v4174_v47 = vld [vmem:[#allocation4 + $0x3c30] sm:$0xff]  ;;  %v3813_v10 = vld [vmem:[#allocation4 + $0x30e8] sm:$0xff] }
 0x5aa   : > { %4522 = vmatpush2.msra.mxu0 %v4002_v50  ;;  %4885 = vmatpush2.msra.mxu1 %v4230_v20  ;;  %v3892_v50 = vld [vmem:[#allocation4 + $0x3360] sm:$0xff]  ;;  %v3805_v20 = vld [vmem:[#allocation4 + $0x30a8] sm:$0xff] }
 0x5ab   : > { %4523 = vmatprep.subr.mxu0 %v3995_v56  ;;  %4886 = vmatprep.subr.mxu1 %v4223_v15  ;;  %v3884_v56 = vld [vmem:[#allocation4 + $0x3320] sm:$0xff]  ;;  %v3797_v15 = vld [vmem:[#allocation4 + $0x3068] sm:$0xff] }
 0x5ac   : > { %4524 = vmatpush2.msra.mxu0 %v3994_v60  ;;  %4887 = vmatpush2.msra.mxu1 %v4222_v44  ;;  %v7874_v60 = vld.sshfl [vmem:[#allocation2 + $0xc] sm:$0x33 pattern:$0x76325410]  ;;  %v3789_v44 = vld [vmem:[#allocation4 + $0x3028] sm:$0xff] }
 0x5ad   : > { %4525 = vmatprep.subr.mxu0 %v3987_v0  ;;  %4888 = vmatprep.subr.mxu1 %v4215_v28  ;;  %v3869_v0 = vld [vmem:[#allocation4 + $0x32a8] sm:$0xff] }
 0x5ae   : > { %4526 = vmatpush2.msra.mxu0 %v3986_v23  ;;  %4889 = vmatpush2.msra.mxu1 %v4214_v30  ;;  %v3861_v23 = vld [vmem:[#allocation4 + $0x3268] sm:$0xff] }
 0x5af   : > { %4527 = vmatprep.subr.mxu0 %v3979_v21  ;;  %4890 = vmatprep.subr.mxu1 %v4207_v55  ;;  %v3853_v21 = vld [vmem:[#allocation4 + $0x3228] sm:$0xff] }
 0x5b0   : > { %4528 = vmatpush2.msra.mxu0 %v3978_v43  ;;  %4891 = vmatpush2.msra.mxu1 %v4206_v58  ;;  %v3844_v43 = vld [vmem:[#allocation4 + $0x31e0] sm:$0xff]  ;;  %v4037_v28 = vld [vmem:[#allocation4 + $0x37e8] sm:$0xff] }
 0x5b1   : > { %4529 = vmatprep.subr.mxu0 %v3971_v26  ;;  %4892 = vmatprep.subr.mxu1 %v4199_v1  ;;  %v3836_v26 = vld [vmem:[#allocation4 + $0x31a0] sm:$0xff]  ;;  %v4029_v30 = vld [vmem:[#allocation4 + $0x37a8] sm:$0xff] }
 0x5b2   : > { %4530 = vmatpush2.msra.mxu0 %v3970_v27  ;;  %4893 = vmatpush2.msra.mxu1 %v4198_v33  ;;  %v3828_v27 = vld [vmem:[#allocation4 + $0x3160] sm:$0xff]  ;;  %v4021_v55 = vld [vmem:[#allocation4 + $0x3768] sm:$0xff] }
 0x5b3   : > { %4531 = vmatprep.subr.mxu0 %v3963_v24  ;;  %4894 = vmatprep.subr.mxu1 %v4191_v57  ;;  %v3820_v24 = vld [vmem:[#allocation4 + $0x3120] sm:$0xff]  ;;  %v4013_v58 = vld [vmem:[#allocation4 + $0x3728] sm:$0xff] }
 0x5b4   : > { %4532 = vmatpush2.msra.mxu0 %v3962_v11  ;;  %4895 = vmatpush2.msra.mxu1 %v4190_v35  ;;  %v3812_v11 = vld [vmem:[#allocation4 + $0x30e0] sm:$0xff]  ;;  %v4005_v1 = vld [vmem:[#allocation4 + $0x36e8] sm:$0xff] }
 0x5b5   : > { %4533 = vmatprep.subr.mxu0 %v3955_v13  ;;  %4896 = vmatprep.subr.mxu1 %v4183_v37  ;;  %v3804_v13 = vld [vmem:[#allocation4 + $0x30a0] sm:$0xff]  ;;  %v3997_v33 = vld [vmem:[#allocation4 + $0x36a8] sm:$0xff] }
 0x5b6   : > { %4534 = vmatpush2.msra.mxu0 %v3954_v17  ;;  %4897 = vmatpush2.msra.mxu1 %v4182_v40  ;;  %v3796_v17 = vld [vmem:[#allocation4 + $0x3060] sm:$0xff]  ;;  %v3989_v57 = vld [vmem:[#allocation4 + $0x3668] sm:$0xff] }
 0x5b7   : > { %4535 = vmatprep.subr.mxu0 %v3947_v62  ;;  %4898 = vmatprep.subr.mxu1 %v4175_v45  ;;  %v3788_v62 = vld [vmem:[#allocation4 + $0x3020] sm:$0xff]  ;;  %v3981_v35 = vld [vmem:[#allocation4 + $0x3628] sm:$0xff] }
 0x5b8   : > { %4536 = vmatpush2.msra.mxu0 %v3946_v29  ;;  %4899 = vmatpush2.msra.mxu1 %v4174_v47  ;;  %v4036_v29 = vld [vmem:[#allocation4 + $0x37e0] sm:$0xff]  ;;  %v3973_v37 = vld [vmem:[#allocation4 + $0x35e8] sm:$0xff] }
 0x5b9   : > { %4537 = vmatprep.subr.mxu0 %v3939_v31  ;;  %4901 = vmatmul.mubr.f32.vlgmr.msra.gmra.mxu1 %v7874_v60  ;;  %v4028_v31 = vld [vmem:[#allocation4 + $0x37a0] sm:$0xff]  ;;  %v3965_v40 = vld [vmem:[#allocation4 + $0x35a8] sm:$0xff] }
 0x5ba   : > { %4538 = vmatpush2.msra.mxu0 %v3938_v53  ;;  %v4020_v53 = vld [vmem:[#allocation4 + $0x3760] sm:$0xff]  ;;  %v3949_v45 = vld [vmem:[#allocation4 + $0x3528] sm:$0xff] }
 0x5bb   : > { %4539 = vmatprep.subr.mxu0 %v3931_v32  ;;  %v4012_v32 = vld [vmem:[#allocation4 + $0x3720] sm:$0xff]  ;;  %v3941_v47 = vld [vmem:[#allocation4 + $0x34e8] sm:$0xff] }
 0x5bc   : > { %4540 = vmatpush2.msra.mxu0 %v3930_v4  ;;  %v4004_v4 = vld [vmem:[#allocation4 + $0x36e0] sm:$0xff]  ;;  %v3917_v60 = vld [vmem:[#allocation4 + $0x3428] sm:$0xff] }
 0x5bd   : > { %4541 = vmatprep.subr.mxu0 %v3923_v19  ;;  %v3996_v19 = vld [vmem:[#allocation4 + $0x36a0] sm:$0xff] }
 0x5be   : > { %4542 = vmatpush2.msra.mxu0 %v3922_v34  ;;  %v3988_v34 = vld [vmem:[#allocation4 + $0x3660] sm:$0xff] }
 0x5bf   : > { %4543 = vmatprep.subr.mxu0 %v3915_v36  ;;  %v3980_v36 = vld [vmem:[#allocation4 + $0x3620] sm:$0xff] }
 0x5c0   : > { %4544 = vmatpush2.msra.mxu0 %v3914_v38  ;;  %v3972_v38 = vld [vmem:[#allocation4 + $0x35e0] sm:$0xff] }
 0x5c1   : > { %4546 = vmatmul.mubr.f32.vlgmr.msra.gmra.mxu0 %v8253_v16  ;;  %4623 = vmatprep.subr.mxu0 %v3909_v39  ;;  %v3964_v39 = vld [vmem:[#allocation4 + $0x35a0] sm:$0xff] }
 0x5c2   : > { %4624 = vmatpush1.msra.mxu0 %v3908_v41  ;;  %4687 = vmatprep.mubr.f32.mxu0 %v8251_v22  ;;  %v3957_v41 = vld [vmem:[#allocation4 + $0x3568] sm:$0xff] }
 0x5c3   : > { %4625 = vmatprep.subr.mxu0 %v3901_v48  ;;  %v3956_v48 = vld [vmem:[#allocation4 + $0x3560] sm:$0xff] }
 0x5c4   : > { %4626 = vmatpush1.msra.mxu0 %v3900_v46  ;;  %v3948_v46 = vld [vmem:[#allocation4 + $0x3520] sm:$0xff] }
 0x5c5   : > { %4627 = vmatprep.subr.mxu0 %v3893_v49  ;;  %v3940_v49 = vld [vmem:[#allocation4 + $0x34e0] sm:$0xff] }
 0x5c6   : > { %4628 = vmatpush1.msra.mxu0 %v3892_v50  ;;  %v3933_v50 = vld [vmem:[#allocation4 + $0x34a8] sm:$0xff] }
 0x5c7   : > { %4629 = vmatprep.subr.mxu0 %v3885_v52  ;;  %v3932_v52 = vld [vmem:[#allocation4 + $0x34a0] sm:$0xff] }
 0x5c8   : > { %4630 = vmatpush1.msra.mxu0 %v3884_v56  ;;  %v3925_v56 = vld [vmem:[#allocation4 + $0x3468] sm:$0xff] }
 0x5c9   : > { %4631 = vmatprep.subr.mxu0 %v3877_v59  ;;  %v3924_v59 = vld [vmem:[#allocation4 + $0x3460] sm:$0xff] }
 0x5ca   : > { %4632 = vmatpush1.msra.mxu0 %v3876_v63  ;;  %v3916_v63 = vld [vmem:[#allocation4 + $0x3420] sm:$0xff] }
 0x5cb   : > { %4633 = vmatprep.subr.mxu0 %v3869_v0  ;;  %v3911_v0 = vld [vmem:[#allocation4 + $0x33f8] sm:$0xff] }
 0x5cc   : > { %4634 = vmatpush1.msra.mxu0 %v3868_v3  ;;  %v3910_v3 = vld [vmem:[#allocation4 + $0x33f0] sm:$0xff] }
 0x5cd   : > { %4635 = vmatprep.subr.mxu0 %v3861_v23  ;;  %v3903_v23 = vld [vmem:[#allocation4 + $0x33b8] sm:$0xff] }
 0x5ce   : > { %4636 = vmatpush1.msra.mxu0 %v3860_v25  ;;  %v3902_v25 = vld [vmem:[#allocation4 + $0x33b0] sm:$0xff] }
 0x5cf   : > { %4637 = vmatprep.subr.mxu0 %v3853_v21  ;;  %v3895_v21 = vld [vmem:[#allocation4 + $0x3378] sm:$0xff] }
 0x5d0   : > { %4638 = vmatpush1.msra.mxu0 %v3852_v6  ;;  %v3894_v6 = vld [vmem:[#allocation4 + $0x3370] sm:$0xff] }
 0x5d1   : > { %4639 = vmatprep.subr.mxu0 %v3845_v42  ;;  %v3887_v42 = vld [vmem:[#allocation4 + $0x3338] sm:$0xff] }
 0x5d2   : > { %4640 = vmatpush1.msra.mxu0 %v3844_v43  ;;  %v3886_v43 = vld [vmem:[#allocation4 + $0x3330] sm:$0xff] }
 0x5d3   : > { %4641 = vmatprep.subr.mxu0 %v3837_v51  ;;  %v3879_v51 = vld [vmem:[#allocation4 + $0x32f8] sm:$0xff] }
 0x5d4   : > { %4642 = vmatpush1.msra.mxu0 %v3836_v26  ;;  %v3878_v26 = vld [vmem:[#allocation4 + $0x32f0] sm:$0xff] }
 0x5d5   : > { %4643 = vmatprep.subr.mxu0 %v3829_v7  ;;  %v3871_v7 = vld [vmem:[#allocation4 + $0x32b8] sm:$0xff] }
 0x5d6   : > { %4644 = vmatpush1.msra.mxu0 %v3828_v27  ;;  %v3870_v27 = vld [vmem:[#allocation4 + $0x32b0] sm:$0xff] }
 0x5d7   : > { %4645 = vmatprep.subr.mxu0 %v3821_v9  ;;  %v3863_v9 = vld [vmem:[#allocation4 + $0x3278] sm:$0xff] }
 0x5d8   : > { %4646 = vmatpush1.msra.mxu0 %v3820_v24  ;;  %v3862_v24 = vld [vmem:[#allocation4 + $0x3270] sm:$0xff] }
 0x5d9   : > { %4647 = vmatprep.subr.mxu0 %v3813_v10  ;;  %v3854_v10 = vld [vmem:[#allocation4 + $0x3230] sm:$0xff] }
 0x5da   : > { %4648 = vmatpush1.msra.mxu0 %v3812_v11  ;;  %v3847_v11 = vld [vmem:[#allocation4 + $0x31f8] sm:$0xff] }
 0x5db   : > { %4649 = vmatprep.subr.mxu0 %v3805_v20  ;;  %v3846_v20 = vld [vmem:[#allocation4 + $0x31f0] sm:$0xff] }
 0x5dc   : > { %4650 = vmatpush1.msra.mxu0 %v3804_v13  ;;  %v3839_v13 = vld [vmem:[#allocation4 + $0x31b8] sm:$0xff] }
 0x5dd   : > { %4651 = vmatprep.subr.mxu0 %v3797_v15  ;;  %v3838_v15 = vld [vmem:[#allocation4 + $0x31b0] sm:$0xff] }
 0x5de   : > { %4652 = vmatpush1.msra.mxu0 %v3796_v17  ;;  %v3831_v17 = vld [vmem:[#allocation4 + $0x3178] sm:$0xff] }
 0x5df   : > { %4653 = vmatprep.subr.mxu0 %v3789_v44  ;;  %v3830_v44 = vld [vmem:[#allocation4 + $0x3170] sm:$0xff] }
 0x5e0   : > { %4654 = vmatpush1.msra.mxu0 %v3788_v62  ;;  %v3823_v62 = vld [vmem:[#allocation4 + $0x3138] sm:$0xff] }
 0x5e1   : > { %4655 = vmatprep.subr.mxu0 %v4037_v28  ;;  %v3822_v28 = vld [vmem:[#allocation4 + $0x3130] sm:$0xff] }
 0x5e2   : > { %4656 = vmatpush2.msra.mxu0 %v4036_v29  ;;  %v3815_v29 = vld [vmem:[#allocation4 + $0x30f8] sm:$0xff] }
 0x5e3   : > { %4657 = vmatprep.subr.mxu0 %v4029_v30  ;;  %v3814_v30 = vld [vmem:[#allocation4 + $0x30f0] sm:$0xff] }
 0x5e4   : > { %4658 = vmatpush2.msra.mxu0 %v4028_v31  ;;  %v3807_v31 = vld [vmem:[#allocation4 + $0x30b8] sm:$0xff] }
 0x5e5   : > { %4659 = vmatprep.subr.mxu0 %v4021_v55  ;;  %v3806_v55 = vld [vmem:[#allocation4 + $0x30b0] sm:$0xff] }
 0x5e6   : > { %4660 = vmatpush2.msra.mxu0 %v4020_v53  ;;  %v3799_v53 = vld [vmem:[#allocation4 + $0x3078] sm:$0xff] }
 0x5e7   : > { %4661 = vmatprep.subr.mxu0 %v4013_v58  ;;  %v3798_v58 = vld [vmem:[#allocation4 + $0x3070] sm:$0xff] }
 0x5e8   : > { %4662 = vmatpush2.msra.mxu0 %v4012_v32  ;;  %v3791_v32 = vld [vmem:[#allocation4 + $0x3038] sm:$0xff] }
 0x5e9   : > { %4663 = vmatprep.subr.mxu0 %v4005_v1  ;;  %v3790_v1 = vld [vmem:[#allocation4 + $0x3030] sm:$0xff] }
 0x5ea   : > { %4664 = vmatpush2.msra.mxu0 %v4004_v4  ;;  %v4039_v4 = vld [vmem:[#allocation4 + $0x37f8] sm:$0xff] }
 0x5eb   : > { %4665 = vmatprep.subr.mxu0 %v3997_v33  ;;  %v4038_v33 = vld [vmem:[#allocation4 + $0x37f0] sm:$0xff] }
 0x5ec   : > { %4666 = vmatpush2.msra.mxu0 %v3996_v19  ;;  %v4031_v19 = vld [vmem:[#allocation4 + $0x37b8] sm:$0xff] }
 0x5ed   : > { %4667 = vmatprep.subr.mxu0 %v3989_v57  ;;  %v4030_v57 = vld [vmem:[#allocation4 + $0x37b0] sm:$0xff] }
 0x5ee   : > { %4668 = vmatpush2.msra.mxu0 %v3988_v34  ;;  %v4023_v34 = vld [vmem:[#allocation4 + $0x3778] sm:$0xff] }
 0x5ef   : > { %4669 = vmatprep.subr.mxu0 %v3981_v35  ;;  %v4022_v35 = vld [vmem:[#allocation4 + $0x3770] sm:$0xff] }
 0x5f0   : > { %4670 = vmatpush2.msra.mxu0 %v3980_v36  ;;  %v4015_v36 = vld [vmem:[#allocation4 + $0x3738] sm:$0xff] }
 0x5f1   : > { %4671 = vmatprep.subr.mxu0 %v3973_v37  ;;  %v4014_v37 = vld [vmem:[#allocation4 + $0x3730] sm:$0xff] }
 0x5f2   : > { %4672 = vmatpush2.msra.mxu0 %v3972_v38  ;;  %v4007_v38 = vld [vmem:[#allocation4 + $0x36f8] sm:$0xff] }
 0x5f3   : > { %4673 = vmatprep.subr.mxu0 %v3965_v40  ;;  %v4006_v40 = vld [vmem:[#allocation4 + $0x36f0] sm:$0xff] }
 0x5f4   : > { %4674 = vmatpush2.msra.mxu0 %v3964_v39  ;;  %v3999_v39 = vld [vmem:[#allocation4 + $0x36b8] sm:$0xff] }
 0x5f5   : > { %4675 = vmatprep.subr.mxu0 %v3957_v41  ;;  %v3998_v41 = vld [vmem:[#allocation4 + $0x36b0] sm:$0xff] }
 0x5f6   : > { %4676 = vmatpush2.msra.mxu0 %v3956_v48  ;;  %v3991_v48 = vld [vmem:[#allocation4 + $0x3678] sm:$0xff] }
 0x5f7   : > { %4677 = vmatprep.subr.mxu0 %v3949_v45  ;;  %v3990_v45 = vld [vmem:[#allocation4 + $0x3670] sm:$0xff] }
 0x5f8   : > { %4678 = vmatpush2.msra.mxu0 %v3948_v46  ;;  %v3983_v46 = vld [vmem:[#allocation4 + $0x3638] sm:$0xff] }
 0x5f9   : > { %4679 = vmatprep.subr.mxu0 %v3941_v47  ;;  %v3982_v47 = vld [vmem:[#allocation4 + $0x3630] sm:$0xff] }
 0x5fa   : > { %4680 = vmatpush2.msra.mxu0 %v3940_v49  ;;  %v3975_v49 = vld [vmem:[#allocation4 + $0x35f8] sm:$0xff] }
 0x5fb   : > { %4681 = vmatprep.subr.mxu0 %v3933_v50  ;;  %v3974_v50 = vld [vmem:[#allocation4 + $0x35f0] sm:$0xff] }
 0x5fc   : > { %4682 = vmatpush2.msra.mxu0 %v3932_v52  ;;  %v3967_v52 = vld [vmem:[#allocation4 + $0x35b8] sm:$0xff] }
 0x5fd   : > { %4683 = vmatprep.subr.mxu0 %v3925_v56  ;;  %v3966_v56 = vld [vmem:[#allocation4 + $0x35b0] sm:$0xff] }
 0x5fe   : > { %4684 = vmatpush2.msra.mxu0 %v3924_v59  ;;  %v3959_v59 = vld [vmem:[#allocation4 + $0x3578] sm:$0xff] }
 0x5ff   : > { %4685 = vmatprep.subr.mxu0 %v3917_v60  ;;  %v3958_v60 = vld [vmem:[#allocation4 + $0x3570] sm:$0xff] }
 0x600   : > { %4686 = vmatpush2.msra.mxu0 %v3916_v63  ;;  %v3951_v63 = vld [vmem:[#allocation4 + $0x3538] sm:$0xff] }
 0x601   : > { %4688 = vmatmul.mubr.f32.vlgmr.msra.gmra.mxu0 %v8253_v16  ;;  %4765 = vmatprep.subr.mxu0 %v3911_v0  ;;  %v3950_v0 = vld [vmem:[#allocation4 + $0x3530] sm:$0xff] }
 0x602   : > { %4766 = vmatpush1.msra.mxu0 %v3910_v3  ;;  %4829 = vmatprep.mubr.f32.mxu0 %v8251_v22  ;;  %v3855_v22 = vld [vmem:[#allocation4 + $0x3238] sm:$0xff] }
 0x603   : > { %4767 = vmatprep.subr.mxu0 %v3903_v23  ;;  %v3943_v3 = vld [vmem:[#allocation4 + $0x34f8] sm:$0xff]  ;;  %v3942_v23 = vld [vmem:[#allocation4 + $0x34f0] sm:$0xff] }
 0x604   : > { %4768 = vmatpush1.msra.mxu0 %v3902_v25  ;;  %v3935_v25 = vld [vmem:[#allocation4 + $0x34b8] sm:$0xff] }
 0x605   : > { %4769 = vmatprep.subr.mxu0 %v3895_v21  ;;  %v3934_v21 = vld [vmem:[#allocation4 + $0x34b0] sm:$0xff] }
 0x606   : > { %4770 = vmatpush1.msra.mxu0 %v3894_v6  ;;  %v3927_v6 = vld [vmem:[#allocation4 + $0x3478] sm:$0xff] }
 0x607   : > { %4771 = vmatprep.subr.mxu0 %v3887_v42  ;;  %v3926_v42 = vld [vmem:[#allocation4 + $0x3470] sm:$0xff] }
 0x608   : > { %4772 = vmatpush1.msra.mxu0 %v3886_v43  ;;  %v3919_v43 = vld [vmem:[#allocation4 + $0x3438] sm:$0xff] }
 0x609   : > { %4773 = vmatprep.subr.mxu0 %v3879_v51  ;;  %v3918_v51 = vld [vmem:[#allocation4 + $0x3430] sm:$0xff] }
 0x60a   : > { %4774 = vmatpush1.msra.mxu0 %v3878_v26  ;;  %v5127_v26 = vld [vmem:[#allocation4 + $0x43c8] sm:$0xff] }
 0x60b   : > { %4775 = vmatprep.subr.mxu0 %v3871_v7  ;;  %v5383_v7 = vld [vmem:[#allocation4 + $0x4bc8] sm:$0xff] }
 0x60c   : > { %4776 = vmatpush1.msra.mxu0 %v3870_v27  ;;  %v5126_v27 = vld [vmem:[#allocation4 + $0x43c0] sm:$0xff]  ;;  %5632 = vmatprep.subr.mxu1 %v5383_v7  ;;  %v5271_v7 = vld [vmem:[#allocation4 + $0x4848] sm:$0xff] }
 0x60d   : > { %4777 = vmatprep.subr.mxu0 %v3863_v9  ;;  %v5382_v9 = vld [vmem:[#allocation4 + $0x4bc0] sm:$0xff] }
 0x60e   : > { %4778 = vmatpush1.msra.mxu0 %v3862_v24  ;;  %v5119_v24 = vld [vmem:[#allocation4 + $0x4388] sm:$0xff]  ;;  %5633 = vmatpush1.msra.mxu1 %v5382_v9  ;;  %v5270_v9 = vld [vmem:[#allocation4 + $0x4840] sm:$0xff] }
 0x60f   : > { %4779 = vmatprep.subr.mxu0 %v3855_v22  ;;  %v5375_v22 = vld [vmem:[#allocation4 + $0x4b88] sm:$0xff] }
 0x610   : > { %4780 = vmatpush1.msra.mxu0 %v3854_v10  ;;  %v5118_v10 = vld [vmem:[#allocation4 + $0x4380] sm:$0xff]  ;;  %5634 = vmatprep.subr.mxu1 %v5375_v22  ;;  %v5263_v22 = vld [vmem:[#allocation4 + $0x4808] sm:$0xff] }
 0x611   : > { %4781 = vmatprep.subr.mxu0 %v3847_v11  ;;  %v5374_v11 = vld [vmem:[#allocation4 + $0x4b80] sm:$0xff] }
 0x612   : > { %4782 = vmatpush1.msra.mxu0 %v3846_v20  ;;  %v5111_v20 = vld [vmem:[#allocation4 + $0x4348] sm:$0xff]  ;;  %5635 = vmatpush1.msra.mxu1 %v5374_v11  ;;  %v5262_v11 = vld [vmem:[#allocation4 + $0x4800] sm:$0xff] }
 0x613   : > { %4783 = vmatprep.subr.mxu0 %v3839_v13  ;;  %v5367_v13 = vld [vmem:[#allocation4 + $0x4b48] sm:$0xff] }
 0x614   : > { %4784 = vmatpush1.msra.mxu0 %v3838_v15  ;;  %v5110_v15 = vld [vmem:[#allocation4 + $0x4340] sm:$0xff]  ;;  %5636 = vmatprep.subr.mxu1 %v5367_v13  ;;  %v5511_v13 = vld [vmem:[#allocation4 + $0x4fc8] sm:$0xff] }
 0x615   : > { %4785 = vmatprep.subr.mxu0 %v3831_v17  ;;  %v5366_v17 = vld [vmem:[#allocation4 + $0x4b40] sm:$0xff] }
 0x616   : > { %4786 = vmatpush1.msra.mxu0 %v3830_v44  ;;  %v5359_v44 = vld [vmem:[#allocation4 + $0x4b08] sm:$0xff]  ;;  %5637 = vmatpush1.msra.mxu1 %v5366_v17  ;;  %v5510_v17 = vld [vmem:[#allocation4 + $0x4fc0] sm:$0xff] }
 0x617   : > { %4787 = vmatprep.subr.mxu0 %v3823_v62  ;;  %v5102_v62 = vld [vmem:[#allocation4 + $0x4300] sm:$0xff]  ;;  %5638 = vmatprep.subr.mxu1 %v5359_v44  ;;  %v5503_v44 = vld [vmem:[#allocation4 + $0x4f88] sm:$0xff] }
 0x618   : > { %4788 = vmatpush1.msra.mxu0 %v3822_v28  ;;  %v5358_v28 = vld [vmem:[#allocation4 + $0x4b00] sm:$0xff] }
 0x619   : > { %4789 = vmatprep.subr.mxu0 %v3815_v29  ;;  %v5095_v29 = vld [vmem:[#allocation4 + $0x42c8] sm:$0xff]  ;;  %5639 = vmatpush1.msra.mxu1 %v5358_v28  ;;  %v5502_v28 = vld [vmem:[#allocation4 + $0x4f80] sm:$0xff] }
 0x61a   : > { %4790 = vmatpush1.msra.mxu0 %v3814_v30  ;;  %v5351_v30 = vld [vmem:[#allocation4 + $0x4ac8] sm:$0xff] }
 0x61b   : > { %4791 = vmatprep.subr.mxu0 %v3807_v31  ;;  %v5094_v31 = vld [vmem:[#allocation4 + $0x42c0] sm:$0xff]  ;;  %5640 = vmatprep.subr.mxu1 %v5351_v30  ;;  %v5495_v30 = vld [vmem:[#allocation4 + $0x4f48] sm:$0xff] }
 0x61c   : > { %4792 = vmatpush1.msra.mxu0 %v3806_v55  ;;  %v5350_v55 = vld [vmem:[#allocation4 + $0x4ac0] sm:$0xff] }
 0x61d   : > { %4793 = vmatprep.subr.mxu0 %v3799_v53  ;;  %v5087_v53 = vld [vmem:[#allocation4 + $0x4288] sm:$0xff]  ;;  %5641 = vmatpush1.msra.mxu1 %v5350_v55  ;;  %v5494_v55 = vld [vmem:[#allocation4 + $0x4f40] sm:$0xff] }
 0x61e   : > { %4794 = vmatpush1.msra.mxu0 %v3798_v58  ;;  %v5343_v58 = vld [vmem:[#allocation4 + $0x4a88] sm:$0xff] }
 0x61f   : > { %4795 = vmatprep.subr.mxu0 %v3791_v32  ;;  %v5086_v32 = vld [vmem:[#allocation4 + $0x4280] sm:$0xff]  ;;  %5642 = vmatprep.subr.mxu1 %v5343_v58  ;;  %v5487_v58 = vld [vmem:[#allocation4 + $0x4f08] sm:$0xff] }
 0x620   : > { %4796 = vmatpush1.msra.mxu0 %v3790_v1  ;;  %v5342_v1 = vld [vmem:[#allocation4 + $0x4a80] sm:$0xff] }
 0x621   : > { %4797 = vmatprep.subr.mxu0 %v4039_v4  ;;  %v5079_v4 = vld [vmem:[#allocation4 + $0x4248] sm:$0xff]  ;;  %5643 = vmatpush1.msra.mxu1 %v5342_v1  ;;  %v5486_v1 = vld [vmem:[#allocation4 + $0x4f00] sm:$0xff] }
 0x622   : > { %4798 = vmatpush2.msra.mxu0 %v4038_v33  ;;  %v5335_v33 = vld [vmem:[#allocation4 + $0x4a48] sm:$0xff] }
 0x623   : > { %4799 = vmatprep.subr.mxu0 %v4031_v19  ;;  %v5078_v19 = vld [vmem:[#allocation4 + $0x4240] sm:$0xff]  ;;  %5644 = vmatprep.subr.mxu1 %v5335_v33  ;;  %v5479_v33 = vld [vmem:[#allocation4 + $0x4ec8] sm:$0xff] }
 0x624   : > { %4800 = vmatpush2.msra.mxu0 %v4030_v57  ;;  %v5334_v57 = vld [vmem:[#allocation4 + $0x4a40] sm:$0xff] }
 0x625   : > { %4801 = vmatprep.subr.mxu0 %v4023_v34  ;;  %v5071_v34 = vld [vmem:[#allocation4 + $0x4208] sm:$0xff]  ;;  %5645 = vmatpush1.msra.mxu1 %v5334_v57  ;;  %v5478_v57 = vld [vmem:[#allocation4 + $0x4ec0] sm:$0xff] }
 0x626   : > { %4802 = vmatpush2.msra.mxu0 %v4022_v35  ;;  %v5327_v35 = vld [vmem:[#allocation4 + $0x4a08] sm:$0xff] }
 0x627   : > { %4803 = vmatprep.subr.mxu0 %v4015_v36  ;;  %v5070_v36 = vld [vmem:[#allocation4 + $0x4200] sm:$0xff]  ;;  %5646 = vmatprep.subr.mxu1 %v5327_v35  ;;  %v5471_v35 = vld [vmem:[#allocation4 + $0x4e88] sm:$0xff] }
 0x628   : > { %4804 = vmatpush2.msra.mxu0 %v4014_v37  ;;  %v5326_v37 = vld [vmem:[#allocation4 + $0x4a00] sm:$0xff] }
 0x629   : > { %4805 = vmatprep.subr.mxu0 %v4007_v38  ;;  %v5063_v38 = vld [vmem:[#allocation4 + $0x41c8] sm:$0xff]  ;;  %5647 = vmatpush1.msra.mxu1 %v5326_v37  ;;  %v5470_v37 = vld [vmem:[#allocation4 + $0x4e80] sm:$0xff] }
 0x62a   : > { %4806 = vmatpush2.msra.mxu0 %v4006_v40  ;;  %v5319_v40 = vld [vmem:[#allocation4 + $0x49c8] sm:$0xff] }
 0x62b   : > { %4807 = vmatprep.subr.mxu0 %v3999_v39  ;;  %v5062_v39 = vld [vmem:[#allocation4 + $0x41c0] sm:$0xff]  ;;  %5648 = vmatprep.subr.mxu1 %v5319_v40  ;;  %v5463_v40 = vld [vmem:[#allocation4 + $0x4e48] sm:$0xff] }
 0x62c   : > { %4808 = vmatpush2.msra.mxu0 %v3998_v41  ;;  %v5318_v41 = vld [vmem:[#allocation4 + $0x49c0] sm:$0xff] }
 0x62d   : > { %4809 = vmatprep.subr.mxu0 %v3991_v48  ;;  %v5055_v48 = vld [vmem:[#allocation4 + $0x4188] sm:$0xff]  ;;  %5649 = vmatpush1.msra.mxu1 %v5318_v41  ;;  %v5462_v41 = vld [vmem:[#allocation4 + $0x4e40] sm:$0xff] }
 0x62e   : > { %4810 = vmatpush2.msra.mxu0 %v3990_v45  ;;  %v5311_v45 = vld [vmem:[#allocation4 + $0x4988] sm:$0xff] }
 0x62f   : > { %4811 = vmatprep.subr.mxu0 %v3983_v46  ;;  %v5054_v46 = vld [vmem:[#allocation4 + $0x4180] sm:$0xff]  ;;  %5650 = vmatprep.subr.mxu1 %v5311_v45  ;;  %v5455_v45 = vld [vmem:[#allocation4 + $0x4e08] sm:$0xff] }
 0x630   : > { %4812 = vmatpush2.msra.mxu0 %v3982_v47  ;;  %v5310_v47 = vld [vmem:[#allocation4 + $0x4980] sm:$0xff] }
 0x631   : > { %4813 = vmatprep.subr.mxu0 %v3975_v49  ;;  %v5047_v49 = vld [vmem:[#allocation4 + $0x4148] sm:$0xff]  ;;  %5651 = vmatpush1.msra.mxu1 %v5310_v47  ;;  %v5198_v47 = vld [vmem:[#allocation4 + $0x4600] sm:$0xff] }
 0x632   : > { %4814 = vmatpush2.msra.mxu0 %v3974_v50  ;;  %v5303_v50 = vld [vmem:[#allocation4 + $0x4948] sm:$0xff] }
 0x633   : > { %4815 = vmatprep.subr.mxu0 %v3967_v52  ;;  %v5046_v52 = vld [vmem:[#allocation4 + $0x4140] sm:$0xff]  ;;  %5652 = vmatprep.subr.mxu1 %v5303_v50  ;;  %v5191_v50 = vld [vmem:[#allocation4 + $0x45c8] sm:$0xff] }
 0x634   : > { %4816 = vmatpush2.msra.mxu0 %v3966_v56  ;;  %v5302_v56 = vld [vmem:[#allocation4 + $0x4940] sm:$0xff] }
 0x635   : > { %4817 = vmatprep.subr.mxu0 %v3959_v59  ;;  %v5039_v59 = vld [vmem:[#allocation4 + $0x4108] sm:$0xff]  ;;  %5653 = vmatpush1.msra.mxu1 %v5302_v56  ;;  %v8267_v56 = vld [vmem:[#allocation6 + $0x18] sm:$0xff] }
 0x636   : > { %4818 = vmatpush2.msra.mxu0 %v3958_v60  ;;  %v5295_v60 = vld [vmem:[#allocation4 + $0x4908] sm:$0xff] }
 0x637   : > { %4819 = vmatprep.subr.mxu0 %v3951_v63  ;;  %5654 = vmatprep.subr.mxu1 %v5295_v60  ;;  %v5038_v63 = vld [vmem:[#allocation4 + $0x4100] sm:$0xff] }
 0x638   : > { %4820 = vmatpush2.msra.mxu0 %v3950_v0  ;;  %v5294_v0 = vld [vmem:[#allocation4 + $0x4900] sm:$0xff] }
 0x639   : > { %4821 = vmatprep.subr.mxu0 %v3943_v3  ;;  %5655 = vmatpush1.msra.mxu1 %v5294_v0  ;;  %v5031_v3 = vld [vmem:[#allocation4 + $0x40c8] sm:$0xff]  ;;  %v5446_v60 = vld [vmem:[#allocation4 + $0x4dc0] sm:$0xff] }
 0x63a   : > { %4822 = vmatpush2.msra.mxu0 %v3942_v23  ;;  %v5287_v23 = vld [vmem:[#allocation4 + $0x48c8] sm:$0xff] }
 0x63b   : > { %4823 = vmatprep.subr.mxu0 %v3935_v25  ;;  %5656 = vmatprep.subr.mxu1 %v5287_v23  ;;  %v5030_v25 = vld [vmem:[#allocation4 + $0x40c0] sm:$0xff]  ;;  %v5439_v0 = vld [vmem:[#allocation4 + $0x4d88] sm:$0xff] }
 0x63c   : > { %4824 = vmatpush2.msra.mxu0 %v3934_v21  ;;  %v5286_v21 = vld [vmem:[#allocation4 + $0x48c0] sm:$0xff] }
 0x63d   : > { %4825 = vmatprep.subr.mxu0 %v3927_v6  ;;  %5657 = vmatpush1.msra.mxu1 %v5286_v21  ;;  %v5023_v6 = vld [vmem:[#allocation4 + $0x4088] sm:$0xff]  ;;  %v5438_v23 = vld [vmem:[#allocation4 + $0x4d80] sm:$0xff] }
 0x63e   : > { %4826 = vmatpush2.msra.mxu0 %v3926_v42  ;;  %v5279_v42 = vld [vmem:[#allocation4 + $0x4888] sm:$0xff] }
 0x63f   : > { %4827 = vmatprep.subr.mxu0 %v3919_v43  ;;  %5658 = vmatprep.subr.mxu1 %v5279_v42  ;;  %v5022_v43 = vld [vmem:[#allocation4 + $0x4080] sm:$0xff]  ;;  %v5431_v42 = vld [vmem:[#allocation4 + $0x4d48] sm:$0xff] }
 0x640   : > { %4828 = vmatpush2.msra.mxu0 %v3918_v51  ;;  %v5278_v51 = vld [vmem:[#allocation4 + $0x4880] sm:$0xff] }
 0x641   : > { %4830 = vmatmul.mubr.f32.vlgmr.msra.gmra.mxu0 %v8253_v16  ;;  %5561 = vmatprep.subr.mxu0 %v5127_v26  ;;  %v5103_v16 = vld [vmem:[#allocation4 + $0x4308] sm:$0xff] }
 0x642   : > { %5562 = vmatpush1.msra.mxu0 %v5126_v27  ;;  %5659 = vmatpush1.msra.mxu1 %v5278_v51  ;;  %v5015_v26 = vld [vmem:[#allocation4 + $0x4048] sm:$0xff]  ;;  %v5014_v27 = vld [vmem:[#allocation4 + $0x4040] sm:$0xff] }
 0x643   : > { %5563 = vmatprep.subr.mxu0 %v5119_v24  ;;  %5660 = vmatprep.subr.mxu1 %v5271_v7  ;;  %v5007_v24 = vld [vmem:[#allocation4 + $0x4008] sm:$0xff]  ;;  %v5430_v51 = vld [vmem:[#allocation4 + $0x4d40] sm:$0xff] }
 0x644   : > { %5564 = vmatpush1.msra.mxu0 %v5118_v10  ;;  %5661 = vmatpush1.msra.mxu1 %v5270_v9  ;;  %v5006_v10 = vld [vmem:[#allocation4 + $0x4000] sm:$0xff]  ;;  %v5423_v7 = vld [vmem:[#allocation4 + $0x4d08] sm:$0xff] }
 0x645   : > { %5565 = vmatprep.subr.mxu0 %v5111_v20  ;;  %5662 = vmatprep.subr.mxu1 %v5263_v22  ;;  %v5255_v20 = vld [vmem:[#allocation4 + $0x47c8] sm:$0xff]  ;;  %v5166_v9 = vld [vmem:[#allocation4 + $0x4500] sm:$0xff]  ;;  %v4302_v22 = vrot.slane %v8267_v56, %v8078_v54 }
 0x646   : > { %5566 = vmatpush1.msra.mxu0 %v5110_v15  ;;  %5663 = vmatpush1.msra.mxu1 %v5262_v11  ;;  %v5254_v15 = vld [vmem:[#allocation4 + $0x47c0] sm:$0xff]  ;;  %v5415_v11 = vld [vmem:[#allocation4 + $0x4cc8] sm:$0xff] }
 0x647   : > { %5567 = vmatprep.subr.mxu0 %v5103_v16  ;;  %5664 = vmatprep.subr.mxu1 %v5511_v13  ;;  %v5247_v16 = vld [vmem:[#allocation4 + $0x4788] sm:$0xff]  ;;  %v4310_v13 = vrot.slane %v8267_v56, %v8087_v61 }
 0x648   : > { %5568 = vmatpush1.msra.mxu0 %v5102_v62  ;;  %5665 = vmatpush2.msra.mxu1 %v5510_v17  ;;  %v5246_v62 = vld [vmem:[#allocation4 + $0x4780] sm:$0xff] }
 0x649   : > { %5569 = vmatprep.subr.mxu0 %v5095_v29  ;;  %5666 = vmatprep.subr.mxu1 %v5503_v44  ;;  %v5239_v29 = vld [vmem:[#allocation4 + $0x4748] sm:$0xff]  ;;  %v5414_v17 = vld [vmem:[#allocation4 + $0x4cc0] sm:$0xff] }
 0x64a   : > { %5570 = vmatpush1.msra.mxu0 %v5094_v31  ;;  %5667 = vmatpush2.msra.mxu1 %v5502_v28  ;;  %v5238_v31 = vld [vmem:[#allocation4 + $0x4740] sm:$0xff]  ;;  %v5151_v44 = vld [vmem:[#allocation4 + $0x4488] sm:$0xff] }
 0x64b   : > { %5571 = vmatprep.subr.mxu0 %v5087_v53  ;;  %5668 = vmatprep.subr.mxu1 %v5495_v30  ;;  %v5231_v53 = vld [vmem:[#allocation4 + $0x4708] sm:$0xff]  ;;  %v5150_v30 = vld [vmem:[#allocation4 + $0x4480] sm:$0xff] }
 0x64c   : > { %5572 = vmatpush1.msra.mxu0 %v5086_v32  ;;  %5669 = vmatpush2.msra.mxu1 %v5494_v55  ;;  %v5230_v32 = vld [vmem:[#allocation4 + $0x4700] sm:$0xff] }
 0x64d   : > { %5573 = vmatprep.subr.mxu0 %v5079_v4  ;;  %5670 = vmatprep.subr.mxu1 %v5487_v58  ;;  %v5223_v4 = vld [vmem:[#allocation4 + $0x46c8] sm:$0xff] }
 0x64e   : > { %5574 = vmatpush1.msra.mxu0 %v5078_v19  ;;  %5671 = vmatpush2.msra.mxu1 %v5486_v1  ;;  %v5222_v19 = vld [vmem:[#allocation4 + $0x46c0] sm:$0xff]  ;;  %v5143_v58 = vld [vmem:[#allocation4 + $0x4448] sm:$0xff] }
 0x64f   : > { %5575 = vmatprep.subr.mxu0 %v5071_v34  ;;  %5672 = vmatprep.subr.mxu1 %v5479_v33  ;;  %v5215_v34 = vld [vmem:[#allocation4 + $0x4688] sm:$0xff]  ;;  %v5398_v33 = vld [vmem:[#allocation4 + $0x4c40] sm:$0xff] }
 0x650   : > { %5576 = vmatpush1.msra.mxu0 %v5070_v36  ;;  %5673 = vmatpush2.msra.mxu1 %v5478_v57  ;;  %v5214_v36 = vld [vmem:[#allocation4 + $0x4680] sm:$0xff]  ;;  %v5135_v57 = vld [vmem:[#allocation4 + $0x4408] sm:$0xff] }
 0x651   : > { %5577 = vmatprep.subr.mxu0 %v5063_v38  ;;  %5674 = vmatprep.subr.mxu1 %v5471_v35  ;;  %v5207_v38 = vld [vmem:[#allocation4 + $0x4648] sm:$0xff] }
 0x652   : > { %5578 = vmatpush1.msra.mxu0 %v5062_v39  ;;  %5675 = vmatpush2.msra.mxu1 %v5470_v37  ;;  %v5206_v39 = vld [vmem:[#allocation4 + $0x4640] sm:$0xff] }
 0x653   : > { %5579 = vmatprep.subr.mxu0 %v5055_v48  ;;  %5676 = vmatprep.subr.mxu1 %v5463_v40  ;;  %v5199_v48 = vld [vmem:[#allocation4 + $0x4608] sm:$0xff]  ;;  %v5390_v37 = vld [vmem:[#allocation4 + $0x4c00] sm:$0xff] }
 0x654   : > { %5580 = vmatpush1.msra.mxu0 %v5054_v46  ;;  %5677 = vmatpush2.msra.mxu1 %v5462_v41  ;;  %v4405_v46 = vpop.f32.mrf.mxu0 }
 0x655   : > { %5581 = vmatprep.subr.mxu0 %v5047_v49  ;;  %5678 = vmatprep.subr.mxu1 %v5455_v45  ;;  %v5454_v49 = vld [vmem:[#allocation4 + $0x4e00] sm:$0xff]  ;;  %v4406_v55 = vadd.f32 %v4405_v46, %v4302_v22  ;;  %v5129_v46 = vld [vmem:[#allocation4 + $0x43d8] sm:$0xff] }
 0x656   : > { %5582 = vmatpush1.msra.mxu0 %v5046_v52  ;;  %5679 = vmatpush2.msra.mxu1 %v5454_v49  ;;  %v5447_v52 = vld [vmem:[#allocation4 + $0x4dc8] sm:$0xff]  ;;  %v4407_v21 = vpop.f32.mrf.mxu0  ;;  %v5321_v22 = vld [vmem:[#allocation4 + $0x49d8] sm:$0xff] }
 0x657   : > { %5583 = vmatprep.subr.mxu0 %v5039_v59  ;;  %5680 = vmatprep.subr.mxu1 %v5447_v52  ;;  %v5190_v59 = vld [vmem:[#allocation4 + $0x45c0] sm:$0xff]  ;;  %v5384_v52 = vld [vmem:[#allocation4 + $0x4bd0] sm:$0xff] }
 0x658   : > { %5584 = vmatpush1.msra.mxu0 %v5038_v63  ;;  %v5183_v63 = vld [vmem:[#allocation4 + $0x4588] sm:$0xff]  ;;  %5681 = vmatpush2.msra.mxu1 %v5446_v60  ;;  %v5377_v60 = vld [vmem:[#allocation4 + $0x4b98] sm:$0xff] }
 0x659   : > { %5585 = vmatprep.subr.mxu0 %v5031_v3  ;;  %v5182_v3 = vld [vmem:[#allocation4 + $0x4580] sm:$0xff]  ;;  %5682 = vmatprep.subr.mxu1 %v5439_v0  ;;  %v5376_v0 = vld [vmem:[#allocation4 + $0x4b90] sm:$0xff] }
 0x65a   : > { %5586 = vmatpush1.msra.mxu0 %v5030_v25  ;;  %v4476_v25 = vpop.f32.mrf.mxu1  ;;  %5683 = vmatpush2.msra.mxu1 %v5438_v23 }
 0x65b   : > { %5587 = vmatprep.subr.mxu0 %v5023_v6  ;;  %v5175_v6 = vld [vmem:[#allocation4 + $0x4548] sm:$0xff]  ;;  %5684 = vmatprep.subr.mxu1 %v5431_v42  ;;  %v5353_v42 = vld [vmem:[#allocation4 + $0x4ad8] sm:$0xff] }
 0x65c   : > { %5588 = vmatpush1.msra.mxu0 %v5022_v43  ;;  %v5174_v43 = vld [vmem:[#allocation4 + $0x4540] sm:$0xff]  ;;  %5685 = vmatpush2.msra.mxu1 %v5430_v51  ;;  %v5345_v51 = vld [vmem:[#allocation4 + $0x4a98] sm:$0xff] }
 0x65d   : > { %5589 = vmatprep.subr.mxu0 %v5015_v26  ;;  %v5167_v26 = vld [vmem:[#allocation4 + $0x4508] sm:$0xff]  ;;  %5686 = vmatprep.subr.mxu1 %v5423_v7  ;;  %v5337_v7 = vld [vmem:[#allocation4 + $0x4a58] sm:$0xff] }
 0x65e   : > { %5590 = vmatpush1.msra.mxu0 %v5014_v27 }
 0x65f   : > { %5591 = vmatprep.subr.mxu0 %v5007_v24  ;;  %v5422_v24 = vld [vmem:[#allocation4 + $0x4d00] sm:$0xff] }
 0x660   : > { %5592 = vmatpush1.msra.mxu0 %v5006_v10  ;;  %v5159_v10 = vld [vmem:[#allocation4 + $0x44c8] sm:$0xff]  ;;  %5687 = vmatpush2.msra.mxu1 %v5422_v24  ;;  %v5328_v24 = vld [vmem:[#allocation4 + $0x4a10] sm:$0xff] }
 0x661   : > { %5593 = vmatprep.subr.mxu0 %v5255_v20  ;;  %v4478_v20 = vpop.f32.mrf.mxu1  ;;  %5688 = vmatprep.subr.mxu1 %v5415_v11 }
 0x662   : > { %5594 = vmatpush2.msra.mxu0 %v5254_v15  ;;  %v5158_v15 = vld [vmem:[#allocation4 + $0x44c0] sm:$0xff]  ;;  %5689 = vmatpush2.msra.mxu1 %v5414_v17 }
 0x663   : > { %5595 = vmatprep.subr.mxu0 %v5247_v16  ;;  %v4314_v16 = vrot.slane %v8267_v56, %v8090_v2  ;;  %v4618_v28 = vpop.f32.mrf.mxu1 }
 0x664   : > { %5596 = vmatpush2.msra.mxu0 %v5246_v62  ;;  %v5407_v62 = vld [vmem:[#allocation4 + $0x4c88] sm:$0xff] }
 0x665   : > { %5597 = vmatprep.subr.mxu0 %v5239_v29  ;;  %5690 = vmatprep.subr.mxu1 %v5407_v62  ;;  %v4620_v35 = vpop.f32.mrf.mxu1 }
 0x666   : > { %5598 = vmatpush2.msra.mxu0 %v5238_v31  ;;  %v5406_v31 = vld [vmem:[#allocation4 + $0x4c80] sm:$0xff] }
 0x667   : > { %5599 = vmatprep.subr.mxu0 %v5231_v53  ;;  %v4306_v53 = vrot.slane %v8267_v56, %v8095_v12  ;;  %5691 = vmatpush2.msra.mxu1 %v5406_v31 }
 0x668   : > { %5600 = vmatpush2.msra.mxu0 %v5230_v32  ;;  %v5399_v32 = vld [vmem:[#allocation4 + $0x4c48] sm:$0xff] }
 0x669   : > { %5601 = vmatprep.subr.mxu0 %v5223_v4  ;;  %v5142_v4 = vld [vmem:[#allocation4 + $0x4440] sm:$0xff]  ;;  %5692 = vmatprep.subr.mxu1 %v5399_v32  ;;  %v4408_v40 = vadd.f32 %v4407_v21, %v4306_v53  ;;  %v5361_v21 = vld [vmem:[#allocation4 + $0x4b18] sm:$0xff] }
 0x66a   : > { %5602 = vmatpush2.msra.mxu0 %v5222_v19  ;;  %5693 = vmatpush2.msra.mxu1 %v5398_v33  ;;  %v5297_v53 = vld [vmem:[#allocation4 + $0x4918] sm:$0xff] }
 0x66b   : > { %5603 = vmatprep.subr.mxu0 %v5215_v34  ;;  %v5391_v34 = vld [vmem:[#allocation4 + $0x4c08] sm:$0xff]  ;;  %v5289_v33 = vld [vmem:[#allocation4 + $0x48d8] sm:$0xff] }
 0x66c   : > { %5604 = vmatpush2.msra.mxu0 %v5214_v36  ;;  %v5134_v36 = vld [vmem:[#allocation4 + $0x4400] sm:$0xff]  ;;  %5694 = vmatprep.subr.mxu1 %v5391_v34 }
 0x66d   : > { %5605 = vmatprep.subr.mxu0 %v5207_v38  ;;  %v4477_v38 = vadd.f32 %v4476_v25, %v4406_v55  ;;  %5695 = vmatpush2.msra.mxu1 %v5390_v37  ;;  %v5368_v25 = vld [vmem:[#allocation4 + $0x4b50] sm:$0xff]  ;;  %v4322_v55 = vrot.slane %v8267_v56, %v8119_v18 }
 0x66e   : > { %5606 = vmatpush2.msra.mxu0 %v5206_v39  ;;  %v8277_v39 = vld.sshfl [vmem:[#allocation2 + $0x10] sm:$0x33 pattern:$0x76325410] }
 0x66f   : > { %5607 = vmatprep.subr.mxu0 %v5199_v48  ;;  %v8281_v48 = vcombine.high %v8277_v39, %v8277_v39  ;;  %v7595_v49 = vmul.f32 -1.442695, %v4477_v38  ;;  %v5281_v38 = vld [vmem:[#allocation4 + $0x4898] sm:$0xff] }
 0x670   : > { %5608 = vmatpush2.msra.mxu0 %v5198_v47  ;;  %v5385_v47 = vld [vmem:[#allocation4 + $0x4bd8] sm:$0xff] }
 0x671   : > { %5609 = vmatprep.subr.mxu0 %v5191_v50  ;;  %5696 = vmatprep.mubr.f32.mxu1 %v8281_v48  ;;  %v4479_v50 = vadd.f32 %v4478_v20, %v4408_v40  ;;  %7774 = vpow2.f32 %v7595_v49  ;;  %v5313_v20 = vld [vmem:[#allocation4 + $0x4998] sm:$0xff]  ;;  %v5280_v40 = vld [vmem:[#allocation4 + $0x4890] sm:$0xff] }
 0x672   : > { %5610 = vmatpush2.msra.mxu0 %v5190_v59  ;;  %5774 = vmatprep.subr.mxu1 %v5385_v47  ;;  %v5265_v47 = vld [vmem:[#allocation4 + $0x4818] sm:$0xff]  ;;  %v5264_v49 = vld [vmem:[#allocation4 + $0x4810] sm:$0xff] }
 0x673   : > { %5611 = vmatprep.subr.mxu0 %v5183_v63  ;;  %5697 = vmatmul.mubr.f32.vlgmr.msra.gmra.mxu1 %v8277_v39  ;;  %v7596_v23 = vmul.f32 -1.442695, %v4479_v50  ;;  %v5513_v50 = vld [vmem:[#allocation4 + $0x4fd8] sm:$0xff] }
 0x674   : > { %5612 = vmatpush2.msra.mxu0 %v5182_v3  ;;  %5775 = vmatpush1.msra.mxu1 %v5384_v52  ;;  %v5369_v3 = vld [vmem:[#allocation4 + $0x4b58] sm:$0xff]  ;;  %v5512_v52 = vld [vmem:[#allocation4 + $0x4fd0] sm:$0xff] }
 0x675   : > { %5613 = vmatprep.subr.mxu0 %v5175_v6  ;;  %5838 = vmatprep.mubr.f32.mxu1 %v8281_v48  ;;  %v5360_v6 = vld [vmem:[#allocation4 + $0x4b10] sm:$0xff] }
 0x676   : > { %5614 = vmatpush2.msra.mxu0 %v5174_v43  ;;  %5776 = vmatprep.subr.mxu1 %v5377_v60  ;;  %v5352_v43 = vld [vmem:[#allocation4 + $0x4ad0] sm:$0xff] }
 0x677   : > { %5615 = vmatprep.subr.mxu0 %v5167_v26  ;;  %5777 = vmatpush1.msra.mxu1 %v5376_v0  ;;  %v5344_v26 = vld [vmem:[#allocation4 + $0x4a90] sm:$0xff] }
 0x678   : > { %5616 = vmatpush2.msra.mxu0 %v5166_v9  ;;  %5778 = vmatprep.subr.mxu1 %v5369_v3  ;;  %v5329_v9 = vld [vmem:[#allocation4 + $0x4a18] sm:$0xff]  ;;  %v5504_v60 = vld [vmem:[#allocation4 + $0x4f90] sm:$0xff] }
 0x679   : > { %5617 = vmatprep.subr.mxu0 %v5159_v10  ;;  %5779 = vmatpush1.msra.mxu1 %v5368_v25  ;;  %v5320_v10 = vld [vmem:[#allocation4 + $0x49d0] sm:$0xff]  ;;  %v5489_v25 = vld [vmem:[#allocation4 + $0x4f18] sm:$0xff] }
 0x67a   : > { %5618 = vmatpush2.msra.mxu0 %v5158_v15  ;;  %5780 = vmatprep.subr.mxu1 %v5361_v21  ;;  %v5312_v15 = vld [vmem:[#allocation4 + $0x4990] sm:$0xff] }
 0x67b   : > { %5619 = vmatprep.subr.mxu0 %v5151_v44  ;;  %5781 = vmatpush1.msra.mxu1 %v5360_v6  ;;  %v5305_v44 = vld [vmem:[#allocation4 + $0x4958] sm:$0xff]  ;;  %v7601_v0 = vld.sshfl [vmem:[#allocation3 + $0xc] sm:$0x33 pattern:$0x76325410] }
 0x67c   : > { %5620 = vmatpush2.msra.mxu0 %v5150_v30  ;;  %5782 = vmatprep.subr.mxu1 %v5353_v42  ;;  %v5496_v3 = vld [vmem:[#allocation4 + $0x4f50] sm:$0xff] }
 0x67d   : > { %5621 = vmatprep.subr.mxu0 %v5143_v58  ;;  %5783 = vmatpush1.msra.mxu1 %v5352_v43  ;;  %v5488_v6 = vld [vmem:[#allocation4 + $0x4f10] sm:$0xff]  ;;  %v4953_v43 = vcombine.high %v7601_v0, %v7601_v0 }
 0x67e   : > { %5622 = vmatpush2.msra.mxu0 %v5142_v4  ;;  %5784 = vmatprep.subr.mxu1 %v5345_v51  ;;  %v7775_v11 = vpop.eup %7774  ;;  %v5481_v51 = vld [vmem:[#allocation4 + $0x4ed8] sm:$0xff] }
 0x67f   : > { %5623 = vmatprep.subr.mxu0 %v5135_v57  ;;  %5785 = vmatpush1.msra.mxu1 %v5344_v26  ;;  %v4913_v62 = vadd.f32 1.0, %v7775_v11 }
 0x680   : > { %5624 = vmatpush2.msra.mxu0 %v5134_v36  ;;  %5786 = vmatprep.subr.mxu1 %v5337_v7  ;;  %v5480_v7 = vld [vmem:[#allocation4 + $0x4ed0] sm:$0xff] }
 0x681   : > { %v4547_v27 = vpop.f32.mrf.mxu0  ;;  %5703 = vmatprep.subr.mxu0 %v5129_v46  ;;  %v5272_v46 = vld [vmem:[#allocation4 + $0x4850] sm:$0xff] }
 0x682   : > { %v4548_v1 = vadd.f32 %v4547_v27, %v4310_v13  ;;  %v5336_v27 = vld [vmem:[#allocation4 + $0x4a50] sm:$0xff] }
 0x683   : > { %v4549_v29 = vpop.f32.mrf.mxu0  ;;  %5787 = vmatpush1.msra.mxu1 %v5336_v27 }
 0x684   : > { %v4550_v19 = vadd.f32 %v4549_v29, %v4314_v16  ;;  %v4619_v41 = vadd.f32 %v4618_v28, %v4548_v1  ;;  %5788 = vmatprep.subr.mxu1 %v5329_v9  ;;  %v4318_v16 = vrot.slane %v8267_v56, %v8116_v14  ;;  %v4760_v28 = vpop.f32.mrf.mxu1  ;;  %v5304_v29 = vld [vmem:[#allocation4 + $0x4950] sm:$0xff] }
 0x685   : > { %5789 = vmatpush1.msra.mxu1 %v5328_v24  ;;  %v5296_v1 = vld [vmem:[#allocation4 + $0x4910] sm:$0xff]  ;;  %v5473_v24 = vld [vmem:[#allocation4 + $0x4e98] sm:$0xff] }
 0x686   : > { %v4621_v45 = vadd.f32 %v4620_v35, %v4550_v19  ;;  %v7597_v59 = vmul.f32 -1.442695, %v4619_v41  ;;  %5790 = vmatprep.subr.mxu1 %v5321_v22  ;;  %v4762_v34 = vpop.f32.mrf.mxu1  ;;  %v5288_v35 = vld [vmem:[#allocation4 + $0x48d0] sm:$0xff] }
 0x687   : > { %5791 = vmatpush1.msra.mxu1 %v5320_v10  ;;  %v5472_v10 = vld [vmem:[#allocation4 + $0x4e90] sm:$0xff] }
 0x688   : > { %v7598_v63 = vmul.f32 -1.442695, %v4621_v45  ;;  %7776 = vpow2.f32 %v7597_v59  ;;  %5792 = vmatprep.subr.mxu1 %v5313_v20  ;;  %v5273_v45 = vld [vmem:[#allocation4 + $0x4858] sm:$0xff] }
 0x689   : > { %5793 = vmatpush1.msra.mxu1 %v5312_v15  ;;  %v5505_v59 = vld [vmem:[#allocation4 + $0x4f98] sm:$0xff] }
 0x68a   : > { %7778 = vpow2.f32 %v7598_v63  ;;  %5794 = vmatprep.subr.mxu1 %v5305_v44  ;;  %v5497_v63 = vld [vmem:[#allocation4 + $0x4f58] sm:$0xff] }
 0x68b   : > { %7780 = vpow2.f32 %v7596_v23  ;;  %5795 = vmatpush1.msra.mxu1 %v5304_v29  ;;  %v5465_v15 = vld [vmem:[#allocation4 + $0x4e58] sm:$0xff] }
 0x68c   : > { %5796 = vmatprep.subr.mxu1 %v5297_v53  ;;  %7782 = vrcp.f32 %v4913_v62  ;;  %v5457_v62 = vld [vmem:[#allocation4 + $0x4e18] sm:$0xff]  ;;  %v5440_v53 = vld [vmem:[#allocation4 + $0x4d90] sm:$0xff] }
 0x68d   : > { %5797 = vmatpush1.msra.mxu1 %v5296_v1  ;;  %v5425_v1 = vld [vmem:[#allocation4 + $0x4d18] sm:$0xff] }
 0x68e   : > { %5798 = vmatprep.subr.mxu1 %v5289_v33  ;;  %v5417_v33 = vld [vmem:[#allocation4 + $0x4cd8] sm:$0xff] }
 0x68f   : > { %5799 = vmatpush1.msra.mxu1 %v5288_v35  ;;  %v5401_v35 = vld [vmem:[#allocation4 + $0x4c58] sm:$0xff] }
 0x690   : > { %5800 = vmatprep.subr.mxu1 %v5281_v38  ;;  %v5392_v38 = vld [vmem:[#allocation4 + $0x4c10] sm:$0xff] }
 0x691   : > { %5801 = vmatpush1.msra.mxu1 %v5280_v40  ;;  %v5387_v40 = vld [vmem:[#allocation4 + $0x4be8] sm:$0xff] }
 0x692   : > { %5802 = vmatprep.subr.mxu1 %v5273_v45  ;;  %v5379_v45 = vld [vmem:[#allocation4 + $0x4ba8] sm:$0xff] }
 0x693   : > { %5803 = vmatpush1.msra.mxu1 %v5272_v46  ;;  %v5378_v46 = vld [vmem:[#allocation4 + $0x4ba0] sm:$0xff] }
 0x694   : > { %5804 = vmatprep.subr.mxu1 %v5265_v47  ;;  %v5371_v47 = vld [vmem:[#allocation4 + $0x4b68] sm:$0xff] }
 0x695   : > { %v7777_v13 = vpop.eup %7776  ;;  %5805 = vmatpush1.msra.mxu1 %v5264_v49  ;;  %v5370_v49 = vld [vmem:[#allocation4 + $0x4b60] sm:$0xff] }
 0x696   : > { %v4925_v31 = vadd.f32 1.0, %v7777_v13  ;;  %5806 = vmatprep.subr.mxu1 %v5513_v50  ;;  %v5363_v50 = vld [vmem:[#allocation4 + $0x4b28] sm:$0xff] }
 0x697   : > { %v7779_v17 = vpop.eup %7778  ;;  %5807 = vmatpush2.msra.mxu1 %v5512_v52  ;;  %v5362_v52 = vld [vmem:[#allocation4 + $0x4b20] sm:$0xff] }
 0x698   : > { %v7781_v30 = vpop.eup %7780  ;;  %v4926_v58 = vadd.f32 1.0, %v7779_v17  ;;  %7784 = vrcp.f32 %v4925_v31  ;;  %5808 = vmatprep.subr.mxu1 %v5505_v59  ;;  %v5464_v17 = vld [vmem:[#allocation4 + $0x4e50] sm:$0xff]  ;;  %v5355_v59 = vld [vmem:[#allocation4 + $0x4ae8] sm:$0xff] }
 0x699   : > { %v4914_v19 = vadd.f32 1.0, %v7781_v30  ;;  %5809 = vmatpush2.msra.mxu1 %v5504_v60  ;;  %v7783_v23 = vpop.eup %7782  ;;  %v5449_v30 = vld [vmem:[#allocation4 + $0x4dd8] sm:$0xff]  ;;  %v5448_v31 = vld [vmem:[#allocation4 + $0x4dd0] sm:$0xff]  ;;  %v5354_v60 = vld [vmem:[#allocation4 + $0x4ae0] sm:$0xff] }
 0x69a   : > { %7786 = vrcp.f32 %v4926_v58  ;;  %5810 = vmatprep.subr.mxu1 %v5497_v63  ;;  %v5433_v58 = vld [vmem:[#allocation4 + $0x4d58] sm:$0xff]  ;;  %v5347_v63 = vld [vmem:[#allocation4 + $0x4aa8] sm:$0xff] }
 0x69b   : > { %5811 = vmatpush2.msra.mxu1 %v5496_v3  ;;  %v5339_v3 = vld [vmem:[#allocation4 + $0x4a68] sm:$0xff] }
 0x69c   : > { %5812 = vmatprep.subr.mxu1 %v5489_v25  ;;  %v5331_v25 = vld [vmem:[#allocation4 + $0x4a28] sm:$0xff] }
 0x69d   : > { %5813 = vmatpush2.msra.mxu1 %v5488_v6  ;;  %v5323_v6 = vld [vmem:[#allocation4 + $0x49e8] sm:$0xff] }
 0x69e   : > { %5814 = vmatprep.subr.mxu1 %v5481_v51  ;;  %v5314_v51 = vld [vmem:[#allocation4 + $0x49a0] sm:$0xff] }
 0x69f   : > { %5815 = vmatpush2.msra.mxu1 %v5480_v7  ;;  %v5307_v7 = vld [vmem:[#allocation4 + $0x4968] sm:$0xff] }
 0x6a0   : > { %5816 = vmatprep.subr.mxu1 %v5473_v24  ;;  %v5299_v24 = vld [vmem:[#allocation4 + $0x4928] sm:$0xff] }
 0x6a1   : > { %5817 = vmatpush2.msra.mxu1 %v5472_v10  ;;  %v4902_v10 = vpop.f32.mrf.mxu1 }
 0x6a2   : > { %5818 = vmatprep.subr.mxu1 %v5465_v15 }
 0x6a3   : > { %5819 = vmatpush2.msra.mxu1 %v5464_v17  ;;  %v5290_v17 = vld [vmem:[#allocation4 + $0x48e0] sm:$0xff] }
 0x6a4   : > { %5820 = vmatprep.subr.mxu1 %v5457_v62 }
 0x6a5   : > { %v7785_v21 = vpop.eup %7784 }
 0x6a6   : > { %v4956_v11 = vmul.f32 %v7785_v21, %v7601_v0  ;;  %v5346_v0 = vld [vmem:[#allocation4 + $0x4aa0] sm:$0xff] }
 0x6a7   : > { %v7787_v42 = vpop.eup %7786  ;;  %v5330_v21 = vld [vmem:[#allocation4 + $0x4a20] sm:$0xff] }
 0x6a8   : > { %v4957_v20 = vmul.f32 %v7787_v42, %v4953_v43  ;;  %v5322_v42 = vld [vmem:[#allocation4 + $0x49e0] sm:$0xff]  ;;  %v5315_v43 = vld [vmem:[#allocation4 + $0x49a8] sm:$0xff] }
 0x6c1   : > { %v4689_v32 = vpop.f32.mrf.mxu0 }
 0x6c2   : > { %v4690_v4 = vadd.f32 %v4689_v32, %v4318_v16  ;;  %v5432_v32 = vld [vmem:[#allocation4 + $0x4d50] sm:$0xff] }
 0x6c3   : > { %v4691_v57 = vpop.f32.mrf.mxu0 }
 0x6c4   : > { %v4761_v36 = vadd.f32 %v4760_v28, %v4690_v4  ;;  %v4692_v37 = vadd.f32 %v4691_v57, %v4322_v55  ;;  %v5456_v28 = vld [vmem:[#allocation4 + $0x4e10] sm:$0xff]  ;;  %v5441_v55 = vld [vmem:[#allocation4 + $0x4d98] sm:$0xff] }
 0x6c5   : > { %5821 = vmatpush2.msra.mxu1 %v5456_v28  ;;  %v5424_v4 = vld [vmem:[#allocation4 + $0x4d10] sm:$0xff]  ;;  %v5409_v57 = vld [vmem:[#allocation4 + $0x4c98] sm:$0xff] }
 0x6c6   : > { %7788 = vtanh.f32 %v4761_v36  ;;  %v4763_v41 = vadd.f32 %v4762_v34, %v4692_v37  ;;  %5822 = vmatprep.subr.mxu1 %v5449_v30  ;;  %v5408_v34 = vld [vmem:[#allocation4 + $0x4c90] sm:$0xff]  ;;  %v5393_v37 = vld [vmem:[#allocation4 + $0x4c18] sm:$0xff]  ;;  %v4904_v30 = vpop.f32.mrf.mxu1 }
 0x6c7   : > { %7790 = vrcp.f32 %v4914_v19  ;;  %5823 = vmatpush2.msra.mxu1 %v5448_v31  ;;  %v5416_v19 = vld [vmem:[#allocation4 + $0x4cd0] sm:$0xff]  ;;  %v5282_v31 = vld [vmem:[#allocation4 + $0x48a0] sm:$0xff] }
 0x6c8   : > { %7792 = vtanh.f32 %v4763_v41  ;;  %5824 = vmatprep.subr.mxu1 %v5441_v55  ;;  %v5400_v36 = vld [vmem:[#allocation4 + $0x4c50] sm:$0xff]  ;;  %v5386_v41 = vld [vmem:[#allocation4 + $0x4be0] sm:$0xff] }
 0x6c9   : > { %5825 = vmatpush2.msra.mxu1 %v5440_v53  ;;  %v5275_v53 = vld [vmem:[#allocation4 + $0x4868] sm:$0xff] }
 0x6ca   : > { %5826 = vmatprep.subr.mxu1 %v5433_v58  ;;  %v5274_v58 = vld [vmem:[#allocation4 + $0x4860] sm:$0xff] }
 0x6cb   : > { %5827 = vmatpush2.msra.mxu1 %v5432_v32 }
 0x6cc   : > { %5828 = vmatprep.subr.mxu1 %v5425_v1  ;;  %v5267_v1 = vld [vmem:[#allocation4 + $0x4828] sm:$0xff] }
 0x6cd   : > { %5829 = vmatpush2.msra.mxu1 %v5424_v4  ;;  %v5266_v4 = vld [vmem:[#allocation4 + $0x4820] sm:$0xff] }
 0x6ce   : > { %5830 = vmatprep.subr.mxu1 %v5417_v33  ;;  %v5515_v33 = vld [vmem:[#allocation4 + $0x4fe8] sm:$0xff] }
 0x6cf   : > { %5831 = vmatpush2.msra.mxu1 %v5416_v19  ;;  %v5514_v19 = vld [vmem:[#allocation4 + $0x4fe0] sm:$0xff] }
 0x6d0   : > { %5832 = vmatprep.subr.mxu1 %v5409_v57  ;;  %v5507_v57 = vld [vmem:[#allocation4 + $0x4fa8] sm:$0xff] }
 0x6d1   : > { %5833 = vmatpush2.msra.mxu1 %v5408_v34  ;;  %v5506_v34 = vld [vmem:[#allocation4 + $0x4fa0] sm:$0xff] }
 0x6d2   : > { %5834 = vmatprep.subr.mxu1 %v5401_v35  ;;  %v5499_v35 = vld [vmem:[#allocation4 + $0x4f68] sm:$0xff] }
 0x6d3   : > { %v7789_v26 = vpop.eup %7788  ;;  %5835 = vmatpush2.msra.mxu1 %v5400_v36  ;;  %v5498_v36 = vld [vmem:[#allocation4 + $0x4f60] sm:$0xff] }
 0x6d4   : > { %v7791_v27 = vpop.eup %7790  ;;  %v4958_v9 = vmul.f32 %v7789_v26, %v7783_v23  ;;  %5836 = vmatprep.subr.mxu1 %v5393_v37  ;;  %v5338_v23 = vld [vmem:[#allocation4 + $0x4a60] sm:$0xff]  ;;  %v4326_v26 = vrot.slane %v8267_v56, %v8134_v5  ;;  %v5491_v37 = vld [vmem:[#allocation4 + $0x4f28] sm:$0xff] }
 0x6d5   : > { %v7793_v22 = vpop.eup %7792  ;;  %5837 = vmatpush2.msra.mxu1 %v5392_v38  ;;  %v5490_v38 = vld [vmem:[#allocation4 + $0x4f20] sm:$0xff] }
 0x6d6   : > { %v4959_v13 = vmul.f32 %v7793_v22, %v7791_v27  ;;  %v8290_v16 = vadd.f32 %v4958_v9, %v4956_v11  ;;  %5916 = vmatprep.subr.mxu1 %v5387_v40  ;;  %5839 = vmatmul.mubr.f32.vlgmr.msra.gmra.mxu1 %v8277_v39  ;;  %v5306_v27 = vld [vmem:[#allocation4 + $0x4960] sm:$0xff]  ;;  %v4330_v9 = vrot.slane %v8267_v56, %v8137_v8  ;;  %v5483_v40 = vld [vmem:[#allocation4 + $0x4ee8] sm:$0xff] }
 0x6d7   : > { %5917 = vmatpush1.msra.mxu1 %v5386_v41  ;;  %5980 = vmatprep.mubr.f32.mxu1 %v8281_v48  ;;  %v5298_v11 = vld [vmem:[#allocation4 + $0x4920] sm:$0xff] }
 0x6d8   : > { %v8292_v44 = vadd.f32 %v4959_v13, %v4957_v20  ;;  %5918 = vmatprep.subr.mxu1 %v5379_v45  ;;  %v5291_v13 = vld [vmem:[#allocation4 + $0x48e8] sm:$0xff]  ;;  %v5482_v41 = vld [vmem:[#allocation4 + $0x4ee0] sm:$0xff] }
 0x6d9   : > { %5919 = vmatpush1.msra.mxu1 %v5378_v46  ;;  %v5475_v45 = vld [vmem:[#allocation4 + $0x4ea8] sm:$0xff] }
 0x6da   : > { %v4968_v29 = vcombine.low %v8290_v16, %v8292_v44  ;;  %5920 = vmatprep.subr.mxu1 %v5371_v47  ;;  %v5474_v47 = vld [vmem:[#allocation4 + $0x4ea0] sm:$0xff] }
 0x6db   : > { %5921 = vmatpush1.msra.mxu1 %v5370_v49 }
 0x6dc   : > { %7602 = vst.sshfl [vmem:[#allocation3 + $0xc] sm:$0x33 pattern:$0x76325410] %v4968_v29  ;;  %5922 = vmatprep.subr.mxu1 %v5363_v50  ;;  %v5283_v29 = vld [vmem:[#allocation4 + $0x48a8] sm:$0xff] }
 0x6dd   : > { %5923 = vmatpush1.msra.mxu1 %v5362_v52  ;;  %v5467_v50 = vld [vmem:[#allocation4 + $0x4e68] sm:$0xff] }
 0x6de   : > { %5924 = vmatprep.subr.mxu1 %v5355_v59  ;;  %v5466_v59 = vld [vmem:[#allocation4 + $0x4e60] sm:$0xff] }
 0x6df   : > { %5925 = vmatpush1.msra.mxu1 %v5354_v60 }
 0x6e0   : > { %5926 = vmatprep.subr.mxu1 %v5347_v63  ;;  %v5459_v63 = vld [vmem:[#allocation4 + $0x4e28] sm:$0xff] }
 0x6e1   : > { %5927 = vmatpush1.msra.mxu1 %v5346_v0  ;;  %v5458_v0 = vld [vmem:[#allocation4 + $0x4e20] sm:$0xff] }
 0x6e2   : > { %5928 = vmatprep.subr.mxu1 %v5339_v3  ;;  %v5451_v3 = vld [vmem:[#allocation4 + $0x4de8] sm:$0xff] }
 0x6e3   : > { %5929 = vmatpush1.msra.mxu1 %v5338_v23  ;;  %v5450_v23 = vld [vmem:[#allocation4 + $0x4de0] sm:$0xff] }
 0x6e4   : > { %5930 = vmatprep.subr.mxu1 %v5331_v25  ;;  %v5443_v25 = vld [vmem:[#allocation4 + $0x4da8] sm:$0xff] }
 0x6e5   : > { %5931 = vmatpush1.msra.mxu1 %v5330_v21  ;;  %v5442_v21 = vld [vmem:[#allocation4 + $0x4da0] sm:$0xff] }
 0x6e6   : > { %5932 = vmatprep.subr.mxu1 %v5323_v6  ;;  %v5434_v6 = vld [vmem:[#allocation4 + $0x4d60] sm:$0xff] }
 0x6e7   : > { %5933 = vmatpush1.msra.mxu1 %v5322_v42  ;;  %v5427_v42 = vld [vmem:[#allocation4 + $0x4d28] sm:$0xff] }
 0x6e8   : > { %5934 = vmatprep.subr.mxu1 %v5315_v43  ;;  %v5426_v43 = vld [vmem:[#allocation4 + $0x4d20] sm:$0xff] }
 0x6e9   : > { %5935 = vmatpush1.msra.mxu1 %v5314_v51  ;;  %v5418_v51 = vld [vmem:[#allocation4 + $0x4ce0] sm:$0xff] }
 0x6ea   : > { %5936 = vmatprep.subr.mxu1 %v5307_v7  ;;  %v5411_v7 = vld [vmem:[#allocation4 + $0x4ca8] sm:$0xff] }
 0x6eb   : > { %5937 = vmatpush1.msra.mxu1 %v5306_v27 }
 0x6ec   : > { %5938 = vmatprep.subr.mxu1 %v5299_v24 }
 0x6ed   : > { %5939 = vmatpush1.msra.mxu1 %v5298_v11  ;;  %v5402_v11 = vld [vmem:[#allocation4 + $0x4c60] sm:$0xff] }
 0x6ee   : > { %5940 = vmatprep.subr.mxu1 %v5291_v13 }
 0x6ef   : > { %5941 = vmatpush1.msra.mxu1 %v5290_v17  ;;  %v5128_v17 = vld [vmem:[#allocation4 + $0x43d0] sm:$0xff] }
 0x6f0   : > { %5942 = vmatprep.subr.mxu1 %v5283_v29  ;;  %v5121_v29 = vld [vmem:[#allocation4 + $0x4398] sm:$0xff] }
 0x6f1   : > { %5943 = vmatpush1.msra.mxu1 %v5282_v31  ;;  %v5120_v31 = vld [vmem:[#allocation4 + $0x4390] sm:$0xff] }
 0x6f2   : > { %5944 = vmatprep.subr.mxu1 %v5275_v53  ;;  %v5381_v53 = vld [vmem:[#allocation4 + $0x4bb8] sm:$0xff] }
 0x6f3   : > { %5945 = vmatpush1.msra.mxu1 %v5274_v58  ;;  %v5112_v58 = vld [vmem:[#allocation4 + $0x4350] sm:$0xff] }
 0x6f4   : > { %5946 = vmatprep.subr.mxu1 %v5267_v1  ;;  %v5105_v1 = vld [vmem:[#allocation4 + $0x4318] sm:$0xff] }
 0x6f5   : > { %5947 = vmatpush1.msra.mxu1 %v5266_v4  ;;  %v5373_v4 = vld [vmem:[#allocation4 + $0x4b78] sm:$0xff] }
 0x6f6   : > { %5948 = vmatprep.subr.mxu1 %v5515_v33  ;;  %v5104_v33 = vld [vmem:[#allocation4 + $0x4310] sm:$0xff] }
 0x6f7   : > { %5949 = vmatpush2.msra.mxu1 %v5514_v19  ;;  %v5372_v19 = vld [vmem:[#allocation4 + $0x4b70] sm:$0xff] }
 0x6f8   : > { %5950 = vmatprep.subr.mxu1 %v5507_v57  ;;  %v5097_v57 = vld [vmem:[#allocation4 + $0x42d8] sm:$0xff] }
 0x6f9   : > { %5951 = vmatpush2.msra.mxu1 %v5506_v34  ;;  %v5365_v34 = vld [vmem:[#allocation4 + $0x4b38] sm:$0xff] }
 0x6fa   : > { %5952 = vmatprep.subr.mxu1 %v5499_v35  ;;  %v5096_v35 = vld [vmem:[#allocation4 + $0x42d0] sm:$0xff] }
 0x6fb   : > { %5953 = vmatpush2.msra.mxu1 %v5498_v36  ;;  %v5364_v36 = vld [vmem:[#allocation4 + $0x4b30] sm:$0xff] }
 0x6fc   : > { %5954 = vmatprep.subr.mxu1 %v5491_v37  ;;  %v5089_v37 = vld [vmem:[#allocation4 + $0x4298] sm:$0xff] }
 0x6fd   : > { %5955 = vmatpush2.msra.mxu1 %v5490_v38  ;;  %v5088_v38 = vld [vmem:[#allocation4 + $0x4290] sm:$0xff] }
 0x6fe   : > { %5956 = vmatprep.subr.mxu1 %v5483_v40  ;;  %v5356_v40 = vld [vmem:[#allocation4 + $0x4af0] sm:$0xff] }
 0x6ff   : > { %5957 = vmatpush2.msra.mxu1 %v5482_v41  ;;  %v5081_v41 = vld [vmem:[#allocation4 + $0x4258] sm:$0xff] }
 0x700   : > { %5958 = vmatprep.subr.mxu1 %v5475_v45  ;;  %v5349_v45 = vld [vmem:[#allocation4 + $0x4ab8] sm:$0xff] }
 0x701   : > { %v4831_v22 = vpop.f32.mrf.mxu0  ;;  %5959 = vmatpush2.msra.mxu1 %v5474_v47  ;;  %v5348_v47 = vld [vmem:[#allocation4 + $0x4ab0] sm:$0xff] }
 0x702   : > { %v4832_v20 = vadd.f32 %v4831_v22, %v4326_v26  ;;  %5960 = vmatprep.subr.mxu1 %v5467_v50  ;;  %v5403_v22 = vld [vmem:[#allocation4 + $0x4c68] sm:$0xff]  ;;  %v5341_v50 = vld [vmem:[#allocation4 + $0x4a78] sm:$0xff] }
 0x703   : > { %v4833_v15 = vpop.f32.mrf.mxu0  ;;  %5961 = vmatpush2.msra.mxu1 %v5466_v59  ;;  %v5340_v59 = vld [vmem:[#allocation4 + $0x4a70] sm:$0xff] }
 0x704   : > { %v4903_v62 = vadd.f32 %v4902_v10, %v4832_v20  ;;  %v4834_v28 = vadd.f32 %v4833_v15, %v4330_v9  ;;  %5962 = vmatprep.subr.mxu1 %v5459_v63  ;;  %v5410_v9 = vld [vmem:[#allocation4 + $0x4ca0] sm:$0xff]  ;;  %v5395_v15 = vld [vmem:[#allocation4 + $0x4c28] sm:$0xff]  ;;  %v5333_v63 = vld [vmem:[#allocation4 + $0x4a38] sm:$0xff] }
 0x705   : > { %5963 = vmatpush2.msra.mxu1 %v5458_v0  ;;  %v5064_v0 = vld [vmem:[#allocation4 + $0x41d0] sm:$0xff] }
 0x706   : > { %v7599_v56 = vmul.f32 -1.442695, %v4903_v62  ;;  %v4905_v55 = vadd.f32 %v4904_v30, %v4834_v28  ;;  %5964 = vmatprep.subr.mxu1 %v5451_v3  ;;  %v5394_v62 = vld [vmem:[#allocation4 + $0x4c20] sm:$0xff]  ;;  %v5389_v30 = vld [vmem:[#allocation4 + $0x4bf8] sm:$0xff]  ;;  %v5332_v3 = vld [vmem:[#allocation4 + $0x4a30] sm:$0xff] }
 0x707   : > { %5965 = vmatpush2.msra.mxu1 %v5450_v23  ;;  %v5057_v23 = vld [vmem:[#allocation4 + $0x4198] sm:$0xff] }
 0x708   : > { %7794 = vpow2.f32 %v7599_v56  ;;  %v7600_v32 = vmul.f32 -1.442695, %v4905_v55  ;;  %5966 = vmatprep.subr.mxu1 %v5443_v25  ;;  %v5388_v56 = vld [vmem:[#allocation4 + $0x4bf0] sm:$0xff]  ;;  %v5113_v55 = vld [vmem:[#allocation4 + $0x4358] sm:$0xff] }
 0x709   : > { %5967 = vmatpush2.msra.mxu1 %v5442_v21  ;;  %v5325_v25 = vld [vmem:[#allocation4 + $0x49f8] sm:$0xff]  ;;  %v5056_v21 = vld [vmem:[#allocation4 + $0x4190] sm:$0xff] }
 0x70a   : > { %7796 = vpow2.f32 %v7600_v32  ;;  %v5380_v32 = vld [vmem:[#allocation4 + $0x4bb0] sm:$0xff] }
 0x70b   : > { %7798 = vtanh.f32 %v8290_v16  ;;  %v5435_v16 = vld [vmem:[#allocation4 + $0x4d68] sm:$0xff] }
 0x70c   : > { %5968 = vmatprep.subr.mxu1 %v5435_v16  ;;  %v5324_v16 = vld [vmem:[#allocation4 + $0x49f0] sm:$0xff] }
 0x70d   : > { %5969 = vmatpush2.msra.mxu1 %v5434_v6  ;;  %v5049_v6 = vld [vmem:[#allocation4 + $0x4158] sm:$0xff] }
 0x70e   : > { %5970 = vmatprep.subr.mxu1 %v5427_v42  ;;  %v5317_v42 = vld [vmem:[#allocation4 + $0x49b8] sm:$0xff] }
 0x70f   : > { %5971 = vmatpush2.msra.mxu1 %v5426_v43  ;;  %v5048_v43 = vld [vmem:[#allocation4 + $0x4150] sm:$0xff] }
 0x715   : > { %v7795_v46 = vpop.eup %7794 }
 0x716   : > { %v4939_v49 = vadd.f32 1.0, %v7795_v46  ;;  %v5080_v46 = vld [vmem:[#allocation4 + $0x4250] sm:$0xff] }
 0x717   : > { %v7797_v52 = vpop.eup %7796 }
 0x718   : > { %7800 = vrcp.f32 %v4939_v49  ;;  %v4940_v60 = vadd.f32 1.0, %v7797_v52  ;;  %v7799_v26 = vpop.eup %7798  ;;  %v5073_v49 = vld [vmem:[#allocation4 + $0x4218] sm:$0xff]  ;;  %v5072_v52 = vld [vmem:[#allocation4 + $0x4210] sm:$0xff] }
 0x719   : > { %7802 = vtanh.f32 %v8292_v44  ;;  %v5419_v44 = vld [vmem:[#allocation4 + $0x4ce8] sm:$0xff] }
 0x71a   : > { %7804 = vrcp.f32 %v4940_v60  ;;  %5972 = vmatprep.subr.mxu1 %v5419_v44  ;;  %v5065_v60 = vld [vmem:[#allocation4 + $0x41d8] sm:$0xff]  ;;  %v5316_v44 = vld [vmem:[#allocation4 + $0x49b0] sm:$0xff] }
 0x71b   : > { %5973 = vmatpush2.msra.mxu1 %v5418_v51  ;;  %v5041_v51 = vld [vmem:[#allocation4 + $0x4118] sm:$0xff] }
 0x71c   : > { %5974 = vmatprep.subr.mxu1 %v5411_v7  ;;  %v5040_v7 = vld [vmem:[#allocation4 + $0x4110] sm:$0xff] }
 0x71d   : > { %5975 = vmatpush2.msra.mxu1 %v5410_v9  ;;  %v5033_v9 = vld [vmem:[#allocation4 + $0x40d8] sm:$0xff] }
 0x71e   : > { %5976 = vmatprep.subr.mxu1 %v5403_v22  ;;  %v5032_v22 = vld [vmem:[#allocation4 + $0x40d0] sm:$0xff] }
 0x71f   : > { %5977 = vmatpush2.msra.mxu1 %v5402_v11  ;;  %v5025_v11 = vld [vmem:[#allocation4 + $0x4098] sm:$0xff] }
 0x720   : > { %5978 = vmatprep.subr.mxu1 %v5395_v15  ;;  %v5293_v15 = vld [vmem:[#allocation4 + $0x48f8] sm:$0xff] }
 0x721   : > { %5979 = vmatpush2.msra.mxu1 %v5394_v62  ;;  %v5292_v62 = vld [vmem:[#allocation4 + $0x48f0] sm:$0xff] }
 0x722   : > { %6058 = vmatprep.subr.mxu1 %v5389_v30  ;;  %5981 = vmatmul.mubr.f32.vlgmr.msra.gmra.mxu1 %v8277_v39  ;;  %v5357_v39 = vld [vmem:[#allocation4 + $0x4af8] sm:$0xff]  ;;  %v5016_v30 = vld [vmem:[#allocation4 + $0x4050] sm:$0xff] }
 0x723   : > { %6059 = vmatpush1.msra.mxu1 %v5388_v56  ;;  %v5009_v56 = vld [vmem:[#allocation4 + $0x4018] sm:$0xff]  ;;  %6122 = vmatprep.mubr.f32.mxu1 %v8281_v48  ;;  %v5067_v48 = vld [vmem:[#allocation4 + $0x41e8] sm:$0xff] }
 0x724   : > { %6060 = vmatprep.subr.mxu1 %v5381_v53  ;;  %v5008_v53 = vld [vmem:[#allocation4 + $0x4010] sm:$0xff] }
 0x725   : > { %v7801_v27 = vpop.eup %7800  ;;  %6061 = vmatpush1.msra.mxu1 %v5380_v32  ;;  %v5257_v32 = vld [vmem:[#allocation4 + $0x47d8] sm:$0xff] }
 0x726   : > { %v7803_v24 = vpop.eup %7802  ;;  %v8306_v13 = vmul.f32 %v7801_v27, %v7799_v26  ;;  %6062 = vmatprep.subr.mxu1 %v5373_v4  ;;  %v5309_v26 = vld [vmem:[#allocation4 + $0x4978] sm:$0xff]  ;;  %v5308_v27 = vld [vmem:[#allocation4 + $0x4970] sm:$0xff] }
 0x727   : > { %v7805_v10 = vpop.eup %7804  ;;  %6063 = vmatpush1.msra.mxu1 %v5372_v19  ;;  %v5256_v4 = vld [vmem:[#allocation4 + $0x47d0] sm:$0xff]  ;;  %v5249_v19 = vld [vmem:[#allocation4 + $0x4798] sm:$0xff] }
 0x728   : > { %v8304_v20 = vmul.f32 %v7805_v10, %v7803_v24  ;;  %6064 = vmatprep.subr.mxu1 %v5365_v34  ;;  %v5301_v24 = vld [vmem:[#allocation4 + $0x4938] sm:$0xff]  ;;  %v5300_v10 = vld [vmem:[#allocation4 + $0x4930] sm:$0xff] }
 0x729   : > { %6065 = vmatpush1.msra.mxu1 %v5364_v36  ;;  %v5248_v34 = vld [vmem:[#allocation4 + $0x4790] sm:$0xff]  ;;  %v5241_v36 = vld [vmem:[#allocation4 + $0x4758] sm:$0xff] }
 0x72a   : > { %5625 = vmatprep.mubr.f32.mxu0 %v8304_v20  ;;  %v4980_v28 = vcombine.low %v8306_v13, %v8304_v20  ;;  %6066 = vmatprep.subr.mxu1 %v5357_v39  ;;  %v5240_v39 = vld [vmem:[#allocation4 + $0x4750] sm:$0xff] }
 0x72b   : > { %5626 = vmatmul.mubr.f32.vlgmr.msra.gmra.mxu0 %v8306_v13  ;;  %6067 = vmatpush1.msra.mxu1 %v5356_v40  ;;  %v5233_v40 = vld [vmem:[#allocation4 + $0x4718] sm:$0xff] }
 0x72c   : > { %7603 = vst.sshfl [vmem:[#allocation2 + $0xc] sm:$0x33 pattern:$0x76325410] %v4980_v28  ;;  %5704 = vmatpush1.msra.mxu0 %v5128_v17  ;;  %5767 = vmatprep.mubr.f32.mxu0 %v8304_v20  ;;  %v5024_v17 = vld [vmem:[#allocation4 + $0x4090] sm:$0xff]  ;;  %v5017_v28 = vld [vmem:[#allocation4 + $0x4058] sm:$0xff] }
 0x72d   : > { %5705 = vmatprep.subr.mxu0 %v5121_v29  ;;  %6068 = vmatprep.subr.mxu1 %v5349_v45  ;;  %v5285_v29 = vld [vmem:[#allocation4 + $0x48b8] sm:$0xff]  ;;  %v5232_v45 = vld [vmem:[#allocation4 + $0x4710] sm:$0xff] }
 0x72e   : > { %5706 = vmatpush1.msra.mxu0 %v5120_v31  ;;  %6069 = vmatpush1.msra.mxu1 %v5348_v47  ;;  %v5284_v31 = vld [vmem:[#allocation4 + $0x48b0] sm:$0xff]  ;;  %v5225_v47 = vld [vmem:[#allocation4 + $0x46d8] sm:$0xff] }
 0x72f   : > { %5707 = vmatprep.subr.mxu0 %v5113_v55  ;;  %6070 = vmatprep.subr.mxu1 %v5341_v50  ;;  %v5277_v55 = vld [vmem:[#allocation4 + $0x4878] sm:$0xff]  ;;  %v5224_v50 = vld [vmem:[#allocation4 + $0x46d0] sm:$0xff] }
 0x730   : > { %5708 = vmatpush1.msra.mxu0 %v5112_v58  ;;  %6071 = vmatpush1.msra.mxu1 %v5340_v59  ;;  %v5276_v58 = vld [vmem:[#allocation4 + $0x4870] sm:$0xff]  ;;  %v5217_v59 = vld [vmem:[#allocation4 + $0x4698] sm:$0xff] }
 0x731   : > { %5709 = vmatprep.subr.mxu0 %v5105_v1  ;;  %6072 = vmatprep.subr.mxu1 %v5333_v63  ;;  %v5269_v1 = vld [vmem:[#allocation4 + $0x4838] sm:$0xff]  ;;  %v5216_v63 = vld [vmem:[#allocation4 + $0x4690] sm:$0xff] }
 0x732   : > { %5710 = vmatpush1.msra.mxu0 %v5104_v33  ;;  %6073 = vmatpush1.msra.mxu1 %v5332_v3  ;;  %v5268_v33 = vld [vmem:[#allocation4 + $0x4830] sm:$0xff]  ;;  %v5209_v3 = vld [vmem:[#allocation4 + $0x4658] sm:$0xff] }
 0x733   : > { %5711 = vmatprep.subr.mxu0 %v5097_v57  ;;  %6074 = vmatprep.subr.mxu1 %v5325_v25  ;;  %v5517_v57 = vld [vmem:[#allocation4 + $0x4ff8] sm:$0xff]  ;;  %v5208_v25 = vld [vmem:[#allocation4 + $0x4650] sm:$0xff] }
 0x734   : > { %5712 = vmatpush1.msra.mxu0 %v5096_v35  ;;  %6075 = vmatpush1.msra.mxu1 %v5324_v16  ;;  %v5516_v35 = vld [vmem:[#allocation4 + $0x4ff0] sm:$0xff]  ;;  %v5201_v16 = vld [vmem:[#allocation4 + $0x4618] sm:$0xff] }
 0x735   : > { %5713 = vmatprep.subr.mxu0 %v5089_v37  ;;  %6076 = vmatprep.subr.mxu1 %v5317_v42  ;;  %v5509_v37 = vld [vmem:[#allocation4 + $0x4fb8] sm:$0xff]  ;;  %v5200_v42 = vld [vmem:[#allocation4 + $0x4610] sm:$0xff] }
 0x736   : > { %5714 = vmatpush1.msra.mxu0 %v5088_v38  ;;  %6077 = vmatpush1.msra.mxu1 %v5316_v44  ;;  %v5508_v38 = vld [vmem:[#allocation4 + $0x4fb0] sm:$0xff]  ;;  %v5193_v44 = vld [vmem:[#allocation4 + $0x45d8] sm:$0xff] }
 0x737   : > { %5715 = vmatprep.subr.mxu0 %v5081_v41  ;;  %6078 = vmatprep.subr.mxu1 %v5309_v26  ;;  %v5501_v41 = vld [vmem:[#allocation4 + $0x4f78] sm:$0xff]  ;;  %v5192_v26 = vld [vmem:[#allocation4 + $0x45d0] sm:$0xff] }
 0x738   : > { %5716 = vmatpush1.msra.mxu0 %v5080_v46  ;;  %6079 = vmatpush1.msra.mxu1 %v5308_v27  ;;  %v5500_v46 = vld [vmem:[#allocation4 + $0x4f70] sm:$0xff]  ;;  %v5185_v27 = vld [vmem:[#allocation4 + $0x4598] sm:$0xff] }
 0x739   : > { %5717 = vmatprep.subr.mxu0 %v5073_v49  ;;  %6080 = vmatprep.subr.mxu1 %v5301_v24  ;;  %v5493_v49 = vld [vmem:[#allocation4 + $0x4f38] sm:$0xff]  ;;  %v5184_v24 = vld [vmem:[#allocation4 + $0x4590] sm:$0xff] }
 0x73a   : > { %5718 = vmatpush1.msra.mxu0 %v5072_v52  ;;  %6081 = vmatpush1.msra.mxu1 %v5300_v10  ;;  %v5492_v52 = vld [vmem:[#allocation4 + $0x4f30] sm:$0xff]  ;;  %v5177_v10 = vld [vmem:[#allocation4 + $0x4558] sm:$0xff] }
 0x73b   : > { %5719 = vmatprep.subr.mxu0 %v5065_v60  ;;  %6082 = vmatprep.subr.mxu1 %v5293_v15  ;;  %v5485_v60 = vld [vmem:[#allocation4 + $0x4ef8] sm:$0xff]  ;;  %v5176_v15 = vld [vmem:[#allocation4 + $0x4550] sm:$0xff] }
 0x73c   : > { %5720 = vmatpush1.msra.mxu0 %v5064_v0  ;;  %6083 = vmatpush1.msra.mxu1 %v5292_v62  ;;  %v5484_v0 = vld [vmem:[#allocation4 + $0x4ef0] sm:$0xff]  ;;  %v5169_v62 = vld [vmem:[#allocation4 + $0x4518] sm:$0xff] }
 0x73d   : > { %5721 = vmatprep.subr.mxu0 %v5057_v23  ;;  %6084 = vmatprep.subr.mxu1 %v5285_v29  ;;  %v5477_v23 = vld [vmem:[#allocation4 + $0x4eb8] sm:$0xff]  ;;  %v5168_v29 = vld [vmem:[#allocation4 + $0x4510] sm:$0xff] }
 0x73e   : > { %5722 = vmatpush1.msra.mxu0 %v5056_v21  ;;  %6085 = vmatpush1.msra.mxu1 %v5284_v31  ;;  %v5476_v21 = vld [vmem:[#allocation4 + $0x4eb0] sm:$0xff]  ;;  %v5161_v31 = vld [vmem:[#allocation4 + $0x44d8] sm:$0xff] }
 0x73f   : > { %5723 = vmatprep.subr.mxu0 %v5049_v6  ;;  %6086 = vmatprep.subr.mxu1 %v5277_v55  ;;  %v5469_v6 = vld [vmem:[#allocation4 + $0x4e78] sm:$0xff]  ;;  %v5160_v55 = vld [vmem:[#allocation4 + $0x44d0] sm:$0xff] }
 0x740   : > { %5724 = vmatpush1.msra.mxu0 %v5048_v43  ;;  %6087 = vmatpush1.msra.mxu1 %v5276_v58  ;;  %v5468_v43 = vld [vmem:[#allocation4 + $0x4e70] sm:$0xff]  ;;  %v5153_v58 = vld [vmem:[#allocation4 + $0x4498] sm:$0xff] }
 0x741   : > { %5725 = vmatprep.subr.mxu0 %v5041_v51  ;;  %6088 = vmatprep.subr.mxu1 %v5269_v1  ;;  %v5461_v51 = vld [vmem:[#allocation4 + $0x4e38] sm:$0xff]  ;;  %v5152_v1 = vld [vmem:[#allocation4 + $0x4490] sm:$0xff] }
 0x742   : > { %5726 = vmatpush1.msra.mxu0 %v5040_v7  ;;  %6089 = vmatpush1.msra.mxu1 %v5268_v33  ;;  %v5460_v7 = vld [vmem:[#allocation4 + $0x4e30] sm:$0xff]  ;;  %v5145_v33 = vld [vmem:[#allocation4 + $0x4458] sm:$0xff] }
 0x743   : > { %5727 = vmatprep.subr.mxu0 %v5033_v9  ;;  %6090 = vmatprep.subr.mxu1 %v5517_v57  ;;  %v5453_v9 = vld [vmem:[#allocation4 + $0x4df8] sm:$0xff]  ;;  %v5144_v57 = vld [vmem:[#allocation4 + $0x4450] sm:$0xff] }
 0x744   : > { %5728 = vmatpush1.msra.mxu0 %v5032_v22  ;;  %6091 = vmatpush2.msra.mxu1 %v5516_v35  ;;  %v5452_v22 = vld [vmem:[#allocation4 + $0x4df0] sm:$0xff]  ;;  %v5137_v35 = vld [vmem:[#allocation4 + $0x4418] sm:$0xff] }
 0x745   : > { %5729 = vmatprep.subr.mxu0 %v5025_v11  ;;  %6092 = vmatprep.subr.mxu1 %v5509_v37  ;;  %v5445_v11 = vld [vmem:[#allocation4 + $0x4db8] sm:$0xff]  ;;  %v5136_v37 = vld [vmem:[#allocation4 + $0x4410] sm:$0xff] }
 0x746   : > { %5730 = vmatpush1.msra.mxu0 %v5024_v17  ;;  %6093 = vmatpush2.msra.mxu1 %v5508_v38  ;;  %v5444_v17 = vld [vmem:[#allocation4 + $0x4db0] sm:$0xff]  ;;  %v5131_v38 = vld [vmem:[#allocation4 + $0x43e8] sm:$0xff] }
 0x747   : > { %5731 = vmatprep.subr.mxu0 %v5017_v28  ;;  %6094 = vmatprep.subr.mxu1 %v5501_v41  ;;  %v5437_v28 = vld [vmem:[#allocation4 + $0x4d78] sm:$0xff]  ;;  %v5123_v41 = vld [vmem:[#allocation4 + $0x43a8] sm:$0xff] }
 0x748   : > { %5732 = vmatpush1.msra.mxu0 %v5016_v30  ;;  %6095 = vmatpush2.msra.mxu1 %v5500_v46  ;;  %v5436_v30 = vld [vmem:[#allocation4 + $0x4d70] sm:$0xff]  ;;  %v5122_v46 = vld [vmem:[#allocation4 + $0x43a0] sm:$0xff] }
 0x749   : > { %5733 = vmatprep.subr.mxu0 %v5009_v56  ;;  %6096 = vmatprep.subr.mxu1 %v5493_v49  ;;  %v5429_v56 = vld [vmem:[#allocation4 + $0x4d38] sm:$0xff]  ;;  %v5115_v49 = vld [vmem:[#allocation4 + $0x4368] sm:$0xff] }
 0x74a   : > { %5734 = vmatpush1.msra.mxu0 %v5008_v53  ;;  %6097 = vmatpush2.msra.mxu1 %v5492_v52  ;;  %v5428_v53 = vld [vmem:[#allocation4 + $0x4d30] sm:$0xff]  ;;  %v5107_v52 = vld [vmem:[#allocation4 + $0x4328] sm:$0xff] }
 0x74b   : > { %5735 = vmatprep.subr.mxu0 %v5257_v32  ;;  %6098 = vmatprep.subr.mxu1 %v5485_v60  ;;  %v5421_v32 = vld [vmem:[#allocation4 + $0x4cf8] sm:$0xff]  ;;  %v5099_v60 = vld [vmem:[#allocation4 + $0x42e8] sm:$0xff] }
 0x74c   : > { %5736 = vmatpush2.msra.mxu0 %v5256_v4  ;;  %6099 = vmatpush2.msra.mxu1 %v5484_v0  ;;  %v5420_v4 = vld [vmem:[#allocation4 + $0x4cf0] sm:$0xff]  ;;  %v5098_v0 = vld [vmem:[#allocation4 + $0x42e0] sm:$0xff] }
 0x74d   : > { %5737 = vmatprep.subr.mxu0 %v5249_v19  ;;  %6100 = vmatprep.subr.mxu1 %v5477_v23  ;;  %v5413_v19 = vld [vmem:[#allocation4 + $0x4cb8] sm:$0xff]  ;;  %v5090_v23 = vld [vmem:[#allocation4 + $0x42a0] sm:$0xff] }
 0x74e   : > { %5738 = vmatpush2.msra.mxu0 %v5248_v34  ;;  %6101 = vmatpush2.msra.mxu1 %v5476_v21  ;;  %v5412_v34 = vld [vmem:[#allocation4 + $0x4cb0] sm:$0xff]  ;;  %v5082_v21 = vld [vmem:[#allocation4 + $0x4260] sm:$0xff] }
 0x74f   : > { %5739 = vmatprep.subr.mxu0 %v5241_v36  ;;  %6102 = vmatprep.subr.mxu1 %v5469_v6  ;;  %v5405_v36 = vld [vmem:[#allocation4 + $0x4c78] sm:$0xff]  ;;  %v5074_v6 = vld [vmem:[#allocation4 + $0x4220] sm:$0xff] }
 0x750   : > { %5740 = vmatpush2.msra.mxu0 %v5240_v39  ;;  %6103 = vmatpush2.msra.mxu1 %v5468_v43  ;;  %v5404_v39 = vld [vmem:[#allocation4 + $0x4c70] sm:$0xff]  ;;  %v5059_v43 = vld [vmem:[#allocation4 + $0x41a8] sm:$0xff] }
 0x751   : > { %5741 = vmatprep.subr.mxu0 %v5233_v40  ;;  %6104 = vmatprep.subr.mxu1 %v5461_v51  ;;  %v5130_v40 = vld [vmem:[#allocation4 + $0x43e0] sm:$0xff]  ;;  %v5051_v51 = vld [vmem:[#allocation4 + $0x4168] sm:$0xff] }
 0x752   : > { %5742 = vmatpush2.msra.mxu0 %v5232_v45  ;;  %6105 = vmatpush2.msra.mxu1 %v5460_v7  ;;  %v5397_v45 = vld [vmem:[#allocation4 + $0x4c38] sm:$0xff]  ;;  %v5043_v7 = vld [vmem:[#allocation4 + $0x4128] sm:$0xff] }
 0x753   : > { %5743 = vmatprep.subr.mxu0 %v5225_v47  ;;  %6106 = vmatprep.subr.mxu1 %v5453_v9  ;;  %v5396_v47 = vld [vmem:[#allocation4 + $0x4c30] sm:$0xff]  ;;  %v5035_v9 = vld [vmem:[#allocation4 + $0x40e8] sm:$0xff] }
 0x754   : > { %5744 = vmatpush2.msra.mxu0 %v5224_v50  ;;  %6107 = vmatpush2.msra.mxu1 %v5452_v22  ;;  %v5114_v50 = vld [vmem:[#allocation4 + $0x4360] sm:$0xff]  ;;  %v5027_v22 = vld [vmem:[#allocation4 + $0x40a8] sm:$0xff] }
 0x755   : > { %5745 = vmatprep.subr.mxu0 %v5217_v59  ;;  %6108 = vmatprep.subr.mxu1 %v5445_v11  ;;  %v5106_v59 = vld [vmem:[#allocation4 + $0x4320] sm:$0xff]  ;;  %v5019_v11 = vld [vmem:[#allocation4 + $0x4068] sm:$0xff] }
 0x756   : > { %5746 = vmatpush2.msra.mxu0 %v5216_v63  ;;  %6109 = vmatpush2.msra.mxu1 %v5444_v17  ;;  %v7875_v63 = vld.sshfl [vmem:[#allocation2 + $0x10] sm:$0x33 pattern:$0x76325410]  ;;  %v5011_v17 = vld [vmem:[#allocation4 + $0x4028] sm:$0xff] }
 0x757   : > { %5747 = vmatprep.subr.mxu0 %v5209_v3  ;;  %6110 = vmatprep.subr.mxu1 %v5437_v28  ;;  %v5091_v3 = vld [vmem:[#allocation4 + $0x42a8] sm:$0xff] }
 0x758   : > { %5748 = vmatpush2.msra.mxu0 %v5208_v25  ;;  %6111 = vmatpush2.msra.mxu1 %v5436_v30  ;;  %v5083_v25 = vld [vmem:[#allocation4 + $0x4268] sm:$0xff] }
 0x759   : > { %5749 = vmatprep.subr.mxu0 %v5201_v16  ;;  %6112 = vmatprep.subr.mxu1 %v5429_v56  ;;  %v5075_v16 = vld [vmem:[#allocation4 + $0x4228] sm:$0xff] }
 0x75a   : > { %5750 = vmatpush2.msra.mxu0 %v5200_v42  ;;  %6113 = vmatpush2.msra.mxu1 %v5428_v53  ;;  %v5066_v42 = vld [vmem:[#allocation4 + $0x41e0] sm:$0xff]  ;;  %v5259_v28 = vld [vmem:[#allocation4 + $0x47e8] sm:$0xff] }
 0x75b   : > { %5751 = vmatprep.subr.mxu0 %v5193_v44  ;;  %6114 = vmatprep.subr.mxu1 %v5421_v32  ;;  %v5058_v44 = vld [vmem:[#allocation4 + $0x41a0] sm:$0xff]  ;;  %v5251_v30 = vld [vmem:[#allocation4 + $0x47a8] sm:$0xff] }
 0x75c   : > { %5752 = vmatpush2.msra.mxu0 %v5192_v26  ;;  %6115 = vmatpush2.msra.mxu1 %v5420_v4  ;;  %v5050_v26 = vld [vmem:[#allocation4 + $0x4160] sm:$0xff]  ;;  %v5243_v56 = vld [vmem:[#allocation4 + $0x4768] sm:$0xff] }
 0x75d   : > { %5753 = vmatprep.subr.mxu0 %v5185_v27  ;;  %6116 = vmatprep.subr.mxu1 %v5413_v19  ;;  %v5042_v27 = vld [vmem:[#allocation4 + $0x4120] sm:$0xff]  ;;  %v5235_v53 = vld [vmem:[#allocation4 + $0x4728] sm:$0xff] }
 0x75e   : > { %5754 = vmatpush2.msra.mxu0 %v5184_v24  ;;  %6117 = vmatpush2.msra.mxu1 %v5412_v34  ;;  %v5034_v24 = vld [vmem:[#allocation4 + $0x40e0] sm:$0xff]  ;;  %v5227_v32 = vld [vmem:[#allocation4 + $0x46e8] sm:$0xff] }
 0x75f   : > { %5755 = vmatprep.subr.mxu0 %v5177_v10  ;;  %6118 = vmatprep.subr.mxu1 %v5405_v36  ;;  %v5026_v10 = vld [vmem:[#allocation4 + $0x40a0] sm:$0xff]  ;;  %v5219_v4 = vld [vmem:[#allocation4 + $0x46a8] sm:$0xff] }
 0x760   : > { %5756 = vmatpush2.msra.mxu0 %v5176_v15  ;;  %6119 = vmatpush2.msra.mxu1 %v5404_v39  ;;  %v5018_v15 = vld [vmem:[#allocation4 + $0x4060] sm:$0xff]  ;;  %v5211_v19 = vld [vmem:[#allocation4 + $0x4668] sm:$0xff] }
 0x761   : > { %5757 = vmatprep.subr.mxu0 %v5169_v62  ;;  %6120 = vmatprep.subr.mxu1 %v5397_v45  ;;  %v5010_v62 = vld [vmem:[#allocation4 + $0x4020] sm:$0xff]  ;;  %v5203_v34 = vld [vmem:[#allocation4 + $0x4628] sm:$0xff] }
 0x762   : > { %5758 = vmatpush2.msra.mxu0 %v5168_v29  ;;  %6121 = vmatpush2.msra.mxu1 %v5396_v47  ;;  %v5258_v29 = vld [vmem:[#allocation4 + $0x47e0] sm:$0xff]  ;;  %v5195_v36 = vld [vmem:[#allocation4 + $0x45e8] sm:$0xff] }
 0x763   : > { %5759 = vmatprep.subr.mxu0 %v5161_v31  ;;  %6123 = vmatmul.mubr.f32.vlgmr.msra.gmra.mxu1 %v7875_v63  ;;  %v5250_v31 = vld [vmem:[#allocation4 + $0x47a0] sm:$0xff]  ;;  %v5187_v39 = vld [vmem:[#allocation4 + $0x45a8] sm:$0xff] }
 0x764   : > { %5760 = vmatpush2.msra.mxu0 %v5160_v55  ;;  %v5242_v55 = vld [vmem:[#allocation4 + $0x4760] sm:$0xff]  ;;  %v5171_v45 = vld [vmem:[#allocation4 + $0x4528] sm:$0xff] }
 0x765   : > { %5761 = vmatprep.subr.mxu0 %v5153_v58  ;;  %v5234_v58 = vld [vmem:[#allocation4 + $0x4720] sm:$0xff]  ;;  %v5163_v47 = vld [vmem:[#allocation4 + $0x44e8] sm:$0xff] }
 0x766   : > { %5762 = vmatpush2.msra.mxu0 %v5152_v1  ;;  %v5226_v1 = vld [vmem:[#allocation4 + $0x46e0] sm:$0xff]  ;;  %v5139_v63 = vld [vmem:[#allocation4 + $0x4428] sm:$0xff] }
 0x767   : > { %5763 = vmatprep.subr.mxu0 %v5145_v33  ;;  %v5218_v33 = vld [vmem:[#allocation4 + $0x46a0] sm:$0xff] }
 0x768   : > { %5764 = vmatpush2.msra.mxu0 %v5144_v57  ;;  %v5210_v57 = vld [vmem:[#allocation4 + $0x4660] sm:$0xff] }
 0x769   : > { %5765 = vmatprep.subr.mxu0 %v5137_v35  ;;  %v5202_v35 = vld [vmem:[#allocation4 + $0x4620] sm:$0xff] }
 0x76a   : > { %5766 = vmatpush2.msra.mxu0 %v5136_v37  ;;  %v5194_v37 = vld [vmem:[#allocation4 + $0x45e0] sm:$0xff] }
 0x76b   : > { %5768 = vmatmul.mubr.f32.vlgmr.msra.gmra.mxu0 %v8306_v13  ;;  %5845 = vmatprep.subr.mxu0 %v5131_v38  ;;  %v5186_v38 = vld [vmem:[#allocation4 + $0x45a0] sm:$0xff] }
 0x76c   : > { %5846 = vmatpush1.msra.mxu0 %v5130_v40  ;;  %5909 = vmatprep.mubr.f32.mxu0 %v8304_v20  ;;  %v5179_v40 = vld [vmem:[#allocation4 + $0x4568] sm:$0xff] }
 0x76d   : > { %5847 = vmatprep.subr.mxu0 %v5123_v41  ;;  %v5178_v41 = vld [vmem:[#allocation4 + $0x4560] sm:$0xff] }
 0x76e   : > { %5848 = vmatpush1.msra.mxu0 %v5122_v46  ;;  %v5170_v46 = vld [vmem:[#allocation4 + $0x4520] sm:$0xff] }
 0x76f   : > { %5849 = vmatprep.subr.mxu0 %v5115_v49  ;;  %v5162_v49 = vld [vmem:[#allocation4 + $0x44e0] sm:$0xff] }
 0x770   : > { %5850 = vmatpush1.msra.mxu0 %v5114_v50  ;;  %v5155_v50 = vld [vmem:[#allocation4 + $0x44a8] sm:$0xff] }
 0x771   : > { %5851 = vmatprep.subr.mxu0 %v5107_v52  ;;  %v5154_v52 = vld [vmem:[#allocation4 + $0x44a0] sm:$0xff] }
 0x772   : > { %5852 = vmatpush1.msra.mxu0 %v5106_v59  ;;  %v5147_v59 = vld [vmem:[#allocation4 + $0x4468] sm:$0xff] }
 0x773   : > { %5853 = vmatprep.subr.mxu0 %v5099_v60  ;;  %v5146_v60 = vld [vmem:[#allocation4 + $0x4460] sm:$0xff] }
 0x774   : > { %5854 = vmatpush1.msra.mxu0 %v5098_v0  ;;  %v5138_v0 = vld [vmem:[#allocation4 + $0x4420] sm:$0xff] }
 0x775   : > { %5855 = vmatprep.subr.mxu0 %v5091_v3  ;;  %v5133_v3 = vld [vmem:[#allocation4 + $0x43f8] sm:$0xff] }
 0x776   : > { %5856 = vmatpush1.msra.mxu0 %v5090_v23  ;;  %v5132_v23 = vld [vmem:[#allocation4 + $0x43f0] sm:$0xff] }
 0x777   : > { %5857 = vmatprep.subr.mxu0 %v5083_v25  ;;  %v5125_v25 = vld [vmem:[#allocation4 + $0x43b8] sm:$0xff] }
 0x778   : > { %5858 = vmatpush1.msra.mxu0 %v5082_v21  ;;  %v5124_v21 = vld [vmem:[#allocation4 + $0x43b0] sm:$0xff] }
 0x779   : > { %5859 = vmatprep.subr.mxu0 %v5075_v16  ;;  %v5117_v16 = vld [vmem:[#allocation4 + $0x4378] sm:$0xff] }
 0x77a   : > { %5860 = vmatpush1.msra.mxu0 %v5074_v6  ;;  %v5116_v6 = vld [vmem:[#allocation4 + $0x4370] sm:$0xff] }
 0x77b   : > { %5861 = vmatprep.subr.mxu0 %v5067_v48  ;;  %v5109_v48 = vld [vmem:[#allocation4 + $0x4338] sm:$0xff] }
 0x77c   : > { %5862 = vmatpush1.msra.mxu0 %v5066_v42  ;;  %v5108_v42 = vld [vmem:[#allocation4 + $0x4330] sm:$0xff] }
 0x77d   : > { %5863 = vmatprep.subr.mxu0 %v5059_v43  ;;  %v5101_v43 = vld [vmem:[#allocation4 + $0x42f8] sm:$0xff] }
 0x77e   : > { %5864 = vmatpush1.msra.mxu0 %v5058_v44  ;;  %v5100_v44 = vld [vmem:[#allocation4 + $0x42f0] sm:$0xff] }
 0x77f   : > { %5865 = vmatprep.subr.mxu0 %v5051_v51  ;;  %v5093_v51 = vld [vmem:[#allocation4 + $0x42b8] sm:$0xff] }
 0x780   : > { %5866 = vmatpush1.msra.mxu0 %v5050_v26  ;;  %v5092_v26 = vld [vmem:[#allocation4 + $0x42b0] sm:$0xff] }
 0x781   : > { %5867 = vmatprep.subr.mxu0 %v5043_v7  ;;  %v5085_v7 = vld [vmem:[#allocation4 + $0x4278] sm:$0xff] }
 0x782   : > { %5868 = vmatpush1.msra.mxu0 %v5042_v27  ;;  %v5084_v27 = vld [vmem:[#allocation4 + $0x4270] sm:$0xff] }
 0x783   : > { %5869 = vmatprep.subr.mxu0 %v5035_v9  ;;  %v5076_v9 = vld [vmem:[#allocation4 + $0x4230] sm:$0xff] }
 0x784   : > { %5870 = vmatpush1.msra.mxu0 %v5034_v24  ;;  %v5069_v24 = vld [vmem:[#allocation4 + $0x41f8] sm:$0xff] }
 0x785   : > { %5871 = vmatprep.subr.mxu0 %v5027_v22  ;;  %v5068_v22 = vld [vmem:[#allocation4 + $0x41f0] sm:$0xff] }
 0x786   : > { %5872 = vmatpush1.msra.mxu0 %v5026_v10  ;;  %v5061_v10 = vld [vmem:[#allocation4 + $0x41b8] sm:$0xff] }
 0x787   : > { %5873 = vmatprep.subr.mxu0 %v5019_v11  ;;  %v5060_v11 = vld [vmem:[#allocation4 + $0x41b0] sm:$0xff] }
 0x788   : > { %5874 = vmatpush1.msra.mxu0 %v5018_v15  ;;  %v5053_v15 = vld [vmem:[#allocation4 + $0x4178] sm:$0xff] }
 0x789   : > { %5875 = vmatprep.subr.mxu0 %v5011_v17  ;;  %v5052_v17 = vld [vmem:[#allocation4 + $0x4170] sm:$0xff] }
 0x78a   : > { %5876 = vmatpush1.msra.mxu0 %v5010_v62  ;;  %v5045_v62 = vld [vmem:[#allocation4 + $0x4138] sm:$0xff] }
 0x78b   : > { %5877 = vmatprep.subr.mxu0 %v5259_v28  ;;  %v5044_v28 = vld [vmem:[#allocation4 + $0x4130] sm:$0xff] }
 0x78c   : > { %5878 = vmatpush2.msra.mxu0 %v5258_v29  ;;  %v5037_v29 = vld [vmem:[#allocation4 + $0x40f8] sm:$0xff] }
 0x78d   : > { %5879 = vmatprep.subr.mxu0 %v5251_v30  ;;  %v5036_v30 = vld [vmem:[#allocation4 + $0x40f0] sm:$0xff] }
 0x78e   : > { %5880 = vmatpush2.msra.mxu0 %v5250_v31  ;;  %v5029_v31 = vld [vmem:[#allocation4 + $0x40b8] sm:$0xff] }
 0x78f   : > { %5881 = vmatprep.subr.mxu0 %v5243_v56  ;;  %v5028_v56 = vld [vmem:[#allocation4 + $0x40b0] sm:$0xff] }
 0x790   : > { %5882 = vmatpush2.msra.mxu0 %v5242_v55  ;;  %v5021_v55 = vld [vmem:[#allocation4 + $0x4078] sm:$0xff] }
 0x791   : > { %5883 = vmatprep.subr.mxu0 %v5235_v53  ;;  %v5020_v53 = vld [vmem:[#allocation4 + $0x4070] sm:$0xff] }
 0x792   : > { %5884 = vmatpush2.msra.mxu0 %v5234_v58  ;;  %v5013_v58 = vld [vmem:[#allocation4 + $0x4038] sm:$0xff] }
 0x793   : > { %5885 = vmatprep.subr.mxu0 %v5227_v32  ;;  %v5012_v32 = vld [vmem:[#allocation4 + $0x4030] sm:$0xff] }
 0x794   : > { %5886 = vmatpush2.msra.mxu0 %v5226_v1  ;;  %v5261_v1 = vld [vmem:[#allocation4 + $0x47f8] sm:$0xff] }
 0x795   : > { %5887 = vmatprep.subr.mxu0 %v5219_v4  ;;  %v5260_v4 = vld [vmem:[#allocation4 + $0x47f0] sm:$0xff] }
 0x796   : > { %5888 = vmatpush2.msra.mxu0 %v5218_v33  ;;  %v5253_v33 = vld [vmem:[#allocation4 + $0x47b8] sm:$0xff] }
 0x797   : > { %5889 = vmatprep.subr.mxu0 %v5211_v19  ;;  %v5252_v19 = vld [vmem:[#allocation4 + $0x47b0] sm:$0xff] }
 0x798   : > { %5890 = vmatpush2.msra.mxu0 %v5210_v57  ;;  %v5245_v57 = vld [vmem:[#allocation4 + $0x4778] sm:$0xff] }
 0x799   : > { %5891 = vmatprep.subr.mxu0 %v5203_v34  ;;  %v5244_v34 = vld [vmem:[#allocation4 + $0x4770] sm:$0xff] }
 0x79a   : > { %5892 = vmatpush2.msra.mxu0 %v5202_v35  ;;  %v5237_v35 = vld [vmem:[#allocation4 + $0x4738] sm:$0xff] }
 0x79b   : > { %5893 = vmatprep.subr.mxu0 %v5195_v36  ;;  %v5236_v36 = vld [vmem:[#allocation4 + $0x4730] sm:$0xff] }
 0x79c   : > { %5894 = vmatpush2.msra.mxu0 %v5194_v37  ;;  %v5229_v37 = vld [vmem:[#allocation4 + $0x46f8] sm:$0xff] }
 0x79d   : > { %5895 = vmatprep.subr.mxu0 %v5187_v39  ;;  %v5228_v39 = vld [vmem:[#allocation4 + $0x46f0] sm:$0xff] }
 0x79e   : > { %5896 = vmatpush2.msra.mxu0 %v5186_v38  ;;  %v5221_v38 = vld [vmem:[#allocation4 + $0x46b8] sm:$0xff] }
 0x79f   : > { %5897 = vmatprep.subr.mxu0 %v5179_v40  ;;  %v5220_v40 = vld [vmem:[#allocation4 + $0x46b0] sm:$0xff] }
 0x7a0   : > { %5898 = vmatpush2.msra.mxu0 %v5178_v41  ;;  %v5213_v41 = vld [vmem:[#allocation4 + $0x4678] sm:$0xff] }
 0x7a1   : > { %5899 = vmatprep.subr.mxu0 %v5171_v45  ;;  %v5212_v45 = vld [vmem:[#allocation4 + $0x4670] sm:$0xff] }
 0x7a2   : > { %5900 = vmatpush2.msra.mxu0 %v5170_v46  ;;  %v5205_v46 = vld [vmem:[#allocation4 + $0x4638] sm:$0xff] }
 0x7a3   : > { %5901 = vmatprep.subr.mxu0 %v5163_v47  ;;  %v5204_v47 = vld [vmem:[#allocation4 + $0x4630] sm:$0xff] }
 0x7a4   : > { %5902 = vmatpush2.msra.mxu0 %v5162_v49  ;;  %v5197_v49 = vld [vmem:[#allocation4 + $0x45f8] sm:$0xff] }
 0x7a5   : > { %5903 = vmatprep.subr.mxu0 %v5155_v50  ;;  %v5196_v50 = vld [vmem:[#allocation4 + $0x45f0] sm:$0xff] }
 0x7a6   : > { %5904 = vmatpush2.msra.mxu0 %v5154_v52  ;;  %v5189_v52 = vld [vmem:[#allocation4 + $0x45b8] sm:$0xff] }
 0x7a7   : > { %5905 = vmatprep.subr.mxu0 %v5147_v59  ;;  %v5188_v59 = vld [vmem:[#allocation4 + $0x45b0] sm:$0xff] }
 0x7a8   : > { %5906 = vmatpush2.msra.mxu0 %v5146_v60  ;;  %v5181_v60 = vld [vmem:[#allocation4 + $0x4578] sm:$0xff] }
 0x7a9   : > { %5907 = vmatprep.subr.mxu0 %v5139_v63  ;;  %v5180_v63 = vld [vmem:[#allocation4 + $0x4570] sm:$0xff] }
 0x7aa   : > { %5908 = vmatpush2.msra.mxu0 %v5138_v0  ;;  %v5173_v0 = vld [vmem:[#allocation4 + $0x4538] sm:$0xff] }
 0x7ab   : > { %5910 = vmatmul.mubr.f32.vlgmr.msra.gmra.mxu0 %v8306_v13  ;;  %5987 = vmatprep.subr.mxu0 %v5133_v3  ;;  %v5172_v3 = vld [vmem:[#allocation4 + $0x4530] sm:$0xff] }
 0x7ac   : > { %5988 = vmatpush1.msra.mxu0 %v5132_v23  ;;  %6051 = vmatprep.mubr.f32.mxu0 %v8304_v20  ;;  %v5077_v20 = vld [vmem:[#allocation4 + $0x4238] sm:$0xff] }
 0x7ad   : > { %5989 = vmatprep.subr.mxu0 %v5125_v25  ;;  %v5165_v23 = vld [vmem:[#allocation4 + $0x44f8] sm:$0xff]  ;;  %v5164_v25 = vld [vmem:[#allocation4 + $0x44f0] sm:$0xff] }
 0x7ae   : > { %5990 = vmatpush1.msra.mxu0 %v5124_v21  ;;  %v5157_v21 = vld [vmem:[#allocation4 + $0x44b8] sm:$0xff] }
 0x7af   : > { %5991 = vmatprep.subr.mxu0 %v5117_v16  ;;  %v5156_v16 = vld [vmem:[#allocation4 + $0x44b0] sm:$0xff] }
 0x7b0   : > { %5992 = vmatpush1.msra.mxu0 %v5116_v6  ;;  %v5149_v6 = vld [vmem:[#allocation4 + $0x4478] sm:$0xff] }
 0x7b1   : > { %5993 = vmatprep.subr.mxu0 %v5109_v48  ;;  %v5148_v48 = vld [vmem:[#allocation4 + $0x4470] sm:$0xff] }
 0x7b2   : > { %5994 = vmatpush1.msra.mxu0 %v5108_v42  ;;  %v5141_v42 = vld [vmem:[#allocation4 + $0x4438] sm:$0xff] }
 0x7b3   : > { %5995 = vmatprep.subr.mxu0 %v5101_v43  ;;  %v5140_v43 = vld [vmem:[#allocation4 + $0x4430] sm:$0xff] }
 0x7b4   : > { %5996 = vmatpush1.msra.mxu0 %v5100_v44  ;;  %v6349_v44 = vld [vmem:[#allocation4 + $0x53c8] sm:$0xff] }
 0x7b5   : > { %5997 = vmatprep.subr.mxu0 %v5093_v51  ;;  %v6605_v51 = vld [vmem:[#allocation4 + $0x5bc8] sm:$0xff] }
 0x7b6   : > { %5998 = vmatpush1.msra.mxu0 %v5092_v26  ;;  %v6348_v26 = vld [vmem:[#allocation4 + $0x53c0] sm:$0xff]  ;;  %6854 = vmatprep.subr.mxu1 %v6605_v51  ;;  %v6493_v51 = vld [vmem:[#allocation4 + $0x5848] sm:$0xff] }
 0x7b7   : > { %5999 = vmatprep.subr.mxu0 %v5085_v7  ;;  %v6604_v7 = vld [vmem:[#allocation4 + $0x5bc0] sm:$0xff] }
 0x7b8   : > { %6000 = vmatpush1.msra.mxu0 %v5084_v27  ;;  %v6341_v27 = vld [vmem:[#allocation4 + $0x5388] sm:$0xff]  ;;  %6855 = vmatpush1.msra.mxu1 %v6604_v7  ;;  %v6492_v7 = vld [vmem:[#allocation4 + $0x5840] sm:$0xff] }
 0x7b9   : > { %6001 = vmatprep.subr.mxu0 %v5077_v20  ;;  %v6597_v20 = vld [vmem:[#allocation4 + $0x5b88] sm:$0xff] }
 0x7ba   : > { %6002 = vmatpush1.msra.mxu0 %v5076_v9  ;;  %v6340_v9 = vld [vmem:[#allocation4 + $0x5380] sm:$0xff]  ;;  %6856 = vmatprep.subr.mxu1 %v6597_v20  ;;  %v6485_v20 = vld [vmem:[#allocation4 + $0x5808] sm:$0xff] }
 0x7bb   : > { %6003 = vmatprep.subr.mxu0 %v5069_v24  ;;  %v6596_v24 = vld [vmem:[#allocation4 + $0x5b80] sm:$0xff] }
 0x7bc   : > { %6004 = vmatpush1.msra.mxu0 %v5068_v22  ;;  %v6333_v22 = vld [vmem:[#allocation4 + $0x5348] sm:$0xff]  ;;  %6857 = vmatpush1.msra.mxu1 %v6596_v24  ;;  %v6484_v24 = vld [vmem:[#allocation4 + $0x5800] sm:$0xff] }
 0x7bd   : > { %6005 = vmatprep.subr.mxu0 %v5061_v10  ;;  %v6589_v10 = vld [vmem:[#allocation4 + $0x5b48] sm:$0xff] }
 0x7be   : > { %6006 = vmatpush1.msra.mxu0 %v5060_v11  ;;  %v6332_v11 = vld [vmem:[#allocation4 + $0x5340] sm:$0xff]  ;;  %6858 = vmatprep.subr.mxu1 %v6589_v10  ;;  %v6733_v10 = vld [vmem:[#allocation4 + $0x5fc8] sm:$0xff] }
 0x7bf   : > { %6007 = vmatprep.subr.mxu0 %v5053_v15  ;;  %v6588_v15 = vld [vmem:[#allocation4 + $0x5b40] sm:$0xff] }
 0x7c0   : > { %6008 = vmatpush1.msra.mxu0 %v5052_v17  ;;  %v6581_v17 = vld [vmem:[#allocation4 + $0x5b08] sm:$0xff]  ;;  %6859 = vmatpush1.msra.mxu1 %v6588_v15  ;;  %v6732_v15 = vld [vmem:[#allocation4 + $0x5fc0] sm:$0xff] }
 0x7c1   : > { %6009 = vmatprep.subr.mxu0 %v5045_v62  ;;  %v6324_v62 = vld [vmem:[#allocation4 + $0x5300] sm:$0xff]  ;;  %6860 = vmatprep.subr.mxu1 %v6581_v17  ;;  %v6725_v17 = vld [vmem:[#allocation4 + $0x5f88] sm:$0xff] }
 0x7c2   : > { %6010 = vmatpush1.msra.mxu0 %v5044_v28  ;;  %v6580_v28 = vld [vmem:[#allocation4 + $0x5b00] sm:$0xff] }
 0x7c3   : > { %6011 = vmatprep.subr.mxu0 %v5037_v29  ;;  %v6317_v29 = vld [vmem:[#allocation4 + $0x52c8] sm:$0xff]  ;;  %6861 = vmatpush1.msra.mxu1 %v6580_v28  ;;  %v6724_v28 = vld [vmem:[#allocation4 + $0x5f80] sm:$0xff] }
 0x7c4   : > { %6012 = vmatpush1.msra.mxu0 %v5036_v30  ;;  %v6573_v30 = vld [vmem:[#allocation4 + $0x5ac8] sm:$0xff] }
 0x7c5   : > { %6013 = vmatprep.subr.mxu0 %v5029_v31  ;;  %v6316_v31 = vld [vmem:[#allocation4 + $0x52c0] sm:$0xff]  ;;  %6862 = vmatprep.subr.mxu1 %v6573_v30  ;;  %v6717_v30 = vld [vmem:[#allocation4 + $0x5f48] sm:$0xff] }
 0x7c6   : > { %6014 = vmatpush1.msra.mxu0 %v5028_v56  ;;  %v6572_v56 = vld [vmem:[#allocation4 + $0x5ac0] sm:$0xff] }
 0x7c7   : > { %6015 = vmatprep.subr.mxu0 %v5021_v55  ;;  %v6309_v55 = vld [vmem:[#allocation4 + $0x5288] sm:$0xff]  ;;  %6863 = vmatpush1.msra.mxu1 %v6572_v56  ;;  %v6716_v56 = vld [vmem:[#allocation4 + $0x5f40] sm:$0xff] }
 0x7c8   : > { %6016 = vmatpush1.msra.mxu0 %v5020_v53  ;;  %v6565_v53 = vld [vmem:[#allocation4 + $0x5a88] sm:$0xff] }
 0x7c9   : > { %6017 = vmatprep.subr.mxu0 %v5013_v58  ;;  %v6308_v58 = vld [vmem:[#allocation4 + $0x5280] sm:$0xff]  ;;  %6864 = vmatprep.subr.mxu1 %v6565_v53  ;;  %v6709_v53 = vld [vmem:[#allocation4 + $0x5f08] sm:$0xff] }
 0x7ca   : > { %6018 = vmatpush1.msra.mxu0 %v5012_v32  ;;  %v6564_v32 = vld [vmem:[#allocation4 + $0x5a80] sm:$0xff] }
 0x7cb   : > { %6019 = vmatprep.subr.mxu0 %v5261_v1  ;;  %v6301_v1 = vld [vmem:[#allocation4 + $0x5248] sm:$0xff]  ;;  %6865 = vmatpush1.msra.mxu1 %v6564_v32  ;;  %v6708_v32 = vld [vmem:[#allocation4 + $0x5f00] sm:$0xff] }
 0x7cc   : > { %6020 = vmatpush2.msra.mxu0 %v5260_v4  ;;  %v6557_v4 = vld [vmem:[#allocation4 + $0x5a48] sm:$0xff] }
 0x7cd   : > { %6021 = vmatprep.subr.mxu0 %v5253_v33  ;;  %v6300_v33 = vld [vmem:[#allocation4 + $0x5240] sm:$0xff]  ;;  %6866 = vmatprep.subr.mxu1 %v6557_v4  ;;  %v6701_v4 = vld [vmem:[#allocation4 + $0x5ec8] sm:$0xff] }
 0x7ce   : > { %6022 = vmatpush2.msra.mxu0 %v5252_v19  ;;  %v6556_v19 = vld [vmem:[#allocation4 + $0x5a40] sm:$0xff] }
 0x7cf   : > { %6023 = vmatprep.subr.mxu0 %v5245_v57  ;;  %v6293_v57 = vld [vmem:[#allocation4 + $0x5208] sm:$0xff]  ;;  %6867 = vmatpush1.msra.mxu1 %v6556_v19  ;;  %v6700_v19 = vld [vmem:[#allocation4 + $0x5ec0] sm:$0xff] }
 0x7d0   : > { %6024 = vmatpush2.msra.mxu0 %v5244_v34  ;;  %v6549_v34 = vld [vmem:[#allocation4 + $0x5a08] sm:$0xff] }
 0x7d1   : > { %6025 = vmatprep.subr.mxu0 %v5237_v35  ;;  %v6292_v35 = vld [vmem:[#allocation4 + $0x5200] sm:$0xff]  ;;  %6868 = vmatprep.subr.mxu1 %v6549_v34  ;;  %v6693_v34 = vld [vmem:[#allocation4 + $0x5e88] sm:$0xff] }
 0x7d2   : > { %6026 = vmatpush2.msra.mxu0 %v5236_v36  ;;  %v6548_v36 = vld [vmem:[#allocation4 + $0x5a00] sm:$0xff] }
 0x7d3   : > { %6027 = vmatprep.subr.mxu0 %v5229_v37  ;;  %v6285_v37 = vld [vmem:[#allocation4 + $0x51c8] sm:$0xff]  ;;  %6869 = vmatpush1.msra.mxu1 %v6548_v36  ;;  %v6692_v36 = vld [vmem:[#allocation4 + $0x5e80] sm:$0xff] }
 0x7d4   : > { %6028 = vmatpush2.msra.mxu0 %v5228_v39  ;;  %v6541_v39 = vld [vmem:[#allocation4 + $0x59c8] sm:$0xff] }
 0x7d5   : > { %6029 = vmatprep.subr.mxu0 %v5221_v38  ;;  %v6284_v38 = vld [vmem:[#allocation4 + $0x51c0] sm:$0xff]  ;;  %6870 = vmatprep.subr.mxu1 %v6541_v39  ;;  %v6685_v39 = vld [vmem:[#allocation4 + $0x5e48] sm:$0xff] }
 0x7d6   : > { %6030 = vmatpush2.msra.mxu0 %v5220_v40  ;;  %v6540_v40 = vld [vmem:[#allocation4 + $0x59c0] sm:$0xff] }
 0x7d7   : > { %6031 = vmatprep.subr.mxu0 %v5213_v41  ;;  %v6277_v41 = vld [vmem:[#allocation4 + $0x5188] sm:$0xff]  ;;  %6871 = vmatpush1.msra.mxu1 %v6540_v40  ;;  %v6684_v40 = vld [vmem:[#allocation4 + $0x5e40] sm:$0xff] }
 0x7d8   : > { %6032 = vmatpush2.msra.mxu0 %v5212_v45  ;;  %v6533_v45 = vld [vmem:[#allocation4 + $0x5988] sm:$0xff] }
 0x7d9   : > { %6033 = vmatprep.subr.mxu0 %v5205_v46  ;;  %v6276_v46 = vld [vmem:[#allocation4 + $0x5180] sm:$0xff]  ;;  %6872 = vmatprep.subr.mxu1 %v6533_v45  ;;  %v6677_v45 = vld [vmem:[#allocation4 + $0x5e08] sm:$0xff] }
 0x7da   : > { %6034 = vmatpush2.msra.mxu0 %v5204_v47  ;;  %v6532_v47 = vld [vmem:[#allocation4 + $0x5980] sm:$0xff] }
 0x7db   : > { %6035 = vmatprep.subr.mxu0 %v5197_v49  ;;  %v6269_v49 = vld [vmem:[#allocation4 + $0x5148] sm:$0xff]  ;;  %6873 = vmatpush1.msra.mxu1 %v6532_v47  ;;  %v6420_v47 = vld [vmem:[#allocation4 + $0x5600] sm:$0xff] }
 0x7dc   : > { %6036 = vmatpush2.msra.mxu0 %v5196_v50  ;;  %v6525_v50 = vld [vmem:[#allocation4 + $0x5948] sm:$0xff] }
 0x7dd   : > { %6037 = vmatprep.subr.mxu0 %v5189_v52  ;;  %v6268_v52 = vld [vmem:[#allocation4 + $0x5140] sm:$0xff]  ;;  %6874 = vmatprep.subr.mxu1 %v6525_v50  ;;  %v6413_v50 = vld [vmem:[#allocation4 + $0x55c8] sm:$0xff] }
 0x7de   : > { %6038 = vmatpush2.msra.mxu0 %v5188_v59  ;;  %v6524_v59 = vld [vmem:[#allocation4 + $0x5940] sm:$0xff] }
 0x7df   : > { %6039 = vmatprep.subr.mxu0 %v5181_v60  ;;  %v6261_v60 = vld [vmem:[#allocation4 + $0x5108] sm:$0xff]  ;;  %6875 = vmatpush1.msra.mxu1 %v6524_v59  ;;  %v8320_v59 = vld [vmem:[#allocation6 + $0x20] sm:$0xff] }
 0x7e0   : > { %6040 = vmatpush2.msra.mxu0 %v5180_v63  ;;  %v6517_v63 = vld [vmem:[#allocation4 + $0x5908] sm:$0xff] }
 0x7e1   : > { %6041 = vmatprep.subr.mxu0 %v5173_v0  ;;  %6876 = vmatprep.subr.mxu1 %v6517_v63  ;;  %v6260_v0 = vld [vmem:[#allocation4 + $0x5100] sm:$0xff] }
 0x7e2   : > { %6042 = vmatpush2.msra.mxu0 %v5172_v3  ;;  %v6516_v3 = vld [vmem:[#allocation4 + $0x5900] sm:$0xff] }
 0x7e3   : > { %6043 = vmatprep.subr.mxu0 %v5165_v23  ;;  %6877 = vmatpush1.msra.mxu1 %v6516_v3  ;;  %v6253_v23 = vld [vmem:[#allocation4 + $0x50c8] sm:$0xff]  ;;  %v6668_v63 = vld [vmem:[#allocation4 + $0x5dc0] sm:$0xff] }
 0x7e4   : > { %6044 = vmatpush2.msra.mxu0 %v5164_v25  ;;  %v6509_v25 = vld [vmem:[#allocation4 + $0x58c8] sm:$0xff] }
 0x7e5   : > { %6045 = vmatprep.subr.mxu0 %v5157_v21  ;;  %6878 = vmatprep.subr.mxu1 %v6509_v25  ;;  %v6252_v21 = vld [vmem:[#allocation4 + $0x50c0] sm:$0xff]  ;;  %v6661_v3 = vld [vmem:[#allocation4 + $0x5d88] sm:$0xff] }
 0x7e6   : > { %6046 = vmatpush2.msra.mxu0 %v5156_v16  ;;  %v6508_v16 = vld [vmem:[#allocation4 + $0x58c0] sm:$0xff] }
 0x7e7   : > { %6047 = vmatprep.subr.mxu0 %v5149_v6  ;;  %6879 = vmatpush1.msra.mxu1 %v6508_v16  ;;  %v6245_v6 = vld [vmem:[#allocation4 + $0x5088] sm:$0xff]  ;;  %v6660_v25 = vld [vmem:[#allocation4 + $0x5d80] sm:$0xff] }
 0x7e8   : > { %6048 = vmatpush2.msra.mxu0 %v5148_v48  ;;  %v6501_v48 = vld [vmem:[#allocation4 + $0x5888] sm:$0xff] }
 0x7e9   : > { %6049 = vmatprep.subr.mxu0 %v5141_v42  ;;  %6880 = vmatprep.subr.mxu1 %v6501_v48  ;;  %v6244_v42 = vld [vmem:[#allocation4 + $0x5080] sm:$0xff]  ;;  %v6653_v48 = vld [vmem:[#allocation4 + $0x5d48] sm:$0xff] }
 0x7ea   : > { %6050 = vmatpush2.msra.mxu0 %v5140_v43  ;;  %v6500_v43 = vld [vmem:[#allocation4 + $0x5880] sm:$0xff] }
 0x7eb   : > { %6052 = vmatmul.mubr.f32.vlgmr.msra.gmra.mxu0 %v8306_v13  ;;  %6783 = vmatprep.subr.mxu0 %v6349_v44  ;;  %v6325_v13 = vld [vmem:[#allocation4 + $0x5308] sm:$0xff] }
 0x7ec   : > { %6784 = vmatpush1.msra.mxu0 %v6348_v26  ;;  %6881 = vmatpush1.msra.mxu1 %v6500_v43  ;;  %v6237_v44 = vld [vmem:[#allocation4 + $0x5048] sm:$0xff]  ;;  %v6236_v26 = vld [vmem:[#allocation4 + $0x5040] sm:$0xff] }
 0x7ed   : > { %6785 = vmatprep.subr.mxu0 %v6341_v27  ;;  %6882 = vmatprep.subr.mxu1 %v6493_v51  ;;  %v6229_v27 = vld [vmem:[#allocation4 + $0x5008] sm:$0xff]  ;;  %v6652_v43 = vld [vmem:[#allocation4 + $0x5d40] sm:$0xff] }
 0x7ee   : > { %6786 = vmatpush1.msra.mxu0 %v6340_v9  ;;  %6883 = vmatpush1.msra.mxu1 %v6492_v7  ;;  %v6228_v9 = vld [vmem:[#allocation4 + $0x5000] sm:$0xff]  ;;  %v6645_v51 = vld [vmem:[#allocation4 + $0x5d08] sm:$0xff] }
 0x7ef   : > { %6787 = vmatprep.subr.mxu0 %v6333_v22  ;;  %6884 = vmatprep.subr.mxu1 %v6485_v20  ;;  %v6477_v22 = vld [vmem:[#allocation4 + $0x57c8] sm:$0xff]  ;;  %v6388_v7 = vld [vmem:[#allocation4 + $0x5500] sm:$0xff]  ;;  %v5524_v20 = vrot.slane %v8320_v59, %v8078_v54 }
 0x7f0   : > { %6788 = vmatpush1.msra.mxu0 %v6332_v11  ;;  %6885 = vmatpush1.msra.mxu1 %v6484_v24  ;;  %v6476_v11 = vld [vmem:[#allocation4 + $0x57c0] sm:$0xff]  ;;  %v6637_v24 = vld [vmem:[#allocation4 + $0x5cc8] sm:$0xff] }
 0x7f1   : > { %6789 = vmatprep.subr.mxu0 %v6325_v13  ;;  %6886 = vmatprep.subr.mxu1 %v6733_v10  ;;  %v6469_v13 = vld [vmem:[#allocation4 + $0x5788] sm:$0xff]  ;;  %v5532_v10 = vrot.slane %v8320_v59, %v8087_v61 }
 0x7f2   : > { %6790 = vmatpush1.msra.mxu0 %v6324_v62  ;;  %6887 = vmatpush2.msra.mxu1 %v6732_v15  ;;  %v6468_v62 = vld [vmem:[#allocation4 + $0x5780] sm:$0xff] }
 0x7f3   : > { %6791 = vmatprep.subr.mxu0 %v6317_v29  ;;  %6888 = vmatprep.subr.mxu1 %v6725_v17  ;;  %v6461_v29 = vld [vmem:[#allocation4 + $0x5748] sm:$0xff]  ;;  %v6636_v15 = vld [vmem:[#allocation4 + $0x5cc0] sm:$0xff] }
 0x7f4   : > { %6792 = vmatpush1.msra.mxu0 %v6316_v31  ;;  %6889 = vmatpush2.msra.mxu1 %v6724_v28  ;;  %v6460_v31 = vld [vmem:[#allocation4 + $0x5740] sm:$0xff]  ;;  %v6373_v17 = vld [vmem:[#allocation4 + $0x5488] sm:$0xff] }
 0x7f5   : > { %6793 = vmatprep.subr.mxu0 %v6309_v55  ;;  %6890 = vmatprep.subr.mxu1 %v6717_v30  ;;  %v6453_v55 = vld [vmem:[#allocation4 + $0x5708] sm:$0xff]  ;;  %v6372_v30 = vld [vmem:[#allocation4 + $0x5480] sm:$0xff] }
 0x7f6   : > { %6794 = vmatpush1.msra.mxu0 %v6308_v58  ;;  %6891 = vmatpush2.msra.mxu1 %v6716_v56  ;;  %v6452_v58 = vld [vmem:[#allocation4 + $0x5700] sm:$0xff] }
 0x7f7   : > { %6795 = vmatprep.subr.mxu0 %v6301_v1  ;;  %6892 = vmatprep.subr.mxu1 %v6709_v53  ;;  %v6445_v1 = vld [vmem:[#allocation4 + $0x56c8] sm:$0xff] }
 0x7f8   : > { %6796 = vmatpush1.msra.mxu0 %v6300_v33  ;;  %6893 = vmatpush2.msra.mxu1 %v6708_v32  ;;  %v6444_v33 = vld [vmem:[#allocation4 + $0x56c0] sm:$0xff]  ;;  %v6365_v53 = vld [vmem:[#allocation4 + $0x5448] sm:$0xff] }
 0x7f9   : > { %6797 = vmatprep.subr.mxu0 %v6293_v57  ;;  %6894 = vmatprep.subr.mxu1 %v6701_v4  ;;  %v6437_v57 = vld [vmem:[#allocation4 + $0x5688] sm:$0xff]  ;;  %v6620_v4 = vld [vmem:[#allocation4 + $0x5c40] sm:$0xff] }
 0x7fa   : > { %6798 = vmatpush1.msra.mxu0 %v6292_v35  ;;  %6895 = vmatpush2.msra.mxu1 %v6700_v19  ;;  %v6436_v35 = vld [vmem:[#allocation4 + $0x5680] sm:$0xff]  ;;  %v6357_v19 = vld [vmem:[#allocation4 + $0x5408] sm:$0xff] }
 0x7fb   : > { %6799 = vmatprep.subr.mxu0 %v6285_v37  ;;  %6896 = vmatprep.subr.mxu1 %v6693_v34  ;;  %v6429_v37 = vld [vmem:[#allocation4 + $0x5648] sm:$0xff] }
 0x7fc   : > { %6800 = vmatpush1.msra.mxu0 %v6284_v38  ;;  %6897 = vmatpush2.msra.mxu1 %v6692_v36  ;;  %v6428_v38 = vld [vmem:[#allocation4 + $0x5640] sm:$0xff] }
 0x7fd   : > { %6801 = vmatprep.subr.mxu0 %v6277_v41  ;;  %6898 = vmatprep.subr.mxu1 %v6685_v39  ;;  %v6421_v41 = vld [vmem:[#allocation4 + $0x5608] sm:$0xff]  ;;  %v6612_v36 = vld [vmem:[#allocation4 + $0x5c00] sm:$0xff] }
 0x7fe   : > { %6802 = vmatpush1.msra.mxu0 %v6276_v46  ;;  %6899 = vmatpush2.msra.mxu1 %v6684_v40  ;;  %v5627_v46 = vpop.f32.mrf.mxu0 }
 0x7ff   : > { %6803 = vmatprep.subr.mxu0 %v6269_v49  ;;  %6900 = vmatprep.subr.mxu1 %v6677_v45  ;;  %v6676_v49 = vld [vmem:[#allocation4 + $0x5e00] sm:$0xff]  ;;  %v5628_v56 = vadd.f32 %v5627_v46, %v5524_v20  ;;  %v6351_v46 = vld [vmem:[#allocation4 + $0x53d8] sm:$0xff] }
 0x800   : > { %6804 = vmatpush1.msra.mxu0 %v6268_v52  ;;  %6901 = vmatpush2.msra.mxu1 %v6676_v49  ;;  %v6669_v52 = vld [vmem:[#allocation4 + $0x5dc8] sm:$0xff]  ;;  %v5629_v16 = vpop.f32.mrf.mxu0  ;;  %v6543_v20 = vld [vmem:[#allocation4 + $0x59d8] sm:$0xff] }
 0x801   : > { %6805 = vmatprep.subr.mxu0 %v6261_v60  ;;  %6902 = vmatprep.subr.mxu1 %v6669_v52  ;;  %v6412_v60 = vld [vmem:[#allocation4 + $0x55c0] sm:$0xff]  ;;  %v6606_v52 = vld [vmem:[#allocation4 + $0x5bd0] sm:$0xff] }
 0x802   : > { %6806 = vmatpush1.msra.mxu0 %v6260_v0  ;;  %v6405_v0 = vld [vmem:[#allocation4 + $0x5588] sm:$0xff]  ;;  %6903 = vmatpush2.msra.mxu1 %v6668_v63  ;;  %v6599_v63 = vld [vmem:[#allocation4 + $0x5b98] sm:$0xff] }
 0x803   : > { %6807 = vmatprep.subr.mxu0 %v6253_v23  ;;  %v6404_v23 = vld [vmem:[#allocation4 + $0x5580] sm:$0xff]  ;;  %6904 = vmatprep.subr.mxu1 %v6661_v3  ;;  %v6598_v3 = vld [vmem:[#allocation4 + $0x5b90] sm:$0xff] }
 0x804   : > { %6808 = vmatpush1.msra.mxu0 %v6252_v21  ;;  %v5698_v21 = vpop.f32.mrf.mxu1  ;;  %6905 = vmatpush2.msra.mxu1 %v6660_v25 }
 0x805   : > { %6809 = vmatprep.subr.mxu0 %v6245_v6  ;;  %v6397_v6 = vld [vmem:[#allocation4 + $0x5548] sm:$0xff]  ;;  %6906 = vmatprep.subr.mxu1 %v6653_v48  ;;  %v6575_v48 = vld [vmem:[#allocation4 + $0x5ad8] sm:$0xff] }
 0x806   : > { %6810 = vmatpush1.msra.mxu0 %v6244_v42  ;;  %v6396_v42 = vld [vmem:[#allocation4 + $0x5540] sm:$0xff]  ;;  %6907 = vmatpush2.msra.mxu1 %v6652_v43  ;;  %v6567_v43 = vld [vmem:[#allocation4 + $0x5a98] sm:$0xff] }
 0x807   : > { %6811 = vmatprep.subr.mxu0 %v6237_v44  ;;  %v6389_v44 = vld [vmem:[#allocation4 + $0x5508] sm:$0xff]  ;;  %6908 = vmatprep.subr.mxu1 %v6645_v51  ;;  %v6559_v51 = vld [vmem:[#allocation4 + $0x5a58] sm:$0xff] }
 0x808   : > { %6812 = vmatpush1.msra.mxu0 %v6236_v26 }
 0x809   : > { %6813 = vmatprep.subr.mxu0 %v6229_v27  ;;  %v6644_v27 = vld [vmem:[#allocation4 + $0x5d00] sm:$0xff] }
 0x80a   : > { %6814 = vmatpush1.msra.mxu0 %v6228_v9  ;;  %v6381_v9 = vld [vmem:[#allocation4 + $0x54c8] sm:$0xff]  ;;  %6909 = vmatpush2.msra.mxu1 %v6644_v27  ;;  %v6550_v27 = vld [vmem:[#allocation4 + $0x5a10] sm:$0xff] }
 0x80b   : > { %6815 = vmatprep.subr.mxu0 %v6477_v22  ;;  %v5700_v22 = vpop.f32.mrf.mxu1  ;;  %6910 = vmatprep.subr.mxu1 %v6637_v24 }
 0x80c   : > { %6816 = vmatpush2.msra.mxu0 %v6476_v11  ;;  %v6380_v11 = vld [vmem:[#allocation4 + $0x54c0] sm:$0xff]  ;;  %6911 = vmatpush2.msra.mxu1 %v6636_v15 }
 0x80d   : > { %6817 = vmatprep.subr.mxu0 %v6469_v13  ;;  %v5536_v13 = vrot.slane %v8320_v59, %v8090_v2  ;;  %v5840_v28 = vpop.f32.mrf.mxu1 }
 0x80e   : > { %6818 = vmatpush2.msra.mxu0 %v6468_v62  ;;  %v6629_v62 = vld [vmem:[#allocation4 + $0x5c88] sm:$0xff] }
 0x80f   : > { %6819 = vmatprep.subr.mxu0 %v6461_v29  ;;  %6912 = vmatprep.subr.mxu1 %v6629_v62  ;;  %v5842_v34 = vpop.f32.mrf.mxu1 }
 0x810   : > { %6820 = vmatpush2.msra.mxu0 %v6460_v31  ;;  %v6628_v31 = vld [vmem:[#allocation4 + $0x5c80] sm:$0xff] }
 0x811   : > { %6821 = vmatprep.subr.mxu0 %v6453_v55  ;;  %v5528_v55 = vrot.slane %v8320_v59, %v8095_v12  ;;  %6913 = vmatpush2.msra.mxu1 %v6628_v31 }
 0x812   : > { %6822 = vmatpush2.msra.mxu0 %v6452_v58  ;;  %v6621_v58 = vld [vmem:[#allocation4 + $0x5c48] sm:$0xff] }
 0x813   : > { %6823 = vmatprep.subr.mxu0 %v6445_v1  ;;  %v6364_v1 = vld [vmem:[#allocation4 + $0x5440] sm:$0xff]  ;;  %6914 = vmatprep.subr.mxu1 %v6621_v58  ;;  %v5630_v39 = vadd.f32 %v5629_v16, %v5528_v55  ;;  %v6583_v16 = vld [vmem:[#allocation4 + $0x5b18] sm:$0xff] }
 0x814   : > { %6824 = vmatpush2.msra.mxu0 %v6444_v33  ;;  %6915 = vmatpush2.msra.mxu1 %v6620_v4  ;;  %v6519_v55 = vld [vmem:[#allocation4 + $0x5918] sm:$0xff] }
 0x815   : > { %6825 = vmatprep.subr.mxu0 %v6437_v57  ;;  %v6613_v57 = vld [vmem:[#allocation4 + $0x5c08] sm:$0xff]  ;;  %v6511_v4 = vld [vmem:[#allocation4 + $0x58d8] sm:$0xff] }
 0x816   : > { %6826 = vmatpush2.msra.mxu0 %v6436_v35  ;;  %v6356_v35 = vld [vmem:[#allocation4 + $0x5400] sm:$0xff]  ;;  %6916 = vmatprep.subr.mxu1 %v6613_v57 }
 0x817   : > { %6827 = vmatprep.subr.mxu0 %v6429_v37  ;;  %v5699_v37 = vadd.f32 %v5698_v21, %v5628_v56  ;;  %6917 = vmatpush2.msra.mxu1 %v6612_v36  ;;  %v6590_v21 = vld [vmem:[#allocation4 + $0x5b50] sm:$0xff]  ;;  %v5544_v56 = vrot.slane %v8320_v59, %v8119_v18 }
 0x818   : > { %6828 = vmatpush2.msra.mxu0 %v6428_v38  ;;  %v8330_v38 = vld.sshfl [vmem:[#allocation2 + $0x14] sm:$0x33 pattern:$0x76325410] }
 0x819   : > { %6829 = vmatprep.subr.mxu0 %v6421_v41  ;;  %v8334_v41 = vcombine.high %v8330_v38, %v8330_v38  ;;  %v7605_v49 = vmul.f32 -1.442695, %v5699_v37  ;;  %v6503_v37 = vld [vmem:[#allocation4 + $0x5898] sm:$0xff] }
 0x81a   : > { %6830 = vmatpush2.msra.mxu0 %v6420_v47  ;;  %v6607_v47 = vld [vmem:[#allocation4 + $0x5bd8] sm:$0xff] }
 0x81b   : > { %6831 = vmatprep.subr.mxu0 %v6413_v50  ;;  %6918 = vmatprep.mubr.f32.mxu1 %v8334_v41  ;;  %v5701_v50 = vadd.f32 %v5700_v22, %v5630_v39  ;;  %7806 = vpow2.f32 %v7605_v49  ;;  %v6535_v22 = vld [vmem:[#allocation4 + $0x5998] sm:$0xff]  ;;  %v6502_v39 = vld [vmem:[#allocation4 + $0x5890] sm:$0xff] }
 0x81c   : > { %6832 = vmatpush2.msra.mxu0 %v6412_v60  ;;  %6996 = vmatprep.subr.mxu1 %v6607_v47  ;;  %v6487_v47 = vld [vmem:[#allocation4 + $0x5818] sm:$0xff]  ;;  %v6486_v49 = vld [vmem:[#allocation4 + $0x5810] sm:$0xff] }
 0x81d   : > { %6833 = vmatprep.subr.mxu0 %v6405_v0  ;;  %6919 = vmatmul.mubr.f32.vlgmr.msra.gmra.mxu1 %v8330_v38  ;;  %v7606_v25 = vmul.f32 -1.442695, %v5701_v50  ;;  %v6735_v50 = vld [vmem:[#allocation4 + $0x5fd8] sm:$0xff] }
 0x81e   : > { %6834 = vmatpush2.msra.mxu0 %v6404_v23  ;;  %6997 = vmatpush1.msra.mxu1 %v6606_v52  ;;  %v6591_v23 = vld [vmem:[#allocation4 + $0x5b58] sm:$0xff]  ;;  %v6734_v52 = vld [vmem:[#allocation4 + $0x5fd0] sm:$0xff] }
 0x81f   : > { %6835 = vmatprep.subr.mxu0 %v6397_v6  ;;  %7060 = vmatprep.mubr.f32.mxu1 %v8334_v41  ;;  %v6582_v6 = vld [vmem:[#allocation4 + $0x5b10] sm:$0xff] }
 0x820   : > { %6836 = vmatpush2.msra.mxu0 %v6396_v42  ;;  %6998 = vmatprep.subr.mxu1 %v6599_v63  ;;  %v6574_v42 = vld [vmem:[#allocation4 + $0x5ad0] sm:$0xff] }
 0x821   : > { %6837 = vmatprep.subr.mxu0 %v6389_v44  ;;  %6999 = vmatpush1.msra.mxu1 %v6598_v3  ;;  %v6566_v44 = vld [vmem:[#allocation4 + $0x5a90] sm:$0xff]  ;;  %v7611_v3 = vld.sshfl [vmem:[#allocation3 + $0x10] sm:$0x33 pattern:$0x76325410] }
 0x822   : > { %6838 = vmatpush2.msra.mxu0 %v6388_v7  ;;  %7000 = vmatprep.subr.mxu1 %v6591_v23  ;;  %v6551_v7 = vld [vmem:[#allocation4 + $0x5a18] sm:$0xff]  ;;  %v6726_v63 = vld [vmem:[#allocation4 + $0x5f90] sm:$0xff] }
 0x823   : > { %6839 = vmatprep.subr.mxu0 %v6381_v9  ;;  %7001 = vmatpush1.msra.mxu1 %v6590_v21  ;;  %v6542_v9 = vld [vmem:[#allocation4 + $0x59d0] sm:$0xff]  ;;  %v6711_v21 = vld [vmem:[#allocation4 + $0x5f18] sm:$0xff] }
 0x824   : > { %6840 = vmatpush2.msra.mxu0 %v6380_v11  ;;  %7002 = vmatprep.subr.mxu1 %v6583_v16  ;;  %v6534_v11 = vld [vmem:[#allocation4 + $0x5990] sm:$0xff] }
 0x825   : > { %6841 = vmatprep.subr.mxu0 %v6373_v17  ;;  %7003 = vmatpush1.msra.mxu1 %v6582_v6  ;;  %v6527_v17 = vld [vmem:[#allocation4 + $0x5958] sm:$0xff]  ;;  %v6718_v23 = vld [vmem:[#allocation4 + $0x5f50] sm:$0xff] }
 0x826   : > { %6842 = vmatpush2.msra.mxu0 %v6372_v30  ;;  %7004 = vmatprep.subr.mxu1 %v6575_v48  ;;  %v6710_v6 = vld [vmem:[#allocation4 + $0x5f10] sm:$0xff] }
 0x827   : > { %6843 = vmatprep.subr.mxu0 %v6365_v53  ;;  %7005 = vmatpush1.msra.mxu1 %v6574_v42  ;;  %v6175_v42 = vcombine.high %v7611_v3, %v7611_v3 }
 0x828   : > { %6844 = vmatpush2.msra.mxu0 %v6364_v1  ;;  %7006 = vmatprep.subr.mxu1 %v6567_v43  ;;  %v7807_v24 = vpop.eup %7806  ;;  %v6703_v43 = vld [vmem:[#allocation4 + $0x5ed8] sm:$0xff] }
 0x829   : > { %6845 = vmatprep.subr.mxu0 %v6357_v19  ;;  %7007 = vmatpush1.msra.mxu1 %v6566_v44  ;;  %v6135_v62 = vadd.f32 1.0, %v7807_v24 }
 0x82a   : > { %6846 = vmatpush2.msra.mxu0 %v6356_v35  ;;  %7008 = vmatprep.subr.mxu1 %v6559_v51  ;;  %v6702_v51 = vld [vmem:[#allocation4 + $0x5ed0] sm:$0xff] }
 0x82b   : > { %v5769_v26 = vpop.f32.mrf.mxu0  ;;  %6925 = vmatprep.subr.mxu0 %v6351_v46  ;;  %v6494_v46 = vld [vmem:[#allocation4 + $0x5850] sm:$0xff] }
 0x82c   : > { %v5770_v32 = vadd.f32 %v5769_v26, %v5532_v10  ;;  %v6558_v26 = vld [vmem:[#allocation4 + $0x5a50] sm:$0xff] }
 0x82d   : > { %v5771_v29 = vpop.f32.mrf.mxu0  ;;  %7009 = vmatpush1.msra.mxu1 %v6558_v26 }
 0x82e   : > { %v5772_v33 = vadd.f32 %v5771_v29, %v5536_v13  ;;  %v5841_v40 = vadd.f32 %v5840_v28, %v5770_v32  ;;  %7010 = vmatprep.subr.mxu1 %v6551_v7  ;;  %v5540_v13 = vrot.slane %v8320_v59, %v8116_v14  ;;  %v5982_v28 = vpop.f32.mrf.mxu1  ;;  %v6526_v29 = vld [vmem:[#allocation4 + $0x5950] sm:$0xff] }
 0x82f   : > { %7011 = vmatpush1.msra.mxu1 %v6550_v27  ;;  %v6518_v32 = vld [vmem:[#allocation4 + $0x5910] sm:$0xff]  ;;  %v6695_v27 = vld [vmem:[#allocation4 + $0x5e98] sm:$0xff] }
 0x830   : > { %v5843_v45 = vadd.f32 %v5842_v34, %v5772_v33  ;;  %v7607_v60 = vmul.f32 -1.442695, %v5841_v40  ;;  %7012 = vmatprep.subr.mxu1 %v6543_v20  ;;  %v5984_v57 = vpop.f32.mrf.mxu1  ;;  %v6510_v34 = vld [vmem:[#allocation4 + $0x58d0] sm:$0xff] }
 0x831   : > { %7013 = vmatpush1.msra.mxu1 %v6542_v9  ;;  %v6694_v9 = vld [vmem:[#allocation4 + $0x5e90] sm:$0xff] }
 0x832   : > { %v7608_v0 = vmul.f32 -1.442695, %v5843_v45  ;;  %7808 = vpow2.f32 %v7607_v60  ;;  %7014 = vmatprep.subr.mxu1 %v6535_v22  ;;  %v6495_v45 = vld [vmem:[#allocation4 + $0x5858] sm:$0xff] }
 0x833   : > { %7015 = vmatpush1.msra.mxu1 %v6534_v11  ;;  %v6727_v60 = vld [vmem:[#allocation4 + $0x5f98] sm:$0xff] }
 0x834   : > { %7810 = vpow2.f32 %v7608_v0  ;;  %7016 = vmatprep.subr.mxu1 %v6527_v17  ;;  %v6719_v0 = vld [vmem:[#allocation4 + $0x5f58] sm:$0xff] }
 0x835   : > { %7812 = vpow2.f32 %v7606_v25  ;;  %7017 = vmatpush1.msra.mxu1 %v6526_v29  ;;  %v6687_v11 = vld [vmem:[#allocation4 + $0x5e58] sm:$0xff] }
 0x836   : > { %7018 = vmatprep.subr.mxu1 %v6519_v55  ;;  %7814 = vrcp.f32 %v6135_v62  ;;  %v6679_v62 = vld [vmem:[#allocation4 + $0x5e18] sm:$0xff]  ;;  %v6662_v55 = vld [vmem:[#allocation4 + $0x5d90] sm:$0xff] }
 0x837   : > { %7019 = vmatpush1.msra.mxu1 %v6518_v32  ;;  %v6647_v32 = vld [vmem:[#allocation4 + $0x5d18] sm:$0xff] }
 0x838   : > { %7020 = vmatprep.subr.mxu1 %v6511_v4  ;;  %v6639_v4 = vld [vmem:[#allocation4 + $0x5cd8] sm:$0xff] }
 0x839   : > { %7021 = vmatpush1.msra.mxu1 %v6510_v34  ;;  %v6623_v34 = vld [vmem:[#allocation4 + $0x5c58] sm:$0xff] }
 0x83a   : > { %7022 = vmatprep.subr.mxu1 %v6503_v37  ;;  %v6614_v37 = vld [vmem:[#allocation4 + $0x5c10] sm:$0xff] }
 0x83b   : > { %7023 = vmatpush1.msra.mxu1 %v6502_v39  ;;  %v6609_v39 = vld [vmem:[#allocation4 + $0x5be8] sm:$0xff] }
 0x83c   : > { %7024 = vmatprep.subr.mxu1 %v6495_v45  ;;  %v6601_v45 = vld [vmem:[#allocation4 + $0x5ba8] sm:$0xff] }
 0x83d   : > { %7025 = vmatpush1.msra.mxu1 %v6494_v46  ;;  %v6600_v46 = vld [vmem:[#allocation4 + $0x5ba0] sm:$0xff] }
 0x83e   : > { %7026 = vmatprep.subr.mxu1 %v6487_v47  ;;  %v6593_v47 = vld [vmem:[#allocation4 + $0x5b68] sm:$0xff] }
 0x83f   : > { %v7809_v10 = vpop.eup %7808  ;;  %7027 = vmatpush1.msra.mxu1 %v6486_v49  ;;  %v6592_v49 = vld [vmem:[#allocation4 + $0x5b60] sm:$0xff] }
 0x840   : > { %v6147_v31 = vadd.f32 1.0, %v7809_v10  ;;  %7028 = vmatprep.subr.mxu1 %v6735_v50  ;;  %v6585_v50 = vld [vmem:[#allocation4 + $0x5b28] sm:$0xff] }
 0x841   : > { %v7811_v15 = vpop.eup %7810  ;;  %7029 = vmatpush2.msra.mxu1 %v6734_v52  ;;  %v6584_v52 = vld [vmem:[#allocation4 + $0x5b20] sm:$0xff] }
 0x842   : > { %v7813_v30 = vpop.eup %7812  ;;  %v6148_v53 = vadd.f32 1.0, %v7811_v15  ;;  %7816 = vrcp.f32 %v6147_v31  ;;  %7030 = vmatprep.subr.mxu1 %v6727_v60  ;;  %v6686_v15 = vld [vmem:[#allocation4 + $0x5e50] sm:$0xff]  ;;  %v6577_v60 = vld [vmem:[#allocation4 + $0x5ae8] sm:$0xff] }
 0x843   : > { %v6136_v33 = vadd.f32 1.0, %v7813_v30  ;;  %7031 = vmatpush2.msra.mxu1 %v6726_v63  ;;  %v7815_v25 = vpop.eup %7814  ;;  %v6671_v30 = vld [vmem:[#allocation4 + $0x5dd8] sm:$0xff]  ;;  %v6670_v31 = vld [vmem:[#allocation4 + $0x5dd0] sm:$0xff]  ;;  %v6576_v63 = vld [vmem:[#allocation4 + $0x5ae0] sm:$0xff] }
 0x844   : > { %7818 = vrcp.f32 %v6148_v53  ;;  %7032 = vmatprep.subr.mxu1 %v6719_v0  ;;  %v6655_v53 = vld [vmem:[#allocation4 + $0x5d58] sm:$0xff]  ;;  %v6569_v0 = vld [vmem:[#allocation4 + $0x5aa8] sm:$0xff] }
 0x845   : > { %7033 = vmatpush2.msra.mxu1 %v6718_v23  ;;  %v6561_v23 = vld [vmem:[#allocation4 + $0x5a68] sm:$0xff] }
 0x846   : > { %7034 = vmatprep.subr.mxu1 %v6711_v21  ;;  %v6553_v21 = vld [vmem:[#allocation4 + $0x5a28] sm:$0xff] }
 0x847   : > { %7035 = vmatpush2.msra.mxu1 %v6710_v6  ;;  %v6545_v6 = vld [vmem:[#allocation4 + $0x59e8] sm:$0xff] }
 0x848   : > { %7036 = vmatprep.subr.mxu1 %v6703_v43  ;;  %v6536_v43 = vld [vmem:[#allocation4 + $0x59a0] sm:$0xff] }
 0x849   : > { %7037 = vmatpush2.msra.mxu1 %v6702_v51  ;;  %v6529_v51 = vld [vmem:[#allocation4 + $0x5968] sm:$0xff] }
 0x84a   : > { %7038 = vmatprep.subr.mxu1 %v6695_v27  ;;  %v6521_v27 = vld [vmem:[#allocation4 + $0x5928] sm:$0xff] }
 0x84b   : > { %7039 = vmatpush2.msra.mxu1 %v6694_v9  ;;  %v6124_v9 = vpop.f32.mrf.mxu1 }
 0x84c   : > { %7040 = vmatprep.subr.mxu1 %v6687_v11 }
 0x84d   : > { %7041 = vmatpush2.msra.mxu1 %v6686_v15  ;;  %v6512_v15 = vld [vmem:[#allocation4 + $0x58e0] sm:$0xff] }
 0x84e   : > { %7042 = vmatprep.subr.mxu1 %v6679_v62 }
 0x84f   : > { %v7817_v16 = vpop.eup %7816 }
 0x850   : > { %v6178_v24 = vmul.f32 %v7817_v16, %v7611_v3  ;;  %v6568_v3 = vld [vmem:[#allocation4 + $0x5aa0] sm:$0xff] }
 0x851   : > { %v7819_v48 = vpop.eup %7818  ;;  %v6552_v16 = vld [vmem:[#allocation4 + $0x5a20] sm:$0xff] }
 0x852   : > { %v6179_v22 = vmul.f32 %v7819_v48, %v6175_v42  ;;  %v6544_v48 = vld [vmem:[#allocation4 + $0x59e0] sm:$0xff]  ;;  %v6537_v42 = vld [vmem:[#allocation4 + $0x59a8] sm:$0xff] }
 0x86b   : > { %v5911_v58 = vpop.f32.mrf.mxu0 }
 0x86c   : > { %v5912_v1 = vadd.f32 %v5911_v58, %v5540_v13  ;;  %v6654_v58 = vld [vmem:[#allocation4 + $0x5d50] sm:$0xff] }
 0x86d   : > { %v5913_v19 = vpop.f32.mrf.mxu0 }
 0x86e   : > { %v5983_v35 = vadd.f32 %v5982_v28, %v5912_v1  ;;  %v5914_v36 = vadd.f32 %v5913_v19, %v5544_v56  ;;  %v6678_v28 = vld [vmem:[#allocation4 + $0x5e10] sm:$0xff]  ;;  %v6663_v56 = vld [vmem:[#allocation4 + $0x5d98] sm:$0xff] }
 0x86f   : > { %7043 = vmatpush2.msra.mxu1 %v6678_v28  ;;  %v6646_v1 = vld [vmem:[#allocation4 + $0x5d10] sm:$0xff]  ;;  %v6631_v19 = vld [vmem:[#allocation4 + $0x5c98] sm:$0xff] }
 0x870   : > { %7820 = vtanh.f32 %v5983_v35  ;;  %v5985_v40 = vadd.f32 %v5984_v57, %v5914_v36  ;;  %7044 = vmatprep.subr.mxu1 %v6671_v30  ;;  %v6630_v57 = vld [vmem:[#allocation4 + $0x5c90] sm:$0xff]  ;;  %v6615_v36 = vld [vmem:[#allocation4 + $0x5c18] sm:$0xff]  ;;  %v6126_v30 = vpop.f32.mrf.mxu1 }
 0x871   : > { %7822 = vrcp.f32 %v6136_v33  ;;  %7045 = vmatpush2.msra.mxu1 %v6670_v31  ;;  %v6638_v33 = vld [vmem:[#allocation4 + $0x5cd0] sm:$0xff]  ;;  %v6504_v31 = vld [vmem:[#allocation4 + $0x58a0] sm:$0xff] }
 0x872   : > { %7824 = vtanh.f32 %v5985_v40  ;;  %7046 = vmatprep.subr.mxu1 %v6663_v56  ;;  %v6622_v35 = vld [vmem:[#allocation4 + $0x5c50] sm:$0xff]  ;;  %v6608_v40 = vld [vmem:[#allocation4 + $0x5be0] sm:$0xff] }
 0x873   : > { %7047 = vmatpush2.msra.mxu1 %v6662_v55  ;;  %v6497_v55 = vld [vmem:[#allocation4 + $0x5868] sm:$0xff] }
 0x874   : > { %7048 = vmatprep.subr.mxu1 %v6655_v53  ;;  %v6496_v53 = vld [vmem:[#allocation4 + $0x5860] sm:$0xff] }
 0x875   : > { %7049 = vmatpush2.msra.mxu1 %v6654_v58 }
 0x876   : > { %7050 = vmatprep.subr.mxu1 %v6647_v32  ;;  %v6489_v32 = vld [vmem:[#allocation4 + $0x5828] sm:$0xff] }
 0x877   : > { %7051 = vmatpush2.msra.mxu1 %v6646_v1  ;;  %v6488_v1 = vld [vmem:[#allocation4 + $0x5820] sm:$0xff] }
 0x878   : > { %7052 = vmatprep.subr.mxu1 %v6639_v4  ;;  %v6737_v4 = vld [vmem:[#allocation4 + $0x5fe8] sm:$0xff] }
 0x879   : > { %7053 = vmatpush2.msra.mxu1 %v6638_v33  ;;  %v6736_v33 = vld [vmem:[#allocation4 + $0x5fe0] sm:$0xff] }
 0x87a   : > { %7054 = vmatprep.subr.mxu1 %v6631_v19  ;;  %v6729_v19 = vld [vmem:[#allocation4 + $0x5fa8] sm:$0xff] }
 0x87b   : > { %7055 = vmatpush2.msra.mxu1 %v6630_v57  ;;  %v6728_v57 = vld [vmem:[#allocation4 + $0x5fa0] sm:$0xff] }
 0x87c   : > { %7056 = vmatprep.subr.mxu1 %v6623_v34  ;;  %v6721_v34 = vld [vmem:[#allocation4 + $0x5f68] sm:$0xff] }
 0x87d   : > { %v7821_v44 = vpop.eup %7820  ;;  %7057 = vmatpush2.msra.mxu1 %v6622_v35  ;;  %v6720_v35 = vld [vmem:[#allocation4 + $0x5f60] sm:$0xff] }
 0x87e   : > { %v7823_v26 = vpop.eup %7822  ;;  %v6180_v7 = vmul.f32 %v7821_v44, %v7815_v25  ;;  %7058 = vmatprep.subr.mxu1 %v6615_v36  ;;  %v6560_v25 = vld [vmem:[#allocation4 + $0x5a60] sm:$0xff]  ;;  %v5548_v44 = vrot.slane %v8320_v59, %v8134_v5  ;;  %v6713_v36 = vld [vmem:[#allocation4 + $0x5f28] sm:$0xff] }
 0x87f   : > { %v7825_v20 = vpop.eup %7824  ;;  %7059 = vmatpush2.msra.mxu1 %v6614_v37  ;;  %v6712_v37 = vld [vmem:[#allocation4 + $0x5f20] sm:$0xff] }
 0x880   : > { %v6181_v10 = vmul.f32 %v7825_v20, %v7823_v26  ;;  %v8343_v13 = vadd.f32 %v6180_v7, %v6178_v24  ;;  %7138 = vmatprep.subr.mxu1 %v6609_v39  ;;  %7061 = vmatmul.mubr.f32.vlgmr.msra.gmra.mxu1 %v8330_v38  ;;  %v6528_v26 = vld [vmem:[#allocation4 + $0x5960] sm:$0xff]  ;;  %v5552_v7 = vrot.slane %v8320_v59, %v8137_v8  ;;  %v6705_v39 = vld [vmem:[#allocation4 + $0x5ee8] sm:$0xff] }
 0x881   : > { %7139 = vmatpush1.msra.mxu1 %v6608_v40  ;;  %7202 = vmatprep.mubr.f32.mxu1 %v8334_v41  ;;  %v6520_v24 = vld [vmem:[#allocation4 + $0x5920] sm:$0xff] }
 0x882   : > { %v8345_v17 = vadd.f32 %v6181_v10, %v6179_v22  ;;  %7140 = vmatprep.subr.mxu1 %v6601_v45  ;;  %v6513_v10 = vld [vmem:[#allocation4 + $0x58e8] sm:$0xff]  ;;  %v6704_v40 = vld [vmem:[#allocation4 + $0x5ee0] sm:$0xff] }
 0x883   : > { %7141 = vmatpush1.msra.mxu1 %v6600_v46  ;;  %v6697_v45 = vld [vmem:[#allocation4 + $0x5ea8] sm:$0xff] }
 0x884   : > { %v6190_v29 = vcombine.low %v8343_v13, %v8345_v17  ;;  %7142 = vmatprep.subr.mxu1 %v6593_v47  ;;  %v6696_v47 = vld [vmem:[#allocation4 + $0x5ea0] sm:$0xff] }
 0x885   : > { %7143 = vmatpush1.msra.mxu1 %v6592_v49 }
 0x886   : > { %7612 = vst.sshfl [vmem:[#allocation3 + $0x10] sm:$0x33 pattern:$0x76325410] %v6190_v29  ;;  %7144 = vmatprep.subr.mxu1 %v6585_v50  ;;  %v6505_v29 = vld [vmem:[#allocation4 + $0x58a8] sm:$0xff] }
 0x887   : > { %7145 = vmatpush1.msra.mxu1 %v6584_v52  ;;  %v6689_v50 = vld [vmem:[#allocation4 + $0x5e68] sm:$0xff] }
 0x888   : > { %7146 = vmatprep.subr.mxu1 %v6577_v60  ;;  %v6688_v60 = vld [vmem:[#allocation4 + $0x5e60] sm:$0xff] }
 0x889   : > { %7147 = vmatpush1.msra.mxu1 %v6576_v63 }
 0x88a   : > { %7148 = vmatprep.subr.mxu1 %v6569_v0  ;;  %v6681_v0 = vld [vmem:[#allocation4 + $0x5e28] sm:$0xff] }
 0x88b   : > { %7149 = vmatpush1.msra.mxu1 %v6568_v3  ;;  %v6680_v3 = vld [vmem:[#allocation4 + $0x5e20] sm:$0xff] }
 0x88c   : > { %7150 = vmatprep.subr.mxu1 %v6561_v23  ;;  %v6673_v23 = vld [vmem:[#allocation4 + $0x5de8] sm:$0xff] }
 0x88d   : > { %7151 = vmatpush1.msra.mxu1 %v6560_v25  ;;  %v6672_v25 = vld [vmem:[#allocation4 + $0x5de0] sm:$0xff] }
 0x88e   : > { %7152 = vmatprep.subr.mxu1 %v6553_v21  ;;  %v6665_v21 = vld [vmem:[#allocation4 + $0x5da8] sm:$0xff] }
 0x88f   : > { %7153 = vmatpush1.msra.mxu1 %v6552_v16  ;;  %v6664_v16 = vld [vmem:[#allocation4 + $0x5da0] sm:$0xff] }
 0x890   : > { %7154 = vmatprep.subr.mxu1 %v6545_v6  ;;  %v6656_v6 = vld [vmem:[#allocation4 + $0x5d60] sm:$0xff] }
 0x891   : > { %7155 = vmatpush1.msra.mxu1 %v6544_v48  ;;  %v6649_v48 = vld [vmem:[#allocation4 + $0x5d28] sm:$0xff] }
 0x892   : > { %7156 = vmatprep.subr.mxu1 %v6537_v42  ;;  %v6648_v42 = vld [vmem:[#allocation4 + $0x5d20] sm:$0xff] }
 0x893   : > { %7157 = vmatpush1.msra.mxu1 %v6536_v43  ;;  %v6640_v43 = vld [vmem:[#allocation4 + $0x5ce0] sm:$0xff] }
 0x894   : > { %7158 = vmatprep.subr.mxu1 %v6529_v51  ;;  %v6633_v51 = vld [vmem:[#allocation4 + $0x5ca8] sm:$0xff] }
 0x895   : > { %7159 = vmatpush1.msra.mxu1 %v6528_v26 }
 0x896   : > { %7160 = vmatprep.subr.mxu1 %v6521_v27 }
 0x897   : > { %7161 = vmatpush1.msra.mxu1 %v6520_v24  ;;  %v6624_v24 = vld [vmem:[#allocation4 + $0x5c60] sm:$0xff] }
 0x898   : > { %7162 = vmatprep.subr.mxu1 %v6513_v10 }
 0x899   : > { %7163 = vmatpush1.msra.mxu1 %v6512_v15  ;;  %v6350_v15 = vld [vmem:[#allocation4 + $0x53d0] sm:$0xff] }
 0x89a   : > { %7164 = vmatprep.subr.mxu1 %v6505_v29  ;;  %v6343_v29 = vld [vmem:[#allocation4 + $0x5398] sm:$0xff] }
 0x89b   : > { %7165 = vmatpush1.msra.mxu1 %v6504_v31  ;;  %v6342_v31 = vld [vmem:[#allocation4 + $0x5390] sm:$0xff] }
 0x89c   : > { %7166 = vmatprep.subr.mxu1 %v6497_v55  ;;  %v6603_v55 = vld [vmem:[#allocation4 + $0x5bb8] sm:$0xff] }
 0x89d   : > { %7167 = vmatpush1.msra.mxu1 %v6496_v53  ;;  %v6334_v53 = vld [vmem:[#allocation4 + $0x5350] sm:$0xff] }
 0x89e   : > { %7168 = vmatprep.subr.mxu1 %v6489_v32  ;;  %v6327_v32 = vld [vmem:[#allocation4 + $0x5318] sm:$0xff] }
 0x89f   : > { %7169 = vmatpush1.msra.mxu1 %v6488_v1  ;;  %v6595_v1 = vld [vmem:[#allocation4 + $0x5b78] sm:$0xff] }
 0x8a0   : > { %7170 = vmatprep.subr.mxu1 %v6737_v4  ;;  %v6326_v4 = vld [vmem:[#allocation4 + $0x5310] sm:$0xff] }
 0x8a1   : > { %7171 = vmatpush2.msra.mxu1 %v6736_v33  ;;  %v6594_v33 = vld [vmem:[#allocation4 + $0x5b70] sm:$0xff] }
 0x8a2   : > { %7172 = vmatprep.subr.mxu1 %v6729_v19  ;;  %v6319_v19 = vld [vmem:[#allocation4 + $0x52d8] sm:$0xff] }
 0x8a3   : > { %7173 = vmatpush2.msra.mxu1 %v6728_v57  ;;  %v6587_v57 = vld [vmem:[#allocation4 + $0x5b38] sm:$0xff] }
 0x8a4   : > { %7174 = vmatprep.subr.mxu1 %v6721_v34  ;;  %v6318_v34 = vld [vmem:[#allocation4 + $0x52d0] sm:$0xff] }
 0x8a5   : > { %7175 = vmatpush2.msra.mxu1 %v6720_v35  ;;  %v6586_v35 = vld [vmem:[#allocation4 + $0x5b30] sm:$0xff] }
 0x8a6   : > { %7176 = vmatprep.subr.mxu1 %v6713_v36  ;;  %v6311_v36 = vld [vmem:[#allocation4 + $0x5298] sm:$0xff] }
 0x8a7   : > { %7177 = vmatpush2.msra.mxu1 %v6712_v37  ;;  %v6310_v37 = vld [vmem:[#allocation4 + $0x5290] sm:$0xff] }
 0x8a8   : > { %7178 = vmatprep.subr.mxu1 %v6705_v39  ;;  %v6578_v39 = vld [vmem:[#allocation4 + $0x5af0] sm:$0xff] }
 0x8a9   : > { %7179 = vmatpush2.msra.mxu1 %v6704_v40  ;;  %v6303_v40 = vld [vmem:[#allocation4 + $0x5258] sm:$0xff] }
 0x8aa   : > { %7180 = vmatprep.subr.mxu1 %v6697_v45  ;;  %v6571_v45 = vld [vmem:[#allocation4 + $0x5ab8] sm:$0xff] }
 0x8ab   : > { %v6053_v20 = vpop.f32.mrf.mxu0  ;;  %7181 = vmatpush2.msra.mxu1 %v6696_v47  ;;  %v6570_v47 = vld [vmem:[#allocation4 + $0x5ab0] sm:$0xff] }
 0x8ac   : > { %v6054_v22 = vadd.f32 %v6053_v20, %v5548_v44  ;;  %7182 = vmatprep.subr.mxu1 %v6689_v50  ;;  %v6625_v20 = vld [vmem:[#allocation4 + $0x5c68] sm:$0xff]  ;;  %v6563_v50 = vld [vmem:[#allocation4 + $0x5a78] sm:$0xff] }
 0x8ad   : > { %v6055_v11 = vpop.f32.mrf.mxu0  ;;  %7183 = vmatpush2.msra.mxu1 %v6688_v60  ;;  %v6562_v60 = vld [vmem:[#allocation4 + $0x5a70] sm:$0xff] }
 0x8ae   : > { %v6125_v62 = vadd.f32 %v6124_v9, %v6054_v22  ;;  %v6056_v28 = vadd.f32 %v6055_v11, %v5552_v7  ;;  %7184 = vmatprep.subr.mxu1 %v6681_v0  ;;  %v6632_v7 = vld [vmem:[#allocation4 + $0x5ca0] sm:$0xff]  ;;  %v6617_v11 = vld [vmem:[#allocation4 + $0x5c28] sm:$0xff]  ;;  %v6555_v0 = vld [vmem:[#allocation4 + $0x5a38] sm:$0xff] }
 0x8af   : > { %7185 = vmatpush2.msra.mxu1 %v6680_v3  ;;  %v6286_v3 = vld [vmem:[#allocation4 + $0x51d0] sm:$0xff] }
 0x8b0   : > { %v7609_v59 = vmul.f32 -1.442695, %v6125_v62  ;;  %v6127_v56 = vadd.f32 %v6126_v30, %v6056_v28  ;;  %7186 = vmatprep.subr.mxu1 %v6673_v23  ;;  %v6616_v62 = vld [vmem:[#allocation4 + $0x5c20] sm:$0xff]  ;;  %v6611_v30 = vld [vmem:[#allocation4 + $0x5bf8] sm:$0xff]  ;;  %v6554_v23 = vld [vmem:[#allocation4 + $0x5a30] sm:$0xff] }
 0x8b1   : > { %7187 = vmatpush2.msra.mxu1 %v6672_v25  ;;  %v6279_v25 = vld [vmem:[#allocation4 + $0x5198] sm:$0xff] }
 0x8b2   : > { %7826 = vpow2.f32 %v7609_v59  ;;  %v7610_v58 = vmul.f32 -1.442695, %v6127_v56  ;;  %7188 = vmatprep.subr.mxu1 %v6665_v21  ;;  %v6610_v59 = vld [vmem:[#allocation4 + $0x5bf0] sm:$0xff]  ;;  %v6335_v56 = vld [vmem:[#allocation4 + $0x5358] sm:$0xff] }
 0x8b3   : > { %7189 = vmatpush2.msra.mxu1 %v6664_v16  ;;  %v6547_v21 = vld [vmem:[#allocation4 + $0x59f8] sm:$0xff]  ;;  %v6278_v16 = vld [vmem:[#allocation4 + $0x5190] sm:$0xff] }
 0x8b4   : > { %7828 = vpow2.f32 %v7610_v58  ;;  %v6602_v58 = vld [vmem:[#allocation4 + $0x5bb0] sm:$0xff] }
 0x8b5   : > { %7830 = vtanh.f32 %v8343_v13  ;;  %v6657_v13 = vld [vmem:[#allocation4 + $0x5d68] sm:$0xff] }
 0x8b6   : > { %7190 = vmatprep.subr.mxu1 %v6657_v13  ;;  %v6546_v13 = vld [vmem:[#allocation4 + $0x59f0] sm:$0xff] }
 0x8b7   : > { %7191 = vmatpush2.msra.mxu1 %v6656_v6  ;;  %v6271_v6 = vld [vmem:[#allocation4 + $0x5158] sm:$0xff] }
 0x8b8   : > { %7192 = vmatprep.subr.mxu1 %v6649_v48  ;;  %v6539_v48 = vld [vmem:[#allocation4 + $0x59b8] sm:$0xff] }
 0x8b9   : > { %7193 = vmatpush2.msra.mxu1 %v6648_v42  ;;  %v6270_v42 = vld [vmem:[#allocation4 + $0x5150] sm:$0xff] }
 0x8bf   : > { %v7827_v46 = vpop.eup %7826 }
 0x8c0   : > { %v6161_v49 = vadd.f32 1.0, %v7827_v46  ;;  %v6302_v46 = vld [vmem:[#allocation4 + $0x5250] sm:$0xff] }
 0x8c1   : > { %v7829_v52 = vpop.eup %7828 }
 0x8c2   : > { %7832 = vrcp.f32 %v6161_v49  ;;  %v6162_v63 = vadd.f32 1.0, %v7829_v52  ;;  %v7831_v44 = vpop.eup %7830  ;;  %v6295_v49 = vld [vmem:[#allocation4 + $0x5218] sm:$0xff]  ;;  %v6294_v52 = vld [vmem:[#allocation4 + $0x5210] sm:$0xff] }
 0x8c3   : > { %7834 = vtanh.f32 %v8345_v17  ;;  %v6641_v17 = vld [vmem:[#allocation4 + $0x5ce8] sm:$0xff] }
 0x8c4   : > { %7836 = vrcp.f32 %v6162_v63  ;;  %7194 = vmatprep.subr.mxu1 %v6641_v17  ;;  %v6287_v63 = vld [vmem:[#allocation4 + $0x51d8] sm:$0xff]  ;;  %v6538_v17 = vld [vmem:[#allocation4 + $0x59b0] sm:$0xff] }
 0x8c5   : > { %7195 = vmatpush2.msra.mxu1 %v6640_v43  ;;  %v6263_v43 = vld [vmem:[#allocation4 + $0x5118] sm:$0xff] }
 0x8c6   : > { %7196 = vmatprep.subr.mxu1 %v6633_v51  ;;  %v6262_v51 = vld [vmem:[#allocation4 + $0x5110] sm:$0xff] }
 0x8c7   : > { %7197 = vmatpush2.msra.mxu1 %v6632_v7  ;;  %v6255_v7 = vld [vmem:[#allocation4 + $0x50d8] sm:$0xff] }
 0x8c8   : > { %7198 = vmatprep.subr.mxu1 %v6625_v20  ;;  %v6254_v20 = vld [vmem:[#allocation4 + $0x50d0] sm:$0xff] }
 0x8c9   : > { %7199 = vmatpush2.msra.mxu1 %v6624_v24  ;;  %v6247_v24 = vld [vmem:[#allocation4 + $0x5098] sm:$0xff] }
 0x8ca   : > { %7200 = vmatprep.subr.mxu1 %v6617_v11  ;;  %v6515_v11 = vld [vmem:[#allocation4 + $0x58f8] sm:$0xff] }
 0x8cb   : > { %7201 = vmatpush2.msra.mxu1 %v6616_v62  ;;  %v6514_v62 = vld [vmem:[#allocation4 + $0x58f0] sm:$0xff] }
 0x8cc   : > { %7280 = vmatprep.subr.mxu1 %v6611_v30  ;;  %7203 = vmatmul.mubr.f32.vlgmr.msra.gmra.mxu1 %v8330_v38  ;;  %v6579_v38 = vld [vmem:[#allocation4 + $0x5af8] sm:$0xff]  ;;  %v6238_v30 = vld [vmem:[#allocation4 + $0x5050] sm:$0xff] }
 0x8cd   : > { %7281 = vmatpush1.msra.mxu1 %v6610_v59  ;;  %v6231_v59 = vld [vmem:[#allocation4 + $0x5018] sm:$0xff]  ;;  %7344 = vmatprep.mubr.f32.mxu1 %v8334_v41  ;;  %v6289_v41 = vld [vmem:[#allocation4 + $0x51e8] sm:$0xff] }
 0x8ce   : > { %7282 = vmatprep.subr.mxu1 %v6603_v55  ;;  %v6230_v55 = vld [vmem:[#allocation4 + $0x5010] sm:$0xff] }
 0x8cf   : > { %v7833_v26 = vpop.eup %7832  ;;  %7283 = vmatpush1.msra.mxu1 %v6602_v58  ;;  %v6479_v58 = vld [vmem:[#allocation4 + $0x57d8] sm:$0xff] }
 0x8d0   : > { %v7835_v27 = vpop.eup %7834  ;;  %v8359_v10 = vmul.f32 %v7833_v26, %v7831_v44  ;;  %7284 = vmatprep.subr.mxu1 %v6595_v1  ;;  %v6531_v44 = vld [vmem:[#allocation4 + $0x5978] sm:$0xff]  ;;  %v6530_v26 = vld [vmem:[#allocation4 + $0x5970] sm:$0xff] }
 0x8d1   : > { %v7837_v9 = vpop.eup %7836  ;;  %7285 = vmatpush1.msra.mxu1 %v6594_v33  ;;  %v6478_v1 = vld [vmem:[#allocation4 + $0x57d0] sm:$0xff]  ;;  %v6471_v33 = vld [vmem:[#allocation4 + $0x5798] sm:$0xff] }
 0x8d2   : > { %v8357_v22 = vmul.f32 %v7837_v9, %v7835_v27  ;;  %7286 = vmatprep.subr.mxu1 %v6587_v57  ;;  %v6523_v27 = vld [vmem:[#allocation4 + $0x5938] sm:$0xff]  ;;  %v6522_v9 = vld [vmem:[#allocation4 + $0x5930] sm:$0xff] }
 0x8d3   : > { %7287 = vmatpush1.msra.mxu1 %v6586_v35  ;;  %v6470_v57 = vld [vmem:[#allocation4 + $0x5790] sm:$0xff]  ;;  %v6463_v35 = vld [vmem:[#allocation4 + $0x5758] sm:$0xff] }
 0x8d4   : > { %6847 = vmatprep.mubr.f32.mxu0 %v8357_v22  ;;  %v6202_v28 = vcombine.low %v8359_v10, %v8357_v22  ;;  %7288 = vmatprep.subr.mxu1 %v6579_v38  ;;  %v6462_v38 = vld [vmem:[#allocation4 + $0x5750] sm:$0xff] }
 0x8d5   : > { %6848 = vmatmul.mubr.f32.vlgmr.msra.gmra.mxu0 %v8359_v10  ;;  %7289 = vmatpush1.msra.mxu1 %v6578_v39  ;;  %v6455_v39 = vld [vmem:[#allocation4 + $0x5718] sm:$0xff] }
 0x8d6   : > { %7613 = vst.sshfl [vmem:[#allocation2 + $0x10] sm:$0x33 pattern:$0x76325410] %v6202_v28  ;;  %6926 = vmatpush1.msra.mxu0 %v6350_v15  ;;  %6989 = vmatprep.mubr.f32.mxu0 %v8357_v22  ;;  %v6246_v15 = vld [vmem:[#allocation4 + $0x5090] sm:$0xff]  ;;  %v6239_v28 = vld [vmem:[#allocation4 + $0x5058] sm:$0xff] }
 0x8d7   : > { %6927 = vmatprep.subr.mxu0 %v6343_v29  ;;  %7290 = vmatprep.subr.mxu1 %v6571_v45  ;;  %v6507_v29 = vld [vmem:[#allocation4 + $0x58b8] sm:$0xff]  ;;  %v6454_v45 = vld [vmem:[#allocation4 + $0x5710] sm:$0xff] }
 0x8d8   : > { %6928 = vmatpush1.msra.mxu0 %v6342_v31  ;;  %7291 = vmatpush1.msra.mxu1 %v6570_v47  ;;  %v6506_v31 = vld [vmem:[#allocation4 + $0x58b0] sm:$0xff]  ;;  %v6447_v47 = vld [vmem:[#allocation4 + $0x56d8] sm:$0xff] }
 0x8d9   : > { %6929 = vmatprep.subr.mxu0 %v6335_v56  ;;  %7292 = vmatprep.subr.mxu1 %v6563_v50  ;;  %v6499_v56 = vld [vmem:[#allocation4 + $0x5878] sm:$0xff]  ;;  %v6446_v50 = vld [vmem:[#allocation4 + $0x56d0] sm:$0xff] }
 0x8da   : > { %6930 = vmatpush1.msra.mxu0 %v6334_v53  ;;  %7293 = vmatpush1.msra.mxu1 %v6562_v60  ;;  %v6498_v53 = vld [vmem:[#allocation4 + $0x5870] sm:$0xff]  ;;  %v6439_v60 = vld [vmem:[#allocation4 + $0x5698] sm:$0xff] }
 0x8db   : > { %6931 = vmatprep.subr.mxu0 %v6327_v32  ;;  %7294 = vmatprep.subr.mxu1 %v6555_v0  ;;  %v6491_v32 = vld [vmem:[#allocation4 + $0x5838] sm:$0xff]  ;;  %v6438_v0 = vld [vmem:[#allocation4 + $0x5690] sm:$0xff] }
 0x8dc   : > { %6932 = vmatpush1.msra.mxu0 %v6326_v4  ;;  %7295 = vmatpush1.msra.mxu1 %v6554_v23  ;;  %v6490_v4 = vld [vmem:[#allocation4 + $0x5830] sm:$0xff]  ;;  %v6431_v23 = vld [vmem:[#allocation4 + $0x5658] sm:$0xff] }
 0x8dd   : > { %6933 = vmatprep.subr.mxu0 %v6319_v19  ;;  %7296 = vmatprep.subr.mxu1 %v6547_v21  ;;  %v6739_v19 = vld [vmem:[#allocation4 + $0x5ff8] sm:$0xff]  ;;  %v6430_v21 = vld [vmem:[#allocation4 + $0x5650] sm:$0xff] }
 0x8de   : > { %6934 = vmatpush1.msra.mxu0 %v6318_v34  ;;  %7297 = vmatpush1.msra.mxu1 %v6546_v13  ;;  %v6738_v34 = vld [vmem:[#allocation4 + $0x5ff0] sm:$0xff]  ;;  %v6423_v13 = vld [vmem:[#allocation4 + $0x5618] sm:$0xff] }
 0x8df   : > { %6935 = vmatprep.subr.mxu0 %v6311_v36  ;;  %7298 = vmatprep.subr.mxu1 %v6539_v48  ;;  %v6731_v36 = vld [vmem:[#allocation4 + $0x5fb8] sm:$0xff]  ;;  %v6422_v48 = vld [vmem:[#allocation4 + $0x5610] sm:$0xff] }
 0x8e0   : > { %6936 = vmatpush1.msra.mxu0 %v6310_v37  ;;  %7299 = vmatpush1.msra.mxu1 %v6538_v17  ;;  %v6730_v37 = vld [vmem:[#allocation4 + $0x5fb0] sm:$0xff]  ;;  %v6415_v17 = vld [vmem:[#allocation4 + $0x55d8] sm:$0xff] }
 0x8e1   : > { %6937 = vmatprep.subr.mxu0 %v6303_v40  ;;  %7300 = vmatprep.subr.mxu1 %v6531_v44  ;;  %v6723_v40 = vld [vmem:[#allocation4 + $0x5f78] sm:$0xff]  ;;  %v6414_v44 = vld [vmem:[#allocation4 + $0x55d0] sm:$0xff] }
 0x8e2   : > { %6938 = vmatpush1.msra.mxu0 %v6302_v46  ;;  %7301 = vmatpush1.msra.mxu1 %v6530_v26  ;;  %v6722_v46 = vld [vmem:[#allocation4 + $0x5f70] sm:$0xff]  ;;  %v6407_v26 = vld [vmem:[#allocation4 + $0x5598] sm:$0xff] }
 0x8e3   : > { %6939 = vmatprep.subr.mxu0 %v6295_v49  ;;  %7302 = vmatprep.subr.mxu1 %v6523_v27  ;;  %v6715_v49 = vld [vmem:[#allocation4 + $0x5f38] sm:$0xff]  ;;  %v6406_v27 = vld [vmem:[#allocation4 + $0x5590] sm:$0xff] }
 0x8e4   : > { %6940 = vmatpush1.msra.mxu0 %v6294_v52  ;;  %7303 = vmatpush1.msra.mxu1 %v6522_v9  ;;  %v6714_v52 = vld [vmem:[#allocation4 + $0x5f30] sm:$0xff]  ;;  %v6399_v9 = vld [vmem:[#allocation4 + $0x5558] sm:$0xff] }
 0x8e5   : > { %6941 = vmatprep.subr.mxu0 %v6287_v63  ;;  %7304 = vmatprep.subr.mxu1 %v6515_v11  ;;  %v6707_v63 = vld [vmem:[#allocation4 + $0x5ef8] sm:$0xff]  ;;  %v6398_v11 = vld [vmem:[#allocation4 + $0x5550] sm:$0xff] }
 0x8e6   : > { %6942 = vmatpush1.msra.mxu0 %v6286_v3  ;;  %7305 = vmatpush1.msra.mxu1 %v6514_v62  ;;  %v6706_v3 = vld [vmem:[#allocation4 + $0x5ef0] sm:$0xff]  ;;  %v6391_v62 = vld [vmem:[#allocation4 + $0x5518] sm:$0xff] }
 0x8e7   : > { %6943 = vmatprep.subr.mxu0 %v6279_v25  ;;  %7306 = vmatprep.subr.mxu1 %v6507_v29  ;;  %v6699_v25 = vld [vmem:[#allocation4 + $0x5eb8] sm:$0xff]  ;;  %v6390_v29 = vld [vmem:[#allocation4 + $0x5510] sm:$0xff] }
 0x8e8   : > { %6944 = vmatpush1.msra.mxu0 %v6278_v16  ;;  %7307 = vmatpush1.msra.mxu1 %v6506_v31  ;;  %v6698_v16 = vld [vmem:[#allocation4 + $0x5eb0] sm:$0xff]  ;;  %v6383_v31 = vld [vmem:[#allocation4 + $0x54d8] sm:$0xff] }
 0x8e9   : > { %6945 = vmatprep.subr.mxu0 %v6271_v6  ;;  %7308 = vmatprep.subr.mxu1 %v6499_v56  ;;  %v6691_v6 = vld [vmem:[#allocation4 + $0x5e78] sm:$0xff]  ;;  %v6382_v56 = vld [vmem:[#allocation4 + $0x54d0] sm:$0xff] }
 0x8ea   : > { %6946 = vmatpush1.msra.mxu0 %v6270_v42  ;;  %7309 = vmatpush1.msra.mxu1 %v6498_v53  ;;  %v6690_v42 = vld [vmem:[#allocation4 + $0x5e70] sm:$0xff]  ;;  %v6375_v53 = vld [vmem:[#allocation4 + $0x5498] sm:$0xff] }
 0x8eb   : > { %6947 = vmatprep.subr.mxu0 %v6263_v43  ;;  %7310 = vmatprep.subr.mxu1 %v6491_v32  ;;  %v6683_v43 = vld [vmem:[#allocation4 + $0x5e38] sm:$0xff]  ;;  %v6374_v32 = vld [vmem:[#allocation4 + $0x5490] sm:$0xff] }
 0x8ec   : > { %6948 = vmatpush1.msra.mxu0 %v6262_v51  ;;  %7311 = vmatpush1.msra.mxu1 %v6490_v4  ;;  %v6682_v51 = vld [vmem:[#allocation4 + $0x5e30] sm:$0xff]  ;;  %v6367_v4 = vld [vmem:[#allocation4 + $0x5458] sm:$0xff] }
 0x8ed   : > { %6949 = vmatprep.subr.mxu0 %v6255_v7  ;;  %7312 = vmatprep.subr.mxu1 %v6739_v19  ;;  %v6675_v7 = vld [vmem:[#allocation4 + $0x5df8] sm:$0xff]  ;;  %v6366_v19 = vld [vmem:[#allocation4 + $0x5450] sm:$0xff] }
 0x8ee   : > { %6950 = vmatpush1.msra.mxu0 %v6254_v20  ;;  %7313 = vmatpush2.msra.mxu1 %v6738_v34  ;;  %v6674_v20 = vld [vmem:[#allocation4 + $0x5df0] sm:$0xff]  ;;  %v6359_v34 = vld [vmem:[#allocation4 + $0x5418] sm:$0xff] }
 0x8ef   : > { %6951 = vmatprep.subr.mxu0 %v6247_v24  ;;  %7314 = vmatprep.subr.mxu1 %v6731_v36  ;;  %v6667_v24 = vld [vmem:[#allocation4 + $0x5db8] sm:$0xff]  ;;  %v6358_v36 = vld [vmem:[#allocation4 + $0x5410] sm:$0xff] }
 0x8f0   : > { %6952 = vmatpush1.msra.mxu0 %v6246_v15  ;;  %7315 = vmatpush2.msra.mxu1 %v6730_v37  ;;  %v6666_v15 = vld [vmem:[#allocation4 + $0x5db0] sm:$0xff]  ;;  %v6353_v37 = vld [vmem:[#allocation4 + $0x53e8] sm:$0xff] }
 0x8f1   : > { %6953 = vmatprep.subr.mxu0 %v6239_v28  ;;  %7316 = vmatprep.subr.mxu1 %v6723_v40  ;;  %v6659_v28 = vld [vmem:[#allocation4 + $0x5d78] sm:$0xff]  ;;  %v6345_v40 = vld [vmem:[#allocation4 + $0x53a8] sm:$0xff] }
 0x8f2   : > { %6954 = vmatpush1.msra.mxu0 %v6238_v30  ;;  %7317 = vmatpush2.msra.mxu1 %v6722_v46  ;;  %v6658_v30 = vld [vmem:[#allocation4 + $0x5d70] sm:$0xff]  ;;  %v6344_v46 = vld [vmem:[#allocation4 + $0x53a0] sm:$0xff] }
 0x8f3   : > { %6955 = vmatprep.subr.mxu0 %v6231_v59  ;;  %7318 = vmatprep.subr.mxu1 %v6715_v49  ;;  %v6651_v59 = vld [vmem:[#allocation4 + $0x5d38] sm:$0xff]  ;;  %v6337_v49 = vld [vmem:[#allocation4 + $0x5368] sm:$0xff] }
 0x8f4   : > { %6956 = vmatpush1.msra.mxu0 %v6230_v55  ;;  %7319 = vmatpush2.msra.mxu1 %v6714_v52  ;;  %v6650_v55 = vld [vmem:[#allocation4 + $0x5d30] sm:$0xff]  ;;  %v6329_v52 = vld [vmem:[#allocation4 + $0x5328] sm:$0xff] }
 0x8f5   : > { %6957 = vmatprep.subr.mxu0 %v6479_v58  ;;  %7320 = vmatprep.subr.mxu1 %v6707_v63  ;;  %v6643_v58 = vld [vmem:[#allocation4 + $0x5cf8] sm:$0xff]  ;;  %v6321_v63 = vld [vmem:[#allocation4 + $0x52e8] sm:$0xff] }
 0x8f6   : > { %6958 = vmatpush2.msra.mxu0 %v6478_v1  ;;  %7321 = vmatpush2.msra.mxu1 %v6706_v3  ;;  %v6642_v1 = vld [vmem:[#allocation4 + $0x5cf0] sm:$0xff]  ;;  %v6320_v3 = vld [vmem:[#allocation4 + $0x52e0] sm:$0xff] }
 0x8f7   : > { %6959 = vmatprep.subr.mxu0 %v6471_v33  ;;  %7322 = vmatprep.subr.mxu1 %v6699_v25  ;;  %v6635_v33 = vld [vmem:[#allocation4 + $0x5cb8] sm:$0xff]  ;;  %v6312_v25 = vld [vmem:[#allocation4 + $0x52a0] sm:$0xff] }
 0x8f8   : > { %6960 = vmatpush2.msra.mxu0 %v6470_v57  ;;  %7323 = vmatpush2.msra.mxu1 %v6698_v16  ;;  %v6634_v57 = vld [vmem:[#allocation4 + $0x5cb0] sm:$0xff]  ;;  %v6304_v16 = vld [vmem:[#allocation4 + $0x5260] sm:$0xff] }
 0x8f9   : > { %6961 = vmatprep.subr.mxu0 %v6463_v35  ;;  %7324 = vmatprep.subr.mxu1 %v6691_v6  ;;  %v6627_v35 = vld [vmem:[#allocation4 + $0x5c78] sm:$0xff]  ;;  %v6296_v6 = vld [vmem:[#allocation4 + $0x5220] sm:$0xff] }
 0x8fa   : > { %6962 = vmatpush2.msra.mxu0 %v6462_v38  ;;  %7325 = vmatpush2.msra.mxu1 %v6690_v42  ;;  %v6626_v38 = vld [vmem:[#allocation4 + $0x5c70] sm:$0xff]  ;;  %v6281_v42 = vld [vmem:[#allocation4 + $0x51a8] sm:$0xff] }
 0x8fb   : > { %6963 = vmatprep.subr.mxu0 %v6455_v39  ;;  %7326 = vmatprep.subr.mxu1 %v6683_v43  ;;  %v6352_v39 = vld [vmem:[#allocation4 + $0x53e0] sm:$0xff]  ;;  %v6273_v43 = vld [vmem:[#allocation4 + $0x5168] sm:$0xff] }
 0x8fc   : > { %6964 = vmatpush2.msra.mxu0 %v6454_v45  ;;  %7327 = vmatpush2.msra.mxu1 %v6682_v51  ;;  %v6619_v45 = vld [vmem:[#allocation4 + $0x5c38] sm:$0xff]  ;;  %v6265_v51 = vld [vmem:[#allocation4 + $0x5128] sm:$0xff] }
 0x8fd   : > { %6965 = vmatprep.subr.mxu0 %v6447_v47  ;;  %7328 = vmatprep.subr.mxu1 %v6675_v7  ;;  %v6618_v47 = vld [vmem:[#allocation4 + $0x5c30] sm:$0xff]  ;;  %v6257_v7 = vld [vmem:[#allocation4 + $0x50e8] sm:$0xff] }
 0x8fe   : > { %6966 = vmatpush2.msra.mxu0 %v6446_v50  ;;  %7329 = vmatpush2.msra.mxu1 %v6674_v20  ;;  %v6336_v50 = vld [vmem:[#allocation4 + $0x5360] sm:$0xff]  ;;  %v6249_v20 = vld [vmem:[#allocation4 + $0x50a8] sm:$0xff] }
 0x8ff   : > { %6967 = vmatprep.subr.mxu0 %v6439_v60  ;;  %7330 = vmatprep.subr.mxu1 %v6667_v24  ;;  %v6328_v60 = vld [vmem:[#allocation4 + $0x5320] sm:$0xff]  ;;  %v6241_v24 = vld [vmem:[#allocation4 + $0x5068] sm:$0xff] }
 0x900   : > { %6968 = vmatpush2.msra.mxu0 %v6438_v0  ;;  %7331 = vmatpush2.msra.mxu1 %v6666_v15  ;;  %v7876_v0 = vld.sshfl [vmem:[#allocation2 + $0x14] sm:$0x33 pattern:$0x76325410]  ;;  %v6233_v15 = vld [vmem:[#allocation4 + $0x5028] sm:$0xff] }
 0x901   : > { %6969 = vmatprep.subr.mxu0 %v6431_v23  ;;  %7332 = vmatprep.subr.mxu1 %v6659_v28  ;;  %v6313_v23 = vld [vmem:[#allocation4 + $0x52a8] sm:$0xff] }
 0x902   : > { %6970 = vmatpush2.msra.mxu0 %v6430_v21  ;;  %7333 = vmatpush2.msra.mxu1 %v6658_v30  ;;  %v6305_v21 = vld [vmem:[#allocation4 + $0x5268] sm:$0xff] }
 0x903   : > { %6971 = vmatprep.subr.mxu0 %v6423_v13  ;;  %7334 = vmatprep.subr.mxu1 %v6651_v59  ;;  %v6297_v13 = vld [vmem:[#allocation4 + $0x5228] sm:$0xff] }
 0x904   : > { %6972 = vmatpush2.msra.mxu0 %v6422_v48  ;;  %7335 = vmatpush2.msra.mxu1 %v6650_v55  ;;  %v6288_v48 = vld [vmem:[#allocation4 + $0x51e0] sm:$0xff]  ;;  %v6481_v28 = vld [vmem:[#allocation4 + $0x57e8] sm:$0xff] }
 0x905   : > { %6973 = vmatprep.subr.mxu0 %v6415_v17  ;;  %7336 = vmatprep.subr.mxu1 %v6643_v58  ;;  %v6280_v17 = vld [vmem:[#allocation4 + $0x51a0] sm:$0xff]  ;;  %v6473_v30 = vld [vmem:[#allocation4 + $0x57a8] sm:$0xff] }
 0x906   : > { %6974 = vmatpush2.msra.mxu0 %v6414_v44  ;;  %7337 = vmatpush2.msra.mxu1 %v6642_v1  ;;  %v6272_v44 = vld [vmem:[#allocation4 + $0x5160] sm:$0xff]  ;;  %v6465_v59 = vld [vmem:[#allocation4 + $0x5768] sm:$0xff] }
 0x907   : > { %6975 = vmatprep.subr.mxu0 %v6407_v26  ;;  %7338 = vmatprep.subr.mxu1 %v6635_v33  ;;  %v6264_v26 = vld [vmem:[#allocation4 + $0x5120] sm:$0xff]  ;;  %v6457_v55 = vld [vmem:[#allocation4 + $0x5728] sm:$0xff] }
 0x908   : > { %6976 = vmatpush2.msra.mxu0 %v6406_v27  ;;  %7339 = vmatpush2.msra.mxu1 %v6634_v57  ;;  %v6256_v27 = vld [vmem:[#allocation4 + $0x50e0] sm:$0xff]  ;;  %v6449_v58 = vld [vmem:[#allocation4 + $0x56e8] sm:$0xff] }
 0x909   : > { %6977 = vmatprep.subr.mxu0 %v6399_v9  ;;  %7340 = vmatprep.subr.mxu1 %v6627_v35  ;;  %v6248_v9 = vld [vmem:[#allocation4 + $0x50a0] sm:$0xff]  ;;  %v6441_v1 = vld [vmem:[#allocation4 + $0x56a8] sm:$0xff] }
 0x90a   : > { %6978 = vmatpush2.msra.mxu0 %v6398_v11  ;;  %7341 = vmatpush2.msra.mxu1 %v6626_v38  ;;  %v6240_v11 = vld [vmem:[#allocation4 + $0x5060] sm:$0xff]  ;;  %v6433_v33 = vld [vmem:[#allocation4 + $0x5668] sm:$0xff] }
 0x90b   : > { %6979 = vmatprep.subr.mxu0 %v6391_v62  ;;  %7342 = vmatprep.subr.mxu1 %v6619_v45  ;;  %v6232_v62 = vld [vmem:[#allocation4 + $0x5020] sm:$0xff]  ;;  %v6425_v57 = vld [vmem:[#allocation4 + $0x5628] sm:$0xff] }
 0x90c   : > { %6980 = vmatpush2.msra.mxu0 %v6390_v29  ;;  %7343 = vmatpush2.msra.mxu1 %v6618_v47  ;;  %v6480_v29 = vld [vmem:[#allocation4 + $0x57e0] sm:$0xff]  ;;  %v6417_v35 = vld [vmem:[#allocation4 + $0x55e8] sm:$0xff] }
 0x90d   : > { %6981 = vmatprep.subr.mxu0 %v6383_v31  ;;  %7345 = vmatmul.mubr.f32.vlgmr.msra.gmra.mxu1 %v7876_v0  ;;  %v6472_v31 = vld [vmem:[#allocation4 + $0x57a0] sm:$0xff]  ;;  %v6409_v38 = vld [vmem:[#allocation4 + $0x55a8] sm:$0xff] }
 0x90e   : > { %6982 = vmatpush2.msra.mxu0 %v6382_v56  ;;  %v6464_v56 = vld [vmem:[#allocation4 + $0x5760] sm:$0xff]  ;;  %v6393_v45 = vld [vmem:[#allocation4 + $0x5528] sm:$0xff] }
 0x90f   : > { %6983 = vmatprep.subr.mxu0 %v6375_v53  ;;  %v6456_v53 = vld [vmem:[#allocation4 + $0x5720] sm:$0xff]  ;;  %v6385_v47 = vld [vmem:[#allocation4 + $0x54e8] sm:$0xff] }
 0x910   : > { %6984 = vmatpush2.msra.mxu0 %v6374_v32  ;;  %v6448_v32 = vld [vmem:[#allocation4 + $0x56e0] sm:$0xff]  ;;  %v6361_v0 = vld [vmem:[#allocation4 + $0x5428] sm:$0xff] }
 0x911   : > { %6985 = vmatprep.subr.mxu0 %v6367_v4  ;;  %v6440_v4 = vld [vmem:[#allocation4 + $0x56a0] sm:$0xff] }
 0x912   : > { %6986 = vmatpush2.msra.mxu0 %v6366_v19  ;;  %v6432_v19 = vld [vmem:[#allocation4 + $0x5660] sm:$0xff] }
 0x913   : > { %6987 = vmatprep.subr.mxu0 %v6359_v34  ;;  %v6424_v34 = vld [vmem:[#allocation4 + $0x5620] sm:$0xff] }
 0x914   : > { %6988 = vmatpush2.msra.mxu0 %v6358_v36  ;;  %v6416_v36 = vld [vmem:[#allocation4 + $0x55e0] sm:$0xff] }
 0x915   : > { %6990 = vmatmul.mubr.f32.vlgmr.msra.gmra.mxu0 %v8359_v10  ;;  %7067 = vmatprep.subr.mxu0 %v6353_v37  ;;  %v6408_v37 = vld [vmem:[#allocation4 + $0x55a0] sm:$0xff] }
 0x916   : > { %7068 = vmatpush1.msra.mxu0 %v6352_v39  ;;  %7131 = vmatprep.mubr.f32.mxu0 %v8357_v22  ;;  %v6401_v39 = vld [vmem:[#allocation4 + $0x5568] sm:$0xff] }
 0x917   : > { %7069 = vmatprep.subr.mxu0 %v6345_v40  ;;  %v6400_v40 = vld [vmem:[#allocation4 + $0x5560] sm:$0xff] }
 0x918   : > { %7070 = vmatpush1.msra.mxu0 %v6344_v46  ;;  %v6392_v46 = vld [vmem:[#allocation4 + $0x5520] sm:$0xff] }
 0x919   : > { %7071 = vmatprep.subr.mxu0 %v6337_v49  ;;  %v6384_v49 = vld [vmem:[#allocation4 + $0x54e0] sm:$0xff] }
 0x91a   : > { %7072 = vmatpush1.msra.mxu0 %v6336_v50  ;;  %v6377_v50 = vld [vmem:[#allocation4 + $0x54a8] sm:$0xff] }
 0x91b   : > { %7073 = vmatprep.subr.mxu0 %v6329_v52  ;;  %v6376_v52 = vld [vmem:[#allocation4 + $0x54a0] sm:$0xff] }
 0x91c   : > { %7074 = vmatpush1.msra.mxu0 %v6328_v60  ;;  %v6369_v60 = vld [vmem:[#allocation4 + $0x5468] sm:$0xff] }
 0x91d   : > { %7075 = vmatprep.subr.mxu0 %v6321_v63  ;;  %v6368_v63 = vld [vmem:[#allocation4 + $0x5460] sm:$0xff] }
 0x91e   : > { %7076 = vmatpush1.msra.mxu0 %v6320_v3  ;;  %v6360_v3 = vld [vmem:[#allocation4 + $0x5420] sm:$0xff] }
 0x91f   : > { %7077 = vmatprep.subr.mxu0 %v6313_v23  ;;  %v6355_v23 = vld [vmem:[#allocation4 + $0x53f8] sm:$0xff] }
 0x920   : > { %7078 = vmatpush1.msra.mxu0 %v6312_v25  ;;  %v6354_v25 = vld [vmem:[#allocation4 + $0x53f0] sm:$0xff] }
 0x921   : > { %7079 = vmatprep.subr.mxu0 %v6305_v21  ;;  %v6347_v21 = vld [vmem:[#allocation4 + $0x53b8] sm:$0xff] }
 0x922   : > { %7080 = vmatpush1.msra.mxu0 %v6304_v16  ;;  %v6346_v16 = vld [vmem:[#allocation4 + $0x53b0] sm:$0xff] }
 0x923   : > { %7081 = vmatprep.subr.mxu0 %v6297_v13  ;;  %v6339_v13 = vld [vmem:[#allocation4 + $0x5378] sm:$0xff] }
 0x924   : > { %7082 = vmatpush1.msra.mxu0 %v6296_v6  ;;  %v6338_v6 = vld [vmem:[#allocation4 + $0x5370] sm:$0xff] }
 0x925   : > { %7083 = vmatprep.subr.mxu0 %v6289_v41  ;;  %v6331_v41 = vld [vmem:[#allocation4 + $0x5338] sm:$0xff] }
 0x926   : > { %7084 = vmatpush1.msra.mxu0 %v6288_v48  ;;  %v6330_v48 = vld [vmem:[#allocation4 + $0x5330] sm:$0xff] }
 0x927   : > { %7085 = vmatprep.subr.mxu0 %v6281_v42  ;;  %v6323_v42 = vld [vmem:[#allocation4 + $0x52f8] sm:$0xff] }
 0x928   : > { %7086 = vmatpush1.msra.mxu0 %v6280_v17  ;;  %v6322_v17 = vld [vmem:[#allocation4 + $0x52f0] sm:$0xff] }
 0x929   : > { %7087 = vmatprep.subr.mxu0 %v6273_v43  ;;  %v6315_v43 = vld [vmem:[#allocation4 + $0x52b8] sm:$0xff] }
 0x92a   : > { %7088 = vmatpush1.msra.mxu0 %v6272_v44  ;;  %v6314_v44 = vld [vmem:[#allocation4 + $0x52b0] sm:$0xff] }
 0x92b   : > { %7089 = vmatprep.subr.mxu0 %v6265_v51  ;;  %v6307_v51 = vld [vmem:[#allocation4 + $0x5278] sm:$0xff] }
 0x92c   : > { %7090 = vmatpush1.msra.mxu0 %v6264_v26  ;;  %v6306_v26 = vld [vmem:[#allocation4 + $0x5270] sm:$0xff] }
 0x92d   : > { %7091 = vmatprep.subr.mxu0 %v6257_v7  ;;  %v6298_v7 = vld [vmem:[#allocation4 + $0x5230] sm:$0xff] }
 0x92e   : > { %7092 = vmatpush1.msra.mxu0 %v6256_v27  ;;  %v6291_v27 = vld [vmem:[#allocation4 + $0x51f8] sm:$0xff] }
 0x92f   : > { %7093 = vmatprep.subr.mxu0 %v6249_v20  ;;  %v6290_v20 = vld [vmem:[#allocation4 + $0x51f0] sm:$0xff] }
 0x930   : > { %7094 = vmatpush1.msra.mxu0 %v6248_v9  ;;  %v6283_v9 = vld [vmem:[#allocation4 + $0x51b8] sm:$0xff] }
 0x931   : > { %7095 = vmatprep.subr.mxu0 %v6241_v24  ;;  %v6282_v24 = vld [vmem:[#allocation4 + $0x51b0] sm:$0xff] }
 0x932   : > { %7096 = vmatpush1.msra.mxu0 %v6240_v11  ;;  %v6275_v11 = vld [vmem:[#allocation4 + $0x5178] sm:$0xff] }
 0x933   : > { %7097 = vmatprep.subr.mxu0 %v6233_v15  ;;  %v6274_v15 = vld [vmem:[#allocation4 + $0x5170] sm:$0xff] }
 0x934   : > { %7098 = vmatpush1.msra.mxu0 %v6232_v62  ;;  %v6267_v62 = vld [vmem:[#allocation4 + $0x5138] sm:$0xff] }
 0x935   : > { %7099 = vmatprep.subr.mxu0 %v6481_v28  ;;  %v6266_v28 = vld [vmem:[#allocation4 + $0x5130] sm:$0xff] }
 0x936   : > { %7100 = vmatpush2.msra.mxu0 %v6480_v29  ;;  %v6259_v29 = vld [vmem:[#allocation4 + $0x50f8] sm:$0xff] }
 0x937   : > { %7101 = vmatprep.subr.mxu0 %v6473_v30  ;;  %v6258_v30 = vld [vmem:[#allocation4 + $0x50f0] sm:$0xff] }
 0x938   : > { %7102 = vmatpush2.msra.mxu0 %v6472_v31  ;;  %v6251_v31 = vld [vmem:[#allocation4 + $0x50b8] sm:$0xff] }
 0x939   : > { %7103 = vmatprep.subr.mxu0 %v6465_v59  ;;  %v6250_v59 = vld [vmem:[#allocation4 + $0x50b0] sm:$0xff] }
 0x93a   : > { %7104 = vmatpush2.msra.mxu0 %v6464_v56  ;;  %v6243_v56 = vld [vmem:[#allocation4 + $0x5078] sm:$0xff] }
 0x93b   : > { %7105 = vmatprep.subr.mxu0 %v6457_v55  ;;  %v6242_v55 = vld [vmem:[#allocation4 + $0x5070] sm:$0xff] }
 0x93c   : > { %7106 = vmatpush2.msra.mxu0 %v6456_v53  ;;  %v6235_v53 = vld [vmem:[#allocation4 + $0x5038] sm:$0xff] }
 0x93d   : > { %7107 = vmatprep.subr.mxu0 %v6449_v58  ;;  %v6234_v58 = vld [vmem:[#allocation4 + $0x5030] sm:$0xff] }
 0x93e   : > { %7108 = vmatpush2.msra.mxu0 %v6448_v32  ;;  %v6483_v32 = vld [vmem:[#allocation4 + $0x57f8] sm:$0xff] }
 0x93f   : > { %7109 = vmatprep.subr.mxu0 %v6441_v1  ;;  %v6482_v1 = vld [vmem:[#allocation4 + $0x57f0] sm:$0xff] }
 0x940   : > { %7110 = vmatpush2.msra.mxu0 %v6440_v4  ;;  %v6475_v4 = vld [vmem:[#allocation4 + $0x57b8] sm:$0xff] }
 0x941   : > { %7111 = vmatprep.subr.mxu0 %v6433_v33  ;;  %v6474_v33 = vld [vmem:[#allocation4 + $0x57b0] sm:$0xff] }
 0x942   : > { %7112 = vmatpush2.msra.mxu0 %v6432_v19  ;;  %v6467_v19 = vld [vmem:[#allocation4 + $0x5778] sm:$0xff] }
 0x943   : > { %7113 = vmatprep.subr.mxu0 %v6425_v57  ;;  %v6466_v57 = vld [vmem:[#allocation4 + $0x5770] sm:$0xff] }
 0x944   : > { %7114 = vmatpush2.msra.mxu0 %v6424_v34  ;;  %v6459_v34 = vld [vmem:[#allocation4 + $0x5738] sm:$0xff] }
 0x945   : > { %7115 = vmatprep.subr.mxu0 %v6417_v35  ;;  %v6458_v35 = vld [vmem:[#allocation4 + $0x5730] sm:$0xff] }
 0x946   : > { %7116 = vmatpush2.msra.mxu0 %v6416_v36  ;;  %v6451_v36 = vld [vmem:[#allocation4 + $0x56f8] sm:$0xff] }
 0x947   : > { %7117 = vmatprep.subr.mxu0 %v6409_v38  ;;  %v6450_v38 = vld [vmem:[#allocation4 + $0x56f0] sm:$0xff] }
 0x948   : > { %7118 = vmatpush2.msra.mxu0 %v6408_v37  ;;  %v6443_v37 = vld [vmem:[#allocation4 + $0x56b8] sm:$0xff] }
 0x949   : > { %7119 = vmatprep.subr.mxu0 %v6401_v39  ;;  %v6442_v39 = vld [vmem:[#allocation4 + $0x56b0] sm:$0xff] }
 0x94a   : > { %7120 = vmatpush2.msra.mxu0 %v6400_v40  ;;  %v6435_v40 = vld [vmem:[#allocation4 + $0x5678] sm:$0xff] }
 0x94b   : > { %7121 = vmatprep.subr.mxu0 %v6393_v45  ;;  %v6434_v45 = vld [vmem:[#allocation4 + $0x5670] sm:$0xff] }
 0x94c   : > { %7122 = vmatpush2.msra.mxu0 %v6392_v46  ;;  %v6427_v46 = vld [vmem:[#allocation4 + $0x5638] sm:$0xff] }
 0x94d   : > { %7123 = vmatprep.subr.mxu0 %v6385_v47  ;;  %v6426_v47 = vld [vmem:[#allocation4 + $0x5630] sm:$0xff] }
 0x94e   : > { %7124 = vmatpush2.msra.mxu0 %v6384_v49  ;;  %v6419_v49 = vld [vmem:[#allocation4 + $0x55f8] sm:$0xff] }
 0x94f   : > { %7125 = vmatprep.subr.mxu0 %v6377_v50  ;;  %v6418_v50 = vld [vmem:[#allocation4 + $0x55f0] sm:$0xff] }
 0x950   : > { %7126 = vmatpush2.msra.mxu0 %v6376_v52  ;;  %v6411_v52 = vld [vmem:[#allocation4 + $0x55b8] sm:$0xff] }
 0x951   : > { %7127 = vmatprep.subr.mxu0 %v6369_v60  ;;  %v6410_v60 = vld [vmem:[#allocation4 + $0x55b0] sm:$0xff] }
 0x952   : > { %7128 = vmatpush2.msra.mxu0 %v6368_v63  ;;  %v6403_v63 = vld [vmem:[#allocation4 + $0x5578] sm:$0xff] }
 0x953   : > { %7129 = vmatprep.subr.mxu0 %v6361_v0  ;;  %v6402_v0 = vld [vmem:[#allocation4 + $0x5570] sm:$0xff] }
 0x954   : > { %7130 = vmatpush2.msra.mxu0 %v6360_v3  ;;  %v6395_v3 = vld [vmem:[#allocation4 + $0x5538] sm:$0xff] }
 0x955   : > { %7132 = vmatmul.mubr.f32.vlgmr.msra.gmra.mxu0 %v8359_v10  ;;  %7209 = vmatprep.subr.mxu0 %v6355_v23  ;;  %v6394_v23 = vld [vmem:[#allocation4 + $0x5530] sm:$0xff] }
 0x956   : > { %7210 = vmatpush1.msra.mxu0 %v6354_v25  ;;  %7273 = vmatprep.mubr.f32.mxu0 %v8357_v22  ;;  %v6299_v22 = vld [vmem:[#allocation4 + $0x5238] sm:$0xff] }
 0x957   : > { %7211 = vmatprep.subr.mxu0 %v6347_v21  ;;  %v6387_v25 = vld [vmem:[#allocation4 + $0x54f8] sm:$0xff]  ;;  %v6386_v21 = vld [vmem:[#allocation4 + $0x54f0] sm:$0xff] }
 0x958   : > { %7212 = vmatpush1.msra.mxu0 %v6346_v16  ;;  %v6379_v16 = vld [vmem:[#allocation4 + $0x54b8] sm:$0xff] }
 0x959   : > { %7213 = vmatprep.subr.mxu0 %v6339_v13  ;;  %v6378_v13 = vld [vmem:[#allocation4 + $0x54b0] sm:$0xff] }
 0x95a   : > { %7214 = vmatpush1.msra.mxu0 %v6338_v6  ;;  %v6371_v6 = vld [vmem:[#allocation4 + $0x5478] sm:$0xff] }
 0x95b   : > { %7215 = vmatprep.subr.mxu0 %v6331_v41  ;;  %v6370_v41 = vld [vmem:[#allocation4 + $0x5470] sm:$0xff] }
 0x95c   : > { %7216 = vmatpush1.msra.mxu0 %v6330_v48  ;;  %v6363_v48 = vld [vmem:[#allocation4 + $0x5438] sm:$0xff] }
 0x95d   : > { %7217 = vmatprep.subr.mxu0 %v6323_v42  ;;  %v6362_v42 = vld [vmem:[#allocation4 + $0x5430] sm:$0xff] }
 0x95e   : > { %7218 = vmatpush1.msra.mxu0 %v6322_v17  ;;  %v7465_v17 = vld [vmem:[#allocation8 + $0xf8] sm:$0xff] }
 0x95f   : > { %7219 = vmatprep.subr.mxu0 %v6315_v43  ;;  %v7449_v43 = vld [vmem:[#allocation8 + $0x78] sm:$0xff] }
 0x960   : > { %7220 = vmatpush1.msra.mxu0 %v6314_v44  ;;  %v7464_v44 = vld [vmem:[#allocation8 + $0xf0] sm:$0xff] }
 0x961   : > { %7221 = vmatprep.subr.mxu0 %v6307_v51  ;;  %v7448_v51 = vld [vmem:[#allocation8 + $0x70] sm:$0xff] }
 0x962   : > { %7222 = vmatpush1.msra.mxu0 %v6306_v26  ;;  %v7463_v26 = vld [vmem:[#allocation8 + $0xe8] sm:$0xff] }
 0x963   : > { %7223 = vmatprep.subr.mxu0 %v6299_v22  ;;  %v7447_v22 = vld [vmem:[#allocation8 + $0x68] sm:$0xff] }
 0x964   : > { %7224 = vmatpush1.msra.mxu0 %v6298_v7  ;;  %v7462_v7 = vld [vmem:[#allocation8 + $0xe0] sm:$0xff] }
 0x965   : > { %7225 = vmatprep.subr.mxu0 %v6291_v27  ;;  %v7446_v27 = vld [vmem:[#allocation8 + $0x60] sm:$0xff] }
 0x966   : > { %7226 = vmatpush1.msra.mxu0 %v6290_v20  ;;  %v7461_v20 = vld [vmem:[#allocation8 + $0xd8] sm:$0xff] }
 0x967   : > { %7227 = vmatprep.subr.mxu0 %v6283_v9  ;;  %v7445_v9 = vld [vmem:[#allocation8 + $0x58] sm:$0xff] }
 0x968   : > { %7228 = vmatpush1.msra.mxu0 %v6282_v24  ;;  %v7444_v24 = vld [vmem:[#allocation8 + $0x50] sm:$0xff] }
 0x969   : > { %7229 = vmatprep.subr.mxu0 %v6275_v11  ;;  %v7459_v11 = vld [vmem:[#allocation8 + $0xc8] sm:$0xff] }
 0x96a   : > { %7230 = vmatpush1.msra.mxu0 %v6274_v15  ;;  %v7443_v15 = vld [vmem:[#allocation8 + $0x48] sm:$0xff] }
 0x96b   : > { %7231 = vmatprep.subr.mxu0 %v6267_v62 }
 0x96c   : > { %7232 = vmatpush1.msra.mxu0 %v6266_v28  ;;  %v7458_v28 = vld [vmem:[#allocation8 + $0xc0] sm:$0xff] }
 0x96d   : > { %7233 = vmatprep.subr.mxu0 %v6259_v29  ;;  %v7442_v29 = vld [vmem:[#allocation8 + $0x40] sm:$0xff] }
 0x96e   : > { %7234 = vmatpush1.msra.mxu0 %v6258_v30  ;;  %v7457_v30 = vld [vmem:[#allocation8 + $0xb8] sm:$0xff] }
 0x96f   : > { %7235 = vmatprep.subr.mxu0 %v6251_v31  ;;  %v7441_v31 = vld [vmem:[#allocation8 + $0x38] sm:$0xff] }
 0x970   : > { %7236 = vmatpush1.msra.mxu0 %v6250_v59  ;;  %v7456_v59 = vld [vmem:[#allocation8 + $0xb0] sm:$0xff] }
 0x971   : > { %7237 = vmatprep.subr.mxu0 %v6243_v56  ;;  %v7440_v56 = vld [vmem:[#allocation8 + $0x30] sm:$0xff] }
 0x972   : > { %7238 = vmatpush1.msra.mxu0 %v6242_v55  ;;  %v8373_v55 = vld [vmem:[#allocation6 + $0x28] sm:$0xff] }
 0x973   : > { %7239 = vmatprep.subr.mxu0 %v6235_v53  ;;  %v6920_v53 = vpop.f32.mrf.mxu1 }
 0x974   : > { %7240 = vmatpush1.msra.mxu0 %v6234_v58 }
 0x975   : > { %7241 = vmatprep.subr.mxu0 %v6483_v32  ;;  %v7455_v32 = vld [vmem:[#allocation8 + $0xa8] sm:$0xff] }
 0x976   : > { %7242 = vmatpush2.msra.mxu0 %v6482_v1  ;;  %v7439_v1 = vld [vmem:[#allocation8 + $0x28] sm:$0xff] }
 0x977   : > { %7243 = vmatprep.subr.mxu0 %v6475_v4 }
 0x978   : > { %7244 = vmatpush2.msra.mxu0 %v6474_v33  ;;  %v7454_v33 = vld [vmem:[#allocation8 + $0xa0] sm:$0xff] }
 0x979   : > { %7245 = vmatprep.subr.mxu0 %v6467_v19  ;;  %v6746_v19 = vrot.slane %v8373_v55, %v8078_v54  ;;  %v6750_v54 = vrot.slane %v8373_v55, %v8095_v12 }
 0x97a   : > { %7246 = vmatpush2.msra.mxu0 %v6466_v57  ;;  %v7438_v57 = vld [vmem:[#allocation8 + $0x20] sm:$0xff] }
 0x97b   : > { %7247 = vmatprep.subr.mxu0 %v6459_v34  ;;  %v6922_v34 = vpop.f32.mrf.mxu1 }
 0x97c   : > { %7248 = vmatpush2.msra.mxu0 %v6458_v35  ;;  %v6754_v35 = vrot.slane %v8373_v55, %v8087_v61  ;;  %v7451_v61 = vld [vmem:[#allocation8 + $0x88] sm:$0xff] }
 0x97d   : > { %7249 = vmatprep.subr.mxu0 %v6451_v36  ;;  %v7453_v36 = vld [vmem:[#allocation8 + $0x98] sm:$0xff] }
 0x97e   : > { %7250 = vmatpush2.msra.mxu0 %v6450_v38  ;;  %v6758_v38 = vrot.slane %v8373_v55, %v8090_v2  ;;  %v7450_v2 = vld [vmem:[#allocation8 + $0x80] sm:$0xff] }
 0x97f   : > { %7251 = vmatprep.subr.mxu0 %v6443_v37  ;;  %v7437_v37 = vld [vmem:[#allocation8 + $0x18] sm:$0xff] }
 0x980   : > { %7252 = vmatpush2.msra.mxu0 %v6442_v39  ;;  %v7062_v39 = vpop.f32.mrf.mxu1 }
 0x981   : > { %7253 = vmatprep.subr.mxu0 %v6435_v40 }
 0x982   : > { %7254 = vmatpush2.msra.mxu0 %v6434_v45  ;;  %v7452_v45 = vld [vmem:[#allocation8 + $0x90] sm:$0xff] }
 0x983   : > { %7255 = vmatprep.subr.mxu0 %v6427_v46 }
 0x984   : > { %7256 = vmatpush2.msra.mxu0 %v6426_v47  ;;  %v7436_v47 = vld [vmem:[#allocation8 + $0x10] sm:$0xff] }
 0x985   : > { %7257 = vmatprep.subr.mxu0 %v6419_v49 }
 0x986   : > { %7258 = vmatpush2.msra.mxu0 %v6418_v50 }
 0x987   : > { %7259 = vmatprep.subr.mxu0 %v6411_v52  ;;  %v7435_v52 = vld [vmem:[#allocation8 + $0x8] sm:$0xff] }
 0x988   : > { %7260 = vmatpush2.msra.mxu0 %v6410_v60  ;;  %v7064_v60 = vpop.f32.mrf.mxu1 }
 0x989   : > { %7261 = vmatprep.subr.mxu0 %v6403_v63 }
 0x98a   : > { %7262 = vmatpush2.msra.mxu0 %v6402_v0 }
 0x98b   : > { %7263 = vmatprep.subr.mxu0 %v6395_v3  ;;  %v7434_v3 = vld [vmem:[#allocation8] sm:$0xff] }
 0x98c   : > { %7264 = vmatpush2.msra.mxu0 %v6394_v23 }
 0x98d   : > { %7265 = vmatprep.subr.mxu0 %v6387_v25 }
 0x98e   : > { %7266 = vmatpush2.msra.mxu0 %v6386_v21 }
 0x98f   : > { %7267 = vmatprep.subr.mxu0 %v6379_v16 }
 0x990   : > { %7268 = vmatpush2.msra.mxu0 %v6378_v13 }
 0x991   : > { %7269 = vmatprep.subr.mxu0 %v6371_v6 }
 0x992   : > { %7270 = vmatpush2.msra.mxu0 %v6370_v41 }
 0x993   : > { %7271 = vmatprep.subr.mxu0 %v6363_v48 }
 0x994   : > { %7272 = vmatpush2.msra.mxu0 %v6362_v42 }
 0x995   : > { %7274 = vmatmul.mubr.f32.vlgmr.msra.gmra.mxu0 %v8359_v10  ;;  %7626 = vmatprep.subr.mxu0 %v7465_v17  ;;  %v7460_v10 = vld [vmem:[#allocation8 + $0xd0] sm:$0xff]  ;;  %v6849_v62 = vpop.f32.mrf.mxu0  ;;  %v6762_v17 = vrot.slane %v8373_v55, %v8116_v14 }
 0x996   : > { %7627 = vmatpush3.msra.mxu0 %v7449_v43  ;;  %v6850_v46 = vadd.f32 %v6849_v62, %v6746_v19  ;;  %v7621_v62 = vld.sshfl [vmem:[#allocation3 + $0x14] sm:$0x33 pattern:$0x76325410] }
 0x997   : > { %7628 = vmatprep.subr.mxu0 %v7464_v44  ;;  %v6851_v58 = vpop.f32.mrf.mxu0  ;;  %v7204_v44 = vpop.f32.mrf.mxu1 }
 0x998   : > { %7629 = vmatpush3.msra.mxu0 %v7448_v51  ;;  %v6921_v63 = vadd.f32 %v6920_v53, %v6850_v46  ;;  %v6852_v0 = vadd.f32 %v6851_v58, %v6750_v54 }
 0x999   : > { %7630 = vmatprep.subr.mxu0 %v7463_v26 }
 0x99a   : > { %7631 = vmatpush3.msra.mxu0 %v7447_v22  ;;  %v7615_v12 = vmul.f32 -1.442695, %v6921_v63  ;;  %v6923_v21 = vadd.f32 %v6922_v34, %v6852_v0  ;;  %v6766_v22 = vrot.slane %v8373_v55, %v8119_v18  ;;  %v7397_v18 = vcombine.high %v7621_v62, %v7621_v62 }
 0x99b   : > { %7632 = vmatprep.subr.mxu0 %v7462_v7  ;;  %v6774_v34 = vrot.slane %v8373_v55, %v8137_v8 }
 0x99c   : > { %7633 = vmatpush3.msra.mxu0 %v7446_v27  ;;  %7838 = vpow2.f32 %v7615_v12  ;;  %v7616_v6 = vmul.f32 -1.442695, %v6923_v21 }
 0x99d   : > { %7634 = vmatprep.subr.mxu0 %v7461_v20 }
 0x99e   : > { %7635 = vmatpush3.msra.mxu0 %v7445_v9 }
 0x99f   : > { %7636 = vmatprep.subr.mxu0 %v7460_v10 }
 0x9a0   : > { %7637 = vmatpush3.msra.mxu0 %v7444_v24  ;;  %v7206_v24 = vpop.f32.mrf.mxu1 }
 0x9a1   : > { %7638 = vmatprep.subr.mxu0 %v7459_v11 }
 0x9a2   : > { %7639 = vmatpush3.msra.mxu0 %v7443_v15 }
 0x9a3   : > { %7640 = vmatprep.subr.mxu0 %v7458_v28 }
 0x9a4   : > { %7641 = vmatpush3.msra.mxu0 %v7442_v29 }
 0x9a5   : > { %7642 = vmatprep.subr.mxu0 %v7457_v30 }
 0x9a6   : > { %7643 = vmatpush3.msra.mxu0 %v7441_v31 }
 0x9a7   : > { %7644 = vmatprep.subr.mxu0 %v7456_v59 }
 0x9a8   : > { %7645 = vmatpush3.msra.mxu0 %v7440_v56 }
 0x9a9   : > { %7646 = vmatprep.subr.mxu0 %v7455_v32  ;;  %v7839_v41 = vpop.eup %7838 }
 0x9aa   : > { %7647 = vmatpush3.msra.mxu0 %v7439_v1  ;;  %v7357_v43 = vadd.f32 1.0, %v7839_v41 }
 0x9ab   : > { %7648 = vmatprep.subr.mxu0 %v7454_v33 }
 0x9ac   : > { %7649 = vmatpush3.msra.mxu0 %v7438_v57  ;;  %v6770_v57 = vrot.slane %v8373_v55, %v8134_v5 }
 0x9ad   : > { %7650 = vmatprep.subr.mxu0 %v7453_v36 }
 0x9ae   : > { %7651 = vmatpush3.msra.mxu0 %v7437_v37 }
 0x9af   : > { %7652 = vmatprep.subr.mxu0 %v7452_v45 }
 0x9b0   : > { %7653 = vmatpush3.msra.mxu0 %v7436_v47 }
 0x9b1   : > { %7654 = vmatprep.subr.mxu0 %v7451_v61 }
 0x9b2   : > { %7655 = vmatpush3.msra.mxu0 %v7435_v52 }
 0x9b3   : > { %7656 = vmatprep.subr.mxu0 %v7450_v2 }
 0x9b4   : > { %7657 = vmatpush3.msra.mxu0 %v7434_v3 }
 0x9cd   : > { %v7346_v36 = vpop.f32.mrf.mxu1 }
 0x9cf   : > { %v7348_v45 = vpop.f32.mrf.mxu1 }
 0x9d5   : > { %v6991_v4 = vpop.f32.mrf.mxu0 }
 0x9d6   : > { %v6992_v49 = vadd.f32 %v6991_v4, %v6754_v35 }
 0x9d7   : > { %v6993_v40 = vpop.f32.mrf.mxu0 }
 0x9d8   : > { %v6994_v50 = vadd.f32 %v6993_v40, %v6758_v38  ;;  %v7063_v23 = vadd.f32 %v7062_v39, %v6992_v49 }
 0x9da   : > { %v7065_v25 = vadd.f32 %v7064_v60, %v6994_v50  ;;  %v7617_v16 = vmul.f32 -1.442695, %v7063_v23  ;;  %v7624_v23 = vld [vmem:[#allocation9] ss:$0 sm:$0xff] }
 0x9dc   : > { %v7618_v13 = vmul.f32 -1.442695, %v7065_v25  ;;  %7840 = vpow2.f32 %v7617_v16 }
 0x9de   : > { %7842 = vpow2.f32 %v7618_v13 }
 0x9df   : > { %7844 = vpow2.f32 %v7616_v6 }
 0x9e0   : > { %7846 = vrcp.f32 %v7357_v43 }
 0x9e9   : > { %v7841_v48 = vpop.eup %7840 }
 0x9ea   : > { %v7369_v26 = vadd.f32 1.0, %v7841_v48 }
 0x9eb   : > { %v7843_v42 = vpop.eup %7842 }
 0x9ec   : > { %v7845_v51 = vpop.eup %7844  ;;  %v7370_v7 = vadd.f32 1.0, %v7843_v42  ;;  %7848 = vrcp.f32 %v7369_v26 }
 0x9ed   : > { %v7358_v9 = vadd.f32 1.0, %v7845_v51  ;;  %v7847_v28 = vpop.eup %7846 }
 0x9ee   : > { %7850 = vrcp.f32 %v7370_v7 }
 0x9f9   : > { %v7849_v29 = vpop.eup %7848 }
 0x9fa   : > { %v7400_v58 = vmul.f32 %v7849_v29, %v7621_v62 }
 0x9fb   : > { %v7851_v30 = vpop.eup %7850 }
 0x9fc   : > { %v7401_v32 = vmul.f32 %v7851_v30, %v7397_v18 }
 0xa15   : > { %v7133_v27 = vpop.f32.mrf.mxu0 }
 0xa16   : > { %v7134_v20 = vadd.f32 %v7133_v27, %v6762_v17 }
 0xa17   : > { %v7135_v10 = vpop.f32.mrf.mxu0 }
 0xa18   : > { %v7205_v11 = vadd.f32 %v7204_v44, %v7134_v20  ;;  %v7136_v15 = vadd.f32 %v7135_v10, %v6766_v22 }
 0xa1a   : > { %7852 = vtanh.f32 %v7205_v11  ;;  %v7207_v14 = vadd.f32 %v7206_v24, %v7136_v15 }
 0xa1b   : > { %7854 = vrcp.f32 %v7358_v9 }
 0xa1c   : > { %7856 = vtanh.f32 %v7207_v14 }
 0xa27   : > { %v7853_v31 = vpop.eup %7852 }
 0xa28   : > { %v7855_v59 = vpop.eup %7854  ;;  %v7402_v56 = vmul.f32 %v7853_v31, %v7847_v28 }
 0xa29   : > { %v7857_v53 = vpop.eup %7856 }
 0xa2a   : > { %v7403_v1 = vmul.f32 %v7857_v53, %v7855_v59  ;;  %v7404_v4 = vadd.f32 %v7402_v56, %v7400_v58 }
 0xa2c   : > { %v7405_v33 = vadd.f32 %v7403_v1, %v7401_v32 }
 0xa2e   : > { %v7412_v19 = vcombine.low %v7404_v4, %v7405_v33 }
 0xa30   : > { %7622 = vst.sshfl [vmem:[#allocation3 + $0x14] sm:$0x33 pattern:$0x76325410] %v7412_v19 }
 0xa55   : > { %v7275_v35 = vpop.f32.mrf.mxu0 }
 0xa56   : > { %v7276_v38 = vadd.f32 %v7275_v35, %v6770_v57 }
 0xa57   : > { %v7277_v37 = vpop.f32.mrf.mxu0 }
 0xa58   : > { %v7347_v39 = vadd.f32 %v7346_v36, %v7276_v38  ;;  %v7278_v40 = vadd.f32 %v7277_v37, %v6774_v34 }
 0xa5a   : > { %v7619_v46 = vmul.f32 -1.442695, %v7347_v39  ;;  %v7349_v54 = vadd.f32 %v7348_v45, %v7278_v40 }
 0xa5c   : > { %7858 = vpow2.f32 %v7619_v46  ;;  %v7620_v47 = vmul.f32 -1.442695, %v7349_v54 }
 0xa5e   : > { %7860 = vpow2.f32 %v7620_v47 }
 0xa5f   : > { %7862 = vtanh.f32 %v7404_v4 }
 0xa69   : > { %v7859_v49 = vpop.eup %7858 }
 0xa6a   : > { %v7383_v61 = vadd.f32 1.0, %v7859_v49 }
 0xa6b   : > { %v7861_v50 = vpop.eup %7860 }
 0xa6c   : > { %7864 = vrcp.f32 %v7383_v61  ;;  %v7384_v5 = vadd.f32 1.0, %v7861_v50  ;;  %v7863_v8 = vpop.eup %7862 }
 0xa6d   : > { %7866 = vtanh.f32 %v7405_v33 }
 0xa6e   : > { %7868 = vrcp.f32 %v7384_v5 }
 0xa79   : > { %v7865_v55 = vpop.eup %7864 }
 0xa7a   : > { %v7867_v52 = vpop.eup %7866  ;;  %v7408_v2 = vmul.f32 %v7865_v55, %v7863_v8 }
 0xa7b   : > { %v7869_v60 = vpop.eup %7868 }
 0xa7c   : > { %v7409_v63 = vmul.f32 %v7869_v60, %v7867_v52 }
 0xa7e   : > { %v7424_v0 = vcombine.low %v7408_v2, %v7409_v63  ;;  %7537 = vmatprep.mubr.f32.mxu0 %v7409_v63 }
 0xa7f   : > { %7538 = vmatmul.mubr.f32.vlgmr.msra.gmra.mxu0 %v7408_v2 }
 0xa80   : > { %7623 = vst.sshfl [vmem:[#allocation2 + $0x14] sm:$0x33 pattern:$0x76325410] %v7424_v0 }
 0xb3f   : > { %v7658_v3 = vpop.f32.mrf.mxu0 }
 0xb41   : > { %v7659_v25 = vpop.f32.mrf.mxu0 }
 0xb42   : > { %v7660_v12 = vadd.f32 %v7659_v25, %v7658_v3  ;;  %89 = sbr.rel (!%p87_p6) target bundleno = 59 (0x3b), region = 85 }
 0xb44   : > { %v7540_v21 = vadd.f32 %v7660_v12, %v7624_v23 }
 0xb46   : > { %7544 = vst [vmem:[%s7543_s22] sm:$0x3] %v7540_v21 }
 0xb47   :  { %7549 = vsyncpa [#allocation5], 1 }
 0xb48   :  { %7550 = vsyncpa [#allocation7], 1 }
 0xb49   :  { %7551 = vsyncpa [#allocation10], 1 }

</bundles_post_ra>
